<compile_context>
chip_gen: v7x
topology: tpu7x:2x2x1
jax: 0.10.0
libtpu: 0.0.40
codegen_flags: <defaults>
</compile_context>

<pallas_src>
import jax
import jax.numpy as jnp
from jax.experimental import pallas as pl
from jax.experimental.pallas import tpu as pltpu


# ----------------------------------------------------------------------------
# In-kernel helpers (operate on values; only static slicing / concat / reshape
# patterns that are known to lower cleanly in Mosaic).
# ----------------------------------------------------------------------------
def _pad2d(x, top, bottom, left, right):
    """Zero-pad a (H, W, C) value spatially using concatenation."""
    H, W, C = x.shape
    if left or right:
        parts = []
        if left:
            parts.append(jnp.zeros((H, left, C), x.dtype))
        parts.append(x)
        if right:
            parts.append(jnp.zeros((H, right, C), x.dtype))
        x = jnp.concatenate(parts, axis=1)
        W = W + left + right
    if top or bottom:
        parts = []
        if top:
            parts.append(jnp.zeros((top, W, C), x.dtype))
        parts.append(x)
        if bottom:
            parts.append(jnp.zeros((bottom, W, C), x.dtype))
        x = jnp.concatenate(parts, axis=0)
    return x


def _im2col(xp, KH, KW, OH, OW):
    """xp: (OH+KH-1, OW+KW-1, C) padded input -> (OH*OW, KH*KW*C) patch matrix.

    Two-stage unfold (KW lane-concats then KH lane-concats) instead of KH*KW
    separate slices.  Column ordering is (kh, kw, c), matching
    w.reshape(KH*KW*C, Cout) for an HWIO weight."""
    C = xp.shape[-1]
    cols = jnp.concatenate([xp[:, kw:kw + OW, :] for kw in range(KW)], axis=-1)
    pat = jnp.concatenate([cols[kh:kh + OH, :, :] for kh in range(KH)], axis=-1)
    return pat.reshape(OH * OW, KH * KW * C)


def _dilate2x_pad(x):
    """(H, W, C) -> (2H+2, 2W+2, C): zero-dilate by 2 and pad (1 top/left, 2 bottom/right).

    This is exactly the input of the 'valid' 3x3 conv that is mathematically
    identical to ConvTranspose2d(k=3, s=2, p=1, output_padding=1).  Built entirely
    in registers/VMEM (never written to HBM)."""
    H, W, C = x.shape
    zc = jnp.zeros((H, 1, C), x.dtype)
    cols = [zc]
    for j in range(W):
        cols.append(x[:, j:j + 1, :])
        cols.append(zc)
    cols.append(zc)
    xc = jnp.concatenate(cols, axis=1)                      # (H, 2W+2, C)
    zr = jnp.zeros((1, 2 * W + 2, C), x.dtype)
    rows = [zr]
    for i in range(H):
        rows.append(xc[i:i + 1, :, :])
        rows.append(zr)
    rows.append(zr)
    return jnp.concatenate(rows, axis=0)                    # (2H+2, 2W+2, C)


def _instance_norm(y, eps=1e-5):
    """y: (H*W, C).  Per-channel InstanceNorm2d (affine=False, biased variance)."""
    mu = jnp.mean(y, axis=0, keepdims=True)
    var = jnp.mean(jnp.square(y - mu), axis=0, keepdims=True)
    return (y - mu) * jax.lax.rsqrt(var + eps)


# ----------------------------------------------------------------------------
# Encoder block kernel: pad -> Conv5x5 (single im2col GEMM, bf16 MXU) -> ReLU
# -> InstanceNorm -> [Dropout=id] -> MaxPool2d(2,2); optional fused latent stats.
# ----------------------------------------------------------------------------
def _make_encoder_kernel(H, W, Cin, Cout, with_latent):
    KH = KW = 5
    H2, W2 = H // 2, W // 2

    def compute_pooled_cols(x_ref, w_ref, b_ref):
        x = x_ref[0]                                        # (H, W, Cin) f32
        xp = _pad2d(x, 2, 2, 2, 2)                          # (H+4, W+4, Cin)
        patches = _im2col(xp, KH, KW, H, W)                 # (H*W, 25*Cin)
        y = jnp.dot(patches.astype(jnp.bfloat16), w_ref[...],
                    preferred_element_type=jnp.float32)     # (H*W, Cout), f32 acc
        y = y + b_ref[...]
        y = jnp.maximum(y, 0.0)                             # ReLU
        y = _instance_norm(y)                               # InstanceNorm2d
        # Dropout(p=0.25): inference identity.
        # MaxPool2d(2,2): pool rows, then column pairs; keep (H2, Cout) columns so
        # the lane-dense store and the fused latent stats can both reuse them.
        yh = jnp.max(y.reshape(H2, 2, W, Cout), axis=1)     # (H2, W, Cout)
        return [jnp.maximum(yh[:, 2 * j, :], yh[:, 2 * j + 1, :]) for j in range(W2)]

    if with_latent:
        LH, LW = H2 // 2, W2 // 2

        def kernel(x_ref, w_ref, b_ref, o_ref, lat_ref):
            cols = compute_pooled_cols(x_ref, w_ref, b_ref)
            # Single lane-dense store: (H2, W2*Cout) == row-major flatten of (W2, Cout).
            o_ref[0] = jnp.concatenate(cols, axis=-1)
            # Latent stats: MaxPool2d(2,2) on the pooled output, then channel mean/max.
            means, maxs = [], []
            for lj in range(LW):
                cc = jnp.maximum(cols[2 * lj], cols[2 * lj + 1])        # (H2, Cout)
                mcol, xcol = [], []
                for lr in range(LH):
                    rr = jnp.maximum(cc[2 * lr:2 * lr + 1, :],
                                     cc[2 * lr + 1:2 * lr + 2, :])      # (1, Cout)
                    mcol.append(jnp.mean(rr, axis=-1, keepdims=True))   # (1, 1)
                    xcol.append(jnp.max(rr, axis=-1, keepdims=True))
                means.append(jnp.concatenate(mcol, axis=0))             # (LH, 1)
                maxs.append(jnp.concatenate(xcol, axis=0))
            lat_ref[0, 0] = jnp.concatenate(means, axis=-1)             # (LH, LW)
            lat_ref[0, 1] = jnp.concatenate(maxs, axis=-1)              # (LH, LW)
        return kernel

    def kernel(x_ref, w_ref, b_ref, o_ref):
        cols = compute_pooled_cols(x_ref, w_ref, b_ref)
        o_ref[0] = jnp.concatenate(cols, axis=-1)                       # (H2, W2*Cout)
    return kernel


def encoder_block(x, w, b, *, with_latent=False):
    """x: (N, H, W, Cin) f32.  w: (5,5,Cin,Cout) HWIO.  b: (Cout,).
    Returns (N, H//2, W//2, Cout) [and (N, 2, H//4, W//4) latent mean/max]."""
    N, H, W, Cin = x.shape
    KH, KW, _, Cout = w.shape
    K = KH * KW * Cin
    assert H % 2 == 0 and W % 2 == 0
    H2, W2 = H // 2, W // 2
    if with_latent:
        assert H2 % 2 == 0 and W2 % 2 == 0

    wk = w.reshape(K, Cout).astype(jnp.bfloat16)            # bf16 MXU operand
    bk = b.reshape(1, Cout).astype(jnp.float32)

    in_specs = [
        pl.BlockSpec((1, H, W, Cin), lambda n: (n, 0, 0, 0)),
        pl.BlockSpec((K, Cout), lambda n: (0, 0)),
        pl.BlockSpec((1, Cout), lambda n: (0, 0)),
    ]
    if with_latent:
        LH, LW = H2 // 2, W2 // 2
        out_shape = (jax.ShapeDtypeStruct((N, H2, W2 * Cout), jnp.float32),
                     jax.ShapeDtypeStruct((N, 2, LH, LW), jnp.float32))
        out_specs = (pl.BlockSpec((1, H2, W2 * Cout), lambda n: (n, 0, 0)),
                     pl.BlockSpec((1, 2, LH, LW), lambda n: (n, 0, 0, 0)))
    else:
        out_shape = jax.ShapeDtypeStruct((N, H2, W2 * Cout), jnp.float32)
        out_specs = pl.BlockSpec((1, H2, W2 * Cout), lambda n: (n, 0, 0))

    out = pl.pallas_call(
        _make_encoder_kernel(H, W, Cin, Cout, with_latent),
        out_shape=out_shape,
        grid=(N,),
        in_specs=in_specs,
        out_specs=out_specs,
        compiler_params=pltpu.CompilerParams(dimension_semantics=("parallel",)),
    )(x, wk, bk)

    if with_latent:
        y, lat = out
        return y.reshape(N, H2, W2, Cout), lat
    return out.reshape(N, H2, W2, Cout)


# ----------------------------------------------------------------------------
# Decoder block kernel (fully fused): ConvTranspose2d(k=3,s=2,p=1,op=1) -> ReLU
# -> Conv2d(k=3,s=1,p=1) -> InstanceNorm2d -> [Dropout=id] -> [sigmoid]
# ----------------------------------------------------------------------------
def _make_decoder_kernel(H, W, Cin, Cout, with_sigmoid):
    OH, OW = 2 * H, 2 * W

    def kernel(x_ref, wt_ref, bt_ref, w_ref, b_ref, o_ref):
        x = x_ref[0]                                        # (H, W, Cin) f32
        # ConvTranspose2d as a 'valid' 3x3 conv over the zero-dilated, asymmetrically
        # padded input (built in VMEM/registers, never in HBM), with the spatially
        # flipped / channel-transposed kernel.  Single im2col GEMM.
        xd = _dilate2x_pad(x)                               # (2H+2, 2W+2, Cin)
        p1 = _im2col(xd, 3, 3, OH, OW)                      # (OH*OW, 9*Cin)
        u = jnp.dot(p1.astype(jnp.bfloat16), wt_ref[...],
                    preferred_element_type=jnp.float32)     # (OH*OW, Cin)
        u = u + bt_ref[...]
        u = jnp.maximum(u, 0.0)                             # ReLU
        # Conv2d(k=3, p=1): pad in-kernel, single im2col GEMM.
        u3 = _pad2d(u.reshape(OH, OW, Cin), 1, 1, 1, 1)     # (OH+2, OW+2, Cin)
        p2 = _im2col(u3, 3, 3, OH, OW)                      # (OH*OW, 9*Cin)
        y = jnp.dot(p2.astype(jnp.bfloat16), w_ref[...],
                    preferred_element_type=jnp.float32)     # (OH*OW, Cout)
        y = y + b_ref[...]
        y = _instance_norm(y)                               # InstanceNorm2d
        # Dropout(p=0.25): inference identity.
        if with_sigmoid:
            y = jax.nn.sigmoid(y)
        y3 = y.reshape(OH, OW, Cout)
        # Single lane-dense store: (OH, OW*Cout) == row-major flatten of (OW, Cout).
        o_ref[0] = jnp.concatenate([y3[:, j, :] for j in range(OW)], axis=-1)
    return kernel


def decoder_block(x, wt, bt, w, b, *, with_sigmoid=False):
    """x: (N, H, W, Cin).  wt: ConvTranspose2d weight (Cin, Cin, 3, 3) [torch layout].
    bt: (Cin,).  w: (3, 3, Cin, Cout) HWIO.  b: (Cout,)."""
    N, H, W, Cin = x.shape
    _, _, _, Cout = w.shape
    OH, OW = 2 * H, 2 * W

    # Equivalent direct-conv weight for the transpose conv: flip spatial dims and
    # move the torch "in" channel axis to the contraction position -> HWIO.
    wt_eq = jnp.flip(wt, axis=(2, 3)).transpose(2, 3, 0, 1)     # (3, 3, Cin, Cin)
    wtk = wt_eq.reshape(9 * Cin, Cin).astype(jnp.bfloat16)
    btk = bt.reshape(1, Cin).astype(jnp.float32)
    wk = w.reshape(9 * Cin, Cout).astype(jnp.bfloat16)
    bk = b.reshape(1, Cout).astype(jnp.float32)

    out = pl.pallas_call(
        _make_decoder_kernel(H, W, Cin, Cout, with_sigmoid),
        out_shape=jax.ShapeDtypeStruct((N, OH, OW * Cout), jnp.float32),
        grid=(N,),
        in_specs=[
            pl.BlockSpec((1, H, W, Cin), lambda n: (n, 0, 0, 0)),
            pl.BlockSpec((9 * Cin, Cin), lambda n: (0, 0)),
            pl.BlockSpec((1, Cin), lambda n: (0, 0)),
            pl.BlockSpec((9 * Cin, Cout), lambda n: (0, 0)),
            pl.BlockSpec((1, Cout), lambda n: (0, 0)),
        ],
        out_specs=pl.BlockSpec((1, OH, OW * Cout), lambda n: (n, 0, 0)),
        compiler_params=pltpu.CompilerParams(dimension_semantics=("parallel",)),
    )(x, wtk, btk, wk, bk)
    return out.reshape(N, OH, OW, Cout)


# ----------------------------------------------------------------------------
# Parameters (deterministic synthetic init, torch-compatible layouts) + forward.
# ----------------------------------------------------------------------------
def init_convae_params(key, num_enc_blocks, input_channels):
    ch_in_enc = [2 ** i * input_channels for i in range(num_enc_blocks)]
    ch_out_enc = [2 ** (i + 1) * input_channels for i in range(num_enc_blocks)]
    ch_in_dec = ch_out_enc[::-1]
    ch_out_dec = ch_in_enc[::-1]
    params = {"enc": [], "dec": []}
    for cin, cout in zip(ch_in_enc, ch_out_enc):
        key, k1, k2 = jax.random.split(key, 3)
        params["enc"].append({
            "w": jax.random.normal(k1, (5, 5, cin, cout), jnp.float32)
                 * (1.0 / (5 * 5 * cin)) ** 0.5,                       # HWIO
            "b": jax.random.normal(k2, (cout,), jnp.float32) * 0.01,
        })
    for cin, cout in zip(ch_in_dec, ch_out_dec):
        key, k1, k2, k3, k4 = jax.random.split(key, 5)
        params["dec"].append({
            # ConvTranspose2d weight in PyTorch layout (Cin, Cout=Cin, KH, KW)
            "wt": jax.random.normal(k1, (cin, cin, 3, 3), jnp.float32)
                  * (1.0 / (3 * 3 * cin)) ** 0.5,
            "bt": jax.random.normal(k2, (cin,), jnp.float32) * 0.01,
            "w": jax.random.normal(k3, (3, 3, cin, cout), jnp.float32)
                 * (1.0 / (3 * 3 * cin)) ** 0.5,                       # HWIO
            "b": jax.random.normal(k4, (cout,), jnp.float32) * 0.01,
        })
    return params


def convae_forward(params, x_nchw):
    # NCHW (PyTorch convention) -> NHWC for the kernels.
    x = jnp.transpose(x_nchw, (0, 2, 3, 1)).astype(jnp.float32)

    n_enc = len(params["enc"])
    vec = None
    for i, p in enumerate(params["enc"]):
        if i == n_enc - 1:
            # Fused latent stats: maxpool(2,2) + channel mean/max of the encoder output.
            x, lat = encoder_block(x, p["w"], p["b"], with_latent=True)
            # lat: (N, 2, LH, LW) with [0]=mean, [1]=max -> row-major flatten matches
            # torch.cat([mean.flatten(1), max.flatten(1)], dim=1).
            vec = lat.reshape(lat.shape[0], -1)
        else:
            x = encoder_block(x, p["w"], p["b"])

    n_dec = len(params["dec"])
    for i, p in enumerate(params["dec"]):
        x = decoder_block(x, p["wt"], p["bt"], p["w"], p["b"],
                          with_sigmoid=(i == n_dec - 1))

    out = jnp.transpose(x, (0, 3, 1, 2))   # back to NCHW
    return out, vec


if __name__ == "__main__":
    num_enc_blocks = 2     # small config (original default: 4)
    input_channels = 4     # small config (original default: 21)
    spatial = 16
    batch = 2

    key = jax.random.PRNGKey(0)
    kp, kx = jax.random.split(key)
    params = init_convae_params(kp, num_enc_blocks, input_channels)
    x = jax.random.normal(kx, (batch, input_channels, spatial, spatial), jnp.float32)

    fwd = jax.jit(convae_forward)
    recon, latent_vec = fwd(params, x)
    jax.block_until_ready((recon, latent_vec))

    assert recon.shape == (batch, input_channels, spatial, spatial)
    lat_sp = spatial // (2 ** (num_enc_blocks + 1))
    assert latent_vec.shape == (batch, 2 * lat_sp * lat_sp)
    assert bool(jnp.all(jnp.isfinite(recon)))
    assert bool(jnp.all((recon >= 0.0) & (recon <= 1.0)))   # sigmoid output range
    assert bool(jnp.all(jnp.isfinite(latent_vec)))
    print("KERNEL_OK")
</pallas_src>

<mosaic_0001>
module attributes {stable_mosaic.version = 11 : i64} {
  func.func @kernel(%arg0: i32, %arg1: memref<1x16x16x4xf32, #tpu.memory_space<vmem>>, %arg2: memref<100x8xbf16, #tpu.memory_space<vmem>>, %arg3: memref<1x8xf32, #tpu.memory_space<vmem>>, %arg4: memref<1x8x64xf32, #tpu.memory_space<vmem>>) attributes {dimension_semantics = [#tpu.dimension_semantics<parallel>], iteration_bounds = array<i64: 2>, scalar_prefetch = 0 : i64, scratch_operands = 0 : i64, tpu.core_type = #tpu.core_type<tc>, window_params = [{transform_indices = @transform_0, window_bounds = array<i64: 1, 16, 16, 4>}, {pipeline_mode = #tpu.pipeline_mode<synchronous>, transform_indices = @transform_1, window_bounds = array<i64: 100, 8>}, {pipeline_mode = #tpu.pipeline_mode<synchronous>, transform_indices = @transform_2, window_bounds = array<i64: 1, 8>}, {transform_indices = @transform_3, window_bounds = array<i64: 1, 8, 64>}]} {
    %c0 = arith.constant 0 : index
    %c0_0 = arith.constant 0 : index
    %c0_1 = arith.constant 0 : index
    %c0_2 = arith.constant 0 : index
    %0 = vector.load %arg1[%c0, %c0_0, %c0_1, %c0_2] : memref<1x16x16x4xf32, #tpu.memory_space<vmem>>, vector<1x16x16x4xf32>
    %1 = vector.shape_cast %0 : vector<1x16x16x4xf32> to vector<16x16x4xf32>
    %cst = arith.constant 0.000000e+00 : f32
    %2 = vector.broadcast %cst : f32 to vector<16x2x4xf32>
    %cst_3 = arith.constant 0.000000e+00 : f32
    %3 = vector.broadcast %cst_3 : f32 to vector<16x2x4xf32>
    %4 = tpu.concatenate %2, %1, %3 in 1 : vector<16x2x4xf32>, vector<16x16x4xf32>, vector<16x2x4xf32> -> vector<16x20x4xf32>
    %cst_4 = arith.constant 0.000000e+00 : f32
    %5 = vector.broadcast %cst_4 : f32 to vector<2x20x4xf32>
    %cst_5 = arith.constant 0.000000e+00 : f32
    %6 = vector.broadcast %cst_5 : f32 to vector<2x20x4xf32>
    %7 = tpu.concatenate %5, %4, %6 in 0 : vector<2x20x4xf32>, vector<16x20x4xf32>, vector<2x20x4xf32> -> vector<20x20x4xf32>
    %8 = vector.extract_strided_slice %7 {offsets = [0, 0, 0], sizes = [20, 16, 4], strides = [1, 1, 1]} : vector<20x20x4xf32> to vector<20x16x4xf32>
    %9 = vector.extract_strided_slice %7 {offsets = [0, 1, 0], sizes = [20, 16, 4], strides = [1, 1, 1]} : vector<20x20x4xf32> to vector<20x16x4xf32>
    %10 = vector.extract_strided_slice %7 {offsets = [0, 2, 0], sizes = [20, 16, 4], strides = [1, 1, 1]} : vector<20x20x4xf32> to vector<20x16x4xf32>
    %11 = vector.extract_strided_slice %7 {offsets = [0, 3, 0], sizes = [20, 16, 4], strides = [1, 1, 1]} : vector<20x20x4xf32> to vector<20x16x4xf32>
    %12 = vector.extract_strided_slice %7 {offsets = [0, 4, 0], sizes = [20, 16, 4], strides = [1, 1, 1]} : vector<20x20x4xf32> to vector<20x16x4xf32>
    %13 = tpu.concatenate %8, %9, %10, %11, %12 in 2 : vector<20x16x4xf32>, vector<20x16x4xf32>, vector<20x16x4xf32>, vector<20x16x4xf32>, vector<20x16x4xf32> -> vector<20x16x20xf32>
    %14 = vector.extract_strided_slice %13 {offsets = [0, 0, 0], sizes = [16, 16, 20], strides = [1, 1, 1]} : vector<20x16x20xf32> to vector<16x16x20xf32>
    %15 = vector.extract_strided_slice %13 {offsets = [1, 0, 0], sizes = [16, 16, 20], strides = [1, 1, 1]} : vector<20x16x20xf32> to vector<16x16x20xf32>
    %16 = vector.extract_strided_slice %13 {offsets = [2, 0, 0], sizes = [16, 16, 20], strides = [1, 1, 1]} : vector<20x16x20xf32> to vector<16x16x20xf32>
    %17 = vector.extract_strided_slice %13 {offsets = [3, 0, 0], sizes = [16, 16, 20], strides = [1, 1, 1]} : vector<20x16x20xf32> to vector<16x16x20xf32>
    %18 = vector.extract_strided_slice %13 {offsets = [4, 0, 0], sizes = [16, 16, 20], strides = [1, 1, 1]} : vector<20x16x20xf32> to vector<16x16x20xf32>
    %19 = tpu.concatenate %14, %15, %16, %17, %18 in 2 : vector<16x16x20xf32>, vector<16x16x20xf32>, vector<16x16x20xf32>, vector<16x16x20xf32>, vector<16x16x20xf32> -> vector<16x16x100xf32>
    %20 = vector.shape_cast %19 : vector<16x16x100xf32> to vector<256x100xf32>
    %21 = arith.truncf %20 : vector<256x100xf32> to vector<256x100xbf16>
    %c0_6 = arith.constant 0 : index
    %c0_7 = arith.constant 0 : index
    %22 = vector.load %arg2[%c0_6, %c0_7] : memref<100x8xbf16, #tpu.memory_space<vmem>>, vector<100x8xbf16>
    %cst_8 = arith.constant dense<0.000000e+00> : vector<256x8xf32>
    %23 = tpu.matmul %21, %22, %cst_8 {dimension_numbers = #tpu.dot_dimension_numbers<[1], [0], [0], [1], [0, 0, 1, 1], [], []>} : vector<256x100xbf16>, vector<100x8xbf16>, vector<256x8xf32> -> vector<256x8xf32>
    %c0_9 = arith.constant 0 : index
    %c0_10 = arith.constant 0 : index
    %24 = vector.load %arg3[%c0_9, %c0_10] : memref<1x8xf32, #tpu.memory_space<vmem>>, vector<1x8xf32>
    %25 = vector.broadcast %24 : vector<1x8xf32> to vector<256x8xf32>
    %26 = arith.addf %23, %25 : vector<256x8xf32>
    %cst_11 = arith.constant 0.000000e+00 : f32
    %27 = vector.broadcast %cst_11 : f32 to vector<256x8xf32>
    %28 = arith.maximumf %26, %27 : vector<256x8xf32>
    %cst_12 = arith.constant dense<0.000000e+00> : vector<8xf32>
    %29 = vector.multi_reduction <add>, %28, %cst_12 [0] : vector<256x8xf32> to vector<8xf32>
    %30 = vector.shape_cast %29 : vector<8xf32> to vector<1x8xf32>
    %cst_13 = arith.constant 2.560000e+02 : f32
    %31 = vector.broadcast %cst_13 : f32 to vector<1x8xf32>
    %32 = arith.divf %30, %31 : vector<1x8xf32>
    %33 = vector.broadcast %32 : vector<1x8xf32> to vector<256x8xf32>
    %34 = arith.subf %28, %33 : vector<256x8xf32>
    %35 = arith.mulf %34, %34 : vector<256x8xf32>
    %cst_14 = arith.constant dense<0.000000e+00> : vector<8xf32>
    %36 = vector.multi_reduction <add>, %35, %cst_14 [0] : vector<256x8xf32> to vector<8xf32>
    %37 = vector.shape_cast %36 : vector<8xf32> to vector<1x8xf32>
    %cst_15 = arith.constant 2.560000e+02 : f32
    %38 = vector.broadcast %cst_15 : f32 to vector<1x8xf32>
    %39 = arith.divf %37, %38 : vector<1x8xf32>
    %40 = vector.broadcast %32 : vector<1x8xf32> to vector<256x8xf32>
    %41 = arith.subf %28, %40 : vector<256x8xf32>
    %cst_16 = arith.constant 9.99999974E-6 : f32
    %42 = vector.broadcast %cst_16 : f32 to vector<1x8xf32>
    %43 = arith.addf %39, %42 : vector<1x8xf32>
    %44 = math.rsqrt %43 : vector<1x8xf32>
    %45 = vector.broadcast %44 : vector<1x8xf32> to vector<256x8xf32>
    %46 = arith.mulf %41, %45 : vector<256x8xf32>
    %47 = vector.shape_cast %46 : vector<256x8xf32> to vector<8x2x16x8xf32>
    %cst_17 = arith.constant dense<0xFF800000> : vector<8x16x8xf32>
    %48 = vector.multi_reduction <maximumf>, %47, %cst_17 [1] : vector<8x2x16x8xf32> to vector<8x16x8xf32>
    %49 = vector.extract_strided_slice %48 {offsets = [0, 0, 0], sizes = [8, 1, 8], strides = [1, 1, 1]} : vector<8x16x8xf32> to vector<8x1x8xf32>
    %50 = vector.shape_cast %49 : vector<8x1x8xf32> to vector<8x8xf32>
    %51 = vector.extract_strided_slice %48 {offsets = [0, 1, 0], sizes = [8, 1, 8], strides = [1, 1, 1]} : vector<8x16x8xf32> to vector<8x1x8xf32>
    %52 = vector.shape_cast %51 : vector<8x1x8xf32> to vector<8x8xf32>
    %53 = arith.maximumf %50, %52 : vector<8x8xf32>
    %54 = vector.extract_strided_slice %48 {offsets = [0, 2, 0], sizes = [8, 1, 8], strides = [1, 1, 1]} : vector<8x16x8xf32> to vector<8x1x8xf32>
    %55 = vector.shape_cast %54 : vector<8x1x8xf32> to vector<8x8xf32>
    %56 = vector.extract_strided_slice %48 {offsets = [0, 3, 0], sizes = [8, 1, 8], strides = [1, 1, 1]} : vector<8x16x8xf32> to vector<8x1x8xf32>
    %57 = vector.shape_cast %56 : vector<8x1x8xf32> to vector<8x8xf32>
    %58 = arith.maximumf %55, %57 : vector<8x8xf32>
    %59 = vector.extract_strided_slice %48 {offsets = [0, 4, 0], sizes = [8, 1, 8], strides = [1, 1, 1]} : vector<8x16x8xf32> to vector<8x1x8xf32>
    %60 = vector.shape_cast %59 : vector<8x1x8xf32> to vector<8x8xf32>
    %61 = vector.extract_strided_slice %48 {offsets = [0, 5, 0], sizes = [8, 1, 8], strides = [1, 1, 1]} : vector<8x16x8xf32> to vector<8x1x8xf32>
    %62 = vector.shape_cast %61 : vector<8x1x8xf32> to vector<8x8xf32>
    %63 = arith.maximumf %60, %62 : vector<8x8xf32>
    %64 = vector.extract_strided_slice %48 {offsets = [0, 6, 0], sizes = [8, 1, 8], strides = [1, 1, 1]} : vector<8x16x8xf32> to vector<8x1x8xf32>
    %65 = vector.shape_cast %64 : vector<8x1x8xf32> to vector<8x8xf32>
    %66 = vector.extract_strided_slice %48 {offsets = [0, 7, 0], sizes = [8, 1, 8], strides = [1, 1, 1]} : vector<8x16x8xf32> to vector<8x1x8xf32>
    %67 = vector.shape_cast %66 : vector<8x1x8xf32> to vector<8x8xf32>
    %68 = arith.maximumf %65, %67 : vector<8x8xf32>
    %69 = vector.extract_strided_slice %48 {offsets = [0, 8, 0], sizes = [8, 1, 8], strides = [1, 1, 1]} : vector<8x16x8xf32> to vector<8x1x8xf32>
    %70 = vector.shape_cast %69 : vector<8x1x8xf32> to vector<8x8xf32>
    %71 = vector.extract_strided_slice %48 {offsets = [0, 9, 0], sizes = [8, 1, 8], strides = [1, 1, 1]} : vector<8x16x8xf32> to vector<8x1x8xf32>
    %72 = vector.shape_cast %71 : vector<8x1x8xf32> to vector<8x8xf32>
    %73 = arith.maximumf %70, %72 : vector<8x8xf32>
    %74 = vector.extract_strided_slice %48 {offsets = [0, 10, 0], sizes = [8, 1, 8], strides = [1, 1, 1]} : vector<8x16x8xf32> to vector<8x1x8xf32>
    %75 = vector.shape_cast %74 : vector<8x1x8xf32> to vector<8x8xf32>
    %76 = vector.extract_strided_slice %48 {offsets = [0, 11, 0], sizes = [8, 1, 8], strides = [1, 1, 1]} : vector<8x16x8xf32> to vector<8x1x8xf32>
    %77 = vector.shape_cast %76 : vector<8x1x8xf32> to vector<8x8xf32>
    %78 = arith.maximumf %75, %77 : vector<8x8xf32>
    %79 = vector.extract_strided_slice %48 {offsets = [0, 12, 0], sizes = [8, 1, 8], strides = [1, 1, 1]} : vector<8x16x8xf32> to vector<8x1x8xf32>
    %80 = vector.shape_cast %79 : vector<8x1x8xf32> to vector<8x8xf32>
    %81 = vector.extract_strided_slice %48 {offsets = [0, 13, 0], sizes = [8, 1, 8], strides = [1, 1, 1]} : vector<8x16x8xf32> to vector<8x1x8xf32>
    %82 = vector.shape_cast %81 : vector<8x1x8xf32> to vector<8x8xf32>
    %83 = arith.maximumf %80, %82 : vector<8x8xf32>
    %84 = vector.extract_strided_slice %48 {offsets = [0, 14, 0], sizes = [8, 1, 8], strides = [1, 1, 1]} : vector<8x16x8xf32> to vector<8x1x8xf32>
    %85 = vector.shape_cast %84 : vector<8x1x8xf32> to vector<8x8xf32>
    %86 = vector.extract_strided_slice %48 {offsets = [0, 15, 0], sizes = [8, 1, 8], strides = [1, 1, 1]} : vector<8x16x8xf32> to vector<8x1x8xf32>
    %87 = vector.shape_cast %86 : vector<8x1x8xf32> to vector<8x8xf32>
    %88 = arith.maximumf %85, %87 : vector<8x8xf32>
    %89 = tpu.concatenate %53, %58, %63, %68, %73, %78, %83, %88 in 1 : vector<8x8xf32>, vector<8x8xf32>, vector<8x8xf32>, vector<8x8xf32>, vector<8x8xf32>, vector<8x8xf32>, vector<8x8xf32>, vector<8x8xf32> -> vector<8x64xf32>
    %c0_18 = arith.constant 0 : index
    %c0_19 = arith.constant 0 : index
    %c0_20 = arith.constant 0 : index
    %90 = vector.load %arg4[%c0_18, %c0_19, %c0_20] : memref<1x8x64xf32, #tpu.memory_space<vmem>>, vector<1x8x64xf32>
    %91 = vector.shape_cast %90 : vector<1x8x64xf32> to vector<8x64xf32>
    %92 = vector.shape_cast %89 : vector<8x64xf32> to vector<1x8x64xf32>
    tpu.vector_store %arg4[%c0_18, %c0_19, %c0_20], %92 {strides = array<i32>} : memref<1x8x64xf32, #tpu.memory_space<vmem>>, vector<1x8x64xf32>,
    return
  }
  func.func @transform_0(%arg0: i32) -> (i32, i32, i32, i32) {
    %c0_i32 = arith.constant 0 : i32
    %c0_i32_0 = arith.constant 0 : i32
    %c0_i32_1 = arith.constant 0 : i32
    %c0_i32_2 = arith.constant 0 : i32
    return %arg0, %c0_i32, %c0_i32_0, %c0_i32_1 : i32, i32, i32, i32
  }
  func.func @transform_1(%arg0: i32) -> (i32, i32) {
    %c0_i32 = arith.constant 0 : i32
    %c0_i32_0 = arith.constant 0 : i32
    %c0_i32_1 = arith.constant 0 : i32
    return %c0_i32, %c0_i32_0 : i32, i32
  }
  func.func @transform_2(%arg0: i32) -> (i32, i32) {
    %c0_i32 = arith.constant 0 : i32
    %c0_i32_0 = arith.constant 0 : i32
    %c0_i32_1 = arith.constant 0 : i32
    return %c0_i32, %c0_i32_0 : i32, i32
  }
  func.func @transform_3(%arg0: i32) -> (i32, i32, i32) {
    %c0_i32 = arith.constant 0 : i32
    %c0_i32_0 = arith.constant 0 : i32
    %c0_i32_1 = arith.constant 0 : i32
    return %arg0, %c0_i32, %c0_i32_0 : i32, i32, i32
  }
}

module attributes {stable_mosaic.version = 11 : i64} {
  func.func @kernel(%arg0: i32, %arg1: memref<1x8x8x8xf32, #tpu.memory_space<vmem>>, %arg2: memref<200x16xbf16, #tpu.memory_space<vmem>>, %arg3: memref<1x16xf32, #tpu.memory_space<vmem>>, %arg4: memref<1x4x64xf32, #tpu.memory_space<vmem>>, %arg5: memref<1x2x2x2xf32, #tpu.memory_space<vmem>>) attributes {dimension_semantics = [#tpu.dimension_semantics<parallel>], iteration_bounds = array<i64: 2>, scalar_prefetch = 0 : i64, scratch_operands = 0 : i64, tpu.core_type = #tpu.core_type<tc>, window_params = [{transform_indices = @transform_0, window_bounds = array<i64: 1, 8, 8, 8>}, {pipeline_mode = #tpu.pipeline_mode<synchronous>, transform_indices = @transform_1, window_bounds = array<i64: 200, 16>}, {pipeline_mode = #tpu.pipeline_mode<synchronous>, transform_indices = @transform_2, window_bounds = array<i64: 1, 16>}, {transform_indices = @transform_3, window_bounds = array<i64: 1, 4, 64>}, {transform_indices = @transform_4, window_bounds = array<i64: 1, 2, 2, 2>}]} {
    %c0 = arith.constant 0 : index
    %c0_0 = arith.constant 0 : index
    %c0_1 = arith.constant 0 : index
    %c0_2 = arith.constant 0 : index
    %0 = vector.load %arg1[%c0, %c0_0, %c0_1, %c0_2] : memref<1x8x8x8xf32, #tpu.memory_space<vmem>>, vector<1x8x8x8xf32>
    %1 = vector.shape_cast %0 : vector<1x8x8x8xf32> to vector<8x8x8xf32>
    %cst = arith.constant 0.000000e+00 : f32
    %2 = vector.broadcast %cst : f32 to vector<8x2x8xf32>
    %cst_3 = arith.constant 0.000000e+00 : f32
    %3 = vector.broadcast %cst_3 : f32 to vector<8x2x8xf32>
    %4 = tpu.concatenate %2, %1, %3 in 1 : vector<8x2x8xf32>, vector<8x8x8xf32>, vector<8x2x8xf32> -> vector<8x12x8xf32>
    %cst_4 = arith.constant 0.000000e+00 : f32
    %5 = vector.broadcast %cst_4 : f32 to vector<2x12x8xf32>
    %cst_5 = arith.constant 0.000000e+00 : f32
    %6 = vector.broadcast %cst_5 : f32 to vector<2x12x8xf32>
    %7 = tpu.concatenate %5, %4, %6 in 0 : vector<2x12x8xf32>, vector<8x12x8xf32>, vector<2x12x8xf32> -> vector<12x12x8xf32>
    %8 = vector.extract_strided_slice %7 {offsets = [0, 0, 0], sizes = [12, 8, 8], strides = [1, 1, 1]} : vector<12x12x8xf32> to vector<12x8x8xf32>
    %9 = vector.extract_strided_slice %7 {offsets = [0, 1, 0], sizes = [12, 8, 8], strides = [1, 1, 1]} : vector<12x12x8xf32> to vector<12x8x8xf32>
    %10 = vector.extract_strided_slice %7 {offsets = [0, 2, 0], sizes = [12, 8, 8], strides = [1, 1, 1]} : vector<12x12x8xf32> to vector<12x8x8xf32>
    %11 = vector.extract_strided_slice %7 {offsets = [0, 3, 0], sizes = [12, 8, 8], strides = [1, 1, 1]} : vector<12x12x8xf32> to vector<12x8x8xf32>
    %12 = vector.extract_strided_slice %7 {offsets = [0, 4, 0], sizes = [12, 8, 8], strides = [1, 1, 1]} : vector<12x12x8xf32> to vector<12x8x8xf32>
    %13 = tpu.concatenate %8, %9, %10, %11, %12 in 2 : vector<12x8x8xf32>, vector<12x8x8xf32>, vector<12x8x8xf32>, vector<12x8x8xf32>, vector<12x8x8xf32> -> vector<12x8x40xf32>
    %14 = vector.extract_strided_slice %13 {offsets = [0, 0, 0], sizes = [8, 8, 40], strides = [1, 1, 1]} : vector<12x8x40xf32> to vector<8x8x40xf32>
    %15 = vector.extract_strided_slice %13 {offsets = [1, 0, 0], sizes = [8, 8, 40], strides = [1, 1, 1]} : vector<12x8x40xf32> to vector<8x8x40xf32>
    %16 = vector.extract_strided_slice %13 {offsets = [2, 0, 0], sizes = [8, 8, 40], strides = [1, 1, 1]} : vector<12x8x40xf32> to vector<8x8x40xf32>
    %17 = vector.extract_strided_slice %13 {offsets = [3, 0, 0], sizes = [8, 8, 40], strides = [1, 1, 1]} : vector<12x8x40xf32> to vector<8x8x40xf32>
    %18 = vector.extract_strided_slice %13 {offsets = [4, 0, 0], sizes = [8, 8, 40], strides = [1, 1, 1]} : vector<12x8x40xf32> to vector<8x8x40xf32>
    %19 = tpu.concatenate %14, %15, %16, %17, %18 in 2 : vector<8x8x40xf32>, vector<8x8x40xf32>, vector<8x8x40xf32>, vector<8x8x40xf32>, vector<8x8x40xf32> -> vector<8x8x200xf32>
    %20 = vector.shape_cast %19 : vector<8x8x200xf32> to vector<64x200xf32>
    %21 = arith.truncf %20 : vector<64x200xf32> to vector<64x200xbf16>
    %c0_6 = arith.constant 0 : index
    %c0_7 = arith.constant 0 : index
    %22 = vector.load %arg2[%c0_6, %c0_7] : memref<200x16xbf16, #tpu.memory_space<vmem>>, vector<200x16xbf16>
    %cst_8 = arith.constant dense<0.000000e+00> : vector<64x16xf32>
    %23 = tpu.matmul %21, %22, %cst_8 {dimension_numbers = #tpu.dot_dimension_numbers<[1], [0], [0], [1], [0, 0, 1, 1], [], []>} : vector<64x200xbf16>, vector<200x16xbf16>, vector<64x16xf32> -> vector<64x16xf32>
    %c0_9 = arith.constant 0 : index
    %c0_10 = arith.constant 0 : index
    %24 = vector.load %arg3[%c0_9, %c0_10] : memref<1x16xf32, #tpu.memory_space<vmem>>, vector<1x16xf32>
    %25 = vector.broadcast %24 : vector<1x16xf32> to vector<64x16xf32>
    %26 = arith.addf %23, %25 : vector<64x16xf32>
    %cst_11 = arith.constant 0.000000e+00 : f32
    %27 = vector.broadcast %cst_11 : f32 to vector<64x16xf32>
    %28 = arith.maximumf %26, %27 : vector<64x16xf32>
    %cst_12 = arith.constant dense<0.000000e+00> : vector<16xf32>
    %29 = vector.multi_reduction <add>, %28, %cst_12 [0] : vector<64x16xf32> to vector<16xf32>
    %30 = vector.shape_cast %29 : vector<16xf32> to vector<1x16xf32>
    %cst_13 = arith.constant 6.400000e+01 : f32
    %31 = vector.broadcast %cst_13 : f32 to vector<1x16xf32>
    %32 = arith.divf %30, %31 : vector<1x16xf32>
    %33 = vector.broadcast %32 : vector<1x16xf32> to vector<64x16xf32>
    %34 = arith.subf %28, %33 : vector<64x16xf32>
    %35 = arith.mulf %34, %34 : vector<64x16xf32>
    %cst_14 = arith.constant dense<0.000000e+00> : vector<16xf32>
    %36 = vector.multi_reduction <add>, %35, %cst_14 [0] : vector<64x16xf32> to vector<16xf32>
    %37 = vector.shape_cast %36 : vector<16xf32> to vector<1x16xf32>
    %cst_15 = arith.constant 6.400000e+01 : f32
    %38 = vector.broadcast %cst_15 : f32 to vector<1x16xf32>
    %39 = arith.divf %37, %38 : vector<1x16xf32>
    %40 = vector.broadcast %32 : vector<1x16xf32> to vector<64x16xf32>
    %41 = arith.subf %28, %40 : vector<64x16xf32>
    %cst_16 = arith.constant 9.99999974E-6 : f32
    %42 = vector.broadcast %cst_16 : f32 to vector<1x16xf32>
    %43 = arith.addf %39, %42 : vector<1x16xf32>
    %44 = math.rsqrt %43 : vector<1x16xf32>
    %45 = vector.broadcast %44 : vector<1x16xf32> to vector<64x16xf32>
    %46 = arith.mulf %41, %45 : vector<64x16xf32>
    %47 = vector.shape_cast %46 : vector<64x16xf32> to vector<4x2x8x16xf32>
    %cst_17 = arith.constant dense<0xFF800000> : vector<4x8x16xf32>
    %48 = vector.multi_reduction <maximumf>, %47, %cst_17 [1] : vector<4x2x8x16xf32> to vector<4x8x16xf32>
    %49 = vector.extract_strided_slice %48 {offsets = [0, 0, 0], sizes = [4, 1, 16], strides = [1, 1, 1]} : vector<4x8x16xf32> to vector<4x1x16xf32>
    %50 = vector.shape_cast %49 : vector<4x1x16xf32> to vector<4x16xf32>
    %51 = vector.extract_strided_slice %48 {offsets = [0, 1, 0], sizes = [4, 1, 16], strides = [1, 1, 1]} : vector<4x8x16xf32> to vector<4x1x16xf32>
    %52 = vector.shape_cast %51 : vector<4x1x16xf32> to vector<4x16xf32>
    %53 = arith.maximumf %50, %52 : vector<4x16xf32>
    %54 = vector.extract_strided_slice %48 {offsets = [0, 2, 0], sizes = [4, 1, 16], strides = [1, 1, 1]} : vector<4x8x16xf32> to vector<4x1x16xf32>
    %55 = vector.shape_cast %54 : vector<4x1x16xf32> to vector<4x16xf32>
    %56 = vector.extract_strided_slice %48 {offsets = [0, 3, 0], sizes = [4, 1, 16], strides = [1, 1, 1]} : vector<4x8x16xf32> to vector<4x1x16xf32>
    %57 = vector.shape_cast %56 : vector<4x1x16xf32> to vector<4x16xf32>
    %58 = arith.maximumf %55, %57 : vector<4x16xf32>
    %59 = vector.extract_strided_slice %48 {offsets = [0, 4, 0], sizes = [4, 1, 16], strides = [1, 1, 1]} : vector<4x8x16xf32> to vector<4x1x16xf32>
    %60 = vector.shape_cast %59 : vector<4x1x16xf32> to vector<4x16xf32>
    %61 = vector.extract_strided_slice %48 {offsets = [0, 5, 0], sizes = [4, 1, 16], strides = [1, 1, 1]} : vector<4x8x16xf32> to vector<4x1x16xf32>
    %62 = vector.shape_cast %61 : vector<4x1x16xf32> to vector<4x16xf32>
    %63 = arith.maximumf %60, %62 : vector<4x16xf32>
    %64 = vector.extract_strided_slice %48 {offsets = [0, 6, 0], sizes = [4, 1, 16], strides = [1, 1, 1]} : vector<4x8x16xf32> to vector<4x1x16xf32>
    %65 = vector.shape_cast %64 : vector<4x1x16xf32> to vector<4x16xf32>
    %66 = vector.extract_strided_slice %48 {offsets = [0, 7, 0], sizes = [4, 1, 16], strides = [1, 1, 1]} : vector<4x8x16xf32> to vector<4x1x16xf32>
    %67 = vector.shape_cast %66 : vector<4x1x16xf32> to vector<4x16xf32>
    %68 = arith.maximumf %65, %67 : vector<4x16xf32>
    %69 = tpu.concatenate %53, %58, %63, %68 in 1 : vector<4x16xf32>, vector<4x16xf32>, vector<4x16xf32>, vector<4x16xf32> -> vector<4x64xf32>
    %c0_18 = arith.constant 0 : index
    %c0_19 = arith.constant 0 : index
    %c0_20 = arith.constant 0 : index
    %70 = vector.load %arg4[%c0_18, %c0_19, %c0_20] : memref<1x4x64xf32, #tpu.memory_space<vmem>>, vector<1x4x64xf32>
    %71 = vector.shape_cast %70 : vector<1x4x64xf32> to vector<4x64xf32>
    %72 = vector.shape_cast %69 : vector<4x64xf32> to vector<1x4x64xf32>
    tpu.vector_store %arg4[%c0_18, %c0_19, %c0_20], %72 {strides = array<i32>} : memref<1x4x64xf32, #tpu.memory_space<vmem>>, vector<1x4x64xf32>,
    %73 = arith.maximumf %53, %58 : vector<4x16xf32>
    %74 = vector.extract_strided_slice %73 {offsets = [0, 0], sizes = [1, 16], strides = [1, 1]} : vector<4x16xf32> to vector<1x16xf32>
    %75 = vector.extract_strided_slice %73 {offsets = [1, 0], sizes = [1, 16], strides = [1, 1]} : vector<4x16xf32> to vector<1x16xf32>
    %76 = arith.maximumf %74, %75 : vector<1x16xf32>
    %cst_21 = arith.constant dense<0.000000e+00> : vector<1xf32>
    %77 = vector.multi_reduction <add>, %76, %cst_21 [1] : vector<1x16xf32> to vector<1xf32>
    %78 = vector.shape_cast %77 : vector<1xf32> to vector<1x1xf32>
    %cst_22 = arith.constant 1.600000e+01 : f32
    %79 = vector.broadcast %cst_22 : f32 to vector<1x1xf32>
    %80 = arith.divf %78, %79 : vector<1x1xf32>
    %cst_23 = arith.constant dense<0xFF800000> : vector<1xf32>
    %81 = vector.multi_reduction <maximumf>, %76, %cst_23 [1] : vector<1x16xf32> to vector<1xf32>
    %82 = vector.shape_cast %81 : vector<1xf32> to vector<1x1xf32>
    %83 = vector.extract_strided_slice %73 {offsets = [2, 0], sizes = [1, 16], strides = [1, 1]} : vector<4x16xf32> to vector<1x16xf32>
    %84 = vector.extract_strided_slice %73 {offsets = [3, 0], sizes = [1, 16], strides = [1, 1]} : vector<4x16xf32> to vector<1x16xf32>
    %85 = arith.maximumf %83, %84 : vector<1x16xf32>
    %cst_24 = arith.constant dense<0.000000e+00> : vector<1xf32>
    %86 = vector.multi_reduction <add>, %85, %cst_24 [1] : vector<1x16xf32> to vector<1xf32>
    %87 = vector.shape_cast %86 : vector<1xf32> to vector<1x1xf32>
    %cst_25 = arith.constant 1.600000e+01 : f32
    %88 = vector.broadcast %cst_25 : f32 to vector<1x1xf32>
    %89 = arith.divf %87, %88 : vector<1x1xf32>
    %cst_26 = arith.constant dense<0xFF800000> : vector<1xf32>
    %90 = vector.multi_reduction <maximumf>, %85, %cst_26 [1] : vector<1x16xf32> to vector<1xf32>
    %91 = vector.shape_cast %90 : vector<1xf32> to vector<1x1xf32>
    %92 = tpu.concatenate %80, %89 in 0 : vector<1x1xf32>, vector<1x1xf32> -> vector<2x1xf32>
    %93 = tpu.concatenate %82, %91 in 0 : vector<1x1xf32>, vector<1x1xf32> -> vector<2x1xf32>
    %94 = arith.maximumf %63, %68 : vector<4x16xf32>
    %95 = vector.extract_strided_slice %94 {offsets = [0, 0], sizes = [1, 16], strides = [1, 1]} : vector<4x16xf32> to vector<1x16xf32>
    %96 = vector.extract_strided_slice %94 {offsets = [1, 0], sizes = [1, 16], strides = [1, 1]} : vector<4x16xf32> to vector<1x16xf32>
    %97 = arith.maximumf %95, %96 : vector<1x16xf32>
    %cst_27 = arith.constant dense<0.000000e+00> : vector<1xf32>
    %98 = vector.multi_reduction <add>, %97, %cst_27 [1] : vector<1x16xf32> to vector<1xf32>
    %99 = vector.shape_cast %98 : vector<1xf32> to vector<1x1xf32>
    %cst_28 = arith.constant 1.600000e+01 : f32
    %100 = vector.broadcast %cst_28 : f32 to vector<1x1xf32>
    %101 = arith.divf %99, %100 : vector<1x1xf32>
    %cst_29 = arith.constant dense<0xFF800000> : vector<1xf32>
    %102 = vector.multi_reduction <maximumf>, %97, %cst_29 [1] : vector<1x16xf32> to vector<1xf32>
    %103 = vector.shape_cast %102 : vector<1xf32> to vector<1x1xf32>
    %104 = vector.extract_strided_slice %94 {offsets = [2, 0], sizes = [1, 16], strides = [1, 1]} : vector<4x16xf32> to vector<1x16xf32>
    %105 = vector.extract_strided_slice %94 {offsets = [3, 0], sizes = [1, 16], strides = [1, 1]} : vector<4x16xf32> to vector<1x16xf32>
    %106 = arith.maximumf %104, %105 : vector<1x16xf32>
    %cst_30 = arith.constant dense<0.000000e+00> : vector<1xf32>
    %107 = vector.multi_reduction <add>, %106, %cst_30 [1] : vector<1x16xf32> to vector<1xf32>
    %108 = vector.shape_cast %107 : vector<1xf32> to vector<1x1xf32>
    %cst_31 = arith.constant 1.600000e+01 : f32
    %109 = vector.broadcast %cst_31 : f32 to vector<1x1xf32>
    %110 = arith.divf %108, %109 : vector<1x1xf32>
    %cst_32 = arith.constant dense<0xFF800000> : vector<1xf32>
    %111 = vector.multi_reduction <maximumf>, %106, %cst_32 [1] : vector<1x16xf32> to vector<1xf32>
    %112 = vector.shape_cast %111 : vector<1xf32> to vector<1x1xf32>
    %113 = tpu.concatenate %101, %110 in 0 : vector<1x1xf32>, vector<1x1xf32> -> vector<2x1xf32>
    %114 = tpu.concatenate %103, %112 in 0 : vector<1x1xf32>, vector<1x1xf32> -> vector<2x1xf32>
    %115 = tpu.concatenate %92, %113 in 1 : vector<2x1xf32>, vector<2x1xf32> -> vector<2x2xf32>
    %c0_33 = arith.constant 0 : index
    %c0_34 = arith.constant 0 : index
    %c0_35 = arith.constant 0 : index
    %c0_36 = arith.constant 0 : index
    %116 = vector.load %arg5[%c0_33, %c0_34, %c0_35, %c0_36] : memref<1x2x2x2xf32, #tpu.memory_space<vmem>>, vector<1x1x2x2xf32>
    %117 = vector.shape_cast %116 : vector<1x1x2x2xf32> to vector<2x2xf32>
    %118 = vector.shape_cast %115 : vector<2x2xf32> to vector<1x1x2x2xf32>
    tpu.vector_store %arg5[%c0_33, %c0_34, %c0_35, %c0_36], %118 {strides = array<i32>} : memref<1x2x2x2xf32, #tpu.memory_space<vmem>>, vector<1x1x2x2xf32>,
    %119 = tpu.concatenate %93, %114 in 1 : vector<2x1xf32>, vector<2x1xf32> -> vector<2x2xf32>
    %c0_37 = arith.constant 0 : index
    %c1 = arith.constant 1 : index
    %c0_38 = arith.constant 0 : index
    %c0_39 = arith.constant 0 : index
    %120 = vector.load %arg5[%c0_37, %c1, %c0_38, %c0_39] : memref<1x2x2x2xf32, #tpu.memory_space<vmem>>, vector<1x1x2x2xf32>
    %121 = vector.shape_cast %120 : vector<1x1x2x2xf32> to vector<2x2xf32>
    %122 = vector.shape_cast %119 : vector<2x2xf32> to vector<1x1x2x2xf32>
    tpu.vector_store %arg5[%c0_37, %c1, %c0_38, %c0_39], %122 {strides = array<i32>} : memref<1x2x2x2xf32, #tpu.memory_space<vmem>>, vector<1x1x2x2xf32>,
    return
  }
  func.func @transform_0(%arg0: i32) -> (i32, i32, i32, i32) {
    %c0_i32 = arith.constant 0 : i32
    %c0_i32_0 = arith.constant 0 : i32
    %c0_i32_1 = arith.constant 0 : i32
    %c0_i32_2 = arith.constant 0 : i32
    return %arg0, %c0_i32, %c0_i32_0, %c0_i32_1 : i32, i32, i32, i32
  }
  func.func @transform_1(%arg0: i32) -> (i32, i32) {
    %c0_i32 = arith.constant 0 : i32
    %c0_i32_0 = arith.constant 0 : i32
    %c0_i32_1 = arith.constant 0 : i32
    return %c0_i32, %c0_i32_0 : i32, i32
  }
  func.func @transform_2(%arg0: i32) -> (i32, i32) {
    %c0_i32 = arith.constant 0 : i32
    %c0_i32_0 = arith.constant 0 : i32
    %c0_i32_1 = arith.constant 0 : i32
    return %c0_i32, %c0_i32_0 : i32, i32
  }
  func.func @transform_3(%arg0: i32) -> (i32, i32, i32) {
    %c0_i32 = arith.constant 0 : i32
    %c0_i32_0 = arith.constant 0 : i32
    %c0_i32_1 = arith.constant 0 : i32
    return %arg0, %c0_i32, %c0_i32_0 : i32, i32, i32
  }
  func.func @transform_4(%arg0: i32) -> (i32, i32, i32, i32) {
    %c0_i32 = arith.constant 0 : i32
    %c0_i32_0 = arith.constant 0 : i32
    %c0_i32_1 = arith.constant 0 : i32
    %c0_i32_2 = arith.constant 0 : i32
    return %arg0, %c0_i32, %c0_i32_0, %c0_i32_1 : i32, i32, i32, i32
  }
}

module attributes {stable_mosaic.version = 11 : i64} {
  func.func @kernel(%arg0: i32, %arg1: memref<1x4x4x16xf32, #tpu.memory_space<vmem>>, %arg2: memref<144x16xbf16, #tpu.memory_space<vmem>>, %arg3: memref<1x16xf32, #tpu.memory_space<vmem>>, %arg4: memref<144x8xbf16, #tpu.memory_space<vmem>>, %arg5: memref<1x8xf32, #tpu.memory_space<vmem>>, %arg6: memref<1x8x64xf32, #tpu.memory_space<vmem>>) attributes {dimension_semantics = [#tpu.dimension_semantics<parallel>], iteration_bounds = array<i64: 2>, scalar_prefetch = 0 : i64, scratch_operands = 0 : i64, tpu.core_type = #tpu.core_type<tc>, window_params = [{transform_indices = @transform_0, window_bounds = array<i64: 1, 4, 4, 16>}, {pipeline_mode = #tpu.pipeline_mode<synchronous>, transform_indices = @transform_1, window_bounds = array<i64: 144, 16>}, {pipeline_mode = #tpu.pipeline_mode<synchronous>, transform_indices = @transform_2, window_bounds = array<i64: 1, 16>}, {pipeline_mode = #tpu.pipeline_mode<synchronous>, transform_indices = @transform_3, window_bounds = array<i64: 144, 8>}, {pipeline_mode = #tpu.pipeline_mode<synchronous>, transform_indices = @transform_4, window_bounds = array<i64: 1, 8>}, {transform_indices = @transform_5, window_bounds = array<i64: 1, 8, 64>}]} {
    %c0 = arith.constant 0 : index
    %c0_0 = arith.constant 0 : index
    %c0_1 = arith.constant 0 : index
    %c0_2 = arith.constant 0 : index
    %0 = vector.load %arg1[%c0, %c0_0, %c0_1, %c0_2] : memref<1x4x4x16xf32, #tpu.memory_space<vmem>>, vector<1x4x4x16xf32>
    %1 = vector.shape_cast %0 : vector<1x4x4x16xf32> to vector<4x4x16xf32>
    %cst = arith.constant 0.000000e+00 : f32
    %2 = vector.broadcast %cst : f32 to vector<4x1x16xf32>
    %3 = vector.extract_strided_slice %1 {offsets = [0, 0, 0], sizes = [4, 1, 16], strides = [1, 1, 1]} : vector<4x4x16xf32> to vector<4x1x16xf32>
    %4 = vector.extract_strided_slice %1 {offsets = [0, 1, 0], sizes = [4, 1, 16], strides = [1, 1, 1]} : vector<4x4x16xf32> to vector<4x1x16xf32>
    %5 = vector.extract_strided_slice %1 {offsets = [0, 2, 0], sizes = [4, 1, 16], strides = [1, 1, 1]} : vector<4x4x16xf32> to vector<4x1x16xf32>
    %6 = vector.extract_strided_slice %1 {offsets = [0, 3, 0], sizes = [4, 1, 16], strides = [1, 1, 1]} : vector<4x4x16xf32> to vector<4x1x16xf32>
    %7 = tpu.concatenate %2, %3, %2, %4, %2, %5, %2, %6, %2, %2 in 1 : vector<4x1x16xf32>, vector<4x1x16xf32>, vector<4x1x16xf32>, vector<4x1x16xf32>, vector<4x1x16xf32>, vector<4x1x16xf32>, vector<4x1x16xf32>, vector<4x1x16xf32>, vector<4x1x16xf32>, vector<4x1x16xf32> -> vector<4x10x16xf32>
    %cst_3 = arith.constant 0.000000e+00 : f32
    %8 = vector.broadcast %cst_3 : f32 to vector<1x10x16xf32>
    %9 = vector.extract_strided_slice %7 {offsets = [0, 0, 0], sizes = [1, 10, 16], strides = [1, 1, 1]} : vector<4x10x16xf32> to vector<1x10x16xf32>
    %10 = vector.extract_strided_slice %7 {offsets = [1, 0, 0], sizes = [1, 10, 16], strides = [1, 1, 1]} : vector<4x10x16xf32> to vector<1x10x16xf32>
    %11 = vector.extract_strided_slice %7 {offsets = [2, 0, 0], sizes = [1, 10, 16], strides = [1, 1, 1]} : vector<4x10x16xf32> to vector<1x10x16xf32>
    %12 = vector.extract_strided_slice %7 {offsets = [3, 0, 0], sizes = [1, 10, 16], strides = [1, 1, 1]} : vector<4x10x16xf32> to vector<1x10x16xf32>
    %13 = tpu.concatenate %8, %9, %8, %10, %8, %11, %8, %12, %8, %8 in 0 : vector<1x10x16xf32>, vector<1x10x16xf32>, vector<1x10x16xf32>, vector<1x10x16xf32>, vector<1x10x16xf32>, vector<1x10x16xf32>, vector<1x10x16xf32>, vector<1x10x16xf32>, vector<1x10x16xf32>, vector<1x10x16xf32> -> vector<10x10x16xf32>
    %14 = vector.extract_strided_slice %13 {offsets = [0, 0, 0], sizes = [10, 8, 16], strides = [1, 1, 1]} : vector<10x10x16xf32> to vector<10x8x16xf32>
    %15 = vector.extract_strided_slice %13 {offsets = [0, 1, 0], sizes = [10, 8, 16], strides = [1, 1, 1]} : vector<10x10x16xf32> to vector<10x8x16xf32>
    %16 = vector.extract_strided_slice %13 {offsets = [0, 2, 0], sizes = [10, 8, 16], strides = [1, 1, 1]} : vector<10x10x16xf32> to vector<10x8x16xf32>
    %17 = tpu.concatenate %14, %15, %16 in 2 : vector<10x8x16xf32>, vector<10x8x16xf32>, vector<10x8x16xf32> -> vector<10x8x48xf32>
    %18 = vector.extract_strided_slice %17 {offsets = [0, 0, 0], sizes = [8, 8, 48], strides = [1, 1, 1]} : vector<10x8x48xf32> to vector<8x8x48xf32>
    %19 = vector.extract_strided_slice %17 {offsets = [1, 0, 0], sizes = [8, 8, 48], strides = [1, 1, 1]} : vector<10x8x48xf32> to vector<8x8x48xf32>
    %20 = vector.extract_strided_slice %17 {offsets = [2, 0, 0], sizes = [8, 8, 48], strides = [1, 1, 1]} : vector<10x8x48xf32> to vector<8x8x48xf32>
    %21 = tpu.concatenate %18, %19, %20 in 2 : vector<8x8x48xf32>, vector<8x8x48xf32>, vector<8x8x48xf32> -> vector<8x8x144xf32>
    %22 = vector.shape_cast %21 : vector<8x8x144xf32> to vector<64x144xf32>
    %23 = arith.truncf %22 : vector<64x144xf32> to vector<64x144xbf16>
    %c0_4 = arith.constant 0 : index
    %c0_5 = arith.constant 0 : index
    %24 = vector.load %arg2[%c0_4, %c0_5] : memref<144x16xbf16, #tpu.memory_space<vmem>>, vector<144x16xbf16>
    %cst_6 = arith.constant dense<0.000000e+00> : vector<64x16xf32>
    %25 = tpu.matmul %23, %24, %cst_6 {dimension_numbers = #tpu.dot_dimension_numbers<[1], [0], [0], [1], [0, 0, 1, 1], [], []>} : vector<64x144xbf16>, vector<144x16xbf16>, vector<64x16xf32> -> vector<64x16xf32>
    %c0_7 = arith.constant 0 : index
    %c0_8 = arith.constant 0 : index
    %26 = vector.load %arg3[%c0_7, %c0_8] : memref<1x16xf32, #tpu.memory_space<vmem>>, vector<1x16xf32>
    %27 = vector.broadcast %26 : vector<1x16xf32> to vector<64x16xf32>
    %28 = arith.addf %25, %27 : vector<64x16xf32>
    %cst_9 = arith.constant 0.000000e+00 : f32
    %29 = vector.broadcast %cst_9 : f32 to vector<64x16xf32>
    %30 = arith.maximumf %28, %29 : vector<64x16xf32>
    %31 = vector.shape_cast %30 : vector<64x16xf32> to vector<8x8x16xf32>
    %cst_10 = arith.constant 0.000000e+00 : f32
    %32 = vector.broadcast %cst_10 : f32 to vector<8x1x16xf32>
    %cst_11 = arith.constant 0.000000e+00 : f32
    %33 = vector.broadcast %cst_11 : f32 to vector<8x1x16xf32>
    %34 = tpu.concatenate %32, %31, %33 in 1 : vector<8x1x16xf32>, vector<8x8x16xf32>, vector<8x1x16xf32> -> vector<8x10x16xf32>
    %cst_12 = arith.constant 0.000000e+00 : f32
    %35 = vector.broadcast %cst_12 : f32 to vector<1x10x16xf32>
    %cst_13 = arith.constant 0.000000e+00 : f32
    %36 = vector.broadcast %cst_13 : f32 to vector<1x10x16xf32>
    %37 = tpu.concatenate %35, %34, %36 in 0 : vector<1x10x16xf32>, vector<8x10x16xf32>, vector<1x10x16xf32> -> vector<10x10x16xf32>
    %38 = vector.extract_strided_slice %37 {offsets = [0, 0, 0], sizes = [10, 8, 16], strides = [1, 1, 1]} : vector<10x10x16xf32> to vector<10x8x16xf32>
    %39 = vector.extract_strided_slice %37 {offsets = [0, 1, 0], sizes = [10, 8, 16], strides = [1, 1, 1]} : vector<10x10x16xf32> to vector<10x8x16xf32>
    %40 = vector.extract_strided_slice %37 {offsets = [0, 2, 0], sizes = [10, 8, 16], strides = [1, 1, 1]} : vector<10x10x16xf32> to vector<10x8x16xf32>
    %41 = tpu.concatenate %38, %39, %40 in 2 : vector<10x8x16xf32>, vector<10x8x16xf32>, vector<10x8x16xf32> -> vector<10x8x48xf32>
    %42 = vector.extract_strided_slice %41 {offsets = [0, 0, 0], sizes = [8, 8, 48], strides = [1, 1, 1]} : vector<10x8x48xf32> to vector<8x8x48xf32>
    %43 = vector.extract_strided_slice %41 {offsets = [1, 0, 0], sizes = [8, 8, 48], strides = [1, 1, 1]} : vector<10x8x48xf32> to vector<8x8x48xf32>
    %44 = vector.extract_strided_slice %41 {offsets = [2, 0, 0], sizes = [8, 8, 48], strides = [1, 1, 1]} : vector<10x8x48xf32> to vector<8x8x48xf32>
    %45 = tpu.concatenate %42, %43, %44 in 2 : vector<8x8x48xf32>, vector<8x8x48xf32>, vector<8x8x48xf32> -> vector<8x8x144xf32>
    %46 = vector.shape_cast %45 : vector<8x8x144xf32> to vector<64x144xf32>
    %47 = arith.truncf %46 : vector<64x144xf32> to vector<64x144xbf16>
    %c0_14 = arith.constant 0 : index
    %c0_15 = arith.constant 0 : index
    %48 = vector.load %arg4[%c0_14, %c0_15] : memref<144x8xbf16, #tpu.memory_space<vmem>>, vector<144x8xbf16>
    %cst_16 = arith.constant dense<0.000000e+00> : vector<64x8xf32>
    %49 = tpu.matmul %47, %48, %cst_16 {dimension_numbers = #tpu.dot_dimension_numbers<[1], [0], [0], [1], [0, 0, 1, 1], [], []>} : vector<64x144xbf16>, vector<144x8xbf16>, vector<64x8xf32> -> vector<64x8xf32>
    %c0_17 = arith.constant 0 : index
    %c0_18 = arith.constant 0 : index
    %50 = vector.load %arg5[%c0_17, %c0_18] : memref<1x8xf32, #tpu.memory_space<vmem>>, vector<1x8xf32>
    %51 = vector.broadcast %50 : vector<1x8xf32> to vector<64x8xf32>
    %52 = arith.addf %49, %51 : vector<64x8xf32>
    %cst_19 = arith.constant dense<0.000000e+00> : vector<8xf32>
    %53 = vector.multi_reduction <add>, %52, %cst_19 [0] : vector<64x8xf32> to vector<8xf32>
    %54 = vector.shape_cast %53 : vector<8xf32> to vector<1x8xf32>
    %cst_20 = arith.constant 6.400000e+01 : f32
    %55 = vector.broadcast %cst_20 : f32 to vector<1x8xf32>
    %56 = arith.divf %54, %55 : vector<1x8xf32>
    %57 = vector.broadcast %56 : vector<1x8xf32> to vector<64x8xf32>
    %58 = arith.subf %52, %57 : vector<64x8xf32>
    %59 = arith.mulf %58, %58 : vector<64x8xf32>
    %cst_21 = arith.constant dense<0.000000e+00> : vector<8xf32>
    %60 = vector.multi_reduction <add>, %59, %cst_21 [0] : vector<64x8xf32> to vector<8xf32>
    %61 = vector.shape_cast %60 : vector<8xf32> to vector<1x8xf32>
    %cst_22 = arith.constant 6.400000e+01 : f32
    %62 = vector.broadcast %cst_22 : f32 to vector<1x8xf32>
    %63 = arith.divf %61, %62 : vector<1x8xf32>
    %64 = vector.broadcast %56 : vector<1x8xf32> to vector<64x8xf32>
    %65 = arith.subf %52, %64 : vector<64x8xf32>
    %cst_23 = arith.constant 9.99999974E-6 : f32
    %66 = vector.broadcast %cst_23 : f32 to vector<1x8xf32>
    %67 = arith.addf %63, %66 : vector<1x8xf32>
    %68 = math.rsqrt %67 : vector<1x8xf32>
    %69 = vector.broadcast %68 : vector<1x8xf32> to vector<64x8xf32>
    %70 = arith.mulf %65, %69 : vector<64x8xf32>
    %71 = vector.shape_cast %70 : vector<64x8xf32> to vector<8x8x8xf32>
    %72 = vector.extract_strided_slice %71 {offsets = [0, 0, 0], sizes = [8, 1, 8], strides = [1, 1, 1]} : vector<8x8x8xf32> to vector<8x1x8xf32>
    %73 = vector.shape_cast %72 : vector<8x1x8xf32> to vector<8x8xf32>
    %74 = vector.extract_strided_slice %71 {offsets = [0, 1, 0], sizes = [8, 1, 8], strides = [1, 1, 1]} : vector<8x8x8xf32> to vector<8x1x8xf32>
    %75 = vector.shape_cast %74 : vector<8x1x8xf32> to vector<8x8xf32>
    %76 = vector.extract_strided_slice %71 {offsets = [0, 2, 0], sizes = [8, 1, 8], strides = [1, 1, 1]} : vector<8x8x8xf32> to vector<8x1x8xf32>
    %77 = vector.shape_cast %76 : vector<8x1x8xf32> to vector<8x8xf32>
    %78 = vector.extract_strided_slice %71 {offsets = [0, 3, 0], sizes = [8, 1, 8], strides = [1, 1, 1]} : vector<8x8x8xf32> to vector<8x1x8xf32>
    %79 = vector.shape_cast %78 : vector<8x1x8xf32> to vector<8x8xf32>
    %80 = vector.extract_strided_slice %71 {offsets = [0, 4, 0], sizes = [8, 1, 8], strides = [1, 1, 1]} : vector<8x8x8xf32> to vector<8x1x8xf32>
    %81 = vector.shape_cast %80 : vector<8x1x8xf32> to vector<8x8xf32>
    %82 = vector.extract_strided_slice %71 {offsets = [0, 5, 0], sizes = [8, 1, 8], strides = [1, 1, 1]} : vector<8x8x8xf32> to vector<8x1x8xf32>
    %83 = vector.shape_cast %82 : vector<8x1x8xf32> to vector<8x8xf32>
    %84 = vector.extract_strided_slice %71 {offsets = [0, 6, 0], sizes = [8, 1, 8], strides = [1, 1, 1]} : vector<8x8x8xf32> to vector<8x1x8xf32>
    %85 = vector.shape_cast %84 : vector<8x1x8xf32> to vector<8x8xf32>
    %86 = vector.extract_strided_slice %71 {offsets = [0, 7, 0], sizes = [8, 1, 8], strides = [1, 1, 1]} : vector<8x8x8xf32> to vector<8x1x8xf32>
    %87 = vector.shape_cast %86 : vector<8x1x8xf32> to vector<8x8xf32>
    %88 = tpu.concatenate %73, %75, %77, %79, %81, %83, %85, %87 in 1 : vector<8x8xf32>, vector<8x8xf32>, vector<8x8xf32>, vector<8x8xf32>, vector<8x8xf32>, vector<8x8xf32>, vector<8x8xf32>, vector<8x8xf32> -> vector<8x64xf32>
    %c0_24 = arith.constant 0 : index
    %c0_25 = arith.constant 0 : index
    %c0_26 = arith.constant 0 : index
    %89 = vector.load %arg6[%c0_24, %c0_25, %c0_26] : memref<1x8x64xf32, #tpu.memory_space<vmem>>, vector<1x8x64xf32>
    %90 = vector.shape_cast %89 : vector<1x8x64xf32> to vector<8x64xf32>
    %91 = vector.shape_cast %88 : vector<8x64xf32> to vector<1x8x64xf32>
    tpu.vector_store %arg6[%c0_24, %c0_25, %c0_26], %91 {strides = array<i32>} : memref<1x8x64xf32, #tpu.memory_space<vmem>>, vector<1x8x64xf32>,
    return
  }
  func.func @transform_0(%arg0: i32) -> (i32, i32, i32, i32) {
    %c0_i32 = arith.constant 0 : i32
    %c0_i32_0 = arith.constant 0 : i32
    %c0_i32_1 = arith.constant 0 : i32
    %c0_i32_2 = arith.constant 0 : i32
    return %arg0, %c0_i32, %c0_i32_0, %c0_i32_1 : i32, i32, i32, i32
  }
  func.func @transform_1(%arg0: i32) -> (i32, i32) {
    %c0_i32 = arith.constant 0 : i32
    %c0_i32_0 = arith.constant 0 : i32
    %c0_i32_1 = arith.constant 0 : i32
    return %c0_i32, %c0_i32_0 : i32, i32
  }
  func.func @transform_2(%arg0: i32) -> (i32, i32) {
    %c0_i32 = arith.constant 0 : i32
    %c0_i32_0 = arith.constant 0 : i32
    %c0_i32_1 = arith.constant 0 : i32
    return %c0_i32, %c0_i32_0 : i32, i32
  }
  func.func @transform_3(%arg0: i32) -> (i32, i32) {
    %c0_i32 = arith.constant 0 : i32
    %c0_i32_0 = arith.constant 0 : i32
    %c0_i32_1 = arith.constant 0 : i32
    return %c0_i32, %c0_i32_0 : i32, i32
  }
  func.func @transform_4(%arg0: i32) -> (i32, i32) {
    %c0_i32 = arith.constant 0 : i32
    %c0_i32_0 = arith.constant 0 : i32
    %c0_i32_1 = arith.constant 0 : i32
    return %c0_i32, %c0_i32_0 : i32, i32
  }
  func.func @transform_5(%arg0: i32) -> (i32, i32, i32) {
    %c0_i32 = arith.constant 0 : i32
    %c0_i32_0 = arith.constant 0 : i32
    %c0_i32_1 = arith.constant 0 : i32
    return %arg0, %c0_i32, %c0_i32_0 : i32, i32, i32
  }
}

module attributes {stable_mosaic.version = 11 : i64} {
  func.func @kernel(%arg0: i32, %arg1: memref<1x8x8x8xf32, #tpu.memory_space<vmem>>, %arg2: memref<72x8xbf16, #tpu.memory_space<vmem>>, %arg3: memref<1x8xf32, #tpu.memory_space<vmem>>, %arg4: memref<72x4xbf16, #tpu.memory_space<vmem>>, %arg5: memref<1x4xf32, #tpu.memory_space<vmem>>, %arg6: memref<1x16x64xf32, #tpu.memory_space<vmem>>) attributes {dimension_semantics = [#tpu.dimension_semantics<parallel>], iteration_bounds = array<i64: 2>, scalar_prefetch = 0 : i64, scratch_operands = 0 : i64, tpu.core_type = #tpu.core_type<tc>, window_params = [{transform_indices = @transform_0, window_bounds = array<i64: 1, 8, 8, 8>}, {pipeline_mode = #tpu.pipeline_mode<synchronous>, transform_indices = @transform_1, window_bounds = array<i64: 72, 8>}, {pipeline_mode = #tpu.pipeline_mode<synchronous>, transform_indices = @transform_2, window_bounds = array<i64: 1, 8>}, {pipeline_mode = #tpu.pipeline_mode<synchronous>, transform_indices = @transform_3, window_bounds = array<i64: 72, 4>}, {pipeline_mode = #tpu.pipeline_mode<synchronous>, transform_indices = @transform_4, window_bounds = array<i64: 1, 4>}, {transform_indices = @transform_5, window_bounds = array<i64: 1, 16, 64>}]} {
    %c0 = arith.constant 0 : index
    %c0_0 = arith.constant 0 : index
    %c0_1 = arith.constant 0 : index
    %c0_2 = arith.constant 0 : index
    %0 = vector.load %arg1[%c0, %c0_0, %c0_1, %c0_2] : memref<1x8x8x8xf32, #tpu.memory_space<vmem>>, vector<1x8x8x8xf32>
    %1 = vector.shape_cast %0 : vector<1x8x8x8xf32> to vector<8x8x8xf32>
    %cst = arith.constant 0.000000e+00 : f32
    %2 = vector.broadcast %cst : f32 to vector<8x1x8xf32>
    %3 = vector.extract_strided_slice %1 {offsets = [0, 0, 0], sizes = [8, 1, 8], strides = [1, 1, 1]} : vector<8x8x8xf32> to vector<8x1x8xf32>
    %4 = vector.extract_strided_slice %1 {offsets = [0, 1, 0], sizes = [8, 1, 8], strides = [1, 1, 1]} : vector<8x8x8xf32> to vector<8x1x8xf32>
    %5 = vector.extract_strided_slice %1 {offsets = [0, 2, 0], sizes = [8, 1, 8], strides = [1, 1, 1]} : vector<8x8x8xf32> to vector<8x1x8xf32>
    %6 = vector.extract_strided_slice %1 {offsets = [0, 3, 0], sizes = [8, 1, 8], strides = [1, 1, 1]} : vector<8x8x8xf32> to vector<8x1x8xf32>
    %7 = vector.extract_strided_slice %1 {offsets = [0, 4, 0], sizes = [8, 1, 8], strides = [1, 1, 1]} : vector<8x8x8xf32> to vector<8x1x8xf32>
    %8 = vector.extract_strided_slice %1 {offsets = [0, 5, 0], sizes = [8, 1, 8], strides = [1, 1, 1]} : vector<8x8x8xf32> to vector<8x1x8xf32>
    %9 = vector.extract_strided_slice %1 {offsets = [0, 6, 0], sizes = [8, 1, 8], strides = [1, 1, 1]} : vector<8x8x8xf32> to vector<8x1x8xf32>
    %10 = vector.extract_strided_slice %1 {offsets = [0, 7, 0], sizes = [8, 1, 8], strides = [1, 1, 1]} : vector<8x8x8xf32> to vector<8x1x8xf32>
    %11 = tpu.concatenate %2, %3, %2, %4, %2, %5, %2, %6, %2, %7, %2, %8, %2, %9, %2, %10 in 1 : vector<8x1x8xf32>, vector<8x1x8xf32>, vector<8x1x8xf32>, vector<8x1x8xf32>, vector<8x1x8xf32>, vector<8x1x8xf32>, vector<8x1x8xf32>, vector<8x1x8xf32>, vector<8x1x8xf32>, vector<8x1x8xf32>, vector<8x1x8xf32>, vector<8x1x8xf32>, vector<8x1x8xf32>, vector<8x1x8xf32>, vector<8x1x8xf32>, vector<8x1x8xf32> -> vector<8x16x8xf32>
    %12 = tpu.concatenate %2, %2 in 1 : vector<8x1x8xf32>, vector<8x1x8xf32> -> vector<8x2x8xf32>
    %13 = tpu.concatenate %11, %12 in 1 : vector<8x16x8xf32>, vector<8x2x8xf32> -> vector<8x18x8xf32>
    %cst_3 = arith.constant 0.000000e+00 : f32
    %14 = vector.broadcast %cst_3 : f32 to vector<1x18x8xf32>
    %15 = vector.extract_strided_slice %13 {offsets = [0, 0, 0], sizes = [1, 18, 8], strides = [1, 1, 1]} : vector<8x18x8xf32> to vector<1x18x8xf32>
    %16 = vector.extract_strided_slice %13 {offsets = [1, 0, 0], sizes = [1, 18, 8], strides = [1, 1, 1]} : vector<8x18x8xf32> to vector<1x18x8xf32>
    %17 = vector.extract_strided_slice %13 {offsets = [2, 0, 0], sizes = [1, 18, 8], strides = [1, 1, 1]} : vector<8x18x8xf32> to vector<1x18x8xf32>
    %18 = vector.extract_strided_slice %13 {offsets = [3, 0, 0], sizes = [1, 18, 8], strides = [1, 1, 1]} : vector<8x18x8xf32> to vector<1x18x8xf32>
    %19 = vector.extract_strided_slice %13 {offsets = [4, 0, 0], sizes = [1, 18, 8], strides = [1, 1, 1]} : vector<8x18x8xf32> to vector<1x18x8xf32>
    %20 = vector.extract_strided_slice %13 {offsets = [5, 0, 0], sizes = [1, 18, 8], strides = [1, 1, 1]} : vector<8x18x8xf32> to vector<1x18x8xf32>
    %21 = vector.extract_strided_slice %13 {offsets = [6, 0, 0], sizes = [1, 18, 8], strides = [1, 1, 1]} : vector<8x18x8xf32> to vector<1x18x8xf32>
    %22 = vector.extract_strided_slice %13 {offsets = [7, 0, 0], sizes = [1, 18, 8], strides = [1, 1, 1]} : vector<8x18x8xf32> to vector<1x18x8xf32>
    %23 = tpu.concatenate %14, %15, %14, %16, %14, %17, %14, %18, %14, %19, %14, %20, %14, %21, %14, %22 in 0 : vector<1x18x8xf32>, vector<1x18x8xf32>, vector<1x18x8xf32>, vector<1x18x8xf32>, vector<1x18x8xf32>, vector<1x18x8xf32>, vector<1x18x8xf32>, vector<1x18x8xf32>, vector<1x18x8xf32>, vector<1x18x8xf32>, vector<1x18x8xf32>, vector<1x18x8xf32>, vector<1x18x8xf32>, vector<1x18x8xf32>, vector<1x18x8xf32>, vector<1x18x8xf32> -> vector<16x18x8xf32>
    %24 = tpu.concatenate %14, %14 in 0 : vector<1x18x8xf32>, vector<1x18x8xf32> -> vector<2x18x8xf32>
    %25 = tpu.concatenate %23, %24 in 0 : vector<16x18x8xf32>, vector<2x18x8xf32> -> vector<18x18x8xf32>
    %26 = vector.extract_strided_slice %25 {offsets = [0, 0, 0], sizes = [18, 16, 8], strides = [1, 1, 1]} : vector<18x18x8xf32> to vector<18x16x8xf32>
    %27 = vector.extract_strided_slice %25 {offsets = [0, 1, 0], sizes = [18, 16, 8], strides = [1, 1, 1]} : vector<18x18x8xf32> to vector<18x16x8xf32>
    %28 = vector.extract_strided_slice %25 {offsets = [0, 2, 0], sizes = [18, 16, 8], strides = [1, 1, 1]} : vector<18x18x8xf32> to vector<18x16x8xf32>
    %29 = tpu.concatenate %26, %27, %28 in 2 : vector<18x16x8xf32>, vector<18x16x8xf32>, vector<18x16x8xf32> -> vector<18x16x24xf32>
    %30 = vector.extract_strided_slice %29 {offsets = [0, 0, 0], sizes = [16, 16, 24], strides = [1, 1, 1]} : vector<18x16x24xf32> to vector<16x16x24xf32>
    %31 = vector.extract_strided_slice %29 {offsets = [1, 0, 0], sizes = [16, 16, 24], strides = [1, 1, 1]} : vector<18x16x24xf32> to vector<16x16x24xf32>
    %32 = vector.extract_strided_slice %29 {offsets = [2, 0, 0], sizes = [16, 16, 24], strides = [1, 1, 1]} : vector<18x16x24xf32> to vector<16x16x24xf32>
    %33 = tpu.concatenate %30, %31, %32 in 2 : vector<16x16x24xf32>, vector<16x16x24xf32>, vector<16x16x24xf32> -> vector<16x16x72xf32>
    %34 = vector.shape_cast %33 : vector<16x16x72xf32> to vector<256x72xf32>
    %35 = arith.truncf %34 : vector<256x72xf32> to vector<256x72xbf16>
    %c0_4 = arith.constant 0 : index
    %c0_5 = arith.constant 0 : index
    %36 = vector.load %arg2[%c0_4, %c0_5] : memref<72x8xbf16, #tpu.memory_space<vmem>>, vector<72x8xbf16>
    %cst_6 = arith.constant dense<0.000000e+00> : vector<256x8xf32>
    %37 = tpu.matmul %35, %36, %cst_6 {dimension_numbers = #tpu.dot_dimension_numbers<[1], [0], [0], [1], [0, 0, 1, 1], [], []>} : vector<256x72xbf16>, vector<72x8xbf16>, vector<256x8xf32> -> vector<256x8xf32>
    %c0_7 = arith.constant 0 : index
    %c0_8 = arith.constant 0 : index
    %38 = vector.load %arg3[%c0_7, %c0_8] : memref<1x8xf32, #tpu.memory_space<vmem>>, vector<1x8xf32>
    %39 = vector.broadcast %38 : vector<1x8xf32> to vector<256x8xf32>
    %40 = arith.addf %37, %39 : vector<256x8xf32>
    %cst_9 = arith.constant 0.000000e+00 : f32
    %41 = vector.broadcast %cst_9 : f32 to vector<256x8xf32>
    %42 = arith.maximumf %40, %41 : vector<256x8xf32>
    %43 = vector.shape_cast %42 : vector<256x8xf32> to vector<16x16x8xf32>
    %cst_10 = arith.constant 0.000000e+00 : f32
    %44 = vector.broadcast %cst_10 : f32 to vector<16x1x8xf32>
    %cst_11 = arith.constant 0.000000e+00 : f32
    %45 = vector.broadcast %cst_11 : f32 to vector<16x1x8xf32>
    %46 = tpu.concatenate %44, %43, %45 in 1 : vector<16x1x8xf32>, vector<16x16x8xf32>, vector<16x1x8xf32> -> vector<16x18x8xf32>
    %cst_12 = arith.constant 0.000000e+00 : f32
    %47 = vector.broadcast %cst_12 : f32 to vector<1x18x8xf32>
    %cst_13 = arith.constant 0.000000e+00 : f32
    %48 = vector.broadcast %cst_13 : f32 to vector<1x18x8xf32>
    %49 = tpu.concatenate %47, %46, %48 in 0 : vector<1x18x8xf32>, vector<16x18x8xf32>, vector<1x18x8xf32> -> vector<18x18x8xf32>
    %50 = vector.extract_strided_slice %49 {offsets = [0, 0, 0], sizes = [18, 16, 8], strides = [1, 1, 1]} : vector<18x18x8xf32> to vector<18x16x8xf32>
    %51 = vector.extract_strided_slice %49 {offsets = [0, 1, 0], sizes = [18, 16, 8], strides = [1, 1, 1]} : vector<18x18x8xf32> to vector<18x16x8xf32>
    %52 = vector.extract_strided_slice %49 {offsets = [0, 2, 0], sizes = [18, 16, 8], strides = [1, 1, 1]} : vector<18x18x8xf32> to vector<18x16x8xf32>
    %53 = tpu.concatenate %50, %51, %52 in 2 : vector<18x16x8xf32>, vector<18x16x8xf32>, vector<18x16x8xf32> -> vector<18x16x24xf32>
    %54 = vector.extract_strided_slice %53 {offsets = [0, 0, 0], sizes = [16, 16, 24], strides = [1, 1, 1]} : vector<18x16x24xf32> to vector<16x16x24xf32>
    %55 = vector.extract_strided_slice %53 {offsets = [1, 0, 0], sizes = [16, 16, 24], strides = [1, 1, 1]} : vector<18x16x24xf32> to vector<16x16x24xf32>
    %56 = vector.extract_strided_slice %53 {offsets = [2, 0, 0], sizes = [16, 16, 24], strides = [1, 1, 1]} : vector<18x16x24xf32> to vector<16x16x24xf32>
    %57 = tpu.concatenate %54, %55, %56 in 2 : vector<16x16x24xf32>, vector<16x16x24xf32>, vector<16x16x24xf32> -> vector<16x16x72xf32>
    %58 = vector.shape_cast %57 : vector<16x16x72xf32> to vector<256x72xf32>
    %59 = arith.truncf %58 : vector<256x72xf32> to vector<256x72xbf16>
    %c0_14 = arith.constant 0 : index
    %c0_15 = arith.constant 0 : index
    %60 = vector.load %arg4[%c0_14, %c0_15] : memref<72x4xbf16, #tpu.memory_space<vmem>>, vector<72x4xbf16>
    %cst_16 = arith.constant dense<0.000000e+00> : vector<256x4xf32>
    %61 = tpu.matmul %59, %60, %cst_16 {dimension_numbers = #tpu.dot_dimension_numbers<[1], [0], [0], [1], [0, 0, 1, 1], [], []>} : vector<256x72xbf16>, vector<72x4xbf16>, vector<256x4xf32> -> vector<256x4xf32>
    %c0_17 = arith.constant 0 : index
    %c0_18 = arith.constant 0 : index
    %62 = vector.load %arg5[%c0_17, %c0_18] : memref<1x4xf32, #tpu.memory_space<vmem>>, vector<1x4xf32>
    %63 = vector.broadcast %62 : vector<1x4xf32> to vector<256x4xf32>
    %64 = arith.addf %61, %63 : vector<256x4xf32>
    %cst_19 = arith.constant dense<0.000000e+00> : vector<4xf32>
    %65 = vector.multi_reduction <add>, %64, %cst_19 [0] : vector<256x4xf32> to vector<4xf32>
    %66 = vector.shape_cast %65 : vector<4xf32> to vector<1x4xf32>
    %cst_20 = arith.constant 2.560000e+02 : f32
    %67 = vector.broadcast %cst_20 : f32 to vector<1x4xf32>
    %68 = arith.divf %66, %67 : vector<1x4xf32>
    %69 = vector.broadcast %68 : vector<1x4xf32> to vector<256x4xf32>
    %70 = arith.subf %64, %69 : vector<256x4xf32>
    %71 = arith.mulf %70, %70 : vector<256x4xf32>
    %cst_21 = arith.constant dense<0.000000e+00> : vector<4xf32>
    %72 = vector.multi_reduction <add>, %71, %cst_21 [0] : vector<256x4xf32> to vector<4xf32>
    %73 = vector.shape_cast %72 : vector<4xf32> to vector<1x4xf32>
    %cst_22 = arith.constant 2.560000e+02 : f32
    %74 = vector.broadcast %cst_22 : f32 to vector<1x4xf32>
    %75 = arith.divf %73, %74 : vector<1x4xf32>
    %76 = vector.broadcast %68 : vector<1x4xf32> to vector<256x4xf32>
    %77 = arith.subf %64, %76 : vector<256x4xf32>
    %cst_23 = arith.constant 9.99999974E-6 : f32
    %78 = vector.broadcast %cst_23 : f32 to vector<1x4xf32>
    %79 = arith.addf %75, %78 : vector<1x4xf32>
    %80 = math.rsqrt %79 : vector<1x4xf32>
    %81 = vector.broadcast %80 : vector<1x4xf32> to vector<256x4xf32>
    %82 = arith.mulf %77, %81 : vector<256x4xf32>
    %83 = arith.negf %82 : vector<256x4xf32>
    %84 = math.exp %83 : vector<256x4xf32>
    %cst_24 = arith.constant 1.000000e+00 : f32
    %85 = vector.broadcast %cst_24 : f32 to vector<256x4xf32>
    %86 = arith.addf %85, %84 : vector<256x4xf32>
    %87 = arith.divf %85, %86 : vector<256x4xf32>
    %88 = vector.shape_cast %87 : vector<256x4xf32> to vector<16x16x4xf32>
    %89 = vector.extract_strided_slice %88 {offsets = [0, 0, 0], sizes = [16, 1, 4], strides = [1, 1, 1]} : vector<16x16x4xf32> to vector<16x1x4xf32>
    %90 = vector.shape_cast %89 : vector<16x1x4xf32> to vector<16x4xf32>
    %91 = vector.extract_strided_slice %88 {offsets = [0, 1, 0], sizes = [16, 1, 4], strides = [1, 1, 1]} : vector<16x16x4xf32> to vector<16x1x4xf32>
    %92 = vector.shape_cast %91 : vector<16x1x4xf32> to vector<16x4xf32>
    %93 = vector.extract_strided_slice %88 {offsets = [0, 2, 0], sizes = [16, 1, 4], strides = [1, 1, 1]} : vector<16x16x4xf32> to vector<16x1x4xf32>
    %94 = vector.shape_cast %93 : vector<16x1x4xf32> to vector<16x4xf32>
    %95 = vector.extract_strided_slice %88 {offsets = [0, 3, 0], sizes = [16, 1, 4], strides = [1, 1, 1]} : vector<16x16x4xf32> to vector<16x1x4xf32>
    %96 = vector.shape_cast %95 : vector<16x1x4xf32> to vector<16x4xf32>
    %97 = vector.extract_strided_slice %88 {offsets = [0, 4, 0], sizes = [16, 1, 4], strides = [1, 1, 1]} : vector<16x16x4xf32> to vector<16x1x4xf32>
    %98 = vector.shape_cast %97 : vector<16x1x4xf32> to vector<16x4xf32>
    %99 = vector.extract_strided_slice %88 {offsets = [0, 5, 0], sizes = [16, 1, 4], strides = [1, 1, 1]} : vector<16x16x4xf32> to vector<16x1x4xf32>
    %100 = vector.shape_cast %99 : vector<16x1x4xf32> to vector<16x4xf32>
    %101 = vector.extract_strided_slice %88 {offsets = [0, 6, 0], sizes = [16, 1, 4], strides = [1, 1, 1]} : vector<16x16x4xf32> to vector<16x1x4xf32>
    %102 = vector.shape_cast %101 : vector<16x1x4xf32> to vector<16x4xf32>
    %103 = vector.extract_strided_slice %88 {offsets = [0, 7, 0], sizes = [16, 1, 4], strides = [1, 1, 1]} : vector<16x16x4xf32> to vector<16x1x4xf32>
    %104 = vector.shape_cast %103 : vector<16x1x4xf32> to vector<16x4xf32>
    %105 = vector.extract_strided_slice %88 {offsets = [0, 8, 0], sizes = [16, 1, 4], strides = [1, 1, 1]} : vector<16x16x4xf32> to vector<16x1x4xf32>
    %106 = vector.shape_cast %105 : vector<16x1x4xf32> to vector<16x4xf32>
    %107 = vector.extract_strided_slice %88 {offsets = [0, 9, 0], sizes = [16, 1, 4], strides = [1, 1, 1]} : vector<16x16x4xf32> to vector<16x1x4xf32>
    %108 = vector.shape_cast %107 : vector<16x1x4xf32> to vector<16x4xf32>
    %109 = vector.extract_strided_slice %88 {offsets = [0, 10, 0], sizes = [16, 1, 4], strides = [1, 1, 1]} : vector<16x16x4xf32> to vector<16x1x4xf32>
    %110 = vector.shape_cast %109 : vector<16x1x4xf32> to vector<16x4xf32>
    %111 = vector.extract_strided_slice %88 {offsets = [0, 11, 0], sizes = [16, 1, 4], strides = [1, 1, 1]} : vector<16x16x4xf32> to vector<16x1x4xf32>
    %112 = vector.shape_cast %111 : vector<16x1x4xf32> to vector<16x4xf32>
    %113 = vector.extract_strided_slice %88 {offsets = [0, 12, 0], sizes = [16, 1, 4], strides = [1, 1, 1]} : vector<16x16x4xf32> to vector<16x1x4xf32>
    %114 = vector.shape_cast %113 : vector<16x1x4xf32> to vector<16x4xf32>
    %115 = vector.extract_strided_slice %88 {offsets = [0, 13, 0], sizes = [16, 1, 4], strides = [1, 1, 1]} : vector<16x16x4xf32> to vector<16x1x4xf32>
    %116 = vector.shape_cast %115 : vector<16x1x4xf32> to vector<16x4xf32>
    %117 = vector.extract_strided_slice %88 {offsets = [0, 14, 0], sizes = [16, 1, 4], strides = [1, 1, 1]} : vector<16x16x4xf32> to vector<16x1x4xf32>
    %118 = vector.shape_cast %117 : vector<16x1x4xf32> to vector<16x4xf32>
    %119 = vector.extract_strided_slice %88 {offsets = [0, 15, 0], sizes = [16, 1, 4], strides = [1, 1, 1]} : vector<16x16x4xf32> to vector<16x1x4xf32>
    %120 = vector.shape_cast %119 : vector<16x1x4xf32> to vector<16x4xf32>
    %121 = tpu.concatenate %90, %92, %94, %96, %98, %100, %102, %104, %106, %108, %110, %112, %114, %116, %118, %120 in 1 : vector<16x4xf32>, vector<16x4xf32>, vector<16x4xf32>, vector<16x4xf32>, vector<16x4xf32>, vector<16x4xf32>, vector<16x4xf32>, vector<16x4xf32>, vector<16x4xf32>, vector<16x4xf32>, vector<16x4xf32>, vector<16x4xf32>, vector<16x4xf32>, vector<16x4xf32>, vector<16x4xf32>, vector<16x4xf32> -> vector<16x64xf32>
    %c0_25 = arith.constant 0 : index
    %c0_26 = arith.constant 0 : index
    %c0_27 = arith.constant 0 : index
    %122 = vector.load %arg6[%c0_25, %c0_26, %c0_27] : memref<1x16x64xf32, #tpu.memory_space<vmem>>, vector<1x16x64xf32>
    %123 = vector.shape_cast %122 : vector<1x16x64xf32> to vector<16x64xf32>
    %124 = vector.shape_cast %121 : vector<16x64xf32> to vector<1x16x64xf32>
    tpu.vector_store %arg6[%c0_25, %c0_26, %c0_27], %124 {strides = array<i32>} : memref<1x16x64xf32, #tpu.memory_space<vmem>>, vector<1x16x64xf32>,
    return
  }
  func.func @transform_0(%arg0: i32) -> (i32, i32, i32, i32) {
    %c0_i32 = arith.constant 0 : i32
    %c0_i32_0 = arith.constant 0 : i32
    %c0_i32_1 = arith.constant 0 : i32
    %c0_i32_2 = arith.constant 0 : i32
    return %arg0, %c0_i32, %c0_i32_0, %c0_i32_1 : i32, i32, i32, i32
  }
  func.func @transform_1(%arg0: i32) -> (i32, i32) {
    %c0_i32 = arith.constant 0 : i32
    %c0_i32_0 = arith.constant 0 : i32
    %c0_i32_1 = arith.constant 0 : i32
    return %c0_i32, %c0_i32_0 : i32, i32
  }
  func.func @transform_2(%arg0: i32) -> (i32, i32) {
    %c0_i32 = arith.constant 0 : i32
    %c0_i32_0 = arith.constant 0 : i32
    %c0_i32_1 = arith.constant 0 : i32
    return %c0_i32, %c0_i32_0 : i32, i32
  }
  func.func @transform_3(%arg0: i32) -> (i32, i32) {
    %c0_i32 = arith.constant 0 : i32
    %c0_i32_0 = arith.constant 0 : i32
    %c0_i32_1 = arith.constant 0 : i32
    return %c0_i32, %c0_i32_0 : i32, i32
  }
  func.func @transform_4(%arg0: i32) -> (i32, i32) {
    %c0_i32 = arith.constant 0 : i32
    %c0_i32_0 = arith.constant 0 : i32
    %c0_i32_1 = arith.constant 0 : i32
    return %c0_i32, %c0_i32_0 : i32, i32
  }
  func.func @transform_5(%arg0: i32) -> (i32, i32, i32) {
    %c0_i32 = arith.constant 0 : i32
    %c0_i32_0 = arith.constant 0 : i32
    %c0_i32_1 = arith.constant 0 : i32
    return %arg0, %c0_i32, %c0_i32_0 : i32, i32, i32
  }
}

</mosaic_0001>

<bundles_post_ra>
// kernel: convae_forward.5
= control target key start
LH: loop header
LB: loop body
LE: loop exit
PB: predicated region body
PF: predicated region fallthrough
CT: control target
= control target key end

     0   :  { %s1480_s15 = smov 0   ;;  %s1922_s0 = inlined_call_operand.vmem [shape: f32[2,8,8,8], index: 0, kind: input, shape index: {}]   ;;  %s1923_s1 = inlined_call_operand.vmem [shape: bf16[200,16], index: 1, kind: input, shape index: {}]   ;;  %s1924_s2 = inlined_call_operand.vmem [shape: f32[1,16], index: 2, kind: input, shape index: {}]   ;;  %s1925_s3 = inlined_call_operand.vmem [shape: f32[2,4,64], index: 3, kind: output, shape index: {0}]   ;;  %s1926_s4 = inlined_call_operand.vmem [shape: f32[2,2,2,2], index: 4, kind: output, shape index: {1}]  }
   0x1 LB: > { %s1188_s16 = sadd.s32 4294967295, %s1442_s15   ;;  %p1192_p0 = scmp.ge.s32.totalorder %s1442_s15, 1  ;;  %s1442_s15 = sphi %s1480_s15, %s15_s15  }
   0x2   : > { %p165_p1 = scmp.lt.s32.totalorder %s1442_s15, 3 }
   0x4   : > { %p166_p2 = pnand %p1192_p0, %p165_p1 }
   0x5   : > { %p195_p3 = scmp.lt.s32.totalorder (!%p166_p2), %s1188_s16, 1  ;;  %vm242_vm0 = vcmask (!%p166_p2), 1041408   ;;  %vm276_vm1 = vcmask (!%p166_p2), 1046528   ;;  %v1444_v3 = vmov (!%p166_p2), 0.0   ;;  %vm330_vm2 = vcmask (!%p166_p2), 1045504   ;;  %s1445_s21 = smov (!%p166_p2), 8  }
   0x6   : > { %169 = sbr.rel (%p166_p2) target bundleno = 919 (0x397), region = 32  ;;  %v277_v4 = vrot.slane (!%p166_p2), %v1444_v3, 1  ;;  %v331_v8 = vrot.slane (!%p166_p2), %v1444_v3, 2  ;;  %v1501_v13 = vrot.slane (!%p166_p2), %v1444_v3, 3  ;;  %v1503_v14 = vrot.slane (!%p166_p2), %v1444_v3, 4  ;;  %s1446_s22 = smov (!%p166_p2), 16  }
   0x7   : > { %vm384_vm3 = vcmask (!%p166_p2), 1044480   ;;  %vm438_vm4 = vcmask (!%p166_p2), 1043456   ;;  %s1447_s23 = smov (!%p166_p2), 24   ;;  %s1448_s24 = smov (!%p166_p2), 32   ;;  %vm492_vm5 = vcmask (!%p166_p2), 64512   ;;  %vm502_vm6 = vcmask (!%p166_p2), 130048  }
   0x8   : > { %vm512_vm7 = vcmask (!%p166_p2), 195584   ;;  %vm522_vm8 = vcmask (!%p166_p2), 261120   ;;  %s1450_s29 = smov (!%p166_p2), 40   ;;  %s1451_s30 = smov (!%p166_p2), 80   ;;  %vm634_vm9 = vcmask (!%p166_p2), 326656   ;;  %vm643_vm10 = vcmask (!%p166_p2), 654336  }
   0x9   : > { %s1452_s5 = smov (!%p166_p2), 120   ;;  %vm652_vm11 = vcmask (!%p166_p2), 982016   ;;  %vm784_vm12 = vcmask (!%p166_p2), 588800   ;;  %vm977_vm13 = vcmask (!%p166_p2), 1041409   ;;  %vm980_vm14 = vcmask (!%p166_p2), 1042434  }
   0xa   : > { %vm983_vm15 = vcmask (!%p166_p2), 1043459  }
   0xd   : > { %s1928_s16 = smov (!%p195_p3, %s1188_s16), 1 }
   0xe   : > { %s1219_s17 = sshll.u32 %s1928_s16, 6  ;;  %s1195_s8 = sshll.u32 %s1928_s16, 2 }
   0xf   : > { %s1494_s20 = scalar_lea.vmem %s1922_s0, %s1219_s17  ;;  %s203_s11 = scalar_lea.vmem %s1925_s3, %s1195_s8 }
  0x10   : > { %v213_v0 = vld [vmem:[%s1494_s20 + $0x18] sm:$0xff]  ;;  %v214_v1 = vld [vmem:[%s1494_s20 + $0x20] sm:$0xff]  ;;  %v211_v9 = vld [vmem:[%s1494_s20 + $0x8] sm:$0xff]  ;;  %s208_s13 = scalar_lea.vmem %s1926_s4, %s1195_s8 }
  0x11   : > { %v210_v2 = vld [vmem:[%s1494_s20] sm:$0xff]  ;;  %v229_v5 = vrot.slane %v213_v0, 6  ;;  %v230_v6 = vrot.slane %v214_v1, 6  ;;  %v212_v10 = vld [vmem:[%s1494_s20 + $0x10] sm:$0xff]  ;;  %v227_v11 = vrot.slane %v211_v9, 6  ;;  %v217_v3 = vld [vmem:[%s1494_s20 + $0x38] sm:$0xff] }
  0x12   : > { %v226_v7 = vrot.slane %v210_v2, 6  ;;  %v228_v12 = vrot.slane %v212_v10, 6 }
  0x13   : > { %v1506_v15 = vsel %vm242_vm0, 0.0, %v229_v5  ;;  %v1509_v16 = vsel %vm242_vm0, 0.0, %v230_v6  ;;  %v1512_v17 = vsel %vm242_vm0, %v229_v5, 0.0  ;;  %v1515_v18 = vsel %vm242_vm0, %v230_v6, 0.0 }
  0x14   : > { %v288_v19 = vrot.slane %v1506_v15, 1  ;;  %v289_v20 = vrot.slane %v1512_v17, 1  ;;  %v291_v21 = vrot.slane %v1509_v16, 1  ;;  %v292_v22 = vrot.slane %v1515_v18, 1 }
  0x15   : > { %v1522_v23 = vsel %vm242_vm0, 0.0, %v226_v7  ;;  %v251_v24 = vsel %vm242_vm0, %v226_v7, 0.0  ;;  %v1526_v25 = vsel %vm242_vm0, 0.0, %v227_v11  ;;  %v1529_v26 = vsel %vm242_vm0, 0.0, %v228_v12 }
  0x16   : > { %v290_v27 = vsel %vm276_vm1, %v288_v19, %v289_v20  ;;  %v293_v28 = vsel %vm276_vm1, %v291_v21, %v292_v22  ;;  %v279_v29 = vrot.slane %v1522_v23, 1  ;;  %v280_v30 = vrot.slane %v251_v24, 1 }
  0x17   : > { %v1276_v31 = vpack.i.bf16 %v293_v28, %v290_v27  ;;  %v333_v32 = vrot.slane %v1522_v23, 2  ;;  %v334_v33 = vrot.slane %v251_v24, 2  ;;  %v1536_v34 = vsel %vm242_vm0, %v227_v11, 0.0 }
  0x18   : > { %v281_v35 = vsel %vm276_vm1, %v279_v29, %v280_v30  ;;  %v1540_v36 = vsel %vm242_vm0, %v228_v12, 0.0  ;;  %v282_v37 = vrot.slane %v1526_v25, 1  ;;  %v283_v38 = vrot.slane %v1536_v34, 1  ;;  %v215_v29 = vld [vmem:[%s1494_s20 + $0x28] sm:$0xff] }
  0x19   : > { %1277 = vrot.lane.b32.xlu1 %v1276_v31, %s1445_s21  ;;  %v1266_v39 = vpack.i.bf16 %v281_v35, %v277_v4  ;;  %v335_v40 = vsel %vm330_vm2, %v333_v32, %v334_v33  ;;  %v285_v41 = vrot.slane %v1529_v26, 1  ;;  %v286_v42 = vrot.slane %v1540_v36, 1  ;;  %v216_v35 = vld [vmem:[%s1494_s20 + $0x30] sm:$0xff] }
  0x1a   : > { %v1281_v43 = vpack.i.bf16 %v335_v40, %v331_v8  ;;  %v284_v44 = vsel %vm276_vm1, %v282_v37, %v283_v38  ;;  %v342_v45 = vrot.slane %v1506_v15, 2  ;;  %v343_v46 = vrot.slane %v1512_v17, 2 }
  0x1b   : > { %1267 = vrot.lane.b32.xlu0 %v1266_v39, %s1445_s21  ;;  %v287_v47 = vsel %vm276_vm1, %v285_v41, %v286_v42  ;;  %v345_v48 = vrot.slane %v1509_v16, 2  ;;  %v346_v49 = vrot.slane %v1515_v18, 2  ;;  %v336_v50 = vrot.slane %v1526_v25, 2 }
  0x1c   : > { %v1271_v51 = vpack.i.bf16 %v287_v47, %v284_v44  ;;  %v344_v52 = vsel %vm330_vm2, %v342_v45, %v343_v46  ;;  %v337_v53 = vrot.slane %v1536_v34, 2  ;;  %v339_v54 = vrot.slane %v1529_v26, 2 }
  0x1d   : > { %1282 = vrot.lane.b32.xlu1 %v1281_v43, %s1446_s22  ;;  %v347_v55 = vsel %vm330_vm2, %v345_v48, %v346_v49  ;;  %v340_v56 = vrot.slane %v1540_v36, 2  ;;  %v390_v57 = vrot.slane %v1526_v25, 3  ;;  %v391_v58 = vrot.slane %v1536_v34, 3 }
  0x1e   : > { %v1291_v59 = vpack.i.bf16 %v347_v55, %v344_v52  ;;  %v338_v60 = vsel %vm330_vm2, %v336_v50, %v337_v53  ;;  %v393_v61 = vrot.slane %v1529_v26, 3  ;;  %v394_v62 = vrot.slane %v1540_v36, 3 }
  0x1f   : > { %1272 = vrot.lane.b32.xlu0 %v1271_v51, %s1445_s21  ;;  %v341_v63 = vsel %vm330_vm2, %v339_v54, %v340_v56  ;;  %v392_v0 = vsel %vm384_vm3, %v390_v57, %v391_v58  ;;  %v387_v1 = vrot.slane %v1522_v23, 3  ;;  %v388_v2 = vrot.slane %v251_v24, 3 }
  0x20   : > { %v1286_v4 = vpack.i.bf16 %v341_v63, %v338_v60  ;;  %v395_v5 = vsel %vm384_vm3, %v393_v61, %v394_v62  ;;  %v441_v6 = vrot.slane %v1522_v23, 4  ;;  %v442_v7 = vrot.slane %v251_v24, 4 }
  0x21   : > { %1292 = vrot.lane.b32.xlu1 %v1291_v59, %s1446_s22  ;;  %v1301_v8 = vpack.i.bf16 %v395_v5, %v392_v0  ;;  %v389_v9 = vsel %vm384_vm3, %v387_v1, %v388_v2  ;;  %v396_v10 = vrot.slane %v1506_v15, 3  ;;  %v397_v11 = vrot.slane %v1512_v17, 3 }
  0x22   : > { %v443_v12 = vsel %vm438_vm4, %v441_v6, %v442_v7  ;;  %v399_v19 = vrot.slane %v1509_v16, 3  ;;  %v400_v20 = vrot.slane %v1515_v18, 3  ;;  %v233_v21 = vrot.slane %v217_v3, 6 }
  0x23   : > { %1287 = vrot.lane.b32.xlu0 %v1286_v4, %s1446_s22  ;;  %v1296_v22 = vpack.i.bf16 %v389_v9, %v1501_v13  ;;  %v398_v24 = vsel %vm384_vm3, %v396_v10, %v397_v11  ;;  %v450_v27 = vrot.slane %v1506_v15, 4  ;;  %v451_v28 = vrot.slane %v1512_v17, 4 }
  0x24   : > { %v401_v30 = vsel %vm384_vm3, %v399_v19, %v400_v20  ;;  %v444_v31 = vrot.slane %v1526_v25, 4  ;;  %v445_v32 = vrot.slane %v1536_v34, 4  ;;  %v447_v33 = vrot.slane %v1529_v26, 4 }
  0x25   : > { %1302 = vrot.lane.b32.xlu1 %v1301_v8, %s1447_s23  ;;  %v1311_v13 = vpack.i.bf16 %v443_v12, %v1503_v14  ;;  %v448_v37 = vrot.slane %v1540_v36, 4  ;;  %v1596_v38 = vsel %vm242_vm0, 0.0, %v233_v21  ;;  %v231_v17 = vrot.slane %v215_v29, 6 }
  0x26   : > { %v1306_v39 = vpack.i.bf16 %v401_v30, %v398_v24  ;;  %v452_v40 = vsel %vm438_vm4, %v450_v27, %v451_v28  ;;  %v258_v34 = vsel %vm242_vm0, %v233_v21, 0.0  ;;  %v232_v41 = vrot.slane %v216_v35, 6 }
  0x27   : > { %1297 = vrot.lane.b32.xlu0 %v1296_v22, %s1447_s23  ;;  %v446_v42 = vsel %vm438_vm4, %v444_v31, %v445_v32  ;;  %v449_v43 = vsel %vm438_vm4, %v447_v33, %v448_v37  ;;  %v1604_v14 = vsel %vm242_vm0, 0.0, %v231_v17  ;;  %v256_v36 = vsel %vm242_vm0, %v231_v17, 0.0  ;;  %v1422_v17 = vld [vmem:[%s1923_s1 + $0x8] sm:$0xff]  }
  0x28   : > { %v300_v44 = vrot.slane %v1596_v38, 1  ;;  %v1610_v45 = vsel %vm242_vm0, 0.0, %v232_v41  ;;  %v257_v46 = vsel %vm242_vm0, %v232_v41, 0.0  ;;  %v294_v47 = vrot.slane %v1604_v14, 1  ;;  %v1426_v41 = vld [vmem:[%s1923_s1 + $0x28] sm:$0xff]  }
  0x29   : > { %1312 = vrot.lane.b32.xlu1 %v1311_v13, %s1448_s24  ;;  %v301_v48 = vrot.slane %v258_v34, 1  ;;  %v295_v49 = vrot.slane %v256_v36, 1  ;;  %v297_v50 = vrot.slane %v1610_v45, 1  ;;  %v298_v51 = vrot.slane %v257_v46, 1  ;;  %v1421_v13 = vld [vmem:[%s1923_s1] sm:$0xff]  }
  0x2a   : > { %v1316_v52 = vpack.i.bf16 %v449_v43, %v446_v42  ;;  %v348_v53 = vrot.slane %v1604_v14, 2  ;;  %v349_v54 = vrot.slane %v256_v36, 2  ;;  %v351_v57 = vrot.slane %v1610_v45, 2  ;;  %v1427_v42 = vld [vmem:[%s1923_s1 + $0x30] sm:$0xff]   ;;  %v1428_v43 = vld [vmem:[%s1923_s1 + $0x38] sm:$0xff]  }
  0x2b   : > { %1307 = vrot.lane.b32.xlu0 %v1306_v39, %s1447_s23  ;;  %v296_v55 = vsel %vm276_vm1, %v294_v47, %v295_v49  ;;  %v299_v56 = vsel %vm276_vm1, %v297_v50, %v298_v51  ;;  %v352_v58 = vrot.slane %v257_v46, 2  ;;  %v354_v59 = vrot.slane %v1596_v38, 2  ;;  %v1423_v39 = vld [vmem:[%s1923_s1 + $0x10] sm:$0xff]  }
  0x2c   : > { %v355_v60 = vrot.slane %v258_v34, 2  ;;  %v302_v61 = vsel %vm276_vm1, %v300_v44, %v301_v48  ;;  %v1321_v62 = vpack.i.bf16 %v299_v56, %v296_v55  ;;  %v402_v63 = vrot.slane %v1604_v14, 3  ;;  %v1430_v44 = vld [vmem:[%s1923_s1 + $0x48] sm:$0xff]  }
  0x2d   : > { %473 = vrot.lane.b32.xlu1 %v452_v40, %s1448_s24  ;;  %v403_v0 = vrot.slane %v256_v36, 3  ;;  %v350_v1 = vsel %vm330_vm2, %v348_v53, %v349_v54  ;;  %v353_v2 = vsel %vm330_vm2, %v351_v57, %v352_v58  ;;  %v405_v3 = vrot.slane %v1610_v45, 3  ;;  %v1424_v40 = vld [vmem:[%s1923_s1 + $0x18] sm:$0xff]  }
  0x2e   : > { %v406_v4 = vrot.slane %v257_v46, 3  ;;  %v356_v5 = vsel %vm330_vm2, %v354_v59, %v355_v60  ;;  %v408_v6 = vrot.slane %v1596_v38, 3  ;;  %v409_v7 = vrot.slane %v258_v34, 3 }
  0x2f   : > { %1317 = vrot.lane.b32.xlu0 %v1316_v52, %s1448_s24  ;;  %v459_v8 = vrot.slane %v1610_v45, 4  ;;  %v460_v9 = vrot.slane %v257_v46, 4  ;;  %v462_v10 = vrot.slane %v1596_v38, 4  ;;  %v463_v11 = vrot.slane %v258_v34, 4  ;;  %v1425_v34 = vld [vmem:[%s1923_s1 + $0x20] sm:$0xff]   ;;  %v1431_v52 = vld [vmem:[%s1923_s1 + $0x50] sm:$0xff]  }
  0x30   : > { %v1326_v12 = vpack.i.bf16 %v353_v2, %v350_v1  ;;  %v404_v19 = vsel %vm384_vm3, %v402_v63, %v403_v0  ;;  %v453_v20 = vrot.slane %v1509_v16, 4  ;;  %v407_v21 = vsel %vm384_vm3, %v405_v3, %v406_v4 }
  0x31   : > { %319 = vrot.lane.b32.xlu1 %v302_v61, %s1445_s21  ;;  %v454_v22 = vrot.slane %v1515_v18, 4  ;;  %v456_v24 = vrot.slane %v1604_v14, 4  ;;  %v457_v27 = vrot.slane %v256_v36, 4  ;;  %v410_v28 = vsel %vm384_vm3, %v408_v6, %v409_v7  ;;  %v1429_v36 = vld [vmem:[%s1923_s1 + $0x40] sm:$0xff]  }
  0x32   : > { %v461_v29 = vsel %vm438_vm4, %v459_v8, %v460_v9  ;;  %v464_v30 = vsel %vm438_vm4, %v462_v10, %v463_v11  ;;  %v1331_v31 = vpack.i.bf16 %v407_v21, %v404_v19  ;;  %v1449_v37 = vmov 0  }
  0x33   : > { %1322 = vrot.lane.b32.xlu0 %v1321_v62, %s1445_s21  ;;  %v455_v32 = vsel %vm438_vm4, %v453_v20, %v454_v22  ;;  %v458_v33 = vsel %vm438_vm4, %v456_v24, %v457_v27  ;;  %v1341_v18 = vpack.i.bf16 %v464_v30, %v461_v29  ;;  %800 = vmatprep.subr.bf16.mxu0 %v1449_v37  ;;  %v1433_v27 = vld [vmem:[%s1923_s1 + $0x60] ss:$0 sps:$4 sm:$0xff]   ;;  %vm1058_vm0 = vcmask 126980  }
  0x34   : > { %v1336_v35 = vpack.i.bf16 %v458_v33, %v455_v32  ;;  %1221 = vmatprep.subr.bf16.mxu1 %v1449_v37  ;;  %801 = vmatpush1.bf16.msra.mxu0 %v1421_v13  ;;  %vm1032_vm1 = vcmask 122880   ;;  %vm1052_vm2 = vcmask 1040384   ;;  %vm1017_vm3 = vcmask 392192  }
  0x35   : > { %373 = vrot.lane.b32.xlu1 %v356_v5, %s1446_s22  ;;  %1234 = vmatpush1.bf16.msra.mxu1 %v1421_v13  ;;  %v1432_v5 = vld [vmem:[%s1923_s1 + $0x58] sm:$0xff]  }
  0x36   : > { %802 = vmatprep.subr.bf16.mxu0 %v1449_v37  ;;  %1222 = vmatprep.subr.bf16.mxu1 %v1449_v37 }
  0x37   : > { %1327 = vrot.lane.b32.xlu0 %v1326_v12, %s1446_s22 }
  0x38   : > { %803 = vmatpush1.bf16.msra.mxu0 %v1422_v17 }
  0x39   : > { %427 = vrot.lane.b32.xlu1 %v410_v28, %s1447_s23  ;;  %1235 = vmatpush1.bf16.msra.mxu1 %v1422_v17 }
  0x3a   : > { %804 = vmatprep.subr.bf16.mxu0 %v1449_v37  ;;  %1223 = vmatprep.subr.bf16.mxu1 %v1449_v37 }
  0x3b   : > { %1332 = vrot.lane.b32.xlu0 %v1331_v31, %s1447_s23 }
  0x3c   : > { %805 = vmatpush1.bf16.msra.mxu0 %v1423_v39 }
  0x3d   : > { %1342 = vrot.lane.b32.xlu1 %v1341_v18, %s1448_s24  ;;  %1236 = vmatpush1.bf16.msra.mxu1 %v1423_v39  ;;  %v798_v18 = vsel %vm438_vm4, %v1433_v27, 0  ;;  %vm1019_vm4 = vcmask 519168  }
  0x3e   : > { %806 = vmatprep.subr.bf16.mxu0 %v1449_v37  ;;  %1224 = vmatprep.subr.bf16.mxu1 %v1449_v37 }
  0x3f   : > { %1337 = vrot.lane.b32.xlu0 %v1336_v35, %s1448_s24 }
  0x40   : > { %807 = vmatpush1.bf16.msra.mxu0 %v1424_v40 }
  0x41   : > { %1237 = vmatpush1.bf16.msra.mxu1 %v1424_v40  ;;  %808 = vmatprep.subr.bf16.mxu0 %v1449_v37 }
  0x42   : > { %1225 = vmatprep.subr.bf16.mxu1 %v1449_v37 }
  0x44   : > { %809 = vmatpush1.bf16.msra.mxu0 %v1425_v34 }
  0x45   : > { %1238 = vmatpush1.bf16.msra.mxu1 %v1425_v34  ;;  %810 = vmatprep.subr.bf16.mxu0 %v1449_v37 }
  0x46   : > { %1226 = vmatprep.subr.bf16.mxu1 %v1449_v37 }
  0x48   : > { %811 = vmatpush1.bf16.msra.mxu0 %v1426_v41 }
  0x49   : > { %1239 = vmatpush1.bf16.msra.mxu1 %v1426_v41  ;;  %812 = vmatprep.subr.bf16.mxu0 %v1449_v37 }
  0x4a   : > { %1227 = vmatprep.subr.bf16.mxu1 %v1449_v37 }
  0x4c   : > { %813 = vmatpush1.bf16.msra.mxu0 %v1427_v42 }
  0x4d   : > { %1240 = vmatpush1.bf16.msra.mxu1 %v1427_v42  ;;  %814 = vmatprep.subr.bf16.mxu0 %v1449_v37 }
  0x4e   : > { %1228 = vmatprep.subr.bf16.mxu1 %v1449_v37 }
  0x50   : > { %815 = vmatpush1.bf16.msra.mxu0 %v1428_v43 }
  0x51   : > { %1241 = vmatpush1.bf16.msra.mxu1 %v1428_v43  ;;  %816 = vmatprep.subr.bf16.mxu0 %v1449_v37 }
  0x52   : > { %1229 = vmatprep.subr.bf16.mxu1 %v1449_v37 }
  0x54   : > { %817 = vmatpush1.bf16.msra.mxu0 %v1429_v36 }
  0x55   : > { %1242 = vmatpush1.bf16.msra.mxu1 %v1429_v36  ;;  %818 = vmatprep.subr.bf16.mxu0 %v1449_v37 }
  0x56   : > { %1230 = vmatprep.subr.bf16.mxu1 %v1449_v37 }
  0x58   : > { %819 = vmatpush1.bf16.msra.mxu0 %v1430_v44 }
  0x59   : > { %1243 = vmatpush1.bf16.msra.mxu1 %v1430_v44  ;;  %820 = vmatprep.subr.bf16.mxu0 %v1449_v37 }
  0x5a   : > { %1231 = vmatprep.subr.bf16.mxu1 %v1449_v37 }
  0x5c   : > { %821 = vmatpush1.bf16.msra.mxu0 %v1431_v52 }
  0x5d   : > { %1244 = vmatpush1.bf16.msra.mxu1 %v1431_v52  ;;  %822 = vmatprep.subr.bf16.mxu0 %v1449_v37 }
  0x5e   : > { %1232 = vmatprep.subr.bf16.mxu1 %v1449_v37 }
  0x60   : > { %823 = vmatpush1.bf16.msra.mxu0 %v1432_v5 }
  0x61   : > { %1245 = vmatpush1.bf16.msra.mxu1 %v1432_v5  ;;  %824 = vmatprep.subr.bf16.mxu0 %v1449_v37 }
  0x62   : > { %1233 = vmatprep.subr.bf16.mxu1 %v1449_v37 }
  0x64   : > { %825 = vmatpush1.bf16.msra.mxu0 %v798_v18 }
  0x65   : > { %1246 = vmatpush1.bf16.msra.mxu1 %v798_v18 }
  0x8b   : > { %v1702_v46 = vpop.permute.xlu1 %1277 }
  0x8c   : > { %v1279_v61 = vunpack.i.l.bf16 %v1702_v46 }
  0x8d   : > { %v1268_v47 = vpop.permute.xlu0 %1267 }
  0x8e   : > { %v1270_v53 = vunpack.i.h.bf16 %v1268_v47  ;;  %v1269_v54 = vunpack.i.l.bf16 %v1268_v47  ;;  %v497_v28 = vsel %vm492_vm5, %v1506_v15, %v1279_v61 }
  0x8f   : > { %v1283_v48 = vpop.permute.xlu1 %1282 }
  0x90   : > { %v1285_v56 = vunpack.i.h.bf16 %v1283_v48  ;;  %v1284_v57 = vunpack.i.l.bf16 %v1283_v48  ;;  %v494_v62 = vsel %vm492_vm5, %v1522_v23, %v1270_v53  ;;  %v493_v63 = vsel %vm492_vm5, 0.0, %v1269_v54 }
  0x91   : > { %v1273_v49 = vpop.permute.xlu0 %1272 }
  0x92   : > { %v503_v1 = vsel %vm502_vm6, %v493_v63, %v1284_v57  ;;  %v504_v2 = vsel %vm502_vm6, %v494_v62, %v1285_v56  ;;  %v1275_v6 = vunpack.i.h.bf16 %v1273_v49  ;;  %v1274_v7 = vunpack.i.l.bf16 %v1273_v49 }
  0x93   : > { %v1704_v50 = vpop.permute.xlu1 %1292 }
  0x94   : > { %v1294_v29 = vunpack.i.l.bf16 %v1704_v50  ;;  %v496_v30 = vsel %vm492_vm5, %v1529_v26, %v1275_v6  ;;  %v495_v31 = vsel %vm492_vm5, %v1526_v25, %v1274_v7  ;;  %v1295_v54 = vunpack.i.h.bf16 %v1704_v50 }
  0x95   : > { %v1288_v51 = vpop.permute.xlu0 %1287 }
  0x96   : > { %v1290_v10 = vunpack.i.h.bf16 %v1288_v51  ;;  %v1289_v11 = vunpack.i.l.bf16 %v1288_v51  ;;  %v507_v39 = vsel %vm502_vm6, %v497_v28, %v1294_v29  ;;  %v1280_v51 = vunpack.i.h.bf16 %v1702_v46 }
  0x97   : > { %v1303_v55 = vpop.permute.xlu1 %1302 }
  0x98   : > { %v1305_v20 = vunpack.i.h.bf16 %v1303_v55  ;;  %v1304_v21 = vunpack.i.l.bf16 %v1303_v55  ;;  %v505_v35 = vsel %vm502_vm6, %v495_v31, %v1289_v11  ;;  %v506_v15 = vsel %vm502_vm6, %v496_v30, %v1290_v10 }
  0x99   : > { %v1298_v58 = vpop.permute.xlu0 %1297  ;;  %v498_v55 = vsel %vm492_vm5, %v1509_v16, %v1280_v51 }
  0x9a   : > { %v1300_v59 = vunpack.i.h.bf16 %v1298_v58  ;;  %v1299_v60 = vunpack.i.l.bf16 %v1298_v58  ;;  %v515_v26 = vsel %vm512_vm7, %v505_v35, %v1304_v21  ;;  %v516_v25 = vsel %vm512_vm7, %v506_v15, %v1305_v20 }
  0x9b   : > { %v1313_v0 = vpop.permute.xlu1 %1312  ;;  %v508_v46 = vsel %vm502_vm6, %v498_v55, %v1295_v54 }
  0x9c   : > { %v1315_v3 = vunpack.i.h.bf16 %v1313_v0  ;;  %v1314_v4 = vunpack.i.l.bf16 %v1313_v0  ;;  %v513_v8 = vsel %vm512_vm7, %v503_v1, %v1299_v60  ;;  %v514_v23 = vsel %vm512_vm7, %v504_v2, %v1300_v59 }
  0x9d   : > { %v1722_v9 = vpop.permute.xlu0 %1307 }
  0x9e   : > { %v1725_v12 = vsel %vm522_vm8, %v513_v8, %v1314_v4  ;;  %v1728_v19 = vsel %vm522_vm8, %v514_v23, %v1315_v3  ;;  %v1309_v32 = vunpack.i.l.bf16 %v1722_v9  ;;  %v1310_v56 = vunpack.i.h.bf16 %v1722_v9 }
  0x9f   : > { %v474_v22 = vpop.permute.xlu1 %473  ;;  %v1346_v24 = vpack.i.bf16 %v1728_v19, %v1725_v12 }
  0xa0   : > { %v517_v41 = vsel %vm512_vm7, %v507_v39, %v1309_v32  ;;  %v518_v63 = vsel %vm512_vm7, %v508_v46, %v1310_v56 }
  0xa1   : > { %v1318_v33 = vpop.permute.xlu0 %1317  ;;  %1347 = vrot.lane.b32.xlu0 %v1346_v24, %s1450_s29  ;;  %v1766_v47 = vsel %vm522_vm8, %v517_v41, %v474_v22 }
  0xa2   : > { %v1320_v13 = vunpack.i.h.bf16 %v1318_v33  ;;  %v1319_v37 = vunpack.i.l.bf16 %v1318_v33 }
  0xa3   : > { %v320_v17 = vpop.permute.xlu1 %319 }
  0xa4   : > { %v1753_v40 = vsel %vm522_vm8, %v515_v26, %v1319_v37  ;;  %v1756_v34 = vsel %vm522_vm8, %v516_v25, %v1320_v13 }
  0xa5   : > { %v1323_v42 = vpop.permute.xlu0 %1322  ;;  %v1351_v43 = vpack.i.bf16 %v1753_v40, %v1728_v19  ;;  %v1356_v36 = vpack.i.bf16 %v1756_v34, %v1753_v40  ;;  %v1361_v49 = vpack.i.bf16 %v1766_v47, %v1756_v34 }
  0xa6   : > { %v1324_v57 = vunpack.i.l.bf16 %v1323_v42  ;;  %v1325_v0 = vunpack.i.h.bf16 %v1323_v42 }
  0xa7   : > { %1352 = vrot.lane.b32.xlu1 %v1351_v43, %s1451_s30  ;;  %1357 = vrot.lane.b32.xlu0 %v1356_v36, %s1452_s5  ;;  %v374_v44 = vpop.permute.xlu1 %373 }
  0xa8   : > { %v499_v50 = vsel %vm492_vm5, %v1604_v14, %v1324_v57  ;;  %v501_v14 = vsel %vm492_vm5, %v1596_v38, %v320_v17  ;;  %v500_v23 = vsel %vm492_vm5, %v1610_v45, %v1325_v0  ;;  %vm1091_vm5 = vcmask 7168  }
  0xa9   : > { %v1328_v48 = vpop.permute.xlu0 %1327  ;;  %v511_v20 = vsel %vm502_vm6, %v501_v14, %v374_v44 }
  0xaa   : > { %v1329_v58 = vunpack.i.l.bf16 %v1328_v48  ;;  %v1330_v16 = vunpack.i.h.bf16 %v1328_v48 }
  0xab   : > { %1362 = vrot.lane.b32.xlu1 %v1361_v49, %s1448_s24  ;;  %1367 = vrot.lane.b32.xlu0 %v1356_v36, %s1450_s29  ;;  %v428_v52 = vpop.permute.xlu1 %427 }
  0xac   : > { %v509_v2 = vsel %vm502_vm6, %v499_v50, %v1329_v58  ;;  %v510_v9 = vsel %vm502_vm6, %v500_v23, %v1330_v16  ;;  %v521_v38 = vsel %vm512_vm7, %v511_v20, %v428_v52 }
  0xad   : > { %v1333_v53 = vpop.permute.xlu0 %1332 }
  0xae   : > { %v1334_v59 = vunpack.i.l.bf16 %v1333_v53  ;;  %v1335_v4 = vunpack.i.h.bf16 %v1333_v53 }
  0xaf   : > { %1377 = vrot.lane.b32.xlu0 %v1361_v49, %s1451_s30  ;;  %v1343_v1 = vpop.permute.xlu1 %1342 }
  0xb0   : > { %v519_v5 = vsel %vm512_vm7, %v509_v2, %v1334_v59  ;;  %v1344_v7 = vunpack.i.l.bf16 %v1343_v1  ;;  %v520_v10 = vsel %vm512_vm7, %v510_v9, %v1335_v4  ;;  %v1345_v21 = vunpack.i.h.bf16 %v1343_v1 }
  0xb1   : > { %v1338_v60 = vpop.permute.xlu0 %1337 }
  0xb2   : > { %v1340_v61 = vunpack.i.h.bf16 %v1338_v60  ;;  %v1339_v62 = vunpack.i.l.bf16 %v1338_v60  ;;  %v530_v22 = vsel %vm522_vm8, %v520_v10, %v1344_v7  ;;  %v531_v24 = vsel %vm522_vm8, %v521_v38, %v1345_v21 }
  0xb3   : > { %v1401_v27 = vpack.i.bf16 %v531_v24, %v530_v22  ;;  %v1416_v28 = vpack.i.bf16 %v1725_v12, %v531_v24 }
  0xb4   : > { %v1784_v3 = vsel %vm522_vm8, %v518_v63, %v1339_v62  ;;  %v1790_v8 = vsel %vm522_vm8, %v519_v5, %v1340_v61 }
  0xb5   : > { %v1371_v6 = vpack.i.bf16 %v1784_v3, %v1766_v47  ;;  %v1381_v11 = vpack.i.bf16 %v1790_v8, %v1784_v3  ;;  %v1391_v45 = vpack.i.bf16 %v530_v22, %v1790_v8 }
  0xb7   : > { %1372 = vrot.lane.b32.xlu1 %v1371_v6, %s1450_s29  ;;  %1387 = vrot.lane.b32.xlu0 %v1371_v6, %s1452_s5 }
  0xbb   : > { %1382 = vrot.lane.b32.xlu1 %v1381_v11, %s1451_s30  ;;  %1397 = vrot.lane.b32.xlu0 %v1381_v11, %s1448_s24 }
  0xbf   : > { %1392 = vrot.lane.b32.xlu1 %v1391_v45, %s1452_s5  ;;  %1407 = vrot.lane.b32.xlu0 %v1391_v45, %s1450_s29 }
  0xc3   : > { %1402 = vrot.lane.b32.xlu1 %v1401_v27, %s1448_s24  ;;  %1417 = vrot.lane.b32.xlu0 %v1416_v28, %s1452_s5 }
  0xc7   : > { %1412 = vrot.lane.b32.xlu1 %v1401_v27, %s1451_s30 }
  0xcb   : > { %625 = vrot.lane.b32.xlu1 %v1725_v12, %s1448_s24 }
 0x113   : > { %v1348_v29 = vpop.permute.xlu0 %1347 }
 0x114   : > { %v1350_v30 = vunpack.i.h.bf16 %v1348_v29  ;;  %v1349_v31 = vunpack.i.l.bf16 %v1348_v29 }
 0x116   : > { %v636_v15 = vsel %vm634_vm9, %v1725_v12, %v1350_v30  ;;  %v635_v13 = vsel %vm634_vm9, %v1725_v12, %v1349_v31 }
 0x119   : > { %v1353_v32 = vpop.permute.xlu1 %1352  ;;  %v1358_v33 = vpop.permute.xlu0 %1357 }
 0x11a   : > { %v1355_v18 = vunpack.i.h.bf16 %v1353_v32  ;;  %v1354_v35 = vunpack.i.l.bf16 %v1353_v32  ;;  %v1360_v37 = vunpack.i.h.bf16 %v1358_v33  ;;  %v1359_v26 = vunpack.i.l.bf16 %v1358_v33 }
 0x11c   : > { %v644_v25 = vsel %vm643_vm10, %v635_v13, %v1354_v35  ;;  %v645_v17 = vsel %vm643_vm10, %v636_v15, %v1355_v18 }
 0x11d   : > { %v1363_v39 = vpop.permute.xlu1 %1362  ;;  %v1368_v43 = vpop.permute.xlu0 %1367  ;;  %v653_v36 = vsel %vm652_vm11, %v644_v25, %v1359_v26  ;;  %v654_v44 = vsel %vm652_vm11, %v645_v17, %v1360_v37 }
 0x11e   : > { %v1365_v41 = vunpack.i.h.bf16 %v1363_v39  ;;  %v1364_v42 = vunpack.i.l.bf16 %v1363_v39  ;;  %v669_v51 = vpack.c.bf16 %v654_v44, %v653_v36  ;;  %v1370_v53 = vunpack.i.h.bf16 %v1368_v43 }
 0x11f   : > { %v1369_v54 = vunpack.i.l.bf16 %v1368_v43 }
 0x120   : > { %v661_v48 = vsel %vm522_vm8, %v1359_v26, %v1364_v42  ;;  %v662_v49 = vsel %vm522_vm8, %v1360_v37, %v1365_v41  ;;  %v638_v46 = vsel %vm634_vm9, %v1753_v40, %v1370_v53 }
 0x121   : > { %v670_v12 = vpack.c.bf16 %v662_v49, %v661_v48  ;;  %v1378_v52 = vpop.permute.xlu0 %1377  ;;  %v637_v61 = vsel %vm634_vm9, %v1728_v19, %v1369_v54 }
 0x122   : > { %v1380_v57 = vunpack.i.h.bf16 %v1378_v52  ;;  %v1379_v58 = vunpack.i.l.bf16 %v1378_v52 }
 0x123   : > { %1212 = vmatprep.mubr.msk.bf16.mxu0 %vm784_vm12, %v670_v12 }
 0x124   : > { %833 = vmatmul.mubr.bf16.vlgmr.msra.gmra.mrb[0].mxu0 %v669_v51  ;;  %v646_v0 = vsel %vm643_vm10, %v637_v61, %v1379_v58  ;;  %v647_v50 = vsel %vm643_vm10, %v638_v46, %v1380_v57  ;;  %v1198_v51 = vld [vmem:[%s1924_s2] ss:$0 sm:$0xff] }
 0x129   : > { %v1373_v55 = vpop.permute.xlu1 %1372  ;;  %v1388_v56 = vpop.permute.xlu0 %1387 }
 0x12a   : > { %v1390_v59 = vunpack.i.h.bf16 %v1388_v56  ;;  %v1389_v60 = vunpack.i.l.bf16 %v1388_v56  ;;  %v1375_v40 = vunpack.i.h.bf16 %v1373_v55  ;;  %v1374_v7 = vunpack.i.l.bf16 %v1373_v55 }
 0x12c   : > { %v655_v2 = vsel %vm652_vm11, %v646_v0, %v1389_v60  ;;  %v656_v4 = vsel %vm652_vm11, %v647_v50, %v1390_v59  ;;  %v640_v22 = vsel %vm634_vm9, %v1766_v47, %v1375_v40  ;;  %v639_v38 = vsel %vm634_vm9, %v1756_v34, %v1374_v7 }
 0x12d   : > { %v1383_v62 = vpop.permute.xlu1 %1382  ;;  %v1398_v63 = vpop.permute.xlu0 %1397  ;;  %v671_v10 = vpack.c.bf16 %v656_v4, %v655_v2 }
 0x12e   : > { %v1400_v1 = vunpack.i.h.bf16 %v1398_v63  ;;  %v1399_v16 = vunpack.i.l.bf16 %v1398_v63  ;;  %v1385_v23 = vunpack.i.h.bf16 %v1383_v62  ;;  %v1384_v9 = vunpack.i.l.bf16 %v1383_v62 }
 0x130   : > { %v663_v5 = vsel %vm522_vm8, %v1389_v60, %v1399_v16  ;;  %v664_v6 = vsel %vm522_vm8, %v1390_v59, %v1400_v1  ;;  %v648_v24 = vsel %vm643_vm10, %v639_v38, %v1384_v9  ;;  %v649_v27 = vsel %vm643_vm10, %v640_v22, %v1385_v23 }
 0x131   : > { %v672_v14 = vpack.c.bf16 %v664_v6, %v663_v5  ;;  %v1393_v19 = vpop.permute.xlu1 %1392  ;;  %v1408_v21 = vpop.permute.xlu0 %1407 }
 0x132   : > { %v1395_v11 = vunpack.i.h.bf16 %v1393_v19  ;;  %v1394_v20 = vunpack.i.l.bf16 %v1393_v19  ;;  %v1410_v30 = vunpack.i.h.bf16 %v1408_v21  ;;  %v1409_v31 = vunpack.i.l.bf16 %v1408_v21 }
 0x133   : > { %1213 = vmatprep.mubr.msk.bf16.mxu0 %vm784_vm12, %v672_v14 }
 0x134   : > { %841 = vmatmul.mubr.bf16.gmra.mrb[4].mxu0 %v671_v10  ;;  %v657_v32 = vsel %vm652_vm11, %v648_v24, %v1394_v20  ;;  %v658_v33 = vsel %vm652_vm11, %v649_v27, %v1395_v11  ;;  %v642_v25 = vsel %vm634_vm9, %v1790_v8, %v1410_v30  ;;  %v641_v17 = vsel %vm634_vm9, %v1784_v3, %v1409_v31 }
 0x135   : > { %v1403_v45 = vpop.permute.xlu1 %1402  ;;  %v1418_v35 = vpop.permute.xlu0 %1417  ;;  %v673_v26 = vpack.c.bf16 %v658_v33, %v657_v32 }
 0x136   : > { %v1405_v28 = vunpack.i.h.bf16 %v1403_v45  ;;  %v1404_v29 = vunpack.i.l.bf16 %v1403_v45  ;;  %v1420_v39 = vunpack.i.h.bf16 %v1418_v35  ;;  %v1419_v41 = vunpack.i.l.bf16 %v1418_v35 }
 0x138   : > { %v665_v18 = vsel %vm522_vm8, %v1394_v20, %v1404_v29  ;;  %v666_v47 = vsel %vm522_vm8, %v1395_v11, %v1405_v28 }
 0x139   : > { %v1413_v15 = vpop.permute.xlu1 %1412  ;;  %v674_v34 = vpack.c.bf16 %v666_v47, %v665_v18 }
 0x13a   : > { %v1415_v13 = vunpack.i.h.bf16 %v1413_v15  ;;  %v1414_v37 = vunpack.i.l.bf16 %v1413_v15 }
 0x13b   : > { %1214 = vmatprep.mubr.msk.bf16.mxu1 %vm784_vm12, %v674_v34 }
 0x13c   : > { %v650_v42 = vsel %vm643_vm10, %v641_v17, %v1414_v37  ;;  %v651_v43 = vsel %vm643_vm10, %v642_v25, %v1415_v13  ;;  %849 = vmatmul.mubr.bf16.vlgmr.msra.gmra.mrb[0].mxu1 %v673_v26 }
 0x13d   : > { %v626_v36 = vpop.permute.xlu1 %625  ;;  %v659_v8 = vsel %vm652_vm11, %v650_v42, %v1419_v41  ;;  %v660_v12 = vsel %vm652_vm11, %v651_v43, %v1420_v39 }
 0x13e   : > { %v667_v44 = vsel %vm522_vm8, %v1419_v41, %v626_v36  ;;  %v668_v48 = vsel %vm522_vm8, %v1420_v39, %v626_v36  ;;  %v675_v3 = vpack.c.bf16 %v660_v12, %v659_v8 }
 0x13f   : > { %v676_v49 = vpack.c.bf16 %v668_v48, %v667_v44 }
 0x141   : > { %1215 = vmatprep.mubr.msk.bf16.mxu1 %vm784_vm12, %v676_v49 }
 0x144   : > { %857 = vmatmul.mubr.bf16.gmra.mrb[4].mxu1 %v675_v3 }
 0x1f7   : > { %v834_v52 = vpop.f32.mrb[0].mxu0 }
 0x1f8   : > { %v835_v53 = vadd.f32 %v1198_v51, %v834_v52  ;;  %v836_v54 = vpop.f32.mrb[1].mxu0 }
 0x1f9   : > { %v837_v55 = vpop.f32.mrb[2].mxu0 }
 0x1fa   : > { %v865_v56 = vmax.f32 %v835_v53, 0.0  ;;  %v838_v57 = vadd.f32 %v1198_v51, %v837_v55  ;;  %v839_v58 = vpop.f32.mrb[3].mxu0 }
 0x1fc   : > { %v866_v59 = vmax.f32 %v838_v57, 0.0  ;;  %v873_v60 = vsel %vm502_vm6, %v865_v56, 0.0 }
 0x1fe   : > { %v874_v46 = vsel %vm502_vm6, %v866_v59, 0.0 }
 0x1ff   : > { %v875_v61 = vadd.f32 %v874_v46, %v873_v60 }
 0x207   : > { %v842_v62 = vpop.f32.mrb[4].mxu0 }
 0x208   : > { %v843_v63 = vadd.f32 %v1198_v51, %v842_v62  ;;  %v844_v0 = vpop.f32.mrb[5].mxu0 }
 0x209   : > { %v845_v50 = vpop.f32.mrb[6].mxu0 }
 0x20a   : > { %v867_v1 = vmax.f32 %v843_v63, 0.0  ;;  %v846_v16 = vadd.f32 %v1198_v51, %v845_v50  ;;  %v847_v2 = vpop.f32.mrb[7].mxu0 }
 0x20c   : > { %v876_v4 = vsel %vm502_vm6, %v867_v1, 0.0  ;;  %v868_v5 = vmax.f32 %v846_v16, 0.0 }
 0x20d   : > { %v877_v6 = vadd.f32 %v876_v4, %v875_v61 }
 0x20e   : > { %v878_v40 = vsel %vm502_vm6, %v868_v5, 0.0 }
 0x20f   : > { %v879_v7 = vadd.f32 %v878_v40, %v877_v6  ;;  %v850_v14 = vpop.f32.mrb[0].mxu1 }
 0x210   : > { %v851_v19 = vadd.f32 %v1198_v51, %v850_v14  ;;  %v852_v23 = vpop.f32.mrb[1].mxu1 }
 0x211   : > { %v853_v9 = vpop.f32.mrb[2].mxu1 }
 0x212   : > { %v869_v10 = vmax.f32 %v851_v19, 0.0  ;;  %v854_v11 = vadd.f32 %v1198_v51, %v853_v9  ;;  %v855_v20 = vpop.f32.mrb[3].mxu1 }
 0x214   : > { %v880_v21 = vsel %vm502_vm6, %v869_v10, 0.0  ;;  %v870_v22 = vmax.f32 %v854_v11, 0.0 }
 0x215   : > { %v881_v38 = vadd.f32 %v880_v21, %v879_v7 }
 0x216   : > { %v882_v45 = vsel %vm502_vm6, %v870_v22, 0.0 }
 0x217   : > { %v883_v24 = vadd.f32 %v882_v45, %v881_v38  ;;  %v858_v27 = vpop.f32.mrb[4].mxu1 }
 0x218   : > { %v859_v28 = vadd.f32 %v1198_v51, %v858_v27  ;;  %v860_v29 = vpop.f32.mrb[5].mxu1 }
 0x219   : > { %v861_v30 = vpop.f32.mrb[6].mxu1 }
 0x21a   : > { %v871_v31 = vmax.f32 %v859_v28, 0.0  ;;  %v862_v32 = vadd.f32 %v1198_v51, %v861_v30  ;;  %v863_v33 = vpop.f32.mrb[7].mxu1 }
 0x21c   : > { %v884_v18 = vsel %vm502_vm6, %v871_v31, 0.0  ;;  %v872_v47 = vmax.f32 %v862_v32, 0.0 }
 0x21d   : > { %v885_v35 = vadd.f32 %v884_v18, %v883_v24 }
 0x21e   : > { %v886_v15 = vsel %vm502_vm6, %v872_v47, 0.0 }
 0x21f   : > { %v887_v34 = vadd.f32 %v886_v15, %v885_v35 }
 0x221   : > { %v888_v13 = vrot.slane %v887_v34, 4 }
 0x223   : > { %v889_v37 = vadd.f32 %v888_v13, %v887_v34 }
 0x225   : > { %v890_v26 = vrot.slane %v889_v37, 2 }
 0x227   : > { %v891_v25 = vadd.f32 %v890_v26, %v889_v37 }
 0x229   : > { %v892_v17 = vrot.slane %v891_v25, 1 }
 0x22b   : > { %v893_v39 = vadd.f32 %v892_v17, %v891_v25 }
 0x22d   : > { %v895_v41 = vmul.f32 0.015625, %v893_v39 }
 0x22f   : > { %v896_v42 = vsub.f32 %v865_v56, %v895_v41  ;;  %v897_v43 = vsub.f32 %v866_v59, %v895_v41  ;;  %v898_v36 = vsub.f32 %v867_v1, %v895_v41  ;;  %v899_v44 = vsub.f32 %v868_v5, %v895_v41 }
 0x230   : > { %v900_v48 = vsub.f32 %v869_v10, %v895_v41  ;;  %v901_v49 = vsub.f32 %v870_v22, %v895_v41  ;;  %v902_v8 = vsub.f32 %v871_v31, %v895_v41  ;;  %v903_v12 = vsub.f32 %v872_v47, %v895_v41 }
 0x231   : > { %v904_v3 = vmul.f32 %v896_v42, %v896_v42  ;;  %v905_v51 = vmul.f32 %v897_v43, %v897_v43  ;;  %v906_v52 = vmul.f32 %v898_v36, %v898_v36  ;;  %v907_v53 = vmul.f32 %v899_v44, %v899_v44 }
 0x232   : > { %v908_v58 = vmul.f32 %v900_v48, %v900_v48  ;;  %v909_v59 = vmul.f32 %v901_v49, %v901_v49  ;;  %v910_v62 = vmul.f32 %v902_v8, %v902_v8  ;;  %v911_v50 = vmul.f32 %v903_v12, %v903_v12 }
 0x233   : > { %v912_v54 = vsel %vm502_vm6, %v904_v3, 0.0  ;;  %v913_v55 = vsel %vm502_vm6, %v905_v51, 0.0  ;;  %v915_v60 = vsel %vm502_vm6, %v906_v52, 0.0  ;;  %v917_v46 = vsel %vm502_vm6, %v907_v53, 0.0 }
 0x234   : > { %v914_v57 = vadd.f32 %v913_v55, %v912_v54  ;;  %v919_v63 = vsel %vm502_vm6, %v908_v58, 0.0  ;;  %v921_v1 = vsel %vm502_vm6, %v909_v59, 0.0  ;;  %v923_v2 = vsel %vm502_vm6, %v910_v62, 0.0 }
 0x235   : > { %v925_v5 = vsel %vm502_vm6, %v911_v50, 0.0 }
 0x236   : > { %v916_v56 = vadd.f32 %v915_v60, %v914_v57 }
 0x238   : > { %v918_v61 = vadd.f32 %v917_v46, %v916_v56 }
 0x23a   : > { %v920_v0 = vadd.f32 %v919_v63, %v918_v61 }
 0x23c   : > { %v922_v16 = vadd.f32 %v921_v1, %v920_v0 }
 0x23e   : > { %v924_v4 = vadd.f32 %v923_v2, %v922_v16 }
 0x240   : > { %v926_v6 = vadd.f32 %v925_v5, %v924_v4 }
 0x242   : > { %v927_v40 = vrot.slane %v926_v6, 4 }
 0x244   : > { %v928_v7 = vadd.f32 %v927_v40, %v926_v6 }
 0x246   : > { %v929_v14 = vrot.slane %v928_v7, 2 }
 0x248   : > { %v930_v19 = vadd.f32 %v929_v14, %v928_v7 }
 0x24a   : > { %v931_v23 = vrot.slane %v930_v19, 1 }
 0x24c   : > { %v932_v9 = vadd.f32 %v931_v23, %v930_v19 }
 0x24e   : > { %v933_v10 = vmul.f32 0.015625, %v932_v9 }
 0x250   : > { %v934_v11 = vadd.f32 1e-05, %v933_v10 }
 0x252   : > { %1434 = vrsqrt.f32 %v934_v11 }
 0x25c   : > { %v1435_v20 = vpop.eup %1434 }
 0x25d   : > { %v936_v21 = vmul.f32 %v1435_v20, %v896_v42  ;;  %v937_v22 = vmul.f32 %v1435_v20, %v897_v43  ;;  %v938_v38 = vmul.f32 %v1435_v20, %v898_v36  ;;  %v939_v45 = vmul.f32 %v1435_v20, %v899_v44 }
 0x25e   : > { %v940_v24 = vmul.f32 %v1435_v20, %v900_v48  ;;  %v941_v27 = vmul.f32 %v1435_v20, %v901_v49  ;;  %v942_v28 = vmul.f32 %v1435_v20, %v902_v8  ;;  %v943_v29 = vmul.f32 %v1435_v20, %v903_v12 }
 0x25f   : > { %v947_v30 = vsel %vm502_vm6, %v938_v38, -inf  ;;  %v948_v31 = vsel %vm502_vm6, %v939_v45, -inf  ;;  %v944_v32 = vsel %vm502_vm6, %v936_v21, -inf  ;;  %v945_v33 = vsel %vm502_vm6, %v937_v22, -inf }
 0x260   : > { %v949_v18 = vmax.f32 %v947_v30, %v948_v31  ;;  %v953_v47 = vsel %vm502_vm6, %v942_v28, -inf  ;;  %v954_v35 = vsel %vm502_vm6, %v943_v29, -inf  ;;  %v946_v15 = vmax.f32 %v944_v32, %v945_v33 }
 0x261   : > { %v955_v34 = vmax.f32 %v953_v47, %v954_v35  ;;  %v950_v13 = vsel %vm502_vm6, %v940_v24, -inf  ;;  %v951_v37 = vsel %vm502_vm6, %v941_v27, -inf }
 0x262   : > { %v961_v26 = vrot.slane %v949_v18, 1  ;;  %v952_v25 = vmax.f32 %v950_v13, %v951_v37  ;;  %v960_v17 = vrot.slane %v946_v15, 1 }
 0x263   : > { %v963_v39 = vrot.slane %v955_v34, 1 }
 0x264   : > { %v969_v41 = vmax.f32 %v949_v18, %v961_v26  ;;  %v962_v42 = vrot.slane %v952_v25, 1  ;;  %v968_v43 = vmax.f32 %v946_v15, %v960_v17 }
 0x265   : > { %v971_v36 = vmax.f32 %v955_v34, %v963_v39 }
 0x266   : > { %v970_v44 = vmax.f32 %v952_v25, %v962_v42  ;;  %v986_v48 = vrot.slane %v968_v43, 2  ;;  %v987_v49 = vrot.slane %v969_v41, 1  ;;  %v1021_v8 = vrot.slane %v969_v41, 2 }
 0x267   : > { %v990_v12 = vrot.slane %v971_v36, 7  ;;  %v1022_v3 = vrot.slane %v971_v36, 2  ;;  %v995_v51 = vrot.slane %v968_v43, 4  ;;  %v996_v52 = vrot.slane %v969_v41, 3 }
 0x268   : > { %v988_v53 = vsel %vm977_vm13, %v987_v49, %v986_v48  ;;  %v1027_v54 = vmax.f32 %v968_v43, %v986_v48  ;;  %v1028_v55 = vmax.f32 %v969_v41, %v1021_v8  ;;  %v998_v57 = vrot.slane %v970_v44, 2 }
 0x269   : > { %v989_v58 = vsel %vm980_vm14, %v970_v44, %v988_v53  ;;  %v1030_v60 = vmax.f32 %v971_v36, %v1022_v3  ;;  %v997_v56 = vsel %vm977_vm13, %v996_v52, %v995_v51  ;;  %v1000_v59 = vrot.slane %v971_v36, 1 }
 0x26a   : > { %v991_v46 = vsel %vm983_vm15, %v990_v12, %v989_v58  ;;  %v1031_v61 = vmax.f32 %v1027_v54, %v1028_v55  ;;  %v1029_v62 = vmax.f32 %v970_v44, %v998_v57  ;;  %v999_v63 = vsel %vm980_vm14, %v998_v57, %v997_v56 }
 0x26b   : > { %992 = vrot.lane.b32.xlu1 %v991_v46, %s1446_s22  ;;  %v1001_v0 = vsel %vm983_vm15, %v1000_v59, %v999_v63  ;;  %v1005_v50 = vrot.slane %v968_v43, 6  ;;  %v1006_v1 = vrot.slane %v969_v41, 5  ;;  %v1008_v16 = vrot.slane %v970_v44, 4  ;;  %s1453_s22 = smov 48  }
 0x26c   : > { %v1059_v2 = vsel %vm1058_vm0, %v1031_v61, 0.0  ;;  %v1041_v4 = vmax.f32 %v1029_v62, %v1030_v60  ;;  %v1010_v6 = vrot.slane %v971_v36, 3  ;;  %v976_v40 = vrot.slane %v969_v41, 7 }
 0x26d   : > { %1060 = vadd.xlane.f32.xlu0 %v1059_v2  ;;  %v1007_v5 = vsel %vm977_vm13, %v1006_v1, %v1005_v50  ;;  %v979_v19 = vrot.slane %v970_v44, 6  ;;  %v1063_v23 = vsel %vm1058_vm0, %v1031_v61, -inf  ;;  %v982_v9 = vrot.slane %v971_v36, 5 }
 0x26e   : > { %v1009_v7 = vsel %vm980_vm14, %v1008_v16, %v1007_v5  ;;  %v978_v10 = vsel %vm977_vm13, %v976_v40, %v968_v43  ;;  %v1070_v21 = vsel %vm1058_vm0, %v1041_v4, -inf  ;;  %v1066_v22 = vsel %vm1058_vm0, %v1041_v4, 0.0 }
 0x26f   : > { %v1011_v14 = vsel %vm983_vm15, %v1010_v6, %v1009_v7  ;;  %v981_v11 = vsel %vm980_vm14, %v979_v19, %v978_v10  ;;  %v1033_v38 = vsel %vm1032_vm1, %v1031_v61, 0.0  ;;  %v1038_v45 = vsel %vm1032_vm1, %v1031_v61, -inf }
 0x270   : > { %v984_v20 = vsel %vm983_vm15, %v982_v9, %v981_v11  ;;  %v1042_v24 = vsel %vm1032_vm1, %v1041_v4, 0.0  ;;  %v1046_v27 = vsel %vm1032_vm1, %v1041_v4, -inf }
 0x271   : > { %1064 = vmax.xlane.f32.xlu0 %v1063_v23 }
 0x275   : > { %1071 = vmax.xlane.f32.xlu0 %v1070_v21 }
 0x28b   : > { %1002 = vrot.lane.b32.xlu0 %v1001_v0, %s1448_s24  ;;  %s1454_s24 = smov 1  }
 0x28f   : > { %1067 = vadd.xlane.f32.xlu1 %v1066_v22 }
 0x2a0   : > { %1012 = vrot.lane.b32.xlu1 %v1011_v14, %s1453_s22 }
 0x2aa   : > { %1034 = vadd.xlane.f32.xlu0 %v1033_v38 }
 0x2ae   : > { %1039 = vmax.xlane.f32.xlu0 %v1038_v45 }
 0x2c4   : > { %1043 = vadd.xlane.f32.xlu1 %v1042_v24 }
 0x2c8   : > { %1047 = vmax.xlane.f32.xlu1 %v1046_v27 }
 0x2dd   : > { %v993_v18 = vpop.permute.xlu1 %992 }
 0x2de   : > { %v1015_v13 = vsel %vm502_vm6, %v984_v20, %v993_v18  ;;  %vm1093_vm6 = vcmask 9216  }
 0x2fa   : > { %v1061_v28 = vpop.xlane.xlu0 %1060 }
 0x2fb   : > { %v1062_v47 = vmul.f32 0.0625, %v1061_v28 }
 0x2fd   : > { %v1074_v37 = vrot.slane %v1062_v47, 4 }
 0x2fe   : > { %v1065_v29 = vpop.xlane.xlu0 %1064 }
 0x2ff   : > { %v1081_v31 = vrot.slane %v1065_v29, 4 }
 0x302   : > { %v1072_v30 = vpop.xlane.xlu0 %1071 }
 0x303   : > { %v1084_v32 = vrot.slane %v1072_v30, 3 }
 0x305   : > { %v1086_v33 = vsel %vm1052_vm2, %v1081_v31, %v1084_v32 }
 0x306   : > { %1096 = vrot.lane.b32.xlu0 %v1086_v33, %s1454_s24  ;;  %v1003_v15 = vpop.permute.xlu0 %1002 }
 0x307   : > { %v1016_v25 = vsel %vm522_vm8, %v1015_v13, %v1003_v15 }
 0x31c   : > { %v1068_v35 = vpop.xlane.xlu1 %1067 }
 0x31d   : > { %v1069_v34 = vmul.f32 0.0625, %v1068_v35 }
 0x31f   : > { %v1077_v26 = vrot.slane %v1069_v34, 3 }
 0x320   : > { %v1013_v17 = vpop.permute.xlu1 %1012 }
 0x321   : > { %v1018_v39 = vsel %vm1017_vm3, %v1016_v25, %v1013_v17  ;;  %v1079_v41 = vsel %vm1052_vm2, %v1074_v37, %v1077_v26 }
 0x322   : > { %1020 = vst.msk [vmem:[%s203_s11] sm:$0xf] %vm1019_vm4, %v1018_v39  ;;  %1088 = vrot.lane.b32.xlu1 %v1079_v41, %s1454_s24 }
 0x337   : > { %v1035_v43 = vpop.xlane.xlu0 %1034 }
 0x338   : > { %v1037_v52 = vmul.f32 0.0625, %v1035_v43 }
 0x33b   : > { %v1040_v44 = vpop.xlane.xlu0 %1039 }
 0x351   : > { %v1044_v42 = vpop.xlane.xlu1 %1043 }
 0x352   : > { %v1045_v3 = vmul.f32 0.0625, %v1044_v42 }
 0x354   : > { %v1050_v51 = vrot.slane %v1045_v3, 7 }
 0x355   : > { %v1048_v36 = vpop.xlane.xlu1 %1047 }
 0x356   : > { %v1055_v48 = vrot.slane %v1048_v36, 7  ;;  %v1053_v53 = vsel %vm1052_vm2, %v1037_v52, %v1050_v51 }
 0x358   : > { %v1057_v8 = vsel %vm1052_vm2, %v1040_v44, %v1055_v48 }
 0x378   : > { %v1097_v49 = vpop.permute.xlu0 %1096 }
 0x379   : > { %v1099_v12 = vsel %vm1091_vm5, %v1057_v8, %v1097_v49 }
 0x37a   : > { %1216 = vst.msk [vmem:[%s208_s13 + $0x2] sm:$0x3] %vm1093_vm6, %v1099_v12 }
 0x394   : > { %v1089_v54 = vpop.permute.xlu1 %1088 }
 0x395   : > { %v1092_v55 = vsel %vm1091_vm5, %v1053_v53, %v1089_v54 }
 0x396   : > { %1094 = vst.msk [vmem:[%s208_s13] sm:$0x3] %vm1093_vm6, %v1092_v55 }
 0x397 PF: > { %s15_s15 = sadd.s32 1, %s1442_s15  }
 0x398   : > { %p12_p4 = scmp.ge.s32.totalorder %s15_s15, 4  }
 0x39a   :  { %14 = sbr.rel (!%p12_p4) target bundleno = 1 (0x1), region = 75 }

// kernel: convae_forward.6
= control target key start
LH: loop header
LB: loop body
LE: loop exit
PB: predicated region body
PF: predicated region fallthrough
CT: control target
= control target key end

     0   :  { %s1485_s18 = smov 0   ;;  %s2027_s0 = inlined_call_operand.vmem [shape: f32[2,4,4,16], index: 0, kind: input, shape index: {}]   ;;  %s2028_s1 = inlined_call_operand.vmem [shape: bf16[144,16], index: 1, kind: input, shape index: {}]   ;;  %s2029_s2 = inlined_call_operand.vmem [shape: f32[1,16], index: 2, kind: input, shape index: {}]   ;;  %s2030_s3 = inlined_call_operand.vmem [shape: bf16[144,8], index: 3, kind: input, shape index: {}]   ;;  %s2031_s4 = inlined_call_operand.vmem [shape: f32[1,8], index: 4, kind: input, shape index: {}]   ;;  %s2032_s5 = inlined_call_operand.vmem [shape: f32[2,8,64], index: 5, kind: output, shape index: {}]  }
   0x1 LB: > { %s1275_s19 = sadd.s32 4294967295, %s1443_s18   ;;  %p1279_p0 = scmp.ge.s32.totalorder %s1443_s18, 1  ;;  %s1443_s18 = sphi %s1485_s18, %s15_s18  }
   0x2   : > { %p187_p1 = scmp.lt.s32.totalorder %s1443_s18, 3 }
   0x4   : > { %p188_p2 = pnand %p1279_p0, %p187_p1 }
   0x5   : > { %p214_p3 = scmp.lt.s32.totalorder (!%p188_p2), %s1275_s19, 1  ;;  %vm264_vm0 = vcmask (!%p188_p2), 1040384   ;;  %vm269_vm1 = vcmask (!%p188_p2), 1041408   ;;  %vm274_vm2 = vcmask (!%p188_p2), 1042432   ;;  %vm279_vm3 = vcmask (!%p188_p2), 1043456   ;;  %s1446_s24 = smov (!%p188_p2), 16  }
   0x6   : > { %191 = sbr.rel (%p188_p2) target bundleno = 1198 (0x4ae), region = 40  ;;  %vm284_vm4 = vcmask (!%p188_p2), 1044480   ;;  %vm289_vm5 = vcmask (!%p188_p2), 1045504   ;;  %vm294_vm6 = vcmask (!%p188_p2), 1046528   ;;  %v1445_v0 = vmov (!%p188_p2), 0.0   ;;  %s1447_s25 = smov (!%p188_p2), 32  }
   0x7   : > { %v1496_v1 = vrot.slane (!%p188_p2), %v1445_v0, 1  ;;  %v1501_v8 = vrot.slane (!%p188_p2), %v1445_v0, 2  ;;  %vm354_vm7 = vcmask (!%p188_p2), 130048   ;;  %vm360_vm8 = vcmask (!%p188_p2), 261120   ;;  %s1449_s21 = smov (!%p188_p2), 48   ;;  %s1450_s22 = smov (!%p188_p2), 96  }
   0x8   : > { %vm398_vm9 = vcmask (!%p188_p2), 392192   ;;  %vm407_vm10 = vcmask (!%p188_p2), 785408   ;;  %vm989_vm11 = vcmask (!%p188_p2), 64512   ;;  %vm1070_vm12 = vcmask (!%p188_p2), 1041409   ;;  %s1451_s27 = smov (!%p188_p2), 8  }
   0x9   : > { %vm1073_vm13 = vcmask (!%p188_p2), 1042434   ;;  %vm1076_vm14 = vcmask (!%p188_p2), 1043459   ;;  %vm1079_vm15 = vcmask (!%p188_p2), 1044484  }
   0xd   : > { %s2034_s19 = smov (!%p214_p3, %s1275_s19), 1 }
   0xe   : > { %s1313_s20 = sshll.u32 %s2034_s19, 4  ;;  %s1282_s28 = sshll.u32 %s2034_s19, 3 }
   0xf   : > { %s218_s23 = scalar_lea.vmem %s2027_s0, %s1313_s20  ;;  %s222_s6 = scalar_lea.vmem %s2032_s5, %s1282_s28 }
  0x10   : > { %v224_v2 = vld [vmem:[%s218_s23] sm:$0xf]  ;;  %v225_v3 = vld [vmem:[%s218_s23 + $0x4] sm:$0xf]  ;;  %v226_v4 = vld [vmem:[%s218_s23 + $0x8] sm:$0xf] }
  0x11   : > { %v232_v5 = vrot.slane %v224_v2, 7  ;;  %v240_v6 = vrot.slane %v224_v2, 6  ;;  %v248_v7 = vrot.slane %v224_v2, 5  ;;  %v227_v9 = vld [vmem:[%s218_s23 + $0xc] sm:$0xf]  ;;  %v256_v10 = vrot.slane %v224_v2, 4 }
  0x12   : > { %v233_v11 = vrot.slane %v225_v3, 7  ;;  %v241_v12 = vrot.slane %v225_v3, 6  ;;  %v249_v13 = vrot.slane %v225_v3, 5  ;;  %v257_v15 = vrot.slane %v225_v3, 4 }
  0x13   : > { %v265_v14 = vsel %vm264_vm0, 0.0, %v232_v5  ;;  %v234_v16 = vrot.slane %v226_v4, 7  ;;  %v242_v17 = vrot.slane %v226_v4, 6  ;;  %v250_v20 = vrot.slane %v226_v4, 5 }
  0x14   : > { %v270_v18 = vsel %vm269_vm1, %v265_v14, 0.0  ;;  %v266_v19 = vsel %vm264_vm0, 0.0, %v233_v11  ;;  %v235_v21 = vrot.slane %v227_v9, 7  ;;  %v258_v24 = vrot.slane %v226_v4, 4  ;;  %v1417_v4 = vld [vmem:[%s2028_s1] sm:$0xff]   ;;  %v1422_v11 = vld [vmem:[%s2028_s1 + $0x28] sm:$0xff]  }
  0x15   : > { %v275_v22 = vsel %vm274_vm2, %v270_v18, %v240_v6  ;;  %v271_v23 = vsel %vm269_vm1, %v266_v19, 0.0  ;;  %v267_v25 = vsel %vm264_vm0, 0.0, %v234_v16  ;;  %v243_v29 = vrot.slane %v227_v9, 6  ;;  %v1418_v6 = vld [vmem:[%s2028_s1 + $0x8] sm:$0xff]   ;;  %v1425_v14 = vld [vmem:[%s2028_s1 + $0x40] sm:$0xff]  }
  0x16   : > { %v280_v26 = vsel %vm279_vm3, %v275_v22, 0.0  ;;  %v276_v27 = vsel %vm274_vm2, %v271_v23, %v241_v12  ;;  %v272_v28 = vsel %vm269_vm1, %v267_v25, 0.0  ;;  %v251_v33 = vrot.slane %v227_v9, 5  ;;  %v1423_v12 = vld [vmem:[%s2028_s1 + $0x30] sm:$0xff]  }
  0x17   : > { %v285_v30 = vsel %vm284_vm4, %v280_v26, %v248_v7  ;;  %v281_v31 = vsel %vm279_vm3, %v276_v27, 0.0  ;;  %v277_v32 = vsel %vm274_vm2, %v272_v28, %v242_v17  ;;  %v268_v37 = vsel %vm264_vm0, 0.0, %v235_v21 }
  0x18   : > { %v290_v34 = vsel %vm289_vm5, %v285_v30, 0.0  ;;  %v286_v35 = vsel %vm284_vm4, %v281_v31, %v249_v13  ;;  %v282_v36 = vsel %vm279_vm3, %v277_v32, 0.0  ;;  %v273_v41 = vsel %vm269_vm1, %v268_v37, 0.0  ;;  %v1424_v13 = vld [vmem:[%s2028_s1 + $0x38] sm:$0xff]  }
  0x19   : > { %v1520_v38 = vsel %vm294_vm6, %v290_v34, %v256_v10  ;;  %v291_v39 = vsel %vm289_vm5, %v286_v35, 0.0  ;;  %v287_v40 = vsel %vm284_vm4, %v282_v36, %v250_v20  ;;  %v259_v47 = vrot.slane %v227_v9, 4  ;;  %v1419_v10 = vld [vmem:[%s2028_s1 + $0x10] sm:$0xff]  }
  0x1a   : > { %v306_v42 = vrot.slane %v1520_v38, 1  ;;  %v331_v43 = vrot.slane %v1520_v38, 2  ;;  %v1528_v44 = vsel %vm294_vm6, %v291_v39, %v257_v15  ;;  %v292_v45 = vsel %vm289_vm5, %v287_v40, 0.0 }
  0x1b   : > { %v308_v46 = vrot.slane %v1528_v44, 1  ;;  %v278_v48 = vsel %vm274_vm2, %v273_v41, %v243_v29  ;;  %v333_v51 = vrot.slane %v1528_v44, 2  ;;  %v1539_v52 = vsel %vm294_vm6, %v292_v45, %v258_v24 }
  0x1c   : > { %v307_v49 = vsel %vm294_vm6, %v306_v42, %v1496_v1  ;;  %v332_v50 = vsel %vm289_vm5, %v331_v43, %v1501_v8  ;;  %v283_v55 = vsel %vm279_vm3, %v278_v48, 0.0  ;;  %v310_v56 = vrot.slane %v1539_v52, 1 }
  0x1d   : > { %v1332_v53 = vpack.i.bf16 %v307_v49, %v1496_v1  ;;  %v1337_v54 = vpack.i.bf16 %v332_v50, %v1501_v8  ;;  %v288_v57 = vsel %vm284_vm4, %v283_v55, %v251_v33  ;;  %v309_v58 = vsel %vm294_vm6, %v308_v46, %v1496_v1 }
  0x1e   : > { %v334_v59 = vsel %vm289_vm5, %v333_v51, %v1501_v8  ;;  %v335_v60 = vrot.slane %v1539_v52, 2  ;;  %v293_v61 = vsel %vm289_vm5, %v288_v57, 0.0  ;;  %v311_v63 = vsel %vm294_vm6, %v310_v56, %v1496_v1 }
  0x1f   : > { %1333 = vrot.lane.b32.xlu0 %v1332_v53, %s1446_s24  ;;  %1338 = vrot.lane.b32.xlu1 %v1337_v54, %s1447_s25  ;;  %v1555_v62 = vsel %vm294_vm6, %v293_v61, %v259_v47  ;;  %v1448_v5 = vmov 0   ;;  %vm1085_vm1 = vcmask 1046534   ;;  %vm1088_vm2 = vcmask 1047559  }
  0x20   : > { %v336_v0 = vsel %vm289_vm5, %v335_v60, %v1501_v8  ;;  %v312_v2 = vrot.slane %v1555_v62, 1  ;;  %v337_v3 = vrot.slane %v1555_v62, 2  ;;  %515 = vmatprep.subr.bf16.mxu0 %v1448_v5  ;;  %924 = vmatprep.subr.bf16.mxu1 %v1448_v5  ;;  %vm1212_vm3 = vcmask 195584  }
  0x21   : > { %516 = vmatpush1.bf16.msra.mxu0 %v1417_v4  ;;  %vm1215_vm4 = vcmask 326656  }
  0x22   : > { %v313_v7 = vsel %vm294_vm6, %v312_v2, %v1496_v1  ;;  %v338_v9 = vsel %vm289_vm5, %v337_v3, %v1501_v8  ;;  %517 = vmatprep.subr.bf16.mxu0 %v1448_v5  ;;  %v1420_v1 = vld [vmem:[%s2028_s1 + $0x18] sm:$0xff]   ;;  %v1421_v8 = vld [vmem:[%s2028_s1 + $0x20] sm:$0xff]  }
  0x23   : > { %318 = vrot.lane.b32.xlu0 %v309_v58, %s1446_s24  ;;  %343 = vrot.lane.b32.xlu1 %v334_v59, %s1447_s25 }
  0x25   : > { %518 = vmatpush1.bf16.msra.mxu0 %v1418_v6 }
  0x26   : > { %519 = vmatprep.subr.bf16.mxu0 %v1448_v5 }
  0x27   : > { %320 = vrot.lane.b32.xlu0 %v311_v63, %s1446_s24  ;;  %345 = vrot.lane.b32.xlu1 %v336_v0, %s1447_s25 }
  0x29   : > { %520 = vmatpush1.bf16.msra.mxu0 %v1419_v10 }
  0x2a   : > { %521 = vmatprep.subr.bf16.mxu0 %v1448_v5 }
  0x2b   : > { %322 = vrot.lane.b32.xlu0 %v313_v7, %s1446_s24  ;;  %347 = vrot.lane.b32.xlu1 %v338_v9, %s1447_s25 }
  0x2d   : > { %522 = vmatpush1.bf16.msra.mxu0 %v1420_v1 }
  0x2e   : > { %523 = vmatprep.subr.bf16.mxu0 %v1448_v5 }
  0x31   : > { %524 = vmatpush1.bf16.msra.mxu0 %v1421_v8 }
  0x32   : > { %525 = vmatprep.subr.bf16.mxu0 %v1448_v5 }
  0x35   : > { %526 = vmatpush1.bf16.msra.mxu0 %v1422_v11  ;;  %v1674_v11 = vld [vmem:[%s2029_s2] ss:$0 sm:$0xff] }
  0x36   : > { %527 = vmatprep.subr.bf16.mxu0 %v1448_v5 }
  0x39   : > { %528 = vmatpush1.bf16.msra.mxu0 %v1423_v12 }
  0x3a   : > { %529 = vmatprep.subr.bf16.mxu0 %v1448_v5 }
  0x3d   : > { %530 = vmatpush1.bf16.msra.mxu0 %v1424_v13 }
  0x3e   : > { %531 = vmatprep.subr.bf16.mxu0 %v1448_v5 }
  0x41   : > { %532 = vmatpush1.bf16.msra.mxu0 %v1425_v14 }
  0x91   : > { %v1334_v15 = vpop.permute.xlu0 %1333  ;;  %v1339_v16 = vpop.permute.xlu1 %1338 }
  0x92   : > { %v1336_v17 = vunpack.i.h.bf16 %v1334_v15  ;;  %v1335_v18 = vunpack.i.l.bf16 %v1334_v15  ;;  %v1341_v19 = vunpack.i.h.bf16 %v1339_v16  ;;  %v1340_v20 = vunpack.i.l.bf16 %v1339_v16 }
  0x94   : > { %v356_v21 = vsel %vm354_vm7, %v1520_v38, %v1336_v17  ;;  %v355_v22 = vsel %vm354_vm7, 0.0, %v1335_v18 }
  0x95   : > { %v1614_v23 = vsel %vm360_vm8, %v355_v22, %v1340_v20  ;;  %v319_v24 = vpop.permute.xlu0 %318  ;;  %v344_v25 = vpop.permute.xlu1 %343  ;;  %v362_v26 = vsel %vm360_vm8, %v356_v21, %v1341_v19 }
  0x96   : > { %v357_v27 = vsel %vm354_vm7, %v1528_v44, %v319_v24  ;;  %v1342_v28 = vpack.i.bf16 %v1614_v23, %v362_v26 }
  0x97   : > { %v363_v29 = vsel %vm360_vm8, %v357_v27, %v344_v25 }
  0x98   : > { %1343 = vrot.lane.b32.xlu0 %v1342_v28, %s1449_s21  ;;  %v1347_v30 = vpack.i.bf16 %v363_v29, %v1614_v23 }
  0x99   : > { %v321_v31 = vpop.permute.xlu0 %320  ;;  %v346_v32 = vpop.permute.xlu1 %345 }
  0x9a   : > { %1348 = vrot.lane.b32.xlu1 %v1347_v30, %s1450_s22  ;;  %v358_v33 = vsel %vm354_vm7, %v1539_v52, %v321_v31 }
  0x9b   : > { %v364_v34 = vsel %vm360_vm8, %v358_v33, %v346_v32 }
  0x9c   : > { %375 = vrot.lane.b32.xlu0 %v363_v29, %s1449_s21 }
  0x9d   : > { %v323_v35 = vpop.permute.xlu0 %322  ;;  %v348_v36 = vpop.permute.xlu1 %347 }
  0x9e   : > { %390 = vrot.lane.b32.xlu1 %v364_v34, %s1450_s22  ;;  %v359_v37 = vsel %vm354_vm7, %v1555_v62, %v323_v35 }
  0x9f   : > { %v365_v38 = vsel %vm360_vm8, %v359_v37, %v348_v36 }
  0xa0   : > { %377 = vrot.lane.b32.xlu0 %v364_v34, %s1449_s21 }
  0xa2   : > { %392 = vrot.lane.b32.xlu1 %v365_v38, %s1450_s22 }
  0xa4   : > { %379 = vrot.lane.b32.xlu0 %v365_v38, %s1449_s21 }
 0x10a   : > { %v1344_v39 = vpop.permute.xlu0 %1343 }
 0x10b   : > { %v1346_v40 = vunpack.i.h.bf16 %v1344_v39  ;;  %v1345_v41 = vunpack.i.l.bf16 %v1344_v39 }
 0x10c   : > { %v1349_v42 = vpop.permute.xlu1 %1348 }
 0x10d   : > { %v399_v43 = vsel %vm398_vm9, %v1614_v23, %v1345_v41  ;;  %v1351_v44 = vunpack.i.h.bf16 %v1349_v42  ;;  %v1637_v45 = vunpack.i.l.bf16 %v1349_v42  ;;  %v400_v46 = vsel %vm398_vm9, %v362_v26, %v1346_v40 }
 0x10e   : > { %v376_v47 = vpop.permute.xlu0 %375  ;;  %v402_v55 = vsel %vm398_vm9, %v363_v29, %v1346_v40  ;;  %v404_v63 = vsel %vm398_vm9, %v364_v34, %v1346_v40  ;;  %v406_v9 = vsel %vm398_vm9, %v365_v38, %v1346_v40 }
 0x10f   : > { %v417_v48 = vpack.c.bf16 %v1351_v44, %v1637_v45  ;;  %v408_v49 = vsel %vm407_vm10, %v399_v43, %v1637_v45  ;;  %v409_v50 = vsel %vm407_vm10, %v400_v46, %v1351_v44  ;;  %v401_v54 = vsel %vm398_vm9, %v1614_v23, %v376_v47 }
 0x110   : > { %v391_v51 = vpop.permute.xlu1 %390  ;;  %v416_v52 = vpack.c.bf16 %v409_v50, %v408_v49  ;;  %v410_v56 = vsel %vm407_vm10, %v401_v54, %v1637_v45  ;;  %v423_v6 = vpack.c.bf16 %v1637_v45, %v1637_v45  ;;  %v415_v1 = vsel %vm407_vm10, %v406_v9, %v1637_v45 }
 0x111   : > { %v419_v53 = vpack.c.bf16 %v391_v51, %v1637_v45  ;;  %1293 = vmatprep.mubr.msk.bf16.mxu0 %vm354_vm7, %v417_v48  ;;  %v411_v57 = vsel %vm407_vm10, %v402_v55, %v391_v51 }
 0x112   : > { %548 = vmatmul.mubr.bf16.vlgmr.msra.gmra.mrb[0].mxu0 %v416_v52  ;;  %v378_v59 = vpop.permute.xlu0 %377  ;;  %v418_v60 = vpack.c.bf16 %v411_v57, %v410_v56 }
 0x113   : > { %1294 = vmatprep.mubr.msk.bf16.mxu0 %vm354_vm7, %v419_v53  ;;  %v403_v62 = vsel %vm398_vm9, %v1614_v23, %v378_v59 }
 0x114   : > { %v393_v58 = vpop.permute.xlu1 %392  ;;  %v412_v0 = vsel %vm407_vm10, %v403_v62, %v1637_v45 }
 0x115   : > { %v421_v61 = vpack.c.bf16 %v393_v58, %v1637_v45  ;;  %v413_v2 = vsel %vm407_vm10, %v404_v63, %v393_v58 }
 0x116   : > { %v380_v3 = vpop.permute.xlu0 %379  ;;  %v420_v4 = vpack.c.bf16 %v413_v2, %v412_v0 }
 0x117   : > { %v405_v7 = vsel %vm398_vm9, %v1614_v23, %v380_v3 }
 0x118   : > { %v414_v10 = vsel %vm407_vm10, %v405_v7, %v1637_v45 }
 0x119   : > { %v422_v8 = vpack.c.bf16 %v415_v1, %v414_v10 }
 0x11a   : > { %556 = vmatmul.mubr.bf16.gmra.mrb[4].mxu0 %v418_v60 }
 0x11b   : > { %1295 = vmatprep.mubr.msk.bf16.mxu0 %vm354_vm7, %v421_v61 }
 0x122   : > { %564 = vmatmul.mubr.bf16.gmra.mrb[8].mxu0 %v420_v4 }
 0x123   : > { %1296 = vmatprep.mubr.msk.bf16.mxu0 %vm354_vm7, %v423_v6 }
 0x12a   : > { %572 = vmatmul.mubr.bf16.gmra.mrb[12].mxu0 %v422_v8 }
 0x1e5   : > { %v549_v12 = vpop.f32.mrb[0].mxu0 }
 0x1e6   : > { %v550_v13 = vadd.f32 %v1674_v11, %v549_v12  ;;  %v551_v14 = vpop.f32.mrb[1].mxu0 }
 0x1e7   : > { %v552_v15 = vpop.f32.mrb[2].mxu0 }
 0x1e8   : > { %v580_v16 = vmax.f32 %v550_v13, 0.0  ;;  %v553_v17 = vadd.f32 %v1674_v11, %v552_v15  ;;  %v554_v18 = vpop.f32.mrb[3].mxu0 }
 0x1ea   : > { %v596_v19 = vrot.slane %v580_v16, 7  ;;  %v581_v20 = vmax.f32 %v553_v17, 0.0 }
 0x1ec   : > { %v1679_v21 = vsel %vm264_vm0, 0.0, %v596_v19  ;;  %v620_v22 = vsel %vm264_vm0, %v596_v19, 0.0  ;;  %v597_v24 = vrot.slane %v581_v20, 7 }
 0x1ed   : > { %v644_v25 = vrot.slane %v1679_v21, 1  ;;  %v645_v26 = vrot.slane %v620_v22, 1  ;;  %v692_v27 = vrot.slane %v1679_v21, 2  ;;  %v693_v28 = vrot.slane %v620_v22, 2  ;;  %v557_v29 = vpop.f32.mrb[4].mxu0 }
 0x1ee   : > { %v1685_v30 = vsel %vm264_vm0, 0.0, %v597_v24  ;;  %v621_v31 = vsel %vm264_vm0, %v597_v24, 0.0  ;;  %v558_v32 = vadd.f32 %v1674_v11, %v557_v29  ;;  %v559_v33 = vpop.f32.mrb[5].mxu0 }
 0x1ef   : > { %v647_v34 = vrot.slane %v1685_v30, 1  ;;  %v648_v35 = vrot.slane %v621_v31, 1  ;;  %v695_v36 = vrot.slane %v1685_v30, 2  ;;  %v696_v37 = vrot.slane %v621_v31, 2  ;;  %v560_v38 = vpop.f32.mrb[6].mxu0 }
 0x1f0   : > { %v582_v39 = vmax.f32 %v558_v32, 0.0  ;;  %v561_v40 = vadd.f32 %v1674_v11, %v560_v38  ;;  %v562_v41 = vpop.f32.mrb[7].mxu0  ;;  %v646_v42 = vsel %vm294_vm6, %v644_v25, %v645_v26  ;;  %v694_v44 = vsel %vm289_vm5, %v692_v27, %v693_v28 }
 0x1f1   : > { %v649_v43 = vsel %vm294_vm6, %v647_v34, %v648_v35  ;;  %v697_v46 = vsel %vm289_vm5, %v695_v36, %v696_v37 }
 0x1f2   : > { %v598_v47 = vrot.slane %v582_v39, 7  ;;  %v583_v48 = vmax.f32 %v561_v40, 0.0  ;;  %v1352_v49 = vpack.i.bf16 %v649_v43, %v646_v42  ;;  %v1357_v50 = vpack.i.bf16 %v697_v46, %v694_v44 }
 0x1f4   : > { %v1697_v51 = vsel %vm264_vm0, 0.0, %v598_v47  ;;  %v622_v52 = vsel %vm264_vm0, %v598_v47, 0.0  ;;  %v599_v53 = vrot.slane %v583_v48, 7  ;;  %1353 = vrot.lane.b32.xlu1 %v1352_v49, %s1446_s24 }
 0x1f5   : > { %v650_v54 = vrot.slane %v1697_v51, 1  ;;  %v651_v55 = vrot.slane %v622_v52, 1  ;;  %v565_v56 = vpop.f32.mrb[8].mxu0  ;;  %v698_v59 = vrot.slane %v1697_v51, 2  ;;  %v699_v60 = vrot.slane %v622_v52, 2 }
 0x1f6   : > { %v566_v57 = vadd.f32 %v1674_v11, %v565_v56  ;;  %v567_v58 = vpop.f32.mrb[9].mxu0  ;;  %v1705_v61 = vsel %vm264_vm0, 0.0, %v599_v53  ;;  %v623_v63 = vsel %vm264_vm0, %v599_v53, 0.0 }
 0x1f7   : > { %v568_v62 = vpop.f32.mrb[10].mxu0  ;;  %v652_v4 = vsel %vm294_vm6, %v650_v54, %v651_v55  ;;  %v653_v9 = vrot.slane %v1705_v61, 1  ;;  %v654_v10 = vrot.slane %v623_v63, 1  ;;  %v701_v1 = vrot.slane %v1705_v61, 2  ;;  %v1426_v58 = vld [vmem:[%s2030_s3] sm:$0xff]  }
 0x1f8   : > { %v584_v0 = vmax.f32 %v566_v57, 0.0  ;;  %v569_v2 = vadd.f32 %v1674_v11, %v568_v62  ;;  %v570_v3 = vpop.f32.mrb[11].mxu0  ;;  %1358 = vrot.lane.b32.xlu1 %v1357_v50, %s1447_s25  ;;  %672 = vrot.lane.b32.xlu0 %v652_v4, %s1446_s24  ;;  %v702_v8 = vrot.slane %v623_v63, 2  ;;  %v700_v15 = vsel %vm289_vm5, %v698_v59, %v699_v60 }
 0x1f9   : > { %v655_v29 = vsel %vm294_vm6, %v653_v9, %v654_v10  ;;  %925 = vmatpush1.bf16.msra.mxu1 %v1426_v58  ;;  %v1427_v3 = vld [vmem:[%s2030_s3 + $0x8] sm:$0xff]   ;;  %v1429_v9 = vld [vmem:[%s2030_s3 + $0x18] sm:$0xff]   ;;  %v1430_v10 = vld [vmem:[%s2030_s3 + $0x20] sm:$0xff]  }
 0x1fa   : > { %v600_v6 = vrot.slane %v584_v0, 7  ;;  %v585_v7 = vmax.f32 %v569_v2, 0.0  ;;  %v703_v28 = vsel %vm289_vm5, %v701_v1, %v702_v8  ;;  %926 = vmatprep.subr.bf16.mxu1 %v1448_v5  ;;  %v1431_v1 = vld [vmem:[%s2030_s3 + $0x28] sm:$0xff]   ;;  %v1432_v8 = vld [vmem:[%s2030_s3 + $0x30] sm:$0xff]  }
 0x1fc   : > { %v1715_v12 = vsel %vm264_vm0, 0.0, %v600_v6  ;;  %v624_v13 = vsel %vm264_vm0, %v600_v6, 0.0  ;;  %v601_v14 = vrot.slane %v585_v7, 7  ;;  %720 = vrot.lane.b32.xlu0 %v700_v15, %s1447_s25  ;;  %v1428_v7 = vld [vmem:[%s2030_s3 + $0x10] sm:$0xff]   ;;  %v1434_v15 = vld [vmem:[%s2030_s3 + $0x40] sm:$0xff]  }
 0x1fd   : > { %v656_v16 = vrot.slane %v1715_v12, 1  ;;  %v657_v17 = vrot.slane %v624_v13, 1  ;;  %v704_v18 = vrot.slane %v1715_v12, 2  ;;  %v705_v19 = vrot.slane %v624_v13, 2  ;;  %v573_v20 = vpop.f32.mrb[12].mxu0  ;;  %927 = vmatpush1.bf16.msra.mxu1 %v1427_v3  ;;  %v1433_v13 = vld [vmem:[%s2030_s3 + $0x38] sm:$0xff]  }
 0x1fe   : > { %v574_v22 = vadd.f32 %v1674_v11, %v573_v20  ;;  %v575_v24 = vpop.f32.mrb[13].mxu0  ;;  %v1724_v25 = vsel %vm264_vm0, 0.0, %v601_v14  ;;  %v625_v26 = vsel %vm264_vm0, %v601_v14, 0.0  ;;  %928 = vmatprep.subr.bf16.mxu1 %v1448_v5 }
 0x1ff   : > { %v576_v27 = vpop.f32.mrb[14].mxu0  ;;  %v706_v34 = vsel %vm289_vm5, %v704_v18, %v705_v19  ;;  %v658_v35 = vsel %vm294_vm6, %v656_v16, %v657_v17  ;;  %v659_v40 = vrot.slane %v1724_v25, 1  ;;  %v660_v41 = vrot.slane %v625_v26, 1 }
 0x200   : > { %v586_v31 = vmax.f32 %v574_v22, 0.0  ;;  %v577_v32 = vadd.f32 %v1674_v11, %v576_v27  ;;  %v578_v33 = vpop.f32.mrb[15].mxu0  ;;  %v1367_v36 = vpack.i.bf16 %v706_v34, %v703_v28  ;;  %v1362_v37 = vpack.i.bf16 %v658_v35, %v655_v29 }
 0x201   : > { %v707_v42 = vrot.slane %v1724_v25, 2  ;;  %v708_v43 = vrot.slane %v625_v26, 2  ;;  %v661_v56 = vsel %vm294_vm6, %v659_v40, %v660_v41  ;;  %929 = vmatpush1.bf16.msra.mxu1 %v1428_v7 }
 0x202   : > { %v602_v38 = vrot.slane %v586_v31, 7  ;;  %v587_v39 = vmax.f32 %v577_v32, 0.0  ;;  %1368 = vrot.lane.b32.xlu0 %v1367_v36, %s1447_s25  ;;  %1363 = vrot.lane.b32.xlu1 %v1362_v37, %s1446_s24 }
 0x203   : > { %v709_v54 = vsel %vm289_vm5, %v707_v42, %v708_v43  ;;  %930 = vmatprep.subr.bf16.mxu1 %v1448_v5 }
 0x204   : > { %v1737_v11 = vsel %vm264_vm0, 0.0, %v602_v38  ;;  %v626_v44 = vsel %vm264_vm0, %v602_v38, 0.0  ;;  %v603_v46 = vrot.slane %v587_v39, 7 }
 0x205   : > { %v662_v47 = vrot.slane %v1737_v11, 1  ;;  %v663_v48 = vrot.slane %v626_v44, 1  ;;  %v710_v49 = vrot.slane %v1737_v11, 2  ;;  %v711_v50 = vrot.slane %v626_v44, 2  ;;  %931 = vmatpush1.bf16.msra.mxu1 %v1429_v9 }
 0x206   : > { %v1743_v52 = vsel %vm264_vm0, 0.0, %v603_v46  ;;  %v627_v53 = vsel %vm264_vm0, %v603_v46, 0.0  ;;  %932 = vmatprep.subr.bf16.mxu1 %v1448_v5  ;;  %vm1082_vm0 = vcmask 1045509  }
 0x207   : > { %v712_v55 = vsel %vm289_vm5, %v710_v49, %v711_v50  ;;  %v664_v57 = vsel %vm294_vm6, %v662_v47, %v663_v48  ;;  %v665_v62 = vrot.slane %v1743_v52, 1  ;;  %v666_v63 = vrot.slane %v627_v53, 1 }
 0x208   : > { %v1377_v59 = vpack.i.bf16 %v712_v55, %v709_v54  ;;  %v1372_v60 = vpack.i.bf16 %v664_v57, %v661_v56  ;;  %v713_v0 = vrot.slane %v1743_v52, 2  ;;  %v714_v2 = vrot.slane %v627_v53, 2 }
 0x209   : > { %v667_v6 = vsel %vm294_vm6, %v665_v62, %v666_v63  ;;  %933 = vmatpush1.bf16.msra.mxu1 %v1430_v10  ;;  %vm1220_vm6 = vcmask 523264  }
 0x20a   : > { %1378 = vrot.lane.b32.xlu0 %v1377_v59, %s1447_s25  ;;  %1373 = vrot.lane.b32.xlu1 %v1372_v60, %s1446_s24  ;;  %v715_v4 = vsel %vm289_vm5, %v713_v0, %v714_v2  ;;  %vm1218_vm5 = vcmask 457728  }
 0x20b   : > { %934 = vmatprep.subr.bf16.mxu1 %v1448_v5 }
 0x20d   : > { %935 = vmatpush1.bf16.msra.mxu1 %v1431_v1 }
 0x20e   : > { %730 = vrot.lane.b32.xlu0 %v715_v4, %s1447_s25  ;;  %682 = vrot.lane.b32.xlu1 %v667_v6, %s1446_s24 }
 0x20f   : > { %936 = vmatprep.subr.bf16.mxu1 %v1448_v5 }
 0x211   : > { %937 = vmatpush1.bf16.msra.mxu1 %v1432_v8 }
 0x212   : > { %938 = vmatprep.subr.bf16.mxu1 %v1448_v5 }
 0x215   : > { %939 = vmatpush1.bf16.msra.mxu1 %v1433_v13 }
 0x216   : > { %940 = vmatprep.subr.bf16.mxu1 %v1448_v5 }
 0x219   : > { %941 = vmatpush1.bf16.msra.mxu1 %v1434_v15 }
 0x266   : > { %v1354_v14 = vpop.permute.xlu1 %1353 }
 0x267   : > { %v1356_v16 = vunpack.i.h.bf16 %v1354_v14  ;;  %v1355_v17 = vunpack.i.l.bf16 %v1354_v14 }
 0x269   : > { %v741_v24 = vsel %vm354_vm7, %v1685_v30, %v1356_v16  ;;  %v740_v26 = vsel %vm354_vm7, %v1679_v21, %v1355_v17 }
 0x26a   : > { %v1359_v18 = vpop.permute.xlu1 %1358  ;;  %v673_v19 = vpop.permute.xlu0 %672 }
 0x26b   : > { %v1361_v20 = vunpack.i.h.bf16 %v1359_v18  ;;  %v1360_v22 = vunpack.i.l.bf16 %v1359_v18  ;;  %v742_v29 = vsel %vm354_vm7, %v1697_v51, %v673_v19 }
 0x26d   : > { %v748_v5 = vsel %vm360_vm8, %v740_v26, %v1360_v22  ;;  %v1799_v27 = vsel %vm360_vm8, %v741_v24, %v1361_v20 }
 0x26e   : > { %v1382_v28 = vpack.i.bf16 %v1799_v27, %v748_v5  ;;  %v721_v31 = vpop.permute.xlu0 %720 }
 0x26f   : > { %v750_v32 = vsel %vm360_vm8, %v742_v29, %v721_v31 }
 0x270   : > { %1383 = vrot.lane.b32.xlu1 %v1382_v28, %s1449_s21  ;;  %v1387_v30 = vpack.i.bf16 %v750_v32, %v1799_v27 }
 0x272   : > { %1388 = vrot.lane.b32.xlu0 %v1387_v30, %s1450_s22 }
 0x274   : > { %v1369_v21 = vpop.permute.xlu0 %1368  ;;  %v1364_v33 = vpop.permute.xlu1 %1363 }
 0x275   : > { %v1371_v34 = vunpack.i.h.bf16 %v1369_v21  ;;  %v1370_v35 = vunpack.i.l.bf16 %v1369_v21  ;;  %v1366_v36 = vunpack.i.h.bf16 %v1364_v33  ;;  %v1365_v37 = vunpack.i.l.bf16 %v1364_v33 }
 0x277   : > { %v744_v38 = vsel %vm354_vm7, %v1715_v12, %v1366_v36  ;;  %v743_v51 = vsel %vm354_vm7, %v1705_v61, %v1365_v37 }
 0x278   : > { %v1813_v39 = vsel %vm360_vm8, %v743_v51, %v1370_v35  ;;  %v752_v40 = vsel %vm360_vm8, %v744_v38, %v1371_v34 }
 0x279   : > { %v1397_v41 = vpack.i.bf16 %v752_v40, %v1813_v39  ;;  %v1392_v42 = vpack.i.bf16 %v1813_v39, %v750_v32 }
 0x27b   : > { %1398 = vrot.lane.b32.xlu0 %v1397_v41, %s1450_s22  ;;  %1393 = vrot.lane.b32.xlu1 %v1392_v42, %s1449_s21 }
 0x27c   : > { %v1379_v43 = vpop.permute.xlu0 %1378  ;;  %v1374_v44 = vpop.permute.xlu1 %1373 }
 0x27d   : > { %v1381_v46 = vunpack.i.h.bf16 %v1379_v43  ;;  %v1380_v12 = vunpack.i.l.bf16 %v1379_v43  ;;  %v1376_v47 = vunpack.i.h.bf16 %v1374_v44  ;;  %v1375_v48 = vunpack.i.l.bf16 %v1374_v44  ;;  %v1297_v43 = vld [vmem:[%s2031_s4] ss:$0 sm:$0xff] }
 0x27f   : > { %v746_v61 = vsel %vm354_vm7, %v1737_v11, %v1376_v47  ;;  %v745_v49 = vsel %vm354_vm7, %v1724_v25, %v1375_v48 }
 0x280   : > { %v731_v50 = vpop.permute.xlu0 %730  ;;  %v683_v53 = vpop.permute.xlu1 %682  ;;  %v753_v54 = vsel %vm360_vm8, %v745_v49, %v1380_v12  ;;  %v754_v55 = vsel %vm360_vm8, %v746_v61, %v1381_v46 }
 0x281   : > { %v747_v56 = vsel %vm354_vm7, %v1743_v52, %v683_v53  ;;  %v1407_v57 = vpack.i.bf16 %v754_v55, %v753_v54  ;;  %v1402_v58 = vpack.i.bf16 %v753_v54, %v752_v40 }
 0x282   : > { %v755_v59 = vsel %vm360_vm8, %v747_v56, %v731_v50 }
 0x283   : > { %1408 = vrot.lane.b32.xlu0 %v1407_v57, %s1450_s22  ;;  %1403 = vrot.lane.b32.xlu1 %v1402_v58, %s1449_s21  ;;  %v1412_v11 = vpack.i.bf16 %v755_v59, %v754_v55 }
 0x287   : > { %800 = vrot.lane.b32.xlu0 %v755_v59, %s1450_s22  ;;  %1413 = vrot.lane.b32.xlu1 %v1412_v11, %s1449_s21 }
 0x2e2   : > { %v1384_v25 = vpop.permute.xlu1 %1383 }
 0x2e3   : > { %v1386_v60 = vunpack.i.h.bf16 %v1384_v25  ;;  %v1385_v62 = vunpack.i.l.bf16 %v1384_v25 }
 0x2e4   : > { %v1389_v0 = vpop.permute.xlu0 %1388 }
 0x2e5   : > { %v810_v63 = vsel %vm398_vm9, %v748_v5, %v1386_v60  ;;  %v809_v52 = vsel %vm398_vm9, %v1614_v23, %v1385_v62  ;;  %v1391_v2 = vunpack.i.h.bf16 %v1389_v0  ;;  %v1390_v3 = vunpack.i.l.bf16 %v1389_v0 }
 0x2e7   : > { %v826_v4 = vpack.c.bf16 %v1391_v2, %v1390_v3  ;;  %v817_v6 = vsel %vm407_vm10, %v809_v52, %v1390_v3  ;;  %v818_v7 = vsel %vm407_vm10, %v810_v63, %v1391_v2 }
 0x2e8   : > { %v825_v9 = vpack.c.bf16 %v818_v7, %v817_v6 }
 0x2e9   : > { %1307 = vmatprep.mubr.msk.bf16.mxu1 %vm354_vm7, %v826_v4 }
 0x2ea   : > { %957 = vmatmul.mubr.bf16.vlgmr.msra.gmra.mrb[0].mxu1 %v825_v9 }
 0x2ed   : > { %v1399_v10 = vpop.permute.xlu0 %1398  ;;  %v1394_v1 = vpop.permute.xlu1 %1393 }
 0x2ee   : > { %v1401_v8 = vunpack.i.h.bf16 %v1399_v10  ;;  %v1400_v13 = vunpack.i.l.bf16 %v1399_v10  ;;  %v1396_v14 = vunpack.i.h.bf16 %v1394_v1  ;;  %v1395_v15 = vunpack.i.l.bf16 %v1394_v1 }
 0x2f0   : > { %v828_v16 = vpack.c.bf16 %v1401_v8, %v1400_v13  ;;  %v812_v23 = vsel %vm398_vm9, %v750_v32, %v1396_v14  ;;  %v811_v17 = vsel %vm398_vm9, %v1799_v27, %v1395_v15 }
 0x2f1   : > { %v819_v18 = vsel %vm407_vm10, %v811_v17, %v1400_v13  ;;  %v820_v19 = vsel %vm407_vm10, %v812_v23, %v1401_v8 }
 0x2f2   : > { %1308 = vmatprep.mubr.msk.bf16.mxu1 %vm354_vm7, %v828_v16  ;;  %v827_v20 = vpack.c.bf16 %v820_v19, %v819_v18 }
 0x2f4   : > { %965 = vmatmul.mubr.bf16.gmra.mrb[4].mxu1 %v827_v20 }
 0x2f5   : > { %v1409_v22 = vpop.permute.xlu0 %1408  ;;  %v1404_v24 = vpop.permute.xlu1 %1403 }
 0x2f6   : > { %v1411_v26 = vunpack.i.h.bf16 %v1409_v22  ;;  %v1410_v5 = vunpack.i.l.bf16 %v1409_v22  ;;  %v1406_v28 = vunpack.i.h.bf16 %v1404_v24  ;;  %v1405_v29 = vunpack.i.l.bf16 %v1404_v24 }
 0x2f8   : > { %v830_v31 = vpack.c.bf16 %v1411_v26, %v1410_v5  ;;  %v814_v32 = vsel %vm398_vm9, %v752_v40, %v1406_v28  ;;  %v813_v27 = vsel %vm398_vm9, %v1813_v39, %v1405_v29 }
 0x2f9   : > { %v801_v30 = vpop.permute.xlu0 %800  ;;  %v1414_v21 = vpop.permute.xlu1 %1413  ;;  %v821_v33 = vsel %vm407_vm10, %v813_v27, %v1410_v5  ;;  %v822_v34 = vsel %vm407_vm10, %v814_v32, %v1411_v26 }
 0x2fa   : > { %v832_v35 = vpack.c.bf16 %v1637_v45, %v801_v30  ;;  %v1416_v36 = vunpack.i.h.bf16 %v1414_v21  ;;  %v1415_v37 = vunpack.i.l.bf16 %v1414_v21  ;;  %1309 = vmatprep.mubr.msk.bf16.mxu1 %vm354_vm7, %v830_v31  ;;  %v829_v38 = vpack.c.bf16 %v822_v34, %v821_v33 }
 0x2fc   : > { %v816_v51 = vsel %vm398_vm9, %v754_v55, %v1416_v36  ;;  %v815_v40 = vsel %vm398_vm9, %v753_v54, %v1415_v37  ;;  %973 = vmatmul.mubr.bf16.gmra.mrb[8].mxu1 %v829_v38 }
 0x2fd   : > { %1310 = vmatprep.mubr.msk.bf16.mxu1 %vm354_vm7, %v832_v35  ;;  %v823_v39 = vsel %vm407_vm10, %v815_v40, %v801_v30  ;;  %v824_v41 = vsel %vm407_vm10, %v816_v51, %v1637_v45 }
 0x2fe   : > { %v831_v42 = vpack.c.bf16 %v824_v41, %v823_v39 }
 0x304   : > { %981 = vmatmul.mubr.bf16.gmra.mrb[12].mxu1 %v831_v42 }
 0x3bd   : > { %v958_v44 = vpop.f32.mrb[0].mxu1 }
 0x3be   : > { %v959_v46 = vadd.f32 %v1297_v43, %v958_v44  ;;  %v960_v12 = vpop.f32.mrb[1].mxu1 }
 0x3bf   : > { %v961_v47 = vpop.f32.mrb[2].mxu1 }
 0x3c0   : > { %v962_v48 = vadd.f32 %v1297_v43, %v961_v47  ;;  %v963_v61 = vpop.f32.mrb[3].mxu1  ;;  %v990_v49 = vsel %vm989_vm11, %v959_v46, 0.0 }
 0x3c2   : > { %v991_v50 = vsel %vm989_vm11, %v962_v48, 0.0 }
 0x3c3   : > { %v992_v53 = vadd.f32 %v991_v50, %v990_v49 }
 0x3c7   : > { %v966_v54 = vpop.f32.mrb[4].mxu1 }
 0x3c8   : > { %v967_v45 = vadd.f32 %v1297_v43, %v966_v54  ;;  %v968_v55 = vpop.f32.mrb[5].mxu1 }
 0x3c9   : > { %v969_v56 = vpop.f32.mrb[6].mxu1 }
 0x3ca   : > { %v993_v57 = vsel %vm989_vm11, %v967_v45, 0.0  ;;  %v970_v58 = vadd.f32 %v1297_v43, %v969_v56  ;;  %v971_v59 = vpop.f32.mrb[7].mxu1 }
 0x3cb   : > { %v994_v11 = vadd.f32 %v993_v57, %v992_v53 }
 0x3cc   : > { %v995_v25 = vsel %vm989_vm11, %v970_v58, 0.0 }
 0x3cd   : > { %v996_v60 = vadd.f32 %v995_v25, %v994_v11 }
 0x3cf   : > { %v974_v62 = vpop.f32.mrb[8].mxu1 }
 0x3d0   : > { %v975_v63 = vadd.f32 %v1297_v43, %v974_v62  ;;  %v976_v52 = vpop.f32.mrb[9].mxu1 }
 0x3d1   : > { %v977_v0 = vpop.f32.mrb[10].mxu1 }
 0x3d2   : > { %v997_v2 = vsel %vm989_vm11, %v975_v63, 0.0  ;;  %v978_v3 = vadd.f32 %v1297_v43, %v977_v0  ;;  %v979_v4 = vpop.f32.mrb[11].mxu1 }
 0x3d3   : > { %v998_v6 = vadd.f32 %v997_v2, %v996_v60 }
 0x3d4   : > { %v999_v7 = vsel %vm989_vm11, %v978_v3, 0.0 }
 0x3d5   : > { %v1000_v9 = vadd.f32 %v999_v7, %v998_v6 }
 0x3d7   : > { %v982_v10 = vpop.f32.mrb[12].mxu1 }
 0x3d8   : > { %v983_v1 = vadd.f32 %v1297_v43, %v982_v10  ;;  %v984_v8 = vpop.f32.mrb[13].mxu1 }
 0x3d9   : > { %v985_v13 = vpop.f32.mrb[14].mxu1 }
 0x3da   : > { %v1001_v14 = vsel %vm989_vm11, %v983_v1, 0.0  ;;  %v986_v15 = vadd.f32 %v1297_v43, %v985_v13  ;;  %v987_v16 = vpop.f32.mrb[15].mxu1 }
 0x3db   : > { %v1002_v23 = vadd.f32 %v1001_v14, %v1000_v9 }
 0x3dc   : > { %v1003_v17 = vsel %vm989_vm11, %v986_v15, 0.0 }
 0x3dd   : > { %v1004_v18 = vadd.f32 %v1003_v17, %v1002_v23 }
 0x3df   : > { %v1005_v19 = vrot.slane %v1004_v18, 4 }
 0x3e1   : > { %v1006_v20 = vadd.f32 %v1005_v19, %v1004_v18 }
 0x3e3   : > { %v1007_v22 = vrot.slane %v1006_v20, 2 }
 0x3e5   : > { %v1008_v24 = vadd.f32 %v1007_v22, %v1006_v20 }
 0x3e7   : > { %v1009_v26 = vrot.slane %v1008_v24, 1 }
 0x3e9   : > { %v1010_v5 = vadd.f32 %v1009_v26, %v1008_v24 }
 0x3eb   : > { %v1012_v28 = vmul.f32 0.015625, %v1010_v5 }
 0x3ed   : > { %v1013_v29 = vsub.f32 %v959_v46, %v1012_v28  ;;  %v1014_v31 = vsub.f32 %v962_v48, %v1012_v28  ;;  %v1015_v32 = vsub.f32 %v967_v45, %v1012_v28  ;;  %v1016_v27 = vsub.f32 %v970_v58, %v1012_v28 }
 0x3ee   : > { %v1017_v30 = vsub.f32 %v975_v63, %v1012_v28  ;;  %v1018_v21 = vsub.f32 %v978_v3, %v1012_v28  ;;  %v1019_v33 = vsub.f32 %v983_v1, %v1012_v28  ;;  %v1020_v34 = vsub.f32 %v986_v15, %v1012_v28 }
 0x3ef   : > { %v1021_v35 = vmul.f32 %v1013_v29, %v1013_v29  ;;  %v1022_v36 = vmul.f32 %v1014_v31, %v1014_v31  ;;  %v1023_v37 = vmul.f32 %v1015_v32, %v1015_v32  ;;  %v1024_v38 = vmul.f32 %v1016_v27, %v1016_v27 }
 0x3f0   : > { %v1025_v41 = vmul.f32 %v1017_v30, %v1017_v30  ;;  %v1026_v44 = vmul.f32 %v1018_v21, %v1018_v21  ;;  %v1027_v47 = vmul.f32 %v1019_v33, %v1019_v33  ;;  %v1028_v49 = vmul.f32 %v1020_v34, %v1020_v34 }
 0x3f1   : > { %v1029_v51 = vsel %vm989_vm11, %v1021_v35, 0.0  ;;  %v1030_v40 = vsel %vm989_vm11, %v1022_v36, 0.0  ;;  %v1032_v42 = vsel %vm989_vm11, %v1023_v37, 0.0  ;;  %v1034_v46 = vsel %vm989_vm11, %v1024_v38, 0.0 }
 0x3f2   : > { %v1031_v39 = vadd.f32 %v1030_v40, %v1029_v51  ;;  %v1036_v48 = vsel %vm989_vm11, %v1025_v41, 0.0  ;;  %v1038_v50 = vsel %vm989_vm11, %v1026_v44, 0.0  ;;  %v1040_v54 = vsel %vm989_vm11, %v1027_v47, 0.0 }
 0x3f3   : > { %v1042_v55 = vsel %vm989_vm11, %v1028_v49, 0.0 }
 0x3f4   : > { %v1033_v43 = vadd.f32 %v1032_v42, %v1031_v39 }
 0x3f6   : > { %v1035_v12 = vadd.f32 %v1034_v46, %v1033_v43 }
 0x3f8   : > { %v1037_v61 = vadd.f32 %v1036_v48, %v1035_v12 }
 0x3fa   : > { %v1039_v53 = vadd.f32 %v1038_v50, %v1037_v61 }
 0x3fc   : > { %v1041_v45 = vadd.f32 %v1040_v54, %v1039_v53 }
 0x3fe   : > { %v1043_v56 = vadd.f32 %v1042_v55, %v1041_v45 }
 0x400   : > { %v1044_v57 = vrot.slane %v1043_v56, 4 }
 0x402   : > { %v1045_v58 = vadd.f32 %v1044_v57, %v1043_v56 }
 0x404   : > { %v1046_v59 = vrot.slane %v1045_v58, 2 }
 0x406   : > { %v1047_v11 = vadd.f32 %v1046_v59, %v1045_v58 }
 0x408   : > { %v1048_v25 = vrot.slane %v1047_v11, 1 }
 0x40a   : > { %v1049_v60 = vadd.f32 %v1048_v25, %v1047_v11 }
 0x40c   : > { %v1050_v62 = vmul.f32 0.015625, %v1049_v60 }
 0x40e   : > { %v1051_v63 = vadd.f32 1e-05, %v1050_v62 }
 0x410   : > { %1435 = vrsqrt.f32 %v1051_v63 }
 0x41a   : > { %v1436_v52 = vpop.eup %1435 }
 0x41b   : > { %v1877_v0 = vmul.f32 %v1436_v52, %v1013_v29  ;;  %v1879_v2 = vmul.f32 %v1436_v52, %v1014_v31  ;;  %v1881_v3 = vmul.f32 %v1436_v52, %v1015_v32  ;;  %v1883_v4 = vmul.f32 %v1436_v52, %v1016_v27 }
 0x41c   : > { %v1885_v6 = vmul.f32 %v1436_v52, %v1017_v30  ;;  %v1887_v7 = vmul.f32 %v1436_v52, %v1018_v21  ;;  %v1889_v9 = vmul.f32 %v1436_v52, %v1019_v33  ;;  %v1891_v10 = vmul.f32 %v1436_v52, %v1020_v34 }
 0x41d   : > { %v1108_v1 = vrot.slane %v1877_v0, 2  ;;  %v1109_v8 = vrot.slane %v1879_v2, 1  ;;  %v1091_v13 = vrot.slane %v1877_v0, 1  ;;  %v1112_v14 = vrot.slane %v1883_v4, 7 }
 0x41e   : > { %v1114_v15 = vrot.slane %v1885_v6, 6  ;;  %v1116_v16 = vrot.slane %v1887_v7, 5  ;;  %v1118_v23 = vrot.slane %v1889_v9, 4  ;;  %v1120_v18 = vrot.slane %v1891_v10, 3 }
 0x41f   : > { %v1110_v17 = vsel %vm1070_vm12, %v1109_v8, %v1108_v1  ;;  %v1092_v19 = vsel %vm1070_vm12, %v1879_v2, %v1091_v13  ;;  %v1093_v20 = vrot.slane %v1881_v3, 7  ;;  %v1095_v24 = vrot.slane %v1883_v4, 6 }
 0x420   : > { %v1111_v22 = vsel %vm1073_vm13, %v1881_v3, %v1110_v17  ;;  %v1097_v26 = vrot.slane %v1885_v6, 5  ;;  %v1099_v5 = vrot.slane %v1887_v7, 4  ;;  %v1101_v31 = vrot.slane %v1889_v9, 3 }
 0x421   : > { %v1113_v28 = vsel %vm1076_vm14, %v1112_v14, %v1111_v22  ;;  %v1094_v29 = vsel %vm1073_vm13, %v1093_v20, %v1092_v19  ;;  %v1142_v32 = vrot.slane %v1877_v0, 4  ;;  %v1143_v21 = vrot.slane %v1879_v2, 3 }
 0x422   : > { %v1115_v27 = vsel %vm1079_vm15, %v1114_v15, %v1113_v28  ;;  %v1096_v30 = vsel %vm1076_vm14, %v1095_v24, %v1094_v29  ;;  %v1145_v33 = vrot.slane %v1881_v3, 2  ;;  %v1103_v36 = vrot.slane %v1891_v10, 2 }
 0x423   : > { %v1117_v34 = vsel %vm1082_vm0, %v1116_v16, %v1115_v27  ;;  %v1098_v35 = vsel %vm1079_vm15, %v1097_v26, %v1096_v30  ;;  %v1147_v37 = vrot.slane %v1883_v4, 1  ;;  %v1144_v40 = vsel %vm1070_vm12, %v1143_v21, %v1142_v32 }
 0x424   : > { %v1119_v38 = vsel %vm1085_vm1, %v1118_v23, %v1117_v34  ;;  %v1100_v51 = vsel %vm1082_vm0, %v1099_v5, %v1098_v35  ;;  %v1150_v39 = vrot.slane %v1887_v7, 7  ;;  %v1146_v43 = vsel %vm1073_vm13, %v1145_v33, %v1144_v40 }
 0x425   : > { %v1121_v41 = vsel %vm1088_vm2, %v1120_v18, %v1119_v38  ;;  %v1102_v42 = vsel %vm1085_vm1, %v1101_v31, %v1100_v51  ;;  %v1152_v44 = vrot.slane %v1889_v9, 6  ;;  %v1148_v12 = vsel %vm1076_vm14, %v1147_v37, %v1146_v43 }
 0x426   : > { %1122 = vrot.lane.b32.xlu0 %v1121_v41, %s1446_s24  ;;  %v1104_v46 = vsel %vm1088_vm2, %v1103_v36, %v1102_v42  ;;  %v1125_v47 = vrot.slane %v1877_v0, 3  ;;  %v1126_v48 = vrot.slane %v1879_v2, 2  ;;  %v1149_v61 = vsel %vm1079_vm15, %v1885_v6, %v1148_v12  ;;  %s1452_s24 = smov 24  }
 0x427   : > { %1105 = vrot.lane.b32.xlu1 %v1104_v46, %s1451_s27  ;;  %v1154_v49 = vrot.slane %v1891_v10, 5  ;;  %v1128_v50 = vrot.slane %v1881_v3, 1  ;;  %v1131_v53 = vrot.slane %v1885_v6, 7  ;;  %v1151_v54 = vsel %vm1082_vm0, %v1150_v39, %v1149_v61 }
 0x428   : > { %v1127_v45 = vsel %vm1070_vm12, %v1126_v48, %v1125_v47  ;;  %v1133_v55 = vrot.slane %v1887_v7, 6  ;;  %v1135_v56 = vrot.slane %v1889_v9, 5  ;;  %v1153_v57 = vsel %vm1085_vm1, %v1152_v44, %v1151_v54 }
 0x429   : > { %v1129_v58 = vsel %vm1073_vm13, %v1128_v50, %v1127_v45  ;;  %v1176_v59 = vrot.slane %v1877_v0, 6  ;;  %v1177_v11 = vrot.slane %v1879_v2, 5  ;;  %v1155_v25 = vsel %vm1088_vm2, %v1154_v49, %v1153_v57 }
 0x42a   : > { %v1130_v60 = vsel %vm1076_vm14, %v1883_v4, %v1129_v58  ;;  %v1137_v62 = vrot.slane %v1891_v10, 4  ;;  %v1179_v63 = vrot.slane %v1881_v3, 4  ;;  %1156 = vrot.lane.b32.xlu0 %v1155_v25, %s1447_s25  ;;  %v1181_v8 = vrot.slane %v1883_v4, 3  ;;  %s1453_s25 = smov 40  }
 0x42b   : > { %v1132_v52 = vsel %vm1079_vm15, %v1131_v53, %v1130_v60  ;;  %v1178_v1 = vsel %vm1070_vm12, %v1177_v11, %v1176_v59  ;;  %v1183_v13 = vrot.slane %v1885_v6, 2  ;;  %v1185_v16 = vrot.slane %v1887_v7, 1 }
 0x42c   : > { %v1134_v14 = vsel %vm1082_vm0, %v1133_v55, %v1132_v52  ;;  %v1180_v15 = vsel %vm1073_vm13, %v1179_v63, %v1178_v1  ;;  %v1159_v23 = vrot.slane %v1877_v0, 5  ;;  %v1160_v19 = vrot.slane %v1879_v2, 4 }
 0x42d   : > { %v1136_v17 = vsel %vm1085_vm1, %v1135_v56, %v1134_v14  ;;  %v1182_v18 = vsel %vm1076_vm14, %v1181_v8, %v1180_v15  ;;  %v1162_v20 = vrot.slane %v1881_v3, 3  ;;  %v1188_v26 = vrot.slane %v1891_v10, 7 }
 0x42e   : > { %v1138_v22 = vsel %vm1088_vm2, %v1137_v62, %v1136_v17  ;;  %v1184_v24 = vsel %vm1079_vm15, %v1183_v13, %v1182_v18  ;;  %v1161_v28 = vsel %vm1070_vm12, %v1160_v19, %v1159_v23  ;;  %v1164_v29 = vrot.slane %v1883_v4, 2 }
 0x42f   : > { %1139 = vrot.lane.b32.xlu1 %v1138_v22, %s1452_s24  ;;  %v1186_v5 = vsel %vm1082_vm0, %v1185_v16, %v1184_v24  ;;  %v1166_v31 = vrot.slane %v1885_v6, 1  ;;  %v1163_v27 = vsel %vm1073_vm13, %v1162_v20, %v1161_v28  ;;  %v1193_v30 = vrot.slane %v1877_v0, 7 }
 0x430   : > { %v1187_v32 = vsel %vm1085_vm1, %v1889_v9, %v1186_v5  ;;  %v1194_v21 = vrot.slane %v1879_v2, 6  ;;  %v1165_v34 = vsel %vm1076_vm14, %v1164_v29, %v1163_v27  ;;  %v1169_v35 = vrot.slane %v1889_v9, 7 }
 0x431   : > { %v1189_v33 = vsel %vm1088_vm2, %v1188_v26, %v1187_v32  ;;  %v1196_v36 = vrot.slane %v1881_v3, 5  ;;  %v1167_v37 = vsel %vm1079_vm15, %v1166_v31, %v1165_v34  ;;  %v1171_v38 = vrot.slane %v1891_v10, 6 }
 0x432   : > { %1190 = vrot.lane.b32.xlu0 %v1189_v33, %s1449_s21  ;;  %v1195_v51 = vsel %vm1070_vm12, %v1194_v21, %v1193_v30  ;;  %v1198_v40 = vrot.slane %v1883_v4, 4  ;;  %v1168_v39 = vsel %vm1082_vm0, %v1887_v7, %v1167_v37  ;;  %v1200_v42 = vrot.slane %v1885_v6, 3  ;;  %s1454_s21 = smov 56  }
 0x433   : > { %v1197_v41 = vsel %vm1073_vm13, %v1196_v36, %v1195_v51  ;;  %v1069_v43 = vrot.slane %v1879_v2, 7  ;;  %v1170_v44 = vsel %vm1085_vm1, %v1169_v35, %v1168_v39  ;;  %v1202_v12 = vrot.slane %v1887_v7, 2 }
 0x434   : > { %v1199_v46 = vsel %vm1076_vm14, %v1198_v40, %v1197_v41  ;;  %v1072_v47 = vrot.slane %v1881_v3, 6  ;;  %v1172_v48 = vsel %vm1088_vm2, %v1171_v38, %v1170_v44  ;;  %v1204_v49 = vrot.slane %v1889_v9, 1 }
 0x435   : > { %v1201_v61 = vsel %vm1079_vm15, %v1200_v42, %v1199_v46  ;;  %1173 = vrot.lane.b32.xlu1 %v1172_v48, %s1453_s25  ;;  %v1075_v2 = vrot.slane %v1883_v4, 5  ;;  %v1071_v53 = vsel %vm1070_vm12, %v1069_v43, %v1877_v0  ;;  %v1078_v45 = vrot.slane %v1885_v6, 4 }
 0x436   : > { %v1203_v50 = vsel %vm1082_vm0, %v1202_v12, %v1201_v61  ;;  %v1074_v3 = vsel %vm1073_vm13, %v1072_v47, %v1071_v53  ;;  %v1081_v56 = vrot.slane %v1887_v7, 3  ;;  %v1084_v58 = vrot.slane %v1889_v9, 2 }
 0x437   : > { %v1205_v54 = vsel %vm1085_vm1, %v1204_v49, %v1203_v50  ;;  %v1077_v57 = vsel %vm1076_vm14, %v1075_v2, %v1074_v3  ;;  %v1087_v0 = vrot.slane %v1891_v10, 1 }
 0x438   : > { %v1206_v55 = vsel %vm1088_vm2, %v1891_v10, %v1205_v54  ;;  %v1080_v4 = vsel %vm1079_vm15, %v1078_v45, %v1077_v57 }
 0x439   : > { %1207 = vrot.lane.b32.xlu1 %v1206_v55, %s1454_s21  ;;  %v1083_v6 = vsel %vm1082_vm0, %v1081_v56, %v1080_v4 }
 0x43a   : > { %v1086_v59 = vsel %vm1085_vm1, %v1084_v58, %v1083_v6 }
 0x43b   : > { %v1089_v11 = vsel %vm1088_vm2, %v1087_v0, %v1086_v59 }
 0x498   : > { %v1123_v60 = vpop.permute.xlu0 %1122 }
 0x499   : > { %v1106_v25 = vpop.permute.xlu1 %1105 }
 0x49a   : > { %v1210_v7 = vsel %vm989_vm11, %v1089_v11, %v1106_v25 }
 0x49b   : > { %v1211_v63 = vsel %vm354_vm7, %v1210_v7, %v1123_v60 }
 0x49c   : > { %v1157_v9 = vpop.permute.xlu0 %1156 }
 0x4a1   : > { %v1140_v62 = vpop.permute.xlu1 %1139 }
 0x4a2   : > { %v1213_v52 = vsel %vm1212_vm3, %v1211_v63, %v1140_v62 }
 0x4a3   : > { %v1214_v10 = vsel %vm360_vm8, %v1213_v52, %v1157_v9 }
 0x4a4   : > { %v1191_v8 = vpop.permute.xlu0 %1190 }
 0x4a7   : > { %v1174_v1 = vpop.permute.xlu1 %1173 }
 0x4a8   : > { %v1216_v13 = vsel %vm1215_vm4, %v1214_v10, %v1174_v1 }
 0x4a9   : > { %v1217_v15 = vsel %vm398_vm9, %v1216_v13, %v1191_v8 }
 0x4ab   : > { %v1208_v14 = vpop.permute.xlu1 %1207 }
 0x4ac   : > { %v1219_v16 = vsel %vm1218_vm5, %v1217_v15, %v1208_v14 }
 0x4ad   : > { %1221 = vst.msk [vmem:[%s222_s6] sm:$0xff] %vm1220_vm6, %v1219_v16 }
 0x4ae PF: > { %s15_s18 = sadd.s32 1, %s1443_s18  }
 0x4af   : > { %p12_p4 = scmp.ge.s32.totalorder %s15_s18, 4  }
 0x4b1   :  { %14 = sbr.rel (!%p12_p4) target bundleno = 1 (0x1), region = 70 }

// kernel: convae_forward.4
= control target key start
LH: loop header
LB: loop body
LE: loop exit
PB: predicated region body
PF: predicated region fallthrough
CT: control target
= control target key end

     0   :  { %s3498_s12 = smov 0   ;;  %s5588_s0 = inlined_call_operand.vmem [shape: f32[2,16,16,4], index: 0, kind: input, shape index: {}]   ;;  %s5589_s1 = inlined_call_operand.vmem [shape: bf16[100,8], index: 1, kind: input, shape index: {}]   ;;  %s5590_s2 = inlined_call_operand.vmem [shape: f32[1,8], index: 2, kind: input, shape index: {}]   ;;  %s5591_s3 = inlined_call_operand.vmem [shape: f32[2,8,64], index: 3, kind: output, shape index: {}]  }
   0x1 LB: > { %s2687_s13 = sadd.s32 4294967295, %s3463_s12   ;;  %p2691_p0 = scmp.ge.s32.totalorder %s3463_s12, 1  ;;  %s3463_s12 = sphi %s3498_s12, %s13_s12  }
   0x2   : > { %p137_p1 = scmp.lt.s32.totalorder %s3463_s12, 3 }
   0x4   : > { %p138_p2 = pnand %p2691_p0, %p137_p1 }
   0x5   : > { %p160_p3 = scmp.lt.s32.totalorder (!%p138_p2), %s2687_s13, 1  ;;  %vm234_vm0 = vcmask (!%p138_p2), 1041408   ;;  %vm578_vm1 = vcmask (!%p138_p2), 1045504   ;;  %vm396_vm2 = vcmask (!%p138_p2), 1046528   ;;  %v3465_v0 = vmov (!%p138_p2), 0.0   ;;  %s3466_s18 = smov (!%p138_p2), 8  }
   0x6   : > { %141 = sbr.rel (%p138_p2) target bundleno = 923 (0x39b), region = 32  ;;  %v579_v1 = vrot.slane (!%p138_p2), %v3465_v0, 2  ;;  %v397_v4 = vrot.slane (!%p138_p2), %v3465_v0, 1  ;;  %vm760_vm3 = vcmask (!%p138_p2), 1044480   ;;  %v3517_v6 = vrot.slane (!%p138_p2), %v3465_v0, 3  ;;  %s3467_s19 = smov (!%p138_p2), 4  }
   0x7   : > { %v3522_v16 = vrot.slane (!%p138_p2), %v3465_v0, 4  ;;  %vm942_vm4 = vcmask (!%p138_p2), 1043456   ;;  %s3468_s20 = smov (!%p138_p2), 12   ;;  %s3469_s21 = smov (!%p138_p2), 16   ;;  %vm1124_vm5 = vcmask (!%p138_p2), 31744   ;;  %vm1158_vm6 = vcmask (!%p138_p2), 64512  }
   0x8   : > { %vm1192_vm7 = vcmask (!%p138_p2), 97280   ;;  %vm1226_vm8 = vcmask (!%p138_p2), 130048   ;;  %s3470_s30 = smov (!%p138_p2), 20   ;;  %s3471_s6 = smov (!%p138_p2), 40   ;;  %vm1662_vm9 = vcmask (!%p138_p2), 162816   ;;  %vm1694_vm10 = vcmask (!%p138_p2), 326656  }
   0x9   : > { %s3472_s11 = smov (!%p138_p2), 60   ;;  %vm1727_vm11 = vcmask (!%p138_p2), 490496   ;;  %vm1760_vm12 = vcmask (!%p138_p2), 654336   ;;  %vm1868_vm13 = vcmask (!%p138_p2), 818176   ;;  %vm2473_vm14 = vcmask (!%p138_p2), 1041409  }
   0xa   : > { %vm2476_vm15 = vcmask (!%p138_p2), 1042434  }
   0xd   : > { %s5605_s13 = smov (!%p160_p3, %s2687_s13), 1 }
   0xe   : > { %s2721_s14 = sshll.u32 %s5605_s13, 8 }
   0xf   : > { %s3512_s17 = scalar_lea.vmem %s5588_s0, %s2721_s14  ;;  %s3473_s14 = smov 80  }
  0x10   : > { %v170_v2 = vld [vmem:[%s3512_s17] sm:$0xff]  ;;  %v171_v3 = vld [vmem:[%s3512_s17 + $0x8] sm:$0xff]  ;;  %v172_v5 = vld [vmem:[%s3512_s17 + $0x10] sm:$0xff] }
  0x11   : > { %v235_v7 = vrot.slane %v170_v2, 6  ;;  %v236_v8 = vrot.slane %v171_v3, 6  ;;  %v173_v9 = vld [vmem:[%s3512_s17 + $0x18] sm:$0xff]  ;;  %v174_v10 = vld [vmem:[%s3512_s17 + $0x20] sm:$0xff]  ;;  %v175_v11 = vld [vmem:[%s3512_s17 + $0x28] sm:$0xff]  ;;  %v238_v12 = vrot.slane %v172_v5, 6 }
  0x12   : > { %v239_v13 = vrot.slane %v173_v9, 6  ;;  %v241_v14 = vrot.slane %v174_v10, 6  ;;  %v242_v15 = vrot.slane %v175_v11, 6  ;;  %v176_v49 = vld [vmem:[%s3512_s17 + $0x30] sm:$0xff]  ;;  %v177_v50 = vld [vmem:[%s3512_s17 + $0x38] sm:$0xff]  ;;  %v178_v11 = vld [vmem:[%s3512_s17 + $0x40] sm:$0xff] }
  0x13   : > { %v3525_v17 = vsel %vm234_vm0, %v235_v7, %v236_v8  ;;  %v3528_v18 = vsel %vm234_vm0, 0.0, %v235_v7  ;;  %v3531_v19 = vsel %vm234_vm0, 0.0, %v238_v12  ;;  %v3534_v20 = vsel %vm234_vm0, %v236_v8, 0.0 }
  0x14   : > { %v581_v21 = vrot.slane %v3528_v18, 2  ;;  %v582_v22 = vrot.slane %v3525_v17, 2  ;;  %v399_v23 = vrot.slane %v3528_v18, 1  ;;  %v400_v24 = vrot.slane %v3525_v17, 1 }
  0x15   : > { %v3541_v25 = vsel %vm234_vm0, %v238_v12, %v239_v13  ;;  %v3544_v26 = vsel %vm234_vm0, %v241_v14, %v242_v15  ;;  %v3547_v27 = vsel %vm234_vm0, 0.0, %v241_v14  ;;  %v3550_v28 = vsel %vm234_vm0, %v239_v13, 0.0 }
  0x16   : > { %v583_v29 = vsel %vm578_vm1, %v581_v21, %v582_v22  ;;  %v401_v30 = vsel %vm396_vm2, %v399_v23, %v400_v24  ;;  %v405_v31 = vrot.slane %v3541_v25, 1  ;;  %v407_v32 = vrot.slane %v3550_v28, 1  ;;  %v3608_v21 = vld [vmem:[%s3512_s17 + $0x48] sm:$0xff] }
  0x17   : > { %v2838_v33 = vpack.i.bf16 %v583_v29, %v579_v1  ;;  %v2828_v34 = vpack.i.bf16 %v401_v30, %v397_v4  ;;  %v409_v35 = vrot.slane %v3547_v27, 1  ;;  %v410_v36 = vrot.slane %v3544_v26, 1 }
  0x18   : > { %v408_v37 = vsel %vm396_vm2, %v405_v31, %v407_v32  ;;  %v402_v38 = vrot.slane %v3534_v20, 1  ;;  %v404_v39 = vrot.slane %v3531_v19, 1  ;;  %v763_v40 = vrot.slane %v3528_v18, 3 }
  0x19   : > { %2839 = vrot.lane.b32.xlu1 %v2838_v33, %s3466_s18  ;;  %2829 = vrot.lane.b32.xlu0 %v2828_v34, %s3467_s19  ;;  %v411_v41 = vsel %vm396_vm2, %v409_v35, %v410_v36  ;;  %v764_v42 = vrot.slane %v3525_v17, 3  ;;  %v584_v43 = vrot.slane %v3534_v20, 2  ;;  %v586_v44 = vrot.slane %v3531_v19, 2 }
  0x1a   : > { %v2843_v45 = vpack.i.bf16 %v411_v41, %v408_v37  ;;  %v403_v46 = vsel %vm396_vm2, %v400_v24, %v402_v38  ;;  %v406_v47 = vsel %vm396_vm2, %v404_v39, %v405_v31  ;;  %v587_v48 = vrot.slane %v3541_v25, 2 }
  0x1b   : > { %v2833_v51 = vpack.i.bf16 %v406_v47, %v403_v46  ;;  %v765_v52 = vsel %vm760_vm3, %v763_v40, %v764_v42  ;;  %v585_v53 = vsel %vm578_vm1, %v582_v22, %v584_v43  ;;  %v589_v54 = vrot.slane %v3550_v28, 2 }
  0x1c   : > { %v2853_v55 = vpack.i.bf16 %v765_v52, %v3517_v6  ;;  %v588_v56 = vsel %vm578_vm1, %v586_v44, %v587_v48  ;;  %v591_v57 = vrot.slane %v3547_v27, 2  ;;  %v592_v58 = vrot.slane %v3544_v26, 2 }
  0x1d   : > { %2844 = vrot.lane.b32.xlu1 %v2843_v45, %s3467_s19  ;;  %2834 = vrot.lane.b32.xlu0 %v2833_v51, %s3467_s19  ;;  %v2848_v59 = vpack.i.bf16 %v588_v56, %v585_v53  ;;  %v590_v60 = vsel %vm578_vm1, %v587_v48, %v589_v54  ;;  %v244_v61 = vrot.slane %v176_v49, 6  ;;  %v245_v62 = vrot.slane %v177_v50, 6 }
  0x1e   : > { %v593_v63 = vsel %vm578_vm1, %v591_v57, %v592_v58  ;;  %v3585_v0 = vsel %vm234_vm0, %v242_v15, 0.0  ;;  %v945_v1 = vrot.slane %v3528_v18, 4  ;;  %v946_v2 = vrot.slane %v3525_v17, 4 }
  0x1f   : > { %v2863_v3 = vpack.i.bf16 %v593_v63, %v590_v60  ;;  %v3590_v4 = vsel %vm234_vm0, %v244_v61, %v245_v62  ;;  %v3593_v5 = vsel %vm234_vm0, 0.0, %v244_v61  ;;  %v412_v6 = vrot.slane %v3585_v0, 1 }
  0x20   : > { %v414_v7 = vrot.slane %v3593_v5, 1  ;;  %v415_v8 = vrot.slane %v3590_v4, 1  ;;  %v947_v9 = vsel %vm942_vm4, %v945_v1, %v946_v2  ;;  %v766_v10 = vrot.slane %v3534_v20, 3 }
  0x21   : > { %2854 = vrot.lane.b32.xlu1 %v2853_v55, %s3468_s20  ;;  %2849 = vrot.lane.b32.xlu0 %v2848_v59, %s3466_s18  ;;  %v413_v12 = vsel %vm396_vm2, %v410_v36, %v412_v6  ;;  %v2873_v13 = vpack.i.bf16 %v947_v9, %v3522_v16  ;;  %v768_v14 = vrot.slane %v3531_v19, 3  ;;  %v769_v15 = vrot.slane %v3541_v25, 3 }
  0x22   : > { %v416_v22 = vsel %vm396_vm2, %v414_v7, %v415_v8  ;;  %v767_v23 = vsel %vm760_vm3, %v764_v42, %v766_v10  ;;  %v594_v24 = vrot.slane %v3585_v0, 2  ;;  %v596_v29 = vrot.slane %v3593_v5, 2 }
  0x23   : > { %v2858_v30 = vpack.i.bf16 %v416_v22, %v413_v12  ;;  %v770_v31 = vsel %vm760_vm3, %v768_v14, %v769_v15  ;;  %v597_v32 = vrot.slane %v3590_v4, 2  ;;  %v247_v16 = vrot.slane %v178_v11, 6 }
  0x24   : > { %v2868_v33 = vpack.i.bf16 %v770_v31, %v767_v23  ;;  %v595_v34 = vsel %vm578_vm1, %v592_v58, %v594_v24  ;;  %v248_v35 = vrot.slane %v3608_v21, 6  ;;  %v3619_v36 = vsel %vm234_vm0, %v245_v62, 0.0  ;;  %v181_v24 = vld [vmem:[%s3512_s17 + $0x58] sm:$0xff] }
  0x25   : > { %2864 = vrot.lane.b32.xlu1 %v2863_v3, %s3466_s18  ;;  %2859 = vrot.lane.b32.xlu0 %v2858_v30, %s3467_s19  ;;  %v598_v37 = vsel %vm578_vm1, %v596_v29, %v597_v32  ;;  %v3625_v38 = vsel %vm234_vm0, 0.0, %v247_v16  ;;  %v417_v39 = vrot.slane %v3619_v36, 1  ;;  %v948_v40 = vrot.slane %v3534_v20, 4  ;;  %v182_v29 = vld [vmem:[%s3512_s17 + $0x60] sm:$0xff] }
  0x26   : > { %v2883_v41 = vpack.i.bf16 %v598_v37, %v595_v34  ;;  %v3632_v42 = vsel %vm234_vm0, %v247_v16, %v248_v35  ;;  %v419_v43 = vrot.slane %v3625_v38, 1  ;;  %v950_v44 = vrot.slane %v3531_v19, 4 }
  0x27   : > { %v418_v45 = vsel %vm396_vm2, %v415_v8, %v417_v39  ;;  %v420_v46 = vrot.slane %v3632_v42, 1  ;;  %v949_v47 = vsel %vm942_vm4, %v946_v2, %v948_v40  ;;  %v951_v48 = vrot.slane %v3541_v25, 4 }
  0x28   : > { %v771_v20 = vrot.slane %v3550_v28, 3  ;;  %v773_v49 = vrot.slane %v3547_v27, 3  ;;  %v774_v50 = vrot.slane %v3544_v26, 3  ;;  %v776_v51 = vrot.slane %v3585_v0, 3 }
  0x29   : > { %2874 = vrot.lane.b32.xlu1 %v2873_v13, %s3469_s21  ;;  %2869 = vrot.lane.b32.xlu0 %v2868_v33, %s3468_s20  ;;  %v421_v52 = vsel %vm396_vm2, %v419_v43, %v420_v46  ;;  %v952_v53 = vsel %vm942_vm4, %v950_v44, %v951_v48  ;;  %v778_v54 = vrot.slane %v3593_v5, 3  ;;  %v779_v55 = vrot.slane %v3590_v4, 3  ;;  %v3684_v33 = vld [vmem:[%s3512_s17 + $0x68] sm:$0xff] }
  0x2a   : > { %v2878_v56 = vpack.i.bf16 %v421_v52, %v418_v45  ;;  %v772_v57 = vsel %vm760_vm3, %v769_v15, %v771_v20  ;;  %v775_v58 = vsel %vm760_vm3, %v773_v49, %v774_v50  ;;  %v2893_v59 = vpack.i.bf16 %v952_v53, %v949_v47 }
  0x2b   : > { %v2888_v60 = vpack.i.bf16 %v775_v58, %v772_v57  ;;  %v777_v61 = vsel %vm760_vm3, %v774_v50, %v776_v51  ;;  %v599_v62 = vrot.slane %v3619_v36, 2  ;;  %v780_v63 = vsel %vm760_vm3, %v778_v54, %v779_v55 }
  0x2c   : > { %v601_v1 = vrot.slane %v3625_v38, 2  ;;  %v602_v2 = vrot.slane %v3632_v42, 2  ;;  %v781_v3 = vrot.slane %v3619_v36, 3  ;;  %v783_v7 = vrot.slane %v3625_v38, 3 }
  0x2d   : > { %2884 = vrot.lane.b32.xlu1 %v2883_v41, %s3466_s18  ;;  %2879 = vrot.lane.b32.xlu0 %v2878_v56, %s3467_s19  ;;  %v600_v6 = vsel %vm578_vm1, %v597_v32, %v599_v62  ;;  %v784_v8 = vrot.slane %v3632_v42, 3  ;;  %v953_v9 = vrot.slane %v3550_v28, 4  ;;  %v955_v12 = vrot.slane %v3547_v27, 4  ;;  %v180_v28 = vld [vmem:[%s3512_s17 + $0x50] sm:$0xff] }
  0x2e   : > { %v603_v10 = vsel %vm578_vm1, %v601_v1, %v602_v2  ;;  %v782_v11 = vsel %vm760_vm3, %v779_v55, %v781_v3  ;;  %v956_v13 = vrot.slane %v3544_v26, 4  ;;  %v2903_v14 = vpack.i.bf16 %v780_v63, %v777_v61 }
  0x2f   : > { %v2898_v15 = vpack.i.bf16 %v603_v10, %v600_v6  ;;  %v785_v22 = vsel %vm760_vm3, %v783_v7, %v784_v8  ;;  %v961_v23 = vrot.slane %v3590_v4, 4  ;;  %v954_v30 = vsel %vm942_vm4, %v951_v48, %v953_v9 }
  0x30   : > { %v957_v31 = vsel %vm942_vm4, %v955_v12, %v956_v13  ;;  %v963_v32 = vrot.slane %v3619_v36, 4  ;;  %v965_v16 = vrot.slane %v3625_v38, 4  ;;  %v2913_v34 = vpack.i.bf16 %v785_v22, %v782_v11 }
  0x31   : > { %2894 = vrot.lane.b32.xlu1 %v2893_v59, %s3469_s21  ;;  %2889 = vrot.lane.b32.xlu0 %v2888_v60, %s3468_s20  ;;  %v966_v37 = vrot.slane %v3632_v42, 4  ;;  %v958_v39 = vrot.slane %v3585_v0, 4  ;;  %v960_v40 = vrot.slane %v3593_v5, 4  ;;  %v250_v43 = vrot.slane %v180_v28, 6 }
  0x32   : > { %v964_v41 = vsel %vm942_vm4, %v961_v23, %v963_v32  ;;  %v251_v44 = vrot.slane %v181_v24, 6  ;;  %v253_v36 = vrot.slane %v182_v29, 6  ;;  %v2908_v45 = vpack.i.bf16 %v957_v31, %v954_v30 }
  0x33   : > { %v967_v47 = vsel %vm942_vm4, %v965_v16, %v966_v37  ;;  %v959_v48 = vsel %vm942_vm4, %v956_v13, %v958_v39  ;;  %v254_v20 = vrot.slane %v3684_v33, 6  ;;  %v962_v50 = vsel %vm942_vm4, %v960_v40, %v961_v23 }
  0x34   : > { %v2923_v49 = vpack.i.bf16 %v967_v47, %v964_v41  ;;  %v3699_v0 = vsel %vm234_vm0, %v250_v43, %v251_v44  ;;  %v3702_v51 = vsel %vm234_vm0, 0.0, %v253_v36  ;;  %v352_v53 = vsel %vm234_vm0, %v251_v44, 0.0  ;;  %v186_v44 = vld [vmem:[%s3512_s17 + $0x80] sm:$0xff] }
  0x35   : > { %2904 = vrot.lane.b32.xlu1 %v2903_v14, %s3468_s20  ;;  %2899 = vrot.lane.b32.xlu0 %v2898_v15, %s3466_s18  ;;  %v3709_v52 = vsel %vm234_vm0, %v253_v36, %v254_v20  ;;  %v425_v54 = vrot.slane %v3699_v0, 1  ;;  %v429_v55 = vrot.slane %v3702_v51, 1  ;;  %v427_v56 = vrot.slane %v352_v53, 1 }
  0x36   : > { %v430_v57 = vrot.slane %v3709_v52, 1  ;;  %v3716_v58 = vsel %vm234_vm0, 0.0, %v250_v43  ;;  %v351_v59 = vsel %vm234_vm0, %v248_v35, 0.0  ;;  %v607_v62 = vrot.slane %v3699_v0, 2  ;;  %v185_v43 = vld [vmem:[%s3512_s17 + $0x78] sm:$0xff] }
  0x37   : > { %v422_v60 = vrot.slane %v351_v59, 1  ;;  %v424_v61 = vrot.slane %v3716_v58, 1  ;;  %v609_v63 = vrot.slane %v352_v53, 2  ;;  %v428_v1 = vsel %vm396_vm2, %v425_v54, %v427_v56 }
  0x38   : > { %v431_v3 = vsel %vm396_vm2, %v429_v55, %v430_v57  ;;  %v611_v6 = vrot.slane %v3702_v51, 2  ;;  %v612_v7 = vrot.slane %v3709_v52, 2  ;;  %v2918_v21 = vpack.i.bf16 %v962_v50, %v959_v48 }
  0x39   : > { %2914 = vrot.lane.b32.xlu1 %v2913_v34, %s3468_s20  ;;  %2909 = vrot.lane.b32.xlu0 %v2908_v45, %s3469_s21  ;;  %v423_v35 = vsel %vm396_vm2, %v420_v46, %v422_v60  ;;  %v426_v9 = vsel %vm396_vm2, %v424_v61, %v425_v54  ;;  %v604_v10 = vrot.slane %v351_v59, 2  ;;  %v2933_v11 = vpack.i.bf16 %v431_v3, %v428_v1 }
  0x3a   : > { %v2928_v12 = vpack.i.bf16 %v426_v9, %v423_v35  ;;  %v606_v13 = vrot.slane %v3716_v58, 2  ;;  %v610_v14 = vsel %vm578_vm1, %v607_v62, %v609_v63  ;;  %v613_v15 = vsel %vm578_vm1, %v611_v6, %v612_v7 }
  0x3b   : > { %v789_v22 = vrot.slane %v3699_v0, 3  ;;  %v791_v23 = vrot.slane %v352_v53, 3  ;;  %v605_v46 = vsel %vm578_vm1, %v602_v2, %v604_v10  ;;  %v793_v28 = vrot.slane %v3702_v51, 3  ;;  %v184_v2 = vld [vmem:[%s3512_s17 + $0x70] sm:$0xff] }
  0x3c   : > { %v794_v24 = vrot.slane %v3709_v52, 3  ;;  %v786_v29 = vrot.slane %v351_v59, 3  ;;  %v608_v30 = vsel %vm578_vm1, %v606_v13, %v607_v62  ;;  %v788_v32 = vrot.slane %v3716_v58, 3 }
  0x3d   : > { %2924 = vrot.lane.b32.xlu1 %v2923_v49, %s3469_s21  ;;  %2919 = vrot.lane.b32.xlu0 %v2918_v21, %s3469_s21  ;;  %v792_v31 = vsel %vm760_vm3, %v789_v22, %v791_v23  ;;  %v971_v16 = vrot.slane %v3699_v0, 4  ;;  %v973_v40 = vrot.slane %v352_v53, 4  ;;  %v975_v41 = vrot.slane %v3702_v51, 4  ;;  %v3765_v49 = vld [vmem:[%s3512_s17 + $0x88] sm:$0xff] }
  0x3e   : > { %v795_v34 = vsel %vm760_vm3, %v793_v28, %v794_v24  ;;  %v787_v39 = vsel %vm760_vm3, %v784_v8, %v786_v29  ;;  %v2943_v36 = vpack.i.bf16 %v613_v15, %v610_v14  ;;  %v790_v45 = vsel %vm760_vm3, %v788_v32, %v789_v22 }
  0x3f   : > { %v976_v47 = vrot.slane %v3709_v52, 4  ;;  %v968_v48 = vrot.slane %v351_v59, 4  ;;  %v2938_v50 = vpack.i.bf16 %v608_v30, %v605_v46  ;;  %v2953_v54 = vpack.i.bf16 %v795_v34, %v792_v31 }
  0x40   : > { %v970_v55 = vrot.slane %v3716_v58, 4  ;;  %v256_v56 = vrot.slane %v184_v2, 6  ;;  %v2948_v8 = vpack.i.bf16 %v790_v45, %v787_v39  ;;  %v974_v53 = vsel %vm942_vm4, %v971_v16, %v973_v40 }
  0x41   : > { %2934 = vrot.lane.b32.xlu1 %v2933_v11, %s3467_s19  ;;  %2929 = vrot.lane.b32.xlu0 %v2928_v12, %s3467_s19  ;;  %v257_v60 = vrot.slane %v185_v43, 6  ;;  %v259_v61 = vrot.slane %v186_v44, 6  ;;  %v977_v59 = vsel %vm942_vm4, %v975_v41, %v976_v47  ;;  %v969_v62 = vsel %vm942_vm4, %v966_v37, %v968_v48 }
  0x42   : > { %v260_v63 = vrot.slane %v3765_v49, 6  ;;  %v3779_v1 = vsel %vm234_vm0, 0.0, %v256_v56  ;;  %v972_v3 = vsel %vm942_vm4, %v970_v55, %v971_v16  ;;  %v3805_v13 = vsel %vm234_vm0, %v254_v20, 0.0  ;;  %v189_v55 = vld [vmem:[%s3512_s17 + $0x98] sm:$0xff] }
  0x43   : > { %v3783_v6 = vsel %vm234_vm0, %v256_v56, %v257_v60  ;;  %v3786_v21 = vsel %vm234_vm0, 0.0, %v259_v61  ;;  %v3789_v35 = vsel %vm234_vm0, %v257_v60, 0.0  ;;  %v434_v14 = vrot.slane %v3779_v1, 1  ;;  %v3845_v60 = vld [vmem:[%s3512_s17 + $0xa8] sm:$0xff] }
  0x44   : > { %v3794_v37 = vsel %vm234_vm0, %v259_v61, %v260_v63  ;;  %v435_v9 = vrot.slane %v3783_v6, 1  ;;  %v437_v10 = vrot.slane %v3789_v35, 1  ;;  %v439_v11 = vrot.slane %v3786_v21, 1 }
  0x45   : > { %2944 = vrot.lane.b32.xlu1 %v2943_v36, %s3466_s18  ;;  %2939 = vrot.lane.b32.xlu0 %v2938_v50, %s3466_s18  ;;  %v440_v12 = vrot.slane %v3794_v37, 1  ;;  %v617_v15 = vrot.slane %v3783_v6, 2  ;;  %v432_v22 = vrot.slane %v3805_v13, 1  ;;  %v619_v23 = vrot.slane %v3789_v35, 2 }
  0x46   : > { %v621_v46 = vrot.slane %v3786_v21, 2  ;;  %v2963_v28 = vpack.i.bf16 %v977_v59, %v974_v53  ;;  %v2958_v29 = vpack.i.bf16 %v972_v3, %v969_v62  ;;  %v622_v30 = vrot.slane %v3794_v37, 2  ;;  %v190_v53 = vld [vmem:[%s3512_s17 + $0xa0] sm:$0xff] }
  0x47   : > { %v614_v31 = vrot.slane %v3805_v13, 2  ;;  %v438_v33 = vsel %vm396_vm2, %v435_v9, %v437_v10  ;;  %v441_v20 = vsel %vm396_vm2, %v439_v11, %v440_v12  ;;  %v436_v32 = vsel %vm396_vm2, %v434_v14, %v435_v9 }
  0x48   : > { %v616_v16 = vrot.slane %v3779_v1, 2  ;;  %v433_v2 = vsel %vm396_vm2, %v430_v57, %v432_v22  ;;  %v620_v34 = vsel %vm578_vm1, %v617_v15, %v619_v23  ;;  %v623_v39 = vsel %vm578_vm1, %v621_v46, %v622_v30 }
  0x49   : > { %2954 = vrot.lane.b32.xlu1 %v2953_v54, %s3468_s20  ;;  %2949 = vrot.lane.b32.xlu0 %v2948_v8, %s3468_s20  ;;  %v615_v40 = vsel %vm578_vm1, %v612_v7, %v614_v31  ;;  %v799_v43 = vrot.slane %v3783_v6, 3  ;;  %v801_v44 = vrot.slane %v3789_v35, 3  ;;  %v803_v57 = vrot.slane %v3786_v21, 3  ;;  %v188_v54 = vld [vmem:[%s3512_s17 + $0x90] sm:$0xff] }
  0x4a   : > { %v618_v41 = vsel %vm578_vm1, %v616_v16, %v617_v15  ;;  %v804_v36 = vrot.slane %v3794_v37, 3  ;;  %v796_v45 = vrot.slane %v3805_v13, 3  ;;  %v2973_v48 = vpack.i.bf16 %v441_v20, %v438_v33 }
  0x4b   : > { %v798_v50 = vrot.slane %v3779_v1, 3  ;;  %v2968_v7 = vpack.i.bf16 %v436_v32, %v433_v2  ;;  %v2983_v56 = vpack.i.bf16 %v623_v39, %v620_v34  ;;  %v2978_v8 = vpack.i.bf16 %v618_v41, %v615_v40 }
  0x4c   : > { %v802_v61 = vsel %vm760_vm3, %v799_v43, %v801_v44  ;;  %v981_v59 = vrot.slane %v3783_v6, 4  ;;  %v983_v62 = vrot.slane %v3789_v35, 4  ;;  %v985_v3 = vrot.slane %v3786_v21, 4 }
  0x4d   : > { %2964 = vrot.lane.b32.xlu1 %v2963_v28, %s3469_s21  ;;  %2959 = vrot.lane.b32.xlu0 %v2958_v29, %s3469_s21  ;;  %v805_v9 = vsel %vm760_vm3, %v803_v57, %v804_v36  ;;  %v797_v10 = vsel %vm760_vm3, %v794_v24, %v796_v45  ;;  %v262_v11 = vrot.slane %v188_v54, 6  ;;  %v263_v14 = vrot.slane %v189_v55, 6 }
  0x4e   : > { %v800_v15 = vsel %vm760_vm3, %v798_v50, %v799_v43  ;;  %v986_v22 = vrot.slane %v3794_v37, 4  ;;  %v265_v23 = vrot.slane %v190_v53, 6  ;;  %v266_v46 = vrot.slane %v3845_v60, 6 }
  0x4f   : > { %v978_v35 = vrot.slane %v3805_v13, 4  ;;  %v3864_v28 = vsel %vm234_vm0, %v262_v11, %v263_v14  ;;  %v3867_v24 = vsel %vm234_vm0, %v263_v14, 0.0  ;;  %v3870_v29 = vsel %vm234_vm0, 0.0, %v262_v11 }
  0x50   : > { %v980_v31 = vrot.slane %v3779_v1, 4  ;;  %v3876_v33 = vsel %vm234_vm0, %v265_v23, %v266_v46  ;;  %v3879_v20 = vsel %vm234_vm0, 0.0, %v265_v23  ;;  %v445_v13 = vrot.slane %v3864_v28, 1 }
  0x51   : > { %2974 = vrot.lane.b32.xlu1 %v2973_v48, %s3467_s19  ;;  %2969 = vrot.lane.b32.xlu0 %v2968_v7, %s3467_s19  ;;  %v447_v32 = vrot.slane %v3867_v24, 1  ;;  %v449_v16 = vrot.slane %v3879_v20, 1  ;;  %v450_v2 = vrot.slane %v3876_v33, 1  ;;  %v3888_v34 = vsel %vm234_vm0, %v260_v63, 0.0 }
  0x52   : > { %v442_v39 = vrot.slane %v3888_v34, 1  ;;  %v444_v40 = vrot.slane %v3870_v29, 1  ;;  %v627_v41 = vrot.slane %v3864_v28, 2  ;;  %v629_v43 = vrot.slane %v3867_v24, 2 }
  0x53   : > { %v2993_v44 = vpack.i.bf16 %v805_v9, %v802_v61  ;;  %v2988_v57 = vpack.i.bf16 %v800_v15, %v797_v10  ;;  %v631_v45 = vrot.slane %v3879_v20, 2  ;;  %v632_v49 = vrot.slane %v3876_v33, 2  ;;  %v192_v10 = vld [vmem:[%s3512_s17 + $0xb0] sm:$0xff] }
  0x54   : > { %v984_v63 = vsel %vm942_vm4, %v981_v59, %v983_v62  ;;  %v987_v48 = vsel %vm942_vm4, %v985_v3, %v986_v22  ;;  %v979_v50 = vsel %vm942_vm4, %v976_v47, %v978_v35  ;;  %v982_v54 = vsel %vm942_vm4, %v980_v31, %v981_v59  ;;  %v193_v35 = vld [vmem:[%s3512_s17 + $0xb8] sm:$0xff]  ;;  %v194_v31 = vld [vmem:[%s3512_s17 + $0xc0] sm:$0xff] }
  0x55   : > { %2984 = vrot.lane.b32.xlu1 %v2983_v56, %s3466_s18  ;;  %2979 = vrot.lane.b32.xlu0 %v2978_v8, %s3466_s18  ;;  %v448_v55 = vsel %vm396_vm2, %v445_v13, %v447_v32  ;;  %v451_v7 = vsel %vm396_vm2, %v449_v16, %v450_v2  ;;  %v443_v56 = vsel %vm396_vm2, %v440_v12, %v442_v39  ;;  %v624_v61 = vrot.slane %v3888_v34, 2 }
  0x56   : > { %v446_v8 = vsel %vm396_vm2, %v444_v40, %v445_v13  ;;  %v630_v53 = vsel %vm578_vm1, %v627_v41, %v629_v43  ;;  %v633_v47 = vsel %vm578_vm1, %v631_v45, %v632_v49  ;;  %v626_v59 = vrot.slane %v3870_v29, 2  ;;  %v3935_v40 = vld [vmem:[%s3512_s17 + $0xc8] sm:$0xff] }
  0x57   : > { %v3003_v12 = vpack.i.bf16 %v987_v48, %v984_v63  ;;  %v2998_v62 = vpack.i.bf16 %v982_v54, %v979_v50  ;;  %v3013_v3 = vpack.i.bf16 %v451_v7, %v448_v55  ;;  %v3008_v9 = vpack.i.bf16 %v446_v8, %v443_v56 }
  0x58   : > { %v3023_v11 = vpack.i.bf16 %v633_v47, %v630_v53  ;;  %v809_v14 = vrot.slane %v3864_v28, 3  ;;  %v811_v15 = vrot.slane %v3867_v24, 3  ;;  %v813_v23 = vrot.slane %v3879_v20, 3 }
  0x59   : > { %2994 = vrot.lane.b32.xlu1 %v2993_v44, %s3468_s20  ;;  %2989 = vrot.lane.b32.xlu0 %v2988_v57, %s3468_s20  ;;  %v625_v13 = vsel %vm578_vm1, %v622_v30, %v624_v61  ;;  %v628_v32 = vsel %vm578_vm1, %v626_v59, %v627_v41  ;;  %v814_v16 = vrot.slane %v3876_v33, 3  ;;  %v806_v39 = vrot.slane %v3888_v34, 3 }
  0x5a   : > { %v808_v43 = vrot.slane %v3870_v29, 3  ;;  %v991_v44 = vrot.slane %v3864_v28, 4  ;;  %v993_v57 = vrot.slane %v3867_v24, 4  ;;  %v268_v45 = vrot.slane %v192_v10, 6 }
  0x5b   : > { %v995_v30 = vrot.slane %v3879_v20, 4  ;;  %v996_v41 = vrot.slane %v3876_v33, 4  ;;  %v269_v63 = vrot.slane %v193_v35, 6  ;;  %v271_v48 = vrot.slane %v194_v31, 6 }
  0x5c   : > { %v3018_v50 = vpack.i.bf16 %v628_v32, %v625_v13  ;;  %v988_v54 = vrot.slane %v3888_v34, 4  ;;  %v990_v55 = vrot.slane %v3870_v29, 4  ;;  %v272_v7 = vrot.slane %v3935_v40, 6 }
  0x5d   : > { %3004 = vrot.lane.b32.xlu1 %v3003_v12, %s3469_s21  ;;  %2999 = vrot.lane.b32.xlu0 %v2998_v62, %s3469_s21  ;;  %v812_v56 = vsel %vm760_vm3, %v809_v14, %v811_v15  ;;  %v815_v24 = vsel %vm760_vm3, %v813_v23, %v814_v16  ;;  %v3952_v8 = vsel %vm234_vm0, %v268_v45, %v269_v63  ;;  %v3955_v53 = vsel %vm234_vm0, %v269_v63, 0.0 }
  0x5e   : > { %v807_v34 = vsel %vm760_vm3, %v804_v36, %v806_v39  ;;  %v3965_v47 = vsel %vm234_vm0, %v271_v48, %v272_v7  ;;  %v3968_v61 = vsel %vm234_vm0, 0.0, %v271_v48  ;;  %v3971_v59 = vsel %vm234_vm0, 0.0, %v268_v45 }
  0x5f   : > { %v810_v12 = vsel %vm760_vm3, %v808_v43, %v809_v14  ;;  %v994_v62 = vsel %vm942_vm4, %v991_v44, %v993_v57  ;;  %v3981_v36 = vsel %vm234_vm0, %v266_v46, 0.0  ;;  %v992_v10 = vsel %vm942_vm4, %v990_v55, %v991_v44 }
  0x60   : > { %v455_v15 = vrot.slane %v3952_v8, 1  ;;  %v457_v14 = vrot.slane %v3955_v53, 1  ;;  %v459_v23 = vrot.slane %v3968_v61, 1  ;;  %v460_v35 = vrot.slane %v3965_v47, 1 }
  0x61   : > { %3014 = vrot.lane.b32.xlu1 %v3013_v3, %s3467_s19  ;;  %3009 = vrot.lane.b32.xlu0 %v3008_v9, %s3467_s19  ;;  %v997_v3 = vsel %vm942_vm4, %v995_v30, %v996_v41  ;;  %v989_v9 = vsel %vm942_vm4, %v986_v22, %v988_v54  ;;  %v454_v31 = vrot.slane %v3971_v59, 1  ;;  %v3033_v60 = vpack.i.bf16 %v815_v24, %v812_v56  ;;  %v196_v56 = vld [vmem:[%s3512_s17 + $0xd0] sm:$0xff] }
  0x62   : > { %v3028_v46 = vpack.i.bf16 %v810_v12, %v807_v34  ;;  %v452_v22 = vrot.slane %v3981_v36, 1  ;;  %v3043_v13 = vpack.i.bf16 %v997_v3, %v994_v62  ;;  %v3038_v32 = vpack.i.bf16 %v992_v10, %v989_v9  ;;  %v197_v3 = vld [vmem:[%s3512_s17 + $0xd8] sm:$0xff]  ;;  %v198_v9 = vld [vmem:[%s3512_s17 + $0xe0] sm:$0xff]  ;;  %v4020_v10 = vld [vmem:[%s3512_s17 + $0xe8] sm:$0xff] }
  0x63   : > { %v458_v39 = vsel %vm396_vm2, %v455_v15, %v457_v14  ;;  %v637_v43 = vrot.slane %v3952_v8, 2  ;;  %v639_v44 = vrot.slane %v3955_v53, 2  ;;  %v641_v57 = vrot.slane %v3968_v61, 2 }
  0x64   : > { %v456_v45 = vsel %vm396_vm2, %v454_v31, %v455_v15  ;;  %v642_v30 = vrot.slane %v3965_v47, 2  ;;  %v634_v63 = vrot.slane %v3981_v36, 2  ;;  %v453_v48 = vsel %vm396_vm2, %v450_v2, %v452_v22 }
  0x65   : > { %3024 = vrot.lane.b32.xlu1 %v3023_v11, %s3466_s18  ;;  %3019 = vrot.lane.b32.xlu0 %v3018_v50, %s3466_s18  ;;  %v461_v11 = vsel %vm396_vm2, %v459_v23, %v460_v35  ;;  %v636_v50 = vrot.slane %v3971_v59, 2  ;;  %v819_v54 = vrot.slane %v3952_v8, 3  ;;  %v821_v55 = vrot.slane %v3955_v53, 3 }
  0x66   : > { %v3053_v24 = vpack.i.bf16 %v461_v11, %v458_v39  ;;  %v823_v34 = vrot.slane %v3968_v61, 3  ;;  %v824_v12 = vrot.slane %v3965_v47, 3  ;;  %v816_v62 = vrot.slane %v3981_v36, 3 }
  0x67   : > { %v3048_v15 = vpack.i.bf16 %v456_v45, %v453_v48  ;;  %v640_v2 = vsel %vm578_vm1, %v637_v43, %v639_v44  ;;  %v643_v14 = vsel %vm578_vm1, %v641_v57, %v642_v30  ;;  %v818_v23 = vrot.slane %v3971_v59, 3 }
  0x68   : > { %v635_v31 = vsel %vm578_vm1, %v632_v49, %v634_v63  ;;  %v1001_v22 = vrot.slane %v3952_v8, 4  ;;  %v274_v39 = vrot.slane %v196_v56, 6  ;;  %v275_v44 = vrot.slane %v197_v3, 6 }
  0x69   : > { %3034 = vrot.lane.b32.xlu1 %v3033_v60, %s3468_s20  ;;  %3029 = vrot.lane.b32.xlu0 %v3028_v46, %s3468_s20  ;;  %v638_v60 = vsel %vm578_vm1, %v636_v50, %v637_v43  ;;  %v822_v46 = vsel %vm760_vm3, %v819_v54, %v821_v55  ;;  %v277_v11 = vrot.slane %v198_v9, 6  ;;  %v278_v57 = vrot.slane %v4020_v10, 6 }
  0x6a   : > { %v1003_v49 = vrot.slane %v3955_v53, 4  ;;  %v1005_v43 = vrot.slane %v3968_v61, 4  ;;  %v820_v45 = vsel %vm760_vm3, %v818_v23, %v819_v54  ;;  %v1006_v63 = vrot.slane %v3965_v47, 4 }
  0x6b   : > { %v998_v48 = vrot.slane %v3981_v36, 4  ;;  %v1000_v50 = vrot.slane %v3971_v59, 4  ;;  %v3063_v55 = vpack.i.bf16 %v643_v14, %v640_v2  ;;  %v3058_v56 = vpack.i.bf16 %v638_v60, %v635_v31 }
  0x6c   : > { %v4056_v53 = vsel %vm234_vm0, %v277_v11, %v278_v57  ;;  %v4059_v54 = vsel %vm234_vm0, 0.0, %v277_v11  ;;  %v4062_v36 = vsel %vm234_vm0, %v275_v44, 0.0  ;;  %v4070_v3 = vsel %vm234_vm0, %v272_v7, 0.0 }
  0x6d   : > { %3044 = vrot.lane.b32.xlu1 %v3043_v13, %s3469_s21  ;;  %3039 = vrot.lane.b32.xlu0 %v3038_v32, %s3469_s21  ;;  %v825_v13 = vsel %vm760_vm3, %v823_v34, %v824_v12  ;;  %v817_v32 = vsel %vm760_vm3, %v814_v16, %v816_v62  ;;  %v4051_v16 = vsel %vm234_vm0, %v274_v39, %v275_v44  ;;  %v4065_v62 = vsel %vm234_vm0, 0.0, %v274_v39 }
  0x6e   : > { %v3073_v34 = vpack.i.bf16 %v825_v13, %v822_v46  ;;  %v1004_v9 = vsel %vm942_vm4, %v1001_v22, %v1003_v49  ;;  %v999_v2 = vsel %vm942_vm4, %v996_v41, %v998_v48  ;;  %v1002_v14 = vsel %vm942_vm4, %v1000_v50, %v1001_v22 }
  0x6f   : > { %v465_v40 = vrot.slane %v4051_v16, 1  ;;  %v467_v7 = vrot.slane %v4062_v36, 1  ;;  %v469_v23 = vrot.slane %v4059_v54, 1  ;;  %v470_v31 = vrot.slane %v4056_v53, 1 }
  0x70   : > { %v462_v60 = vrot.slane %v4070_v3, 1  ;;  %v464_v46 = vrot.slane %v4065_v62, 1  ;;  %v647_v41 = vrot.slane %v4051_v16, 2  ;;  %v649_v22 = vrot.slane %v4062_v36, 2 }
  0x71   : > { %3054 = vrot.lane.b32.xlu1 %v3053_v24, %s3467_s19  ;;  %3049 = vrot.lane.b32.xlu0 %v3048_v15, %s3467_s19  ;;  %v3068_v24 = vpack.i.bf16 %v820_v45, %v817_v32  ;;  %v1007_v15 = vsel %vm942_vm4, %v1005_v43, %v1006_v63  ;;  %v651_v39 = vrot.slane %v4059_v54, 2  ;;  %v652_v44 = vrot.slane %v4056_v53, 2 }
  0x72   : > { %v644_v11 = vrot.slane %v4070_v3, 2  ;;  %v646_v13 = vrot.slane %v4065_v62, 2  ;;  %v3083_v32 = vpack.i.bf16 %v1007_v15, %v1004_v9  ;;  %v3078_v49 = vpack.i.bf16 %v1002_v14, %v999_v2 }
  0x73   : > { %v468_v43 = vsel %vm396_vm2, %v465_v40, %v467_v7  ;;  %v471_v45 = vsel %vm396_vm2, %v469_v23, %v470_v31  ;;  %v463_v48 = vsel %vm396_vm2, %v460_v35, %v462_v60  ;;  %v466_v50 = vsel %vm396_vm2, %v464_v46, %v465_v40  ;;  %v200_v40 = vld [vmem:[%s3512_s17 + $0xf0] sm:$0xff]  ;;  %v201_v7 = vld [vmem:[%s3512_s17 + $0xf8] sm:$0xff]  ;;  %s3474_s17 = smov 32  }
  0x74   : > { %v833_v9 = vrot.slane %v4059_v54, 3  ;;  %v645_v15 = vsel %vm578_vm1, %v642_v30, %v644_v11  ;;  %v648_v35 = vsel %vm578_vm1, %v646_v13, %v647_v41  ;;  %v834_v2 = vrot.slane %v4056_v53, 3 }
  0x75   : > { %3064 = vrot.lane.b32.xlu1 %v3063_v55, %s3466_s18  ;;  %3059 = vrot.lane.b32.xlu0 %v3058_v56, %s3466_s18  ;;  %v650_v55 = vsel %vm578_vm1, %v647_v41, %v649_v22  ;;  %v653_v56 = vsel %vm578_vm1, %v651_v39, %v652_v44  ;;  %v826_v14 = vrot.slane %v4070_v3, 3  ;;  %v3093_v23 = vpack.i.bf16 %v471_v45, %v468_v43 }
  0x76   : > { %v3088_v60 = vpack.i.bf16 %v466_v50, %v463_v48  ;;  %v828_v46 = vrot.slane %v4065_v62, 3  ;;  %v3103_v22 = vpack.i.bf16 %v653_v56, %v650_v55  ;;  %v3098_v39 = vpack.i.bf16 %v648_v35, %v645_v15 }
  0x77   : > { %v280_v11 = vrot.slane %v200_v40, 6  ;;  %v281_v41 = vrot.slane %v201_v7, 6  ;;  %v835_v13 = vsel %vm760_vm3, %v833_v9, %v834_v2  ;;  %v1013_v43 = vrot.slane %v4062_v36, 4 }
  0x78   : > { %v1015_v48 = vrot.slane %v4059_v54, 4  ;;  %v1016_v50 = vrot.slane %v4056_v53, 4  ;;  %v1008_v55 = vrot.slane %v4070_v3, 4  ;;  %v1010_v56 = vrot.slane %v4065_v62, 4 }
  0x79   : > { %3074 = vrot.lane.b32.xlu1 %v3073_v34, %s3468_s20  ;;  %3069 = vrot.lane.b32.xlu0 %v3068_v24, %s3468_s20  ;;  %v829_v34 = vrot.slane %v4051_v16, 3  ;;  %v831_v24 = vrot.slane %v4062_v36, 3  ;;  %v361_v36 = vsel %vm234_vm0, %v278_v57, 0.0  ;;  %v4158_v7 = vsel %vm234_vm0, %v281_v41, 0.0 }
  0x7a   : > { %v1017_v15 = vsel %vm942_vm4, %v1015_v48, %v1016_v50  ;;  %v1009_v35 = vsel %vm942_vm4, %v1006_v63, %v1008_v55  ;;  %v472_v40 = vrot.slane %v361_v36, 1 }
  0x7b   : > { %v832_v30 = vsel %vm760_vm3, %v829_v34, %v831_v24  ;;  %v830_v45 = vsel %vm760_vm3, %v828_v46, %v829_v34  ;;  %v4142_v24 = vsel %vm234_vm0, 0.0, %v280_v11 }
  0x7c   : > { %v3113_v9 = vpack.i.bf16 %v835_v13, %v832_v30  ;;  %v474_v57 = vrot.slane %v4142_v24, 1  ;;  %v656_v63 = vrot.slane %v4142_v24, 2  ;;  %v473_v30 = vsel %vm396_vm2, %v470_v31, %v472_v40 }
  0x7d   : > { %3084 = vrot.lane.b32.xlu1 %v3083_v32, %s3469_s21  ;;  %3079 = vrot.lane.b32.xlu0 %v3078_v49, %s3469_s21  ;;  %v827_v32 = vsel %vm760_vm3, %v824_v12, %v826_v14  ;;  %v1011_v49 = vrot.slane %v4051_v16, 4  ;;  %v4139_v12 = vsel %vm234_vm0, %v280_v11, %v281_v41  ;;  %v838_v31 = vrot.slane %v4142_v24, 3 }
  0x7e   : > { %v3108_v34 = vpack.i.bf16 %v830_v45, %v827_v32  ;;  %v475_v10 = vrot.slane %v4139_v12, 1  ;;  %v657_v46 = vrot.slane %v4139_v12, 2  ;;  %v839_v32 = vrot.slane %v4139_v12, 3 }
  0x7f   : > { %v1014_v3 = vsel %vm942_vm4, %v1011_v49, %v1013_v43  ;;  %v1012_v14 = vsel %vm942_vm4, %v1010_v56, %v1011_v49  ;;  %v836_v49 = vrot.slane %v361_v36, 3  ;;  %v659_v56 = vrot.slane %v4158_v7, 2 }
  0x80   : > { %v476_v11 = vsel %vm396_vm2, %v474_v57, %v475_v10  ;;  %v658_v48 = vsel %vm578_vm1, %v656_v63, %v657_v46  ;;  %v841_v57 = vrot.slane %v4158_v7, 3 }
  0x81   : > { %3094 = vrot.lane.b32.xlu1 %v3093_v23, %s3467_s19  ;;  %3089 = vrot.lane.b32.xlu0 %v3088_v60, %s3467_s19  ;;  %v3123_v23 = vpack.i.bf16 %v1017_v15, %v1014_v3  ;;  %v3118_v60 = vpack.i.bf16 %v1012_v14, %v1009_v35  ;;  %v3128_v43 = vpack.i.bf16 %v476_v11, %v473_v30  ;;  %v1021_v35 = vrot.slane %v4139_v12, 4  ;;  %v3448_v11 = vld [vmem:[%s5589_s1] sm:$0xff]  }
  0x82   : > { %v837_v15 = vsel %vm760_vm3, %v834_v2, %v836_v49  ;;  %v1018_v14 = vrot.slane %v361_v36, 4  ;;  %v660_v40 = vsel %vm578_vm1, %v657_v46, %v659_v56  ;;  %v842_v30 = vsel %vm760_vm3, %v839_v32, %v841_v57  ;;  %2745 = vmatprep.subr.bf16.mxu0 %v3448_v11  ;;  %2791 = vmatprep.subr.bf16.mxu1 %v3448_v11 }
  0x83   : > { %v1023_v46 = vrot.slane %v4158_v7, 4  ;;  %2746 = vmatpush3.bf16.msra.mxu0 %v3448_v11  ;;  %2798 = vmatpush3.bf16.msra.mxu1 %v3448_v11 }
  0x85   : > { %3104 = vrot.lane.b32.xlu1 %v3103_v22, %s3466_s18  ;;  %3099 = vrot.lane.b32.xlu0 %v3098_v39, %s3466_s18  ;;  %v654_v22 = vrot.slane %v361_v36, 2  ;;  %v477_v39 = vrot.slane %v4158_v7, 1  ;;  %v1024_v56 = vsel %vm942_vm4, %v1021_v35, %v1023_v46 }
  0x87   : > { %v655_v45 = vsel %vm578_vm1, %v652_v44, %v654_v22  ;;  %v478_v55 = vsel %vm396_vm2, %v475_v10, %v477_v39  ;;  %v840_v44 = vsel %vm760_vm3, %v838_v31, %v839_v32  ;;  %v1020_v10 = vrot.slane %v4142_v24, 4 }
  0x88   : > { %v3133_v3 = vpack.i.bf16 %v658_v48, %v655_v45  ;;  %v3138_v22 = vpack.i.bf16 %v840_v44, %v837_v15  ;;  %v1019_v39 = vsel %vm942_vm4, %v1016_v50, %v1018_v14  ;;  %vm2482_vm1 = vcmask 1044484  }
  0x89   : > { %3114 = vrot.lane.b32.xlu1 %v3113_v9, %s3468_s20  ;;  %3109 = vrot.lane.b32.xlu0 %v3108_v34, %s3468_s20  ;;  %v1022_v36 = vsel %vm942_vm4, %v1020_v10, %v1021_v35  ;;  %vm2485_vm2 = vcmask 1045509   ;;  %vm2488_vm3 = vcmask 1046534   ;;  %vm2491_vm4 = vcmask 1047559  }
  0x8a   : > { %v3143_v32 = vpack.i.bf16 %v1022_v36, %v1019_v39 }
  0x8b   : > { %v4169_v41 = vpop.permute.xlu1 %2839  ;;  %v2830_v13 = vpop.permute.xlu0 %2829 }
  0x8c   : > { %v2832_v2 = vunpack.i.h.bf16 %v2830_v13  ;;  %v2831_v63 = vunpack.i.l.bf16 %v2830_v13  ;;  %v2842_v50 = vunpack.i.h.bf16 %v4169_v41  ;;  %v2841_v45 = vunpack.i.l.bf16 %v4169_v41 }
  0x8d   : > { %3124 = vrot.lane.b32.xlu1 %v3123_v23, %s3469_s21  ;;  %3119 = vrot.lane.b32.xlu0 %v3118_v60, %s3469_s21 }
  0x8e   : > { %v1126_v7 = vsel %vm1124_vm5, %v3528_v18, %v2832_v2  ;;  %v1125_v48 = vsel %vm1124_vm5, 0.0, %v2831_v63 }
  0x8f   : > { %v4181_v9 = vpop.permute.xlu1 %2844  ;;  %v4183_v34 = vpop.permute.xlu0 %2834  ;;  %v1159_v15 = vsel %vm1158_vm6, %v1125_v48, %v2841_v45  ;;  %v1160_v18 = vsel %vm1158_vm6, %v1126_v7, %v2842_v50 }
  0x90   : > { %v2836_v2 = vunpack.i.l.bf16 %v4183_v34 }
  0x91   : > { %543 = vrot.lane.b32.xlu1 %v478_v55, %s3467_s19  ;;  %3129 = vrot.lane.b32.xlu0 %v3128_v43, %s3467_s19  ;;  %v3449_v43 = vld [vmem:[%s5589_s1 + $0x8] sm:$0xff]   ;;  %s3476_s19 = smov 48  }
  0x92   : > { %2747 = vmatprep.subr.bf16.mxu0 %v3449_v43  ;;  %2792 = vmatprep.subr.bf16.mxu1 %v3449_v43 }
  0x93   : > { %v2855_v23 = vpop.permute.xlu1 %2854  ;;  %v4195_v60 = vpop.permute.xlu0 %2849  ;;  %2748 = vmatpush3.bf16.msra.mxu0 %v3449_v43  ;;  %2799 = vmatpush3.bf16.msra.mxu1 %v3449_v43 }
  0x94   : > { %v2857_v31 = vunpack.i.h.bf16 %v2855_v23  ;;  %v2856_v55 = vunpack.i.l.bf16 %v2855_v23  ;;  %v3450_v23 = vld [vmem:[%s5589_s1 + $0x10] sm:$0xff]   ;;  %v2852_v46 = vunpack.i.h.bf16 %v4195_v60  ;;  %v2851_v11 = vunpack.i.l.bf16 %v4195_v60 }
  0x95   : > { %725 = vrot.lane.b32.xlu1 %v660_v40, %s3466_s18  ;;  %3134 = vrot.lane.b32.xlu0 %v3133_v3, %s3466_s18 }
  0x96   : > { %v1193_v10 = vsel %vm1192_vm7, %v1159_v15, %v2856_v55  ;;  %v1194_v40 = vsel %vm1192_vm7, %v1160_v18, %v2857_v31  ;;  %2749 = vmatprep.subr.bf16.mxu0 %v3450_v23  ;;  %2793 = vmatprep.subr.bf16.mxu1 %v3450_v23  ;;  %v3452_v18 = vld [vmem:[%s5589_s1 + $0x20] sm:$0xff]  }
  0x97   : > { %v4206_v49 = vpop.permute.xlu1 %2864  ;;  %v4208_v13 = vpop.permute.xlu0 %2859  ;;  %2750 = vmatpush3.bf16.msra.mxu0 %v3450_v23  ;;  %2800 = vmatpush3.bf16.msra.mxu1 %v3450_v23 }
  0x99   : > { %907 = vrot.lane.b32.xlu1 %v842_v30, %s3468_s20  ;;  %3139 = vrot.lane.b32.xlu0 %v3138_v22, %s3468_s20  ;;  %v2837_v22 = vunpack.i.h.bf16 %v4183_v34  ;;  %v3451_v30 = vld [vmem:[%s5589_s1 + $0x18] sm:$0xff]   ;;  %s3477_s20 = smov 56  }
  0x9a   : > { %2751 = vmatprep.subr.bf16.mxu0 %v3451_v30  ;;  %2794 = vmatprep.subr.bf16.mxu1 %v3451_v30 }
  0x9b   : > { %v2875_v41 = vpop.permute.xlu1 %2874  ;;  %v2870_v3 = vpop.permute.xlu0 %2869  ;;  %v1128_v45 = vsel %vm1124_vm5, %v3531_v19, %v2837_v22  ;;  %v2847_v19 = vunpack.i.h.bf16 %v4181_v9  ;;  %2752 = vmatpush3.bf16.msra.mxu0 %v3451_v30  ;;  %2801 = vmatpush3.bf16.msra.mxu1 %v3451_v30  ;;  %v2862_v22 = vunpack.i.h.bf16 %v4208_v13 }
  0x9c   : > { %v2877_v44 = vunpack.i.h.bf16 %v2875_v41  ;;  %v2876_v14 = vunpack.i.l.bf16 %v2875_v41  ;;  %v2872_v50 = vunpack.i.h.bf16 %v2870_v3  ;;  %v2871_v34 = vunpack.i.l.bf16 %v2870_v3  ;;  %2753 = vmatprep.subr.bf16.mxu0 %v3452_v18  ;;  %2795 = vmatprep.subr.bf16.mxu1 %v3452_v18 }
  0x9d   : > { %1089 = vrot.lane.b32.xlu1 %v1024_v56, %s3469_s21  ;;  %3144 = vrot.lane.b32.xlu0 %v3143_v32, %s3469_s21  ;;  %v1127_v32 = vsel %vm1124_vm5, %v3525_v17, %v2836_v2  ;;  %v1162_v48 = vsel %vm1158_vm6, %v1128_v45, %v2852_v46  ;;  %v2846_v17 = vunpack.i.l.bf16 %v4181_v9  ;;  %v2861_v2 = vunpack.i.l.bf16 %v4208_v13  ;;  %v3453_v13 = vld [vmem:[%s5589_s1 + $0x28] sm:$0xff]  }
  0x9e   : > { %v4228_v35 = vsel %vm1226_vm8, %v1193_v10, %v2876_v14  ;;  %v4231_v57 = vsel %vm1226_vm8, %v1194_v40, %v2877_v44  ;;  %v1161_v60 = vsel %vm1158_vm6, %v1127_v32, %v2851_v11  ;;  %v1196_v41 = vsel %vm1192_vm7, %v1162_v48, %v2872_v50 }
  0x9f   : > { %v4238_v63 = vpop.permute.xlu1 %2884  ;;  %v4240_v39 = vpop.permute.xlu0 %2879  ;;  %v3148_v36 = vpack.i.bf16 %v4231_v57, %v4228_v35  ;;  %v1195_v56 = vsel %vm1192_vm7, %v1161_v60, %v2871_v34  ;;  %v2867_v44 = vunpack.i.h.bf16 %v4206_v49  ;;  %v2866_v14 = vunpack.i.l.bf16 %v4206_v49  ;;  %2754 = vmatpush3.bf16.msra.mxu0 %v3452_v18  ;;  %2802 = vmatpush3.bf16.msra.mxu1 %v3452_v18 }
  0xa0   : > { %v1130_v49 = vsel %vm1124_vm5, %v3547_v27, %v2847_v19  ;;  %v1129_v46 = vsel %vm1124_vm5, %v3541_v25, %v2846_v17  ;;  %v1132_v45 = vsel %vm1124_vm5, %v3593_v5, %v2862_v22  ;;  %v1131_v27 = vsel %vm1124_vm5, %v3544_v26, %v2861_v2  ;;  %2755 = vmatprep.subr.bf16.mxu0 %v3453_v13 }
  0xa1   : > { %3149 = vrot.lane.b32.xlu0 %v3148_v36, %s3470_s30  ;;  %v1163_v30 = vsel %vm1158_vm6, %v1129_v46, %v2866_v14  ;;  %v1164_v11 = vsel %vm1158_vm6, %v1130_v49, %v2867_v44  ;;  %v2886_v25 = vunpack.i.l.bf16 %v4238_v63  ;;  %2796 = vmatprep.subr.bf16.mxu1 %v3453_v13 }
  0xa3   : > { %v2895_v7 = vpop.permute.xlu1 %2894  ;;  %v4254_v43 = vpop.permute.xlu0 %2889  ;;  %2756 = vmatpush3.bf16.msra.mxu0 %v3453_v13  ;;  %2803 = vmatpush3.bf16.msra.mxu1 %v3453_v13  ;;  %v1165_v44 = vsel %vm1158_vm6, %v1131_v27, %v2886_v25 }
  0xa4   : > { %v2897_v31 = vunpack.i.h.bf16 %v2895_v7  ;;  %v2896_v55 = vunpack.i.l.bf16 %v2895_v7  ;;  %v2891_v36 = vunpack.i.l.bf16 %v4254_v43  ;;  %v2881_v7 = vunpack.i.l.bf16 %v4240_v39 }
  0xa5   : > { %v2892_v60 = vunpack.i.h.bf16 %v4254_v43 }
  0xa6   : > { %v4263_v3 = vsel %vm1226_vm8, %v1195_v56, %v2896_v55  ;;  %v4266_v15 = vsel %vm1226_vm8, %v1196_v41, %v2897_v31  ;;  %v1197_v48 = vsel %vm1192_vm7, %v1163_v30, %v2891_v36  ;;  %v2887_v55 = vunpack.i.h.bf16 %v4238_v63  ;;  %v3454_v63 = vld [vmem:[%s5589_s1 + $0x30] ss:$0 sps:$4 sm:$0x33]  }
  0xa7   : > { %v2905_v10 = vpop.permute.xlu1 %2904  ;;  %v4273_v40 = vpop.permute.xlu0 %2899  ;;  %v3153_v9 = vpack.i.bf16 %v4266_v15, %v4263_v3  ;;  %v3158_v23 = vpack.i.bf16 %v4263_v3, %v4231_v57  ;;  %v1198_v22 = vsel %vm1192_vm7, %v1164_v11, %v2892_v60  ;;  %v1918_v36 = vsel %vm234_vm0, %v3454_v63, 0  ;;  %2805 = vmatprep.subr.msk.bf16.mxu0 %vm234_vm0, %v3454_v63  ;;  %2806 = vmatprep.subr.msk.bf16.mxu1 %vm234_vm0, %v3454_v63 }
  0xa8   : > { %v2906_v31 = vunpack.i.l.bf16 %v2905_v10  ;;  %v2901_v56 = vunpack.i.l.bf16 %v4273_v40  ;;  %v2907_v26 = vunpack.i.h.bf16 %v2905_v10  ;;  %v1133_v10 = vsel %vm1124_vm5, %v3590_v4, %v2881_v7  ;;  %2758 = vmatpush3.bf16.msra.mxu0 %v1918_v36  ;;  %2804 = vmatpush3.bf16.msra.mxu1 %v1918_v36 }
  0xa9   : > { %3154 = vrot.lane.b32.xlu1 %v3153_v9, %s3470_s30  ;;  %3159 = vrot.lane.b32.xlu0 %v3158_v23, %s3471_s6  ;;  %v1166_v49 = vsel %vm1158_vm6, %v1132_v45, %v2887_v55  ;;  %v2882_v7 = vunpack.i.h.bf16 %v4240_v39  ;;  %vm2479_vm0 = vcmask 1043459  }
  0xaa   : > { %v1199_v2 = vsel %vm1192_vm7, %v1165_v44, %v2906_v31  ;;  %v1167_v46 = vsel %vm1158_vm6, %v1133_v10, %v2901_v56  ;;  %v1200_v30 = vsel %vm1192_vm7, %v1166_v49, %v2907_v26  ;;  %v2902_v56 = vunpack.i.h.bf16 %v4273_v40 }
  0xab   : > { %v4293_v50 = vpop.permute.xlu1 %2914  ;;  %v2910_v34 = vpop.permute.xlu0 %2909 }
  0xac   : > { %v2911_v32 = vunpack.i.l.bf16 %v2910_v34  ;;  %v2912_v5 = vunpack.i.h.bf16 %v2910_v34  ;;  %v2916_v19 = vunpack.i.l.bf16 %v4293_v50  ;;  %v2917_v40 = vunpack.i.h.bf16 %v4293_v50 }
  0xae   : > { %v4306_v41 = vsel %vm1226_vm8, %v1197_v48, %v2911_v32  ;;  %v4328_v13 = vsel %vm1226_vm8, %v1198_v22, %v2912_v5  ;;  %v1201_v11 = vsel %vm1192_vm7, %v1167_v46, %v2916_v19  ;;  %v1134_v5 = vsel %vm1124_vm5, %v3625_v38, %v2882_v7 }
  0xaf   : > { %v4309_v17 = vpop.permute.xlu1 %2924  ;;  %v2920_v18 = vpop.permute.xlu0 %2919  ;;  %v3163_v43 = vpack.i.bf16 %v4306_v41, %v4266_v15  ;;  %v3188_v55 = vpack.i.bf16 %v4328_v13, %v4306_v41  ;;  %v1168_v63 = vsel %vm1158_vm6, %v1134_v5, %v2902_v56 }
  0xb0   : > { %v2926_v14 = vunpack.i.l.bf16 %v4309_v17  ;;  %v2922_v9 = vunpack.i.h.bf16 %v2920_v18  ;;  %v2921_v23 = vunpack.i.l.bf16 %v2920_v18 }
  0xb1   : > { %3164 = vrot.lane.b32.xlu1 %v3163_v43, %s3471_s6  ;;  %3169 = vrot.lane.b32.xlu0 %v3163_v43, %s3472_s11 }
  0xb2   : > { %v4331_v4 = vsel %vm1226_vm8, %v1199_v2, %v2921_v23  ;;  %v4341_v25 = vsel %vm1226_vm8, %v1201_v11, %v2926_v14  ;;  %v4344_v32 = vsel %vm1226_vm8, %v1200_v30, %v2922_v9  ;;  %v2927_v14 = vunpack.i.h.bf16 %v4309_v17 }
  0xb3   : > { %v4336_v34 = vpop.permute.xlu1 %2934  ;;  %v2930_v27 = vpop.permute.xlu0 %2929  ;;  %v3173_v45 = vpack.i.bf16 %v4331_v4, %v4328_v13  ;;  %v3183_v31 = vpack.i.bf16 %v4341_v25, %v4344_v32  ;;  %v3193_v43 = vpack.i.bf16 %v4344_v32, %v4331_v4 }
  0xb4   : > { %v2936_v39 = vunpack.i.l.bf16 %v4336_v34  ;;  %v2931_v26 = vunpack.i.l.bf16 %v2930_v27  ;;  %v2932_v9 = vunpack.i.h.bf16 %v2930_v27 }
  0xb5   : > { %3174 = vrot.lane.b32.xlu1 %v3173_v45, %s3472_s11  ;;  %3179 = vrot.lane.b32.xlu0 %v3173_v45, %s3473_s14 }
  0xb6   : > { %v1137_v22 = vsel %vm1124_vm5, %v3699_v0, %v2936_v39  ;;  %v1135_v2 = vsel %vm1124_vm5, %v3632_v42, %v2931_v26  ;;  %v1136_v0 = vsel %vm1124_vm5, %v3716_v58, %v2932_v9 }
  0xb7   : > { %v4350_v60 = vpop.permute.xlu1 %2944  ;;  %v2940_v48 = vpop.permute.xlu0 %2939 }
  0xb8   : > { %v2941_v44 = vunpack.i.l.bf16 %v2940_v48  ;;  %v2946_v38 = vunpack.i.l.bf16 %v4350_v60  ;;  %v2942_v10 = vunpack.i.h.bf16 %v2940_v48 }
  0xb9   : > { %3184 = vrot.lane.b32.xlu1 %v3183_v31, %s3473_s14  ;;  %3189 = vrot.lane.b32.xlu0 %v3188_v55, %s3470_s30 }
  0xba   : > { %v1169_v46 = vsel %vm1158_vm6, %v1135_v2, %v2941_v44  ;;  %v1171_v48 = vsel %vm1158_vm6, %v1137_v22, %v2946_v38  ;;  %v1170_v55 = vsel %vm1158_vm6, %v1136_v0, %v2942_v10 }
  0xbb   : > { %v4362_v19 = vpop.permute.xlu1 %2954  ;;  %v2950_v18 = vpop.permute.xlu0 %2949 }
  0xbc   : > { %v2951_v23 = vunpack.i.l.bf16 %v2950_v18  ;;  %v2956_v36 = vunpack.i.l.bf16 %v4362_v19  ;;  %v2952_v50 = vunpack.i.h.bf16 %v2950_v18 }
  0xbd   : > { %3194 = vrot.lane.b32.xlu1 %v3193_v43, %s3470_s30  ;;  %3199 = vrot.lane.b32.xlu0 %v3173_v45, %s3471_s6  ;;  %v1202_v45 = vsel %vm1192_vm7, %v1168_v63, %v2917_v40  ;;  %v2937_v63 = vunpack.i.h.bf16 %v4336_v34 }
  0xbe   : > { %v1203_v7 = vsel %vm1192_vm7, %v1169_v46, %v2951_v23  ;;  %v4388_v42 = vsel %vm1226_vm8, %v1202_v45, %v2927_v14  ;;  %v1205_v5 = vsel %vm1192_vm7, %v1171_v48, %v2956_v36  ;;  %v1204_v58 = vsel %vm1192_vm7, %v1170_v55, %v2952_v50 }
  0xbf   : > { %v4377_v49 = vpop.permute.xlu1 %2964  ;;  %v2960_v17 = vpop.permute.xlu0 %2959  ;;  %v3228_v9 = vpack.i.bf16 %v4388_v42, %v4341_v25  ;;  %v2947_v23 = vunpack.i.h.bf16 %v4350_v60  ;;  %v1138_v38 = vsel %vm1124_vm5, %v3702_v51, %v2937_v63  ;;  %v2957_v60 = vunpack.i.h.bf16 %v4362_v19 }
  0xc0   : > { %v2966_v30 = vunpack.i.l.bf16 %v4377_v49  ;;  %v2962_v11 = vunpack.i.h.bf16 %v2960_v17  ;;  %v2961_v27 = vunpack.i.l.bf16 %v2960_v17  ;;  %v2967_v51 = vunpack.i.h.bf16 %v4377_v49 }
  0xc1   : > { %3204 = vrot.lane.b32.xlu1 %v3183_v31, %s3471_s6  ;;  %3209 = vrot.lane.b32.xlu0 %v3183_v31, %s3472_s11  ;;  %v1172_v50 = vsel %vm1158_vm6, %v1138_v38, %v2947_v23 }
  0xc2   : > { %v4393_v56 = vsel %vm1226_vm8, %v1203_v7, %v2961_v27  ;;  %v4402_v18 = vsel %vm1226_vm8, %v1205_v5, %v2966_v30  ;;  %v4405_v43 = vsel %vm1226_vm8, %v1204_v58, %v2962_v11 }
  0xc3   : > { %v4397_v39 = vpop.permute.xlu1 %2974  ;;  %v2970_v26 = vpop.permute.xlu0 %2969  ;;  %v3213_v31 = vpack.i.bf16 %v4393_v56, %v4388_v42  ;;  %v3223_v14 = vpack.i.bf16 %v4402_v18, %v4405_v43  ;;  %v3233_v36 = vpack.i.bf16 %v4405_v43, %v4393_v56 }
  0xc4   : > { %v2976_v34 = vunpack.i.l.bf16 %v4397_v39  ;;  %v2971_v10 = vunpack.i.l.bf16 %v2970_v26  ;;  %v2972_v46 = vunpack.i.h.bf16 %v2970_v26 }
  0xc5   : > { %3214 = vrot.lane.b32.xlu1 %v3213_v31, %s3472_s11  ;;  %3219 = vrot.lane.b32.xlu0 %v3213_v31, %s3473_s14 }
  0xc6   : > { %v1141_v45 = vsel %vm1124_vm5, %v3783_v6, %v2976_v34  ;;  %v1139_v0 = vsel %vm1124_vm5, %v3709_v52, %v2971_v10  ;;  %v1140_v6 = vsel %vm1124_vm5, %v3779_v1, %v2972_v46 }
  0xc7   : > { %v4410_v44 = vpop.permute.xlu1 %2984  ;;  %v2980_v40 = vpop.permute.xlu0 %2979 }
  0xc8   : > { %v2981_v17 = vunpack.i.l.bf16 %v2980_v40  ;;  %v2986_v11 = vunpack.i.l.bf16 %v4410_v44  ;;  %v2982_v27 = vunpack.i.h.bf16 %v2980_v40 }
  0xc9   : > { %3224 = vrot.lane.b32.xlu1 %v3223_v14, %s3473_s14  ;;  %3229 = vrot.lane.b32.xlu0 %v3228_v9, %s3470_s30 }
  0xca   : > { %v1173_v55 = vsel %vm1158_vm6, %v1139_v0, %v2981_v17  ;;  %v1175_v40 = vsel %vm1158_vm6, %v1141_v45, %v2986_v11  ;;  %v1174_v9 = vsel %vm1158_vm6, %v1140_v6, %v2982_v27 }
  0xcb   : > { %v4422_v22 = vpop.permute.xlu1 %2994  ;;  %v2990_v2 = vpop.permute.xlu0 %2989 }
  0xcc   : > { %v2991_v30 = vunpack.i.l.bf16 %v2990_v2  ;;  %v2996_v7 = vunpack.i.l.bf16 %v4422_v22  ;;  %v2992_v19 = vunpack.i.h.bf16 %v2990_v2 }
  0xcd   : > { %3234 = vrot.lane.b32.xlu1 %v3233_v36, %s3470_s30  ;;  %3239 = vrot.lane.b32.xlu0 %v3213_v31, %s3471_s6  ;;  %v1206_v31 = vsel %vm1192_vm7, %v1172_v50, %v2957_v60  ;;  %v2977_v50 = vunpack.i.h.bf16 %v4397_v39 }
  0xce   : > { %v1207_v63 = vsel %vm1192_vm7, %v1173_v55, %v2991_v30  ;;  %v4448_v52 = vsel %vm1226_vm8, %v1206_v31, %v2967_v51  ;;  %v1209_v38 = vsel %vm1192_vm7, %v1175_v40, %v2996_v7  ;;  %v1208_v1 = vsel %vm1192_vm7, %v1174_v9, %v2992_v19 }
  0xcf   : > { %v4437_v48 = vpop.permute.xlu1 %3004  ;;  %v3000_v49 = vpop.permute.xlu0 %2999  ;;  %v3268_v46 = vpack.i.bf16 %v4448_v52, %v4402_v18  ;;  %v2987_v30 = vunpack.i.h.bf16 %v4410_v44  ;;  %v1142_v11 = vsel %vm1124_vm5, %v3786_v21, %v2977_v50  ;;  %v2997_v44 = vunpack.i.h.bf16 %v4422_v22 }
  0xd0   : > { %v3006_v5 = vunpack.i.l.bf16 %v4437_v48  ;;  %v3002_v58 = vunpack.i.h.bf16 %v3000_v49  ;;  %v3001_v26 = vunpack.i.l.bf16 %v3000_v49  ;;  %v3007_v21 = vunpack.i.h.bf16 %v4437_v48 }
  0xd1   : > { %3244 = vrot.lane.b32.xlu1 %v3223_v14, %s3471_s6  ;;  %3249 = vrot.lane.b32.xlu0 %v3223_v14, %s3472_s11  ;;  %v1176_v19 = vsel %vm1158_vm6, %v1142_v11, %v2987_v30 }
  0xd2   : > { %v4453_v23 = vsel %vm1226_vm8, %v1207_v63, %v3001_v26  ;;  %v4462_v2 = vsel %vm1226_vm8, %v1209_v38, %v3006_v5  ;;  %v4465_v36 = vsel %vm1226_vm8, %v1208_v1, %v3002_v58 }
  0xd3   : > { %v4457_v34 = vpop.permute.xlu1 %3014  ;;  %v3010_v10 = vpop.permute.xlu0 %3009  ;;  %v3253_v14 = vpack.i.bf16 %v4453_v23, %v4448_v52  ;;  %v3263_v51 = vpack.i.bf16 %v4462_v2, %v4465_v36  ;;  %v3273_v7 = vpack.i.bf16 %v4465_v36, %v4453_v23 }
  0xd4   : > { %v3016_v39 = vunpack.i.l.bf16 %v4457_v34  ;;  %v3011_v27 = vunpack.i.l.bf16 %v3010_v10  ;;  %v3012_v55 = vunpack.i.h.bf16 %v3010_v10 }
  0xd5   : > { %3254 = vrot.lane.b32.xlu1 %v3253_v14, %s3472_s11  ;;  %3259 = vrot.lane.b32.xlu0 %v3253_v14, %s3473_s14 }
  0xd6   : > { %v1145_v31 = vsel %vm1124_vm5, %v3864_v28, %v3016_v39  ;;  %v1143_v6 = vsel %vm1124_vm5, %v3794_v37, %v3011_v27  ;;  %v1144_v28 = vsel %vm1124_vm5, %v3870_v29, %v3012_v55 }
  0xd7   : > { %v4470_v17 = vpop.permute.xlu1 %3024  ;;  %v3020_v60 = vpop.permute.xlu0 %3019 }
  0xd8   : > { %v3021_v49 = vunpack.i.l.bf16 %v3020_v60  ;;  %v3026_v58 = vunpack.i.l.bf16 %v4470_v17  ;;  %v3022_v26 = vunpack.i.h.bf16 %v3020_v60 }
  0xd9   : > { %3264 = vrot.lane.b32.xlu1 %v3263_v51, %s3473_s14  ;;  %3269 = vrot.lane.b32.xlu0 %v3268_v46, %s3470_s30 }
  0xda   : > { %v1177_v9 = vsel %vm1158_vm6, %v1143_v6, %v3021_v49  ;;  %v1179_v60 = vsel %vm1158_vm6, %v1145_v31, %v3026_v58  ;;  %v1178_v46 = vsel %vm1158_vm6, %v1144_v28, %v3022_v26 }
  0xdb   : > { %v4482_v45 = vpop.permute.xlu1 %3034  ;;  %v3030_v0 = vpop.permute.xlu0 %3029 }
  0xdc   : > { %v3031_v5 = vunpack.i.l.bf16 %v3030_v0  ;;  %v3036_v63 = vunpack.i.l.bf16 %v4482_v45  ;;  %v3032_v22 = vunpack.i.h.bf16 %v3030_v0 }
  0xdd   : > { %3274 = vrot.lane.b32.xlu1 %v3273_v7, %s3470_s30  ;;  %3279 = vrot.lane.b32.xlu0 %v3253_v14, %s3471_s6  ;;  %v1210_v14 = vsel %vm1192_vm7, %v1176_v19, %v2997_v44  ;;  %v3017_v19 = vunpack.i.h.bf16 %v4457_v34 }
  0xde   : > { %v1211_v50 = vsel %vm1192_vm7, %v1177_v9, %v3031_v5  ;;  %v4508_v37 = vsel %vm1226_vm8, %v1210_v14, %v3007_v21  ;;  %v1213_v11 = vsel %vm1192_vm7, %v1179_v60, %v3036_v63  ;;  %v1212_v29 = vsel %vm1192_vm7, %v1178_v46, %v3032_v22 }
  0xdf   : > { %v4497_v40 = vpop.permute.xlu1 %3044  ;;  %v3040_v48 = vpop.permute.xlu0 %3039  ;;  %v3308_v55 = vpack.i.bf16 %v4508_v37, %v4462_v2  ;;  %v3027_v5 = vunpack.i.h.bf16 %v4470_v17  ;;  %v1146_v58 = vsel %vm1124_vm5, %v3879_v20, %v3017_v19  ;;  %v3037_v17 = vunpack.i.h.bf16 %v4482_v45 }
  0xe0   : > { %v3046_v38 = vunpack.i.l.bf16 %v4497_v40  ;;  %v3042_v1 = vunpack.i.h.bf16 %v3040_v48  ;;  %v3041_v10 = vunpack.i.l.bf16 %v3040_v48  ;;  %v3047_v20 = vunpack.i.h.bf16 %v4497_v40 }
  0xe1   : > { %3284 = vrot.lane.b32.xlu1 %v3263_v51, %s3471_s6  ;;  %3289 = vrot.lane.b32.xlu0 %v3263_v51, %s3472_s11  ;;  %v1180_v22 = vsel %vm1158_vm6, %v1146_v58, %v3027_v5 }
  0xe2   : > { %v4513_v30 = vsel %vm1226_vm8, %v1211_v50, %v3041_v10  ;;  %v4522_v0 = vsel %vm1226_vm8, %v1213_v11, %v3046_v38  ;;  %v4525_v7 = vsel %vm1226_vm8, %v1212_v29, %v3042_v1 }
  0xe3   : > { %v4517_v39 = vpop.permute.xlu1 %3054  ;;  %v3050_v27 = vpop.permute.xlu0 %3049  ;;  %v3293_v51 = vpack.i.bf16 %v4513_v30, %v4508_v37  ;;  %v3303_v21 = vpack.i.bf16 %v4522_v0, %v4525_v7  ;;  %v3313_v63 = vpack.i.bf16 %v4525_v7, %v4513_v30 }
  0xe4   : > { %v3056_v34 = vunpack.i.l.bf16 %v4517_v39  ;;  %v3051_v26 = vunpack.i.l.bf16 %v3050_v27  ;;  %v3052_v9 = vunpack.i.h.bf16 %v3050_v27 }
  0xe5   : > { %3294 = vrot.lane.b32.xlu1 %v3293_v51, %s3472_s11  ;;  %3299 = vrot.lane.b32.xlu0 %v3293_v51, %s3473_s14 }
  0xe6   : > { %v1149_v14 = vsel %vm1124_vm5, %v3952_v8, %v3056_v34  ;;  %v1147_v28 = vsel %vm1124_vm5, %v3876_v33, %v3051_v26  ;;  %v1148_v8 = vsel %vm1124_vm5, %v3971_v59, %v3052_v9 }
  0xe7   : > { %v4530_v49 = vpop.permute.xlu1 %3064  ;;  %v3060_v44 = vpop.permute.xlu0 %3059 }
  0xe8   : > { %v3061_v48 = vunpack.i.l.bf16 %v3060_v44  ;;  %v3066_v1 = vunpack.i.l.bf16 %v4530_v49  ;;  %v3062_v10 = vunpack.i.h.bf16 %v3060_v44 }
  0xe9   : > { %3304 = vrot.lane.b32.xlu1 %v3303_v21, %s3473_s14  ;;  %3309 = vrot.lane.b32.xlu0 %v3308_v55, %s3470_s30 }
  0xea   : > { %v1181_v46 = vsel %vm1158_vm6, %v1147_v28, %v3061_v48  ;;  %v1183_v44 = vsel %vm1158_vm6, %v1149_v14, %v3066_v1  ;;  %v1182_v55 = vsel %vm1158_vm6, %v1148_v8, %v3062_v10 }
  0xeb   : > { %v4542_v31 = vpop.permute.xlu1 %3074  ;;  %v3070_v6 = vpop.permute.xlu0 %3069 }
  0xec   : > { %v3071_v38 = vunpack.i.l.bf16 %v3070_v6  ;;  %v3076_v50 = vunpack.i.l.bf16 %v4542_v31  ;;  %v3072_v45 = vunpack.i.h.bf16 %v3070_v6 }
  0xed   : > { %3314 = vrot.lane.b32.xlu1 %v3313_v63, %s3470_s30  ;;  %3319 = vrot.lane.b32.xlu0 %v3293_v51, %s3471_s6  ;;  %v1214_v51 = vsel %vm1192_vm7, %v1180_v22, %v3037_v17  ;;  %v3057_v22 = vunpack.i.h.bf16 %v4517_v39 }
  0xee   : > { %v1215_v19 = vsel %vm1192_vm7, %v1181_v46, %v3071_v38  ;;  %v4568_v33 = vsel %vm1226_vm8, %v1214_v51, %v3047_v20  ;;  %v1217_v58 = vsel %vm1192_vm7, %v1183_v44, %v3076_v50  ;;  %v1216_v59 = vsel %vm1192_vm7, %v1182_v55, %v3072_v45 }
  0xef   : > { %v4557_v60 = vpop.permute.xlu1 %3084  ;;  %v3080_v40 = vpop.permute.xlu0 %3079  ;;  %v3348_v9 = vpack.i.bf16 %v4568_v33, %v4522_v0  ;;  %v3067_v38 = vunpack.i.h.bf16 %v4530_v49  ;;  %v1150_v1 = vsel %vm1124_vm5, %v3968_v61, %v3057_v22  ;;  %v3077_v49 = vunpack.i.h.bf16 %v4542_v31 }
  0xf0   : > { %v3086_v11 = vunpack.i.l.bf16 %v4557_v60  ;;  %v3082_v29 = vunpack.i.h.bf16 %v3080_v40  ;;  %v3081_v27 = vunpack.i.l.bf16 %v3080_v40  ;;  %v3087_v61 = vunpack.i.h.bf16 %v4557_v60 }
  0xf1   : > { %3324 = vrot.lane.b32.xlu1 %v3303_v21, %s3471_s6  ;;  %3329 = vrot.lane.b32.xlu0 %v3303_v21, %s3472_s11  ;;  %v1184_v45 = vsel %vm1158_vm6, %v1150_v1, %v3067_v38 }
  0xf2   : > { %v4573_v5 = vsel %vm1226_vm8, %v1215_v19, %v3081_v27  ;;  %v4582_v6 = vsel %vm1226_vm8, %v1217_v58, %v3086_v11  ;;  %v4585_v63 = vsel %vm1226_vm8, %v1216_v59, %v3082_v29 }
  0xf3   : > { %v4577_v34 = vpop.permute.xlu1 %3094  ;;  %v3090_v26 = vpop.permute.xlu0 %3089  ;;  %v3333_v21 = vpack.i.bf16 %v4573_v5, %v4568_v33  ;;  %v3343_v20 = vpack.i.bf16 %v4582_v6, %v4585_v63  ;;  %v3353_v50 = vpack.i.bf16 %v4585_v63, %v4573_v5 }
  0xf4   : > { %v3096_v39 = vunpack.i.l.bf16 %v4577_v34  ;;  %v3091_v10 = vunpack.i.l.bf16 %v3090_v26  ;;  %v3092_v46 = vunpack.i.h.bf16 %v3090_v26 }
  0xf5   : > { %3334 = vrot.lane.b32.xlu1 %v3333_v21, %s3472_s11  ;;  %3339 = vrot.lane.b32.xlu0 %v3333_v21, %s3473_s14 }
  0xf6   : > { %v1153_v51 = vsel %vm1124_vm5, %v4051_v16, %v3096_v39  ;;  %v1151_v8 = vsel %vm1124_vm5, %v3965_v47, %v3091_v10  ;;  %v1152_v22 = vsel %vm1124_vm5, %v4065_v62, %v3092_v46  ;;  %v3097_v46 = vunpack.i.h.bf16 %v4577_v34 }
  0xf7   : > { %v4590_v48 = vpop.permute.xlu1 %3104  ;;  %v3100_v17 = vpop.permute.xlu0 %3099 }
  0xf8   : > { %v3101_v40 = vunpack.i.l.bf16 %v3100_v17  ;;  %v3106_v29 = vunpack.i.l.bf16 %v4590_v48  ;;  %v3102_v27 = vunpack.i.h.bf16 %v3100_v17 }
  0xf9   : > { %3344 = vrot.lane.b32.xlu1 %v3343_v20, %s3473_s14  ;;  %3349 = vrot.lane.b32.xlu0 %v3348_v9, %s3470_s30 }
  0xfa   : > { %v1185_v55 = vsel %vm1158_vm6, %v1151_v8, %v3101_v40  ;;  %v1187_v17 = vsel %vm1158_vm6, %v1153_v51, %v3106_v29  ;;  %v1186_v9 = vsel %vm1158_vm6, %v1152_v22, %v3102_v27  ;;  %v3107_v51 = vunpack.i.h.bf16 %v4590_v48 }
  0xfb   : > { %v4602_v14 = vpop.permute.xlu1 %3114  ;;  %v3110_v28 = vpop.permute.xlu0 %3109 }
  0xfc   : > { %v3111_v11 = vunpack.i.l.bf16 %v3110_v28  ;;  %v3116_v19 = vunpack.i.l.bf16 %v4602_v14  ;;  %v3112_v31 = vunpack.i.h.bf16 %v3110_v28 }
  0xfd   : > { %3354 = vrot.lane.b32.xlu1 %v3353_v50, %s3470_s30  ;;  %3359 = vrot.lane.b32.xlu0 %v3333_v21, %s3471_s6  ;;  %v1218_v21 = vsel %vm1192_vm7, %v1184_v45, %v3077_v49 }
  0xfe   : > { %v1219_v16 = vsel %vm1192_vm7, %v1185_v55, %v3111_v11  ;;  %v4625_v47 = vsel %vm1226_vm8, %v1218_v21, %v3087_v61  ;;  %v1221_v1 = vsel %vm1192_vm7, %v1187_v17, %v3116_v19  ;;  %v1220_v62 = vsel %vm1192_vm7, %v1186_v9, %v3112_v31 }
  0xff   : > { %v3125_v44 = vpop.permute.xlu1 %3124  ;;  %v3120_v60 = vpop.permute.xlu0 %3119  ;;  %v3388_v61 = vpack.i.bf16 %v4625_v47, %v4582_v6  ;;  %v1154_v19 = vsel %vm1124_vm5, %v4059_v54, %v3097_v46  ;;  %v3117_v31 = vunpack.i.h.bf16 %v4602_v14 }
 0x100   : > { %v3126_v58 = vunpack.i.l.bf16 %v3125_v44  ;;  %v3122_v59 = vunpack.i.h.bf16 %v3120_v60  ;;  %v3121_v26 = vunpack.i.l.bf16 %v3120_v60  ;;  %v1188_v54 = vsel %vm1158_vm6, %v1154_v19, %v3107_v51 }
 0x101   : > { %3364 = vrot.lane.b32.xlu1 %v3343_v20, %s3471_s6  ;;  %3369 = vrot.lane.b32.xlu0 %v3343_v20, %s3472_s11  ;;  %v1222_v9 = vsel %vm1192_vm7, %v1188_v54, %v3117_v31 }
 0x102   : > { %v4630_v38 = vsel %vm1226_vm8, %v1219_v16, %v3121_v26  ;;  %v4637_v20 = vsel %vm1226_vm8, %v1221_v1, %v3126_v58  ;;  %v4640_v50 = vsel %vm1226_vm8, %v1220_v62, %v3122_v59  ;;  %v3127_v58 = vunpack.i.h.bf16 %v3125_v44 }
 0x103   : > { %v544_v39 = vpop.permute.xlu1 %543  ;;  %v3130_v10 = vpop.permute.xlu0 %3129  ;;  %v3373_v28 = vpack.i.bf16 %v4630_v38, %v4625_v47  ;;  %v3383_v49 = vpack.i.bf16 %v4637_v20, %v4640_v50  ;;  %v3393_v27 = vpack.i.bf16 %v4640_v50, %v4630_v38 }
 0x104   : > { %v3131_v11 = vunpack.i.l.bf16 %v3130_v10  ;;  %v3132_v60 = vunpack.i.h.bf16 %v3130_v10  ;;  %v1157_v59 = vsel %vm1124_vm5, %v4139_v12, %v544_v39 }
 0x105   : > { %3374 = vrot.lane.b32.xlu1 %v3373_v28, %s3472_s11  ;;  %3379 = vrot.lane.b32.xlu0 %v3373_v28, %s3473_s14 }
 0x106   : > { %v1155_v48 = vsel %vm1124_vm5, %v4056_v53, %v3131_v11  ;;  %v1156_v44 = vsel %vm1124_vm5, %v4142_v24, %v3132_v60  ;;  %v1256_v53 = vsel %vm1226_vm8, %v1222_v9, %v3127_v58  ;;  %vm2623_vm5 = vcmask 195584  }
 0x107   : > { %v726_v45 = vpop.permute.xlu1 %725  ;;  %v3135_v40 = vpop.permute.xlu0 %3134 }
 0x108   : > { %v3136_v8 = vunpack.i.l.bf16 %v3135_v40  ;;  %v3137_v26 = vunpack.i.h.bf16 %v3135_v40  ;;  %v1191_v12 = vsel %vm1158_vm6, %v1157_v59, %v726_v45  ;;  %v3428_v45 = vpack.i.bf16 %v1256_v53, %v4637_v20 }
 0x109   : > { %3384 = vrot.lane.b32.xlu1 %v3383_v49, %s3473_s14  ;;  %3389 = vrot.lane.b32.xlu0 %v3388_v61, %s3470_s30 }
 0x10a   : > { %v1189_v14 = vsel %vm1158_vm6, %v1155_v48, %v3136_v8  ;;  %v1190_v62 = vsel %vm1158_vm6, %v1156_v44, %v3137_v26 }
 0x10b   : > { %v3140_v29 = vpop.permute.xlu0 %3139  ;;  %v908_v55 = vpop.permute.xlu1 %907 }
 0x10c   : > { %v3141_v34 = vunpack.i.l.bf16 %v3140_v29  ;;  %v3142_v21 = vunpack.i.h.bf16 %v3140_v29  ;;  %v1225_v61 = vsel %vm1192_vm7, %v1191_v12, %v908_v55 }
 0x10d   : > { %3394 = vrot.lane.b32.xlu1 %v3393_v27, %s3470_s30  ;;  %3399 = vrot.lane.b32.xlu0 %v3373_v28, %s3471_s6 }
 0x10e   : > { %v1223_v1 = vsel %vm1192_vm7, %v1189_v14, %v3141_v34  ;;  %v1224_v10 = vsel %vm1192_vm7, %v1190_v62, %v3142_v21  ;;  %vm2625_vm7 = vcmask 261120  }
 0x10f   : > { %v3145_v22 = vpop.permute.xlu0 %3144  ;;  %v1090_v28 = vpop.permute.xlu1 %1089 }
 0x110   : > { %v3147_v16 = vunpack.i.h.bf16 %v3145_v22  ;;  %v3146_v17 = vunpack.i.l.bf16 %v3145_v22 }
 0x111   : > { %3404 = vrot.lane.b32.xlu1 %v3383_v49, %s3471_s6  ;;  %3409 = vrot.lane.b32.xlu0 %v3383_v49, %s3472_s11  ;;  %v1259_v49 = vsel %vm1226_vm8, %v1225_v61, %v1090_v28 }
 0x112   : > { %v1257_v39 = vsel %vm1226_vm8, %v1223_v1, %v3146_v17  ;;  %v1258_v24 = vsel %vm1226_vm8, %v1224_v10, %v3147_v16 }
 0x113   : > { %v3413_v40 = vpack.i.bf16 %v1257_v39, %v1256_v53  ;;  %v3423_v46 = vpack.i.bf16 %v1259_v49, %v1258_v24  ;;  %v3150_v11 = vpop.permute.xlu0 %3149 }
 0x114   : > { %v3151_v51 = vunpack.i.l.bf16 %v3150_v11  ;;  %v3152_v59 = vunpack.i.h.bf16 %v3150_v11 }
 0x115   : > { %3414 = vrot.lane.b32.xlu1 %v3413_v40, %s3472_s11  ;;  %3419 = vrot.lane.b32.xlu0 %v3413_v40, %s3473_s14 }
 0x116   : > { %v1663_v58 = vsel %vm1662_vm9, %v4228_v35, %v3151_v51  ;;  %v1664_v10 = vsel %vm1662_vm9, %v4228_v35, %v3152_v59 }
 0x119   : > { %3424 = vrot.lane.b32.xlu1 %v3423_v46, %s3473_s14  ;;  %3429 = vrot.lane.b32.xlu0 %v3428_v45, %s3470_s30 }
 0x11b   : > { %v4686_v29 = vpop.permute.xlu1 %3154  ;;  %v3160_v27 = vpop.permute.xlu0 %3159 }
 0x11c   : > { %v3162_v8 = vunpack.i.h.bf16 %v3160_v27  ;;  %v3161_v19 = vunpack.i.l.bf16 %v3160_v27  ;;  %v3156_v26 = vunpack.i.l.bf16 %v4686_v29 }
 0x11d   : > { %1351 = vrot.lane.b32.xlu1 %v1257_v39, %s3470_s30  ;;  %3434 = vrot.lane.b32.xlu0 %v3413_v40, %s3471_s6 }
 0x11e   : > { %v1695_v48 = vsel %vm1694_vm10, %v1663_v58, %v3161_v19  ;;  %v1696_v21 = vsel %vm1694_vm10, %v1663_v58, %v3162_v8  ;;  %v1665_v28 = vsel %vm1662_vm9, %v4228_v35, %v3156_v26 }
 0x121   : > { %3439 = vrot.lane.b32.xlu1 %v3423_v46, %s3471_s6  ;;  %3444 = vrot.lane.b32.xlu0 %v3423_v46, %s3472_s11 }
 0x123   : > { %v3165_v31 = vpop.permute.xlu1 %3164  ;;  %v3170_v60 = vpop.permute.xlu0 %3169 }
 0x124   : > { %v3172_v55 = vunpack.i.h.bf16 %v3170_v60  ;;  %v3171_v34 = vunpack.i.l.bf16 %v3170_v60  ;;  %v3167_v14 = vunpack.i.h.bf16 %v3165_v31  ;;  %v3166_v16 = vunpack.i.l.bf16 %v3165_v31 }
 0x125   : > { %1542 = vrot.lane.b32.xlu1 %v4228_v35, %s3472_s11  ;;  %1631 = vrot.lane.b32.xlu0 %v4228_v35, %s3473_s14 }
 0x126   : > { %v1728_v53 = vsel %vm1727_vm11, %v1695_v48, %v3171_v34  ;;  %v1729_v12 = vsel %vm1727_vm11, %v1696_v21, %v3172_v55  ;;  %v1697_v49 = vsel %vm1694_vm10, %v1664_v10, %v3166_v16  ;;  %v1698_v46 = vsel %vm1694_vm10, %v1665_v28, %v3167_v14 }
 0x127   : > { %v3175_v22 = vpop.permute.xlu1 %3174  ;;  %v3180_v54 = vpop.permute.xlu0 %3179  ;;  %v3157_v55 = vunpack.i.h.bf16 %v4686_v29 }
 0x128   : > { %v3182_v17 = vunpack.i.h.bf16 %v3180_v54  ;;  %v3181_v9 = vunpack.i.l.bf16 %v3180_v54  ;;  %v3177_v44 = vunpack.i.h.bf16 %v3175_v22  ;;  %v3176_v1 = vunpack.i.l.bf16 %v3175_v22 }
 0x129   : > { %v1666_v54 = vsel %vm1662_vm9, %v4231_v57, %v3157_v55 }
 0x12a   : > { %v1761_v62 = vsel %vm1760_vm12, %v1728_v53, %v3181_v9  ;;  %v1762_v39 = vsel %vm1760_vm12, %v1729_v12, %v3182_v17  ;;  %v1730_v27 = vsel %vm1727_vm11, %v1697_v49, %v3176_v1  ;;  %v1731_v51 = vsel %vm1727_vm11, %v1698_v46, %v3177_v44 }
 0x12b   : > { %v3185_v40 = vpop.permute.xlu1 %3184  ;;  %v3190_v24 = vpop.permute.xlu0 %3189  ;;  %v1793_v61 = vpack.c.bf16 %v1762_v39, %v1761_v62 }
 0x12c   : > { %v3187_v45 = vunpack.i.h.bf16 %v3185_v40  ;;  %v3186_v11 = vunpack.i.l.bf16 %v3185_v40  ;;  %v3191_v34 = vunpack.i.l.bf16 %v3190_v24  ;;  %v3192_v16 = vunpack.i.h.bf16 %v3190_v24 }
 0x12d   : > { %2759 = vmatprep.mubr.msk.bf16.mxu0 %vm1868_vm13, %v1793_v61 }
 0x12e   : > { %v1763_v8 = vsel %vm1760_vm12, %v1730_v27, %v3186_v11  ;;  %v1764_v19 = vsel %vm1760_vm12, %v1731_v51, %v3187_v45  ;;  %v1667_v14 = vsel %vm1662_vm9, %v4263_v3, %v3191_v34  ;;  %v1668_v61 = vsel %vm1662_vm9, %v4266_v15, %v3192_v16 }
 0x12f   : > { %v1794_v35 = vpack.c.bf16 %v1764_v19, %v1763_v8  ;;  %v3195_v31 = vpop.permute.xlu1 %3194  ;;  %v3200_v60 = vpop.permute.xlu0 %3199 }
 0x130   : > { %v3202_v58 = vunpack.i.h.bf16 %v3200_v60  ;;  %v3201_v59 = vunpack.i.l.bf16 %v3200_v60  ;;  %v3196_v17 = vunpack.i.l.bf16 %v3195_v31 }
 0x131   : > { %2760 = vmatmul.mubr.msk.bf16.vlgmr.msra.gmra.mrb[0].mxu0 %vm1868_vm13, %v1794_v35 }
 0x132   : > { %v1699_v9 = vsel %vm1694_vm10, %v1666_v54, %v3201_v59  ;;  %v1700_v44 = vsel %vm1694_vm10, %v1667_v14, %v3202_v58  ;;  %v1669_v49 = vsel %vm1662_vm9, %v4306_v41, %v3196_v17  ;;  %v3197_v59 = vunpack.i.h.bf16 %v3195_v31 }
 0x133   : > { %v3205_v26 = vpop.permute.xlu1 %3204  ;;  %v3210_v48 = vpop.permute.xlu0 %3209 }
 0x134   : > { %v3212_v21 = vunpack.i.h.bf16 %v3210_v48  ;;  %v3211_v22 = vunpack.i.l.bf16 %v3210_v48  ;;  %v3207_v53 = vunpack.i.h.bf16 %v3205_v26  ;;  %v3206_v12 = vunpack.i.l.bf16 %v3205_v26 }
 0x135   : > { %v1670_v17 = vsel %vm1662_vm9, %v4328_v13, %v3197_v59 }
 0x136   : > { %v1732_v10 = vsel %vm1727_vm11, %v1699_v9, %v3211_v22  ;;  %v1733_v28 = vsel %vm1727_vm11, %v1700_v44, %v3212_v21  ;;  %v1701_v27 = vsel %vm1694_vm10, %v1668_v61, %v3206_v12  ;;  %v1702_v51 = vsel %vm1694_vm10, %v1669_v49, %v3207_v53 }
 0x137   : > { %v3215_v29 = vpop.permute.xlu1 %3214  ;;  %v3220_v1 = vpop.permute.xlu0 %3219 }
 0x138   : > { %v3222_v62 = vunpack.i.h.bf16 %v3220_v1  ;;  %v3221_v39 = vunpack.i.l.bf16 %v3220_v1  ;;  %v3217_v57 = vunpack.i.h.bf16 %v3215_v29  ;;  %v3216_v40 = vunpack.i.l.bf16 %v3215_v29 }
 0x13a   : > { %v1765_v3 = vsel %vm1760_vm12, %v1732_v10, %v3221_v39  ;;  %v1766_v24 = vsel %vm1760_vm12, %v1733_v28, %v3222_v62  ;;  %v1734_v35 = vsel %vm1727_vm11, %v1701_v27, %v3216_v40  ;;  %v1735_v60 = vsel %vm1727_vm11, %v1702_v51, %v3217_v57 }
 0x13b   : > { %v1795_v46 = vpack.c.bf16 %v1766_v24, %v1765_v3  ;;  %v3225_v45 = vpop.permute.xlu1 %3224  ;;  %v3230_v11 = vpop.permute.xlu0 %3229 }
 0x13c   : > { %v3227_v8 = vunpack.i.h.bf16 %v3225_v45  ;;  %v3226_v19 = vunpack.i.l.bf16 %v3225_v45  ;;  %v3231_v26 = vunpack.i.l.bf16 %v3230_v11  ;;  %v3232_v44 = vunpack.i.h.bf16 %v3230_v11 }
 0x13d   : > { %2763 = vmatprep.mubr.msk.bf16.mxu0 %vm1868_vm13, %v1795_v46 }
 0x13e   : > { %v1767_v15 = vsel %vm1760_vm12, %v1734_v35, %v3226_v19  ;;  %v1768_v55 = vsel %vm1760_vm12, %v1735_v60, %v3227_v8  ;;  %v1671_v9 = vsel %vm1662_vm9, %v4331_v4, %v3231_v26  ;;  %v1672_v61 = vsel %vm1662_vm9, %v4344_v32, %v3232_v44 }
 0x13f   : > { %v1796_v41 = vpack.c.bf16 %v1768_v55, %v1767_v15  ;;  %v3235_v34 = vpop.permute.xlu1 %3234  ;;  %v3240_v58 = vpop.permute.xlu0 %3239 }
 0x140   : > { %v3242_v48 = vunpack.i.h.bf16 %v3240_v58  ;;  %v3241_v21 = vunpack.i.l.bf16 %v3240_v58  ;;  %v3236_v29 = vunpack.i.l.bf16 %v3235_v34  ;;  %v3237_v58 = vunpack.i.h.bf16 %v3235_v34 }
 0x141   : > { %2764 = vmatmul.mubr.msk.bf16.gmra.mrb[4].mxu0 %vm1868_vm13, %v1796_v41 }
 0x142   : > { %v1703_v1 = vsel %vm1694_vm10, %v1670_v17, %v3241_v21  ;;  %v1704_v53 = vsel %vm1694_vm10, %v1671_v9, %v3242_v48  ;;  %v1673_v49 = vsel %vm1662_vm9, %v4341_v25, %v3236_v29 }
 0x143   : > { %v3245_v22 = vpop.permute.xlu1 %3244  ;;  %v3250_v54 = vpop.permute.xlu0 %3249 }
 0x144   : > { %v3252_v14 = vunpack.i.h.bf16 %v3250_v54  ;;  %v3251_v16 = vunpack.i.l.bf16 %v3250_v54  ;;  %v3247_v62 = vunpack.i.h.bf16 %v3245_v22  ;;  %v3246_v39 = vunpack.i.l.bf16 %v3245_v22 }
 0x146   : > { %v1736_v57 = vsel %vm1727_vm11, %v1703_v1, %v3251_v16  ;;  %v1737_v40 = vsel %vm1727_vm11, %v1704_v53, %v3252_v14  ;;  %v1705_v27 = vsel %vm1694_vm10, %v1672_v61, %v3246_v39  ;;  %v1706_v51 = vsel %vm1694_vm10, %v1673_v49, %v3247_v62 }
 0x147   : > { %v3255_v31 = vpop.permute.xlu1 %3254  ;;  %v3260_v12 = vpop.permute.xlu0 %3259  ;;  %v1674_v16 = vsel %vm1662_vm9, %v4388_v42, %v3237_v58 }
 0x148   : > { %v3262_v10 = vunpack.i.h.bf16 %v3260_v12  ;;  %v3261_v28 = vunpack.i.l.bf16 %v3260_v12  ;;  %v3257_v13 = vunpack.i.h.bf16 %v3255_v31  ;;  %v3256_v3 = vunpack.i.l.bf16 %v3255_v31 }
 0x14a   : > { %v1769_v4 = vsel %vm1760_vm12, %v1736_v57, %v3261_v28  ;;  %v1770_v24 = vsel %vm1760_vm12, %v1737_v40, %v3262_v10  ;;  %v1738_v35 = vsel %vm1727_vm11, %v1705_v27, %v3256_v3  ;;  %v1739_v60 = vsel %vm1727_vm11, %v1706_v51, %v3257_v13 }
 0x14b   : > { %v1797_v46 = vpack.c.bf16 %v1770_v24, %v1769_v4  ;;  %v3265_v45 = vpop.permute.xlu1 %3264  ;;  %v3270_v11 = vpop.permute.xlu0 %3269 }
 0x14c   : > { %v3267_v8 = vunpack.i.h.bf16 %v3265_v45  ;;  %v3266_v19 = vunpack.i.l.bf16 %v3265_v45  ;;  %v3271_v59 = vunpack.i.l.bf16 %v3270_v11  ;;  %v3272_v9 = vunpack.i.h.bf16 %v3270_v11 }
 0x14d   : > { %2767 = vmatprep.mubr.msk.bf16.mxu0 %vm1868_vm13, %v1797_v46 }
 0x14e   : > { %v1771_v32 = vsel %vm1760_vm12, %v1738_v35, %v3266_v19  ;;  %v1772_v15 = vsel %vm1760_vm12, %v1739_v60, %v3267_v8  ;;  %v1675_v17 = vsel %vm1662_vm9, %v4393_v56, %v3271_v59  ;;  %v1676_v13 = vsel %vm1662_vm9, %v4405_v43, %v3272_v9 }
 0x14f   : > { %v1798_v25 = vpack.c.bf16 %v1772_v15, %v1771_v32  ;;  %v3275_v55 = vpop.permute.xlu1 %3274  ;;  %v3280_v41 = vpop.permute.xlu0 %3279 }
 0x150   : > { %v3282_v26 = vunpack.i.h.bf16 %v3280_v41  ;;  %v3281_v48 = vunpack.i.l.bf16 %v3280_v41  ;;  %v3276_v44 = vunpack.i.l.bf16 %v3275_v55  ;;  %v3277_v60 = vunpack.i.h.bf16 %v3275_v55 }
 0x151   : > { %2768 = vmatmul.mubr.msk.bf16.gmra.mrb[8].mxu0 %vm1868_vm13, %v1798_v25 }
 0x152   : > { %v1707_v29 = vsel %vm1694_vm10, %v1674_v16, %v3281_v48  ;;  %v1708_v1 = vsel %vm1694_vm10, %v1675_v17, %v3282_v26  ;;  %v1677_v3 = vsel %vm1662_vm9, %v4402_v18, %v3276_v44  ;;  %v1678_v48 = vsel %vm1662_vm9, %v4448_v52, %v3277_v60 }
 0x153   : > { %v3285_v21 = vpop.permute.xlu1 %3284  ;;  %v3290_v22 = vpop.permute.xlu0 %3289 }
 0x154   : > { %v3292_v54 = vunpack.i.h.bf16 %v3290_v22  ;;  %v3291_v14 = vunpack.i.l.bf16 %v3290_v22  ;;  %v3287_v31 = vunpack.i.h.bf16 %v3285_v21  ;;  %v3286_v12 = vunpack.i.l.bf16 %v3285_v21 }
 0x156   : > { %v1740_v10 = vsel %vm1727_vm11, %v1707_v29, %v3291_v14  ;;  %v1741_v28 = vsel %vm1727_vm11, %v1708_v1, %v3292_v54  ;;  %v1709_v49 = vsel %vm1694_vm10, %v1676_v13, %v3286_v12  ;;  %v1710_v46 = vsel %vm1694_vm10, %v1677_v3, %v3287_v31 }
 0x157   : > { %v3295_v34 = vpop.permute.xlu1 %3294  ;;  %v3300_v53 = vpop.permute.xlu0 %3299 }
 0x158   : > { %v3302_v62 = vunpack.i.h.bf16 %v3300_v53  ;;  %v3301_v39 = vunpack.i.l.bf16 %v3300_v53  ;;  %v3297_v42 = vunpack.i.h.bf16 %v3295_v34  ;;  %v3296_v57 = vunpack.i.l.bf16 %v3295_v34 }
 0x15a   : > { %v1773_v56 = vsel %vm1760_vm12, %v1740_v10, %v3301_v39  ;;  %v1774_v40 = vsel %vm1760_vm12, %v1741_v28, %v3302_v62  ;;  %v1742_v27 = vsel %vm1727_vm11, %v1709_v49, %v3296_v57  ;;  %v1743_v51 = vsel %vm1727_vm11, %v1710_v46, %v3297_v42 }
 0x15b   : > { %v1799_v4 = vpack.c.bf16 %v1774_v40, %v1773_v56  ;;  %v3305_v24 = vpop.permute.xlu1 %3304  ;;  %v3310_v61 = vpop.permute.xlu0 %3309 }
 0x15c   : > { %v3307_v45 = vunpack.i.h.bf16 %v3305_v24  ;;  %v3306_v11 = vunpack.i.l.bf16 %v3305_v24  ;;  %v3311_v32 = vunpack.i.l.bf16 %v3310_v61  ;;  %v3312_v22 = vunpack.i.h.bf16 %v3310_v61 }
 0x15d   : > { %2771 = vmatprep.mubr.msk.bf16.mxu0 %vm1868_vm13, %v1799_v4 }
 0x15e   : > { %v1775_v43 = vsel %vm1760_vm12, %v1742_v27, %v3306_v11  ;;  %v1776_v8 = vsel %vm1760_vm12, %v1743_v51, %v3307_v45  ;;  %v1679_v21 = vsel %vm1662_vm9, %v4453_v23, %v3311_v32  ;;  %v1680_v62 = vsel %vm1662_vm9, %v4465_v36, %v3312_v22 }
 0x15f   : > { %v1800_v18 = vpack.c.bf16 %v1776_v8, %v1775_v43  ;;  %v3315_v19 = vpop.permute.xlu1 %3314  ;;  %v3320_v35 = vpop.permute.xlu0 %3319 }
 0x160   : > { %v3322_v15 = vunpack.i.h.bf16 %v3320_v35  ;;  %v3321_v25 = vunpack.i.l.bf16 %v3320_v35  ;;  %v3316_v54 = vunpack.i.l.bf16 %v3315_v19  ;;  %v3317_v46 = vunpack.i.h.bf16 %v3315_v19 }
 0x161   : > { %2772 = vmatmul.mubr.msk.bf16.gmra.mrb[12].mxu0 %vm1868_vm13, %v1800_v18 }
 0x162   : > { %v1711_v14 = vsel %vm1694_vm10, %v1678_v48, %v3321_v25  ;;  %v1712_v16 = vsel %vm1694_vm10, %v1679_v21, %v3322_v15  ;;  %v1681_v39 = vsel %vm1662_vm9, %v4462_v2, %v3316_v54  ;;  %v1682_v35 = vsel %vm1662_vm9, %v4508_v37, %v3317_v46 }
 0x163   : > { %v3325_v41 = vpop.permute.xlu1 %3324  ;;  %v3330_v58 = vpop.permute.xlu0 %3329 }
 0x164   : > { %v3332_v59 = vunpack.i.h.bf16 %v3330_v58  ;;  %v3331_v26 = vunpack.i.l.bf16 %v3330_v58  ;;  %v3327_v9 = vunpack.i.h.bf16 %v3325_v41  ;;  %v3326_v44 = vunpack.i.l.bf16 %v3325_v41 }
 0x166   : > { %v1744_v31 = vsel %vm1727_vm11, %v1711_v14, %v3331_v26  ;;  %v1745_v52 = vsel %vm1727_vm11, %v1712_v16, %v3332_v59  ;;  %v1713_v57 = vsel %vm1694_vm10, %v1680_v62, %v3326_v44  ;;  %v1714_v56 = vsel %vm1694_vm10, %v1681_v39, %v3327_v9 }
 0x167   : > { %v3335_v55 = vpop.permute.xlu1 %3334  ;;  %v3340_v17 = vpop.permute.xlu0 %3339 }
 0x168   : > { %v3342_v29 = vunpack.i.h.bf16 %v3340_v17  ;;  %v3341_v1 = vunpack.i.l.bf16 %v3340_v17  ;;  %v3337_v34 = vunpack.i.h.bf16 %v3335_v55  ;;  %v3336_v53 = vunpack.i.l.bf16 %v3335_v55 }
 0x16a   : > { %v1777_v23 = vsel %vm1760_vm12, %v1744_v31, %v3341_v1  ;;  %v1778_v12 = vsel %vm1760_vm12, %v1745_v52, %v3342_v29  ;;  %v1746_v3 = vsel %vm1727_vm11, %v1713_v57, %v3336_v53  ;;  %v1747_v4 = vsel %vm1727_vm11, %v1714_v56, %v3337_v34 }
 0x16b   : > { %v3345_v10 = vpop.permute.xlu1 %3344  ;;  %v3350_v28 = vpop.permute.xlu0 %3349  ;;  %v1801_v42 = vpack.c.bf16 %v1778_v12, %v1777_v23 }
 0x16c   : > { %v3347_v40 = vunpack.i.h.bf16 %v3345_v10  ;;  %v3346_v13 = vunpack.i.l.bf16 %v3345_v10  ;;  %v3351_v45 = vunpack.i.l.bf16 %v3350_v28  ;;  %v3352_v32 = vunpack.i.h.bf16 %v3350_v28 }
 0x16d   : > { %2775 = vmatprep.mubr.msk.bf16.mxu1 %vm1868_vm13, %v1801_v42 }
 0x16e   : > { %v1779_v36 = vsel %vm1760_vm12, %v1746_v3, %v3346_v13  ;;  %v1780_v24 = vsel %vm1760_vm12, %v1747_v4, %v3347_v40  ;;  %v1683_v60 = vsel %vm1662_vm9, %v4513_v30, %v3351_v45  ;;  %v1684_v55 = vsel %vm1662_vm9, %v4525_v7, %v3352_v32 }
 0x16f   : > { %v1802_v2 = vpack.c.bf16 %v1780_v24, %v1779_v36  ;;  %v3355_v61 = vpop.permute.xlu1 %3354  ;;  %v3360_v49 = vpop.permute.xlu0 %3359 }
 0x170   : > { %v3362_v11 = vunpack.i.h.bf16 %v3360_v49  ;;  %v3361_v27 = vunpack.i.l.bf16 %v3360_v49  ;;  %v3356_v15 = vunpack.i.l.bf16 %v3355_v61  ;;  %v3357_v10 = vunpack.i.h.bf16 %v3355_v61 }
 0x171   : > { %2776 = vmatmul.mubr.msk.bf16.vlgmr.msra.gmra.mrb[0].mxu1 %vm1868_vm13, %v1802_v2 }
 0x172   : > { %v1715_v25 = vsel %vm1694_vm10, %v1682_v35, %v3361_v27  ;;  %v1716_v41 = vsel %vm1694_vm10, %v1683_v60, %v3362_v11  ;;  %v1685_v17 = vsel %vm1662_vm9, %v4522_v0, %v3356_v15  ;;  %v1686_v4 = vsel %vm1662_vm9, %v4568_v33, %v3357_v10 }
 0x173   : > { %v3365_v51 = vpop.permute.xlu1 %3364  ;;  %v3370_v43 = vpop.permute.xlu0 %3369 }
 0x174   : > { %v3372_v8 = vunpack.i.h.bf16 %v3370_v43  ;;  %v3371_v18 = vunpack.i.l.bf16 %v3370_v43  ;;  %v3367_v59 = vunpack.i.h.bf16 %v3365_v51  ;;  %v3366_v26 = vunpack.i.l.bf16 %v3365_v51 }
 0x176   : > { %v1748_v22 = vsel %vm1727_vm11, %v1715_v25, %v3371_v18  ;;  %v1749_v54 = vsel %vm1727_vm11, %v1716_v41, %v3372_v8  ;;  %v1717_v1 = vsel %vm1694_vm10, %v1684_v55, %v3366_v26  ;;  %v1718_v34 = vsel %vm1694_vm10, %v1685_v17, %v3367_v59 }
 0x177   : > { %v3375_v19 = vpop.permute.xlu1 %3374  ;;  %v3380_v58 = vpop.permute.xlu0 %3379 }
 0x178   : > { %v3382_v48 = vunpack.i.h.bf16 %v3380_v58  ;;  %v3381_v21 = vunpack.i.l.bf16 %v3380_v58  ;;  %v3377_v37 = vunpack.i.h.bf16 %v3375_v19  ;;  %v3376_v14 = vunpack.i.l.bf16 %v3375_v19 }
 0x17a   : > { %v1781_v30 = vsel %vm1760_vm12, %v1748_v22, %v3381_v21  ;;  %v1782_v16 = vsel %vm1760_vm12, %v1749_v54, %v3382_v48  ;;  %v1750_v52 = vsel %vm1727_vm11, %v1717_v1, %v3376_v14  ;;  %v1751_v23 = vsel %vm1727_vm11, %v1718_v34, %v3377_v37 }
 0x17b   : > { %v1803_v9 = vpack.c.bf16 %v1782_v16, %v1781_v30  ;;  %v3385_v44 = vpop.permute.xlu1 %3384  ;;  %v3390_v29 = vpop.permute.xlu0 %3389 }
 0x17c   : > { %v3387_v53 = vunpack.i.h.bf16 %v3385_v44  ;;  %v3386_v31 = vunpack.i.l.bf16 %v3385_v44  ;;  %v3391_v28 = vunpack.i.l.bf16 %v3390_v29  ;;  %v3392_v24 = vunpack.i.h.bf16 %v3390_v29 }
 0x17d   : > { %2779 = vmatprep.mubr.msk.bf16.mxu1 %vm1868_vm13, %v1803_v9 }
 0x17e   : > { %v1783_v7 = vsel %vm1760_vm12, %v1750_v52, %v3386_v31  ;;  %v1784_v12 = vsel %vm1760_vm12, %v1751_v23, %v3387_v53  ;;  %v1687_v36 = vsel %vm1662_vm9, %v4573_v5, %v3391_v28  ;;  %v1688_v32 = vsel %vm1662_vm9, %v4585_v63, %v3392_v24 }
 0x17f   : > { %v1804_v0 = vpack.c.bf16 %v1784_v12, %v1783_v7  ;;  %v3395_v62 = vpop.permute.xlu1 %3394  ;;  %v3400_v39 = vpop.permute.xlu0 %3399 }
 0x180   : > { %v3402_v42 = vunpack.i.h.bf16 %v3400_v39  ;;  %v3401_v57 = vunpack.i.l.bf16 %v3400_v39  ;;  %v3396_v2 = vunpack.i.l.bf16 %v3395_v62 }
 0x181   : > { %2780 = vmatmul.mubr.msk.bf16.gmra.mrb[4].mxu1 %vm1868_vm13, %v1804_v0 }
 0x182   : > { %v1719_v49 = vsel %vm1694_vm10, %v1686_v4, %v3401_v57  ;;  %v1720_v46 = vsel %vm1694_vm10, %v1687_v36, %v3402_v42  ;;  %v1689_v15 = vsel %vm1662_vm9, %v4582_v6, %v3396_v2  ;;  %v3397_v6 = vunpack.i.h.bf16 %v3395_v62 }
 0x183   : > { %v3405_v56 = vpop.permute.xlu1 %3404  ;;  %v3410_v40 = vpop.permute.xlu0 %3409 }
 0x184   : > { %v3412_v13 = vunpack.i.h.bf16 %v3410_v40  ;;  %v3411_v3 = vunpack.i.l.bf16 %v3410_v40  ;;  %v3407_v11 = vunpack.i.h.bf16 %v3405_v56  ;;  %v3406_v27 = vunpack.i.l.bf16 %v3405_v56 }
 0x185   : > { %v1690_v44 = vsel %vm1662_vm9, %v4625_v47, %v3397_v6 }
 0x186   : > { %v1752_v8 = vsel %vm1727_vm11, %v1719_v49, %v3411_v3  ;;  %v1753_v18 = vsel %vm1727_vm11, %v1720_v46, %v3412_v13  ;;  %v1721_v58 = vsel %vm1694_vm10, %v1688_v32, %v3406_v27  ;;  %v1722_v59 = vsel %vm1694_vm10, %v1689_v15, %v3407_v11  ;;  %v4873_v46 = vld [vmem:[%s5590_s2] ss:$0 sm:$0xff] }
 0x187   : > { %v3415_v61 = vpop.permute.xlu1 %3414  ;;  %v3420_v45 = vpop.permute.xlu0 %3419 }
 0x188   : > { %v3422_v51 = vunpack.i.h.bf16 %v3420_v45  ;;  %v3421_v43 = vunpack.i.l.bf16 %v3420_v45  ;;  %v3417_v33 = vunpack.i.h.bf16 %v3415_v61  ;;  %v3416_v35 = vunpack.i.l.bf16 %v3415_v61 }
 0x18a   : > { %v1785_v5 = vsel %vm1760_vm12, %v1752_v8, %v3421_v43  ;;  %v1786_v60 = vsel %vm1760_vm12, %v1753_v18, %v3422_v51  ;;  %v1754_v21 = vsel %vm1727_vm11, %v1721_v58, %v3416_v35  ;;  %v1755_v22 = vsel %vm1727_vm11, %v1722_v59, %v3417_v33 }
 0x18b   : > { %v1805_v25 = vpack.c.bf16 %v1786_v60, %v1785_v5  ;;  %v3425_v41 = vpop.permute.xlu1 %3424  ;;  %v3430_v19 = vpop.permute.xlu0 %3429 }
 0x18c   : > { %v3427_v26 = vunpack.i.h.bf16 %v3425_v41  ;;  %v3426_v48 = vunpack.i.l.bf16 %v3425_v41  ;;  %v3431_v14 = vunpack.i.l.bf16 %v3430_v19  ;;  %v3432_v55 = vunpack.i.h.bf16 %v3430_v19 }
 0x18d   : > { %2783 = vmatprep.mubr.msk.bf16.mxu1 %vm1868_vm13, %v1805_v25 }
 0x18e   : > { %v1787_v63 = vsel %vm1760_vm12, %v1754_v21, %v3426_v48  ;;  %v1788_v54 = vsel %vm1760_vm12, %v1755_v22, %v3427_v26  ;;  %v1691_v29 = vsel %vm1662_vm9, %v4630_v38, %v3431_v14  ;;  %v1692_v62 = vsel %vm1662_vm9, %v4640_v50, %v3432_v55 }
 0x18f   : > { %v1806_v37 = vpack.c.bf16 %v1788_v54, %v1787_v63  ;;  %v1352_v30 = vpop.permute.xlu1 %1351  ;;  %v3435_v16 = vpop.permute.xlu0 %3434 }
 0x190   : > { %v3437_v17 = vunpack.i.h.bf16 %v3435_v16  ;;  %v3436_v9 = vunpack.i.l.bf16 %v3435_v16  ;;  %v1693_v7 = vsel %vm1662_vm9, %v4637_v20, %v1352_v30  ;;  %vm2628_vm9 = vcmask 392192  }
 0x191   : > { %2784 = vmatmul.mubr.msk.bf16.gmra.mrb[8].mxu1 %vm1868_vm13, %v1806_v37 }
 0x192   : > { %v1723_v12 = vsel %vm1694_vm10, %v1690_v44, %v3436_v9  ;;  %v1724_v0 = vsel %vm1694_vm10, %v1691_v29, %v3437_v17 }
 0x193   : > { %v3440_v1 = vpop.permute.xlu1 %3439  ;;  %v3445_v34 = vpop.permute.xlu0 %3444 }
 0x194   : > { %v3442_v53 = vunpack.i.h.bf16 %v3440_v1  ;;  %v3441_v31 = vunpack.i.l.bf16 %v3440_v1  ;;  %v3447_v52 = vunpack.i.h.bf16 %v3445_v34  ;;  %v3446_v23 = vunpack.i.l.bf16 %v3445_v34 }
 0x196   : > { %v1756_v47 = vsel %vm1727_vm11, %v1723_v12, %v3446_v23  ;;  %v1757_v38 = vsel %vm1727_vm11, %v1724_v0, %v3447_v52  ;;  %v1726_v39 = vsel %vm1694_vm10, %v1693_v7, %v3442_v53  ;;  %v1725_v10 = vsel %vm1694_vm10, %v1692_v62, %v3441_v31 }
 0x197   : > { %v1543_v28 = vpop.permute.xlu1 %1542  ;;  %v1632_v42 = vpop.permute.xlu0 %1631 }
 0x198   : > { %v1758_v57 = vsel %vm1727_vm11, %v1725_v10, %v1543_v28  ;;  %v1759_v20 = vsel %vm1727_vm11, %v1726_v39, %v1543_v28  ;;  %v1789_v56 = vsel %vm1760_vm12, %v1756_v47, %v1632_v42  ;;  %v1790_v40 = vsel %vm1760_vm12, %v1757_v38, %v1632_v42 }
 0x199   : > { %v1791_v50 = vsel %vm1760_vm12, %v1758_v57, %v1632_v42  ;;  %v1792_v13 = vsel %vm1760_vm12, %v1759_v20, %v1632_v42  ;;  %v1807_v3 = vpack.c.bf16 %v1790_v40, %v1789_v56  ;;  %vm2630_vm11 = vcmask 457728  }
 0x19a   : > { %v1808_v4 = vpack.c.bf16 %v1792_v13, %v1791_v50 }
 0x19b   : > { %2787 = vmatprep.mubr.msk.bf16.mxu1 %vm1868_vm13, %v1807_v3 }
 0x19c   : > { %2788 = vmatmul.mubr.msk.bf16.gmra.mrb[12].mxu1 %vm1868_vm13, %v1808_v4 }
 0x204   : > { %v2761_v36 = vpop.f32.mrb[0].mxu0 }
 0x205   : > { %v1954_v24 = vpop.f32.mrb[1].mxu0  ;;  %v4883_v27 = vadd.f32 %v2761_v36, %v4873_v46 }
 0x206   : > { %v2762_v2 = vpop.f32.mrb[2].mxu0  ;;  %v4879_v45 = vadd.f32 %v4873_v46, %v1954_v24 }
 0x207   : > { %v1957_v49 = vpop.f32.mrb[3].mxu0  ;;  %v2083_v5 = vmax.f32 %v4883_v27, 0.0  ;;  %v4894_v32 = vadd.f32 %v2762_v2, %v4873_v46 }
 0x208   : > { %v4876_v61 = vadd.f32 %v4873_v46, %v1957_v49  ;;  %v2081_v51 = vmax.f32 %v4879_v45, 0.0 }
 0x209   : > { %v2116_v41 = vsel %vm1158_vm6, %v2083_v5, 0.0  ;;  %v2084_v19 = vmax.f32 %v4894_v32, 0.0 }
 0x20a   : > { %v2082_v11 = vmax.f32 %v4876_v61, 0.0  ;;  %v2113_v60 = vsel %vm1158_vm6, %v2081_v51, 0.0 }
 0x20b   : > { %v2118_v48 = vsel %vm1158_vm6, %v2084_v19, 0.0 }
 0x20c   : > { %v2114_v18 = vsel %vm1158_vm6, %v2082_v11, 0.0 }
 0x20d   : > { %v2115_v25 = vadd.f32 %v2114_v18, %v2113_v60 }
 0x20f   : > { %v2117_v26 = vadd.f32 %v2116_v41, %v2115_v25 }
 0x211   : > { %v2119_v63 = vadd.f32 %v2118_v48, %v2117_v26 }
 0x214   : > { %v2765_v43 = vpop.f32.mrb[4].mxu0 }
 0x215   : > { %v1970_v8 = vpop.f32.mrb[5].mxu0  ;;  %v4915_v54 = vadd.f32 %v2765_v43, %v4873_v46 }
 0x216   : > { %v2766_v33 = vpop.f32.mrb[6].mxu0  ;;  %v4897_v15 = vadd.f32 %v4873_v46, %v1970_v8 }
 0x217   : > { %v1973_v35 = vpop.f32.mrb[7].mxu0  ;;  %v2087_v16 = vmax.f32 %v4915_v54, 0.0  ;;  %v4922_v55 = vadd.f32 %v2766_v33, %v4873_v46 }
 0x218   : > { %v2085_v58 = vmax.f32 %v4897_v15, 0.0  ;;  %v4905_v59 = vadd.f32 %v4873_v46, %v1973_v35 }
 0x219   : > { %v2124_v1 = vsel %vm1158_vm6, %v2087_v16, 0.0  ;;  %v2088_v34 = vmax.f32 %v4922_v55, 0.0 }
 0x21a   : > { %v2120_v21 = vsel %vm1158_vm6, %v2085_v58, 0.0  ;;  %v2086_v22 = vmax.f32 %v4905_v59, 0.0 }
 0x21b   : > { %v2121_v6 = vadd.f32 %v2120_v21, %v2119_v63  ;;  %v2126_v23 = vsel %vm1158_vm6, %v2088_v34, 0.0 }
 0x21c   : > { %v2122_v37 = vsel %vm1158_vm6, %v2086_v22, 0.0 }
 0x21d   : > { %v2123_v44 = vadd.f32 %v2122_v37, %v2121_v6 }
 0x21f   : > { %v2125_v52 = vadd.f32 %v2124_v1, %v2123_v44 }
 0x221   : > { %v2127_v0 = vadd.f32 %v2126_v23, %v2125_v52 }
 0x224   : > { %v2769_v14 = vpop.f32.mrb[8].mxu0 }
 0x225   : > { %v1986_v30 = vpop.f32.mrb[9].mxu0  ;;  %v4943_v62 = vadd.f32 %v2769_v14, %v4873_v46 }
 0x226   : > { %v4925_v17 = vadd.f32 %v4873_v46, %v1986_v30  ;;  %v2770_v9 = vpop.f32.mrb[10].mxu0 }
 0x227   : > { %v1989_v29 = vpop.f32.mrb[11].mxu0  ;;  %v2091_v39 = vmax.f32 %v4943_v62, 0.0  ;;  %v4950_v10 = vadd.f32 %v2770_v9, %v4873_v46 }
 0x228   : > { %v2089_v53 = vmax.f32 %v4925_v17, 0.0  ;;  %v4933_v31 = vadd.f32 %v4873_v46, %v1989_v29 }
 0x229   : > { %v2132_v50 = vsel %vm1158_vm6, %v2091_v39, 0.0  ;;  %v2092_v13 = vmax.f32 %v4950_v10, 0.0 }
 0x22a   : > { %v2128_v7 = vsel %vm1158_vm6, %v2089_v53, 0.0  ;;  %v2090_v12 = vmax.f32 %v4933_v31, 0.0 }
 0x22b   : > { %v2129_v47 = vadd.f32 %v2128_v7, %v2127_v0  ;;  %v2134_v24 = vsel %vm1158_vm6, %v2092_v13, 0.0 }
 0x22c   : > { %v2130_v38 = vsel %vm1158_vm6, %v2090_v12, 0.0 }
 0x22d   : > { %v2131_v42 = vadd.f32 %v2130_v38, %v2129_v47 }
 0x22f   : > { %v2133_v36 = vadd.f32 %v2132_v50, %v2131_v42 }
 0x231   : > { %v2135_v43 = vadd.f32 %v2134_v24, %v2133_v36 }
 0x234   : > { %v2773_v28 = vpop.f32.mrb[12].mxu0 }
 0x235   : > { %v2002_v57 = vpop.f32.mrb[13].mxu0  ;;  %v4971_v8 = vadd.f32 %v2773_v28, %v4873_v46 }
 0x236   : > { %v4953_v20 = vadd.f32 %v4873_v46, %v2002_v57  ;;  %v2774_v56 = vpop.f32.mrb[14].mxu0 }
 0x237   : > { %v2005_v40 = vpop.f32.mrb[15].mxu0  ;;  %v5597_v35 = vmax.f32 %v4971_v8, 0.0  ;;  %v4978_v60 = vadd.f32 %v2774_v56, %v4873_v46 }
 0x238   : > { %v2093_v3 = vmax.f32 %v4953_v20, 0.0  ;;  %v4961_v4 = vadd.f32 %v4873_v46, %v2005_v40  ;;  %v5598_v20 = vmax.f32 %v4971_v8, 0.0 }
 0x239   : > { %v2140_v48 = vsel %vm1158_vm6, %v5597_v35, 0.0  ;;  %v5596_v21 = vmax.f32 %v4978_v60, 0.0 }
 0x23a   : > { %v2136_v2 = vsel %vm1158_vm6, %v2093_v3, 0.0  ;;  %v2094_v49 = vmax.f32 %v4961_v4, 0.0  ;;  %v5599_v4 = vmax.f32 %v4978_v60, 0.0 }
 0x23b   : > { %v2137_v18 = vadd.f32 %v2136_v2, %v2135_v43  ;;  %v2142_v44 = vsel %vm1158_vm6, %v5596_v21, 0.0 }
 0x23c   : > { %v2138_v33 = vsel %vm1158_vm6, %v2094_v49, 0.0 }
 0x23d   : > { %v2139_v25 = vadd.f32 %v2138_v33, %v2137_v18 }
 0x23f   : > { %v2141_v37 = vadd.f32 %v2140_v48, %v2139_v25 }
 0x241   : > { %v2143_v52 = vadd.f32 %v2142_v44, %v2141_v37 }
 0x244   : > { %v2777_v41 = vpop.f32.mrb[0].mxu1 }
 0x245   : > { %v2018_v26 = vpop.f32.mrb[1].mxu1  ;;  %v4999_v23 = vadd.f32 %v2777_v41, %v4873_v46 }
 0x246   : > { %v4985_v63 = vadd.f32 %v4873_v46, %v2018_v26  ;;  %v2778_v6 = vpop.f32.mrb[2].mxu1 }
 0x247   : > { %v2021_v14 = vpop.f32.mrb[3].mxu1  ;;  %v5593_v47 = vmax.f32 %v4999_v23, 0.0  ;;  %v5006_v38 = vadd.f32 %v2778_v6, %v4873_v46 }
 0x248   : > { %v5595_v30 = vmax.f32 %v4985_v63, 0.0  ;;  %v4989_v9 = vadd.f32 %v4873_v46, %v2021_v14  ;;  %v5600_v8 = vmax.f32 %v4985_v63, 0.0  ;;  %v5602_v63 = vmax.f32 %v4999_v23, 0.0 }
 0x249   : > { %v2148_v42 = vsel %vm1158_vm6, %v5593_v47, 0.0  ;;  %v5592_v57 = vmax.f32 %v5006_v38, 0.0 }
 0x24a   : > { %v2144_v29 = vsel %vm1158_vm6, %v5595_v30, 0.0  ;;  %v5594_v1 = vmax.f32 %v4989_v9, 0.0  ;;  %v5601_v60 = vmax.f32 %v4989_v9, 0.0  ;;  %v5603_v9 = vmax.f32 %v5006_v38, 0.0 }
 0x24b   : > { %v2145_v7 = vadd.f32 %v2144_v29, %v2143_v52  ;;  %v2150_v18 = vsel %vm1158_vm6, %v5592_v57, 0.0 }
 0x24c   : > { %v2146_v0 = vsel %vm1158_vm6, %v5594_v1, 0.0 }
 0x24d   : > { %v2147_v28 = vadd.f32 %v2146_v0, %v2145_v7 }
 0x24f   : > { %v2149_v40 = vadd.f32 %v2148_v42, %v2147_v28 }
 0x251   : > { %v2151_v26 = vadd.f32 %v2150_v18, %v2149_v40 }
 0x254   : > { %v2781_v56 = vpop.f32.mrb[4].mxu1 }
 0x255   : > { %v2034_v50 = vpop.f32.mrb[5].mxu1  ;;  %v5013_v36 = vadd.f32 %v2781_v56, %v4873_v46 }
 0x256   : > { %v5016_v24 = vadd.f32 %v4873_v46, %v2034_v50  ;;  %v2782_v2 = vpop.f32.mrb[6].mxu1 }
 0x257   : > { %v2037_v43 = vpop.f32.mrb[7].mxu1  ;;  %v5023_v25 = vadd.f32 %v2782_v2, %v4873_v46  ;;  %v2103_v48 = vmax.f32 %v5013_v36, 0.0 }
 0x258   : > { %v2101_v33 = vmax.f32 %v5016_v24, 0.0  ;;  %v2038_v41 = vadd.f32 %v4873_v46, %v2037_v43 }
 0x259   : > { %v2104_v44 = vmax.f32 %v5023_v25, 0.0  ;;  %v2156_v7 = vsel %vm1158_vm6, %v2103_v48, 0.0 }
 0x25a   : > { %v2152_v6 = vsel %vm1158_vm6, %v2101_v33, 0.0  ;;  %v2102_v37 = vmax.f32 %v2038_v41, 0.0 }
 0x25b   : > { %v2153_v14 = vadd.f32 %v2152_v6, %v2151_v26  ;;  %v2158_v28 = vsel %vm1158_vm6, %v2104_v44, 0.0 }
 0x25c   : > { %v2154_v29 = vsel %vm1158_vm6, %v2102_v37, 0.0 }
 0x25d   : > { %v2155_v52 = vadd.f32 %v2154_v29, %v2153_v14 }
 0x25f   : > { %v2157_v0 = vadd.f32 %v2156_v7, %v2155_v52 }
 0x261   : > { %v2159_v42 = vadd.f32 %v2158_v28, %v2157_v0 }
 0x264   : > { %v2785_v56 = vpop.f32.mrb[8].mxu1 }
 0x265   : > { %v2050_v50 = vpop.f32.mrb[9].mxu1  ;;  %v2059_v40 = vadd.f32 %v2785_v56, %v4873_v46 }
 0x266   : > { %v2051_v36 = vadd.f32 %v4873_v46, %v2050_v50  ;;  %v2786_v24 = vpop.f32.mrb[10].mxu1 }
 0x267   : > { %v2053_v2 = vpop.f32.mrb[11].mxu1  ;;  %v2062_v18 = vadd.f32 %v2786_v24, %v4873_v46  ;;  %v2107_v41 = vmax.f32 %v2059_v40, 0.0 }
 0x268   : > { %v2105_v43 = vmax.f32 %v2051_v36, 0.0  ;;  %v2054_v25 = vadd.f32 %v4873_v46, %v2053_v2 }
 0x269   : > { %v2108_v29 = vmax.f32 %v2062_v18, 0.0  ;;  %v2164_v0 = vsel %vm1158_vm6, %v2107_v41, 0.0 }
 0x26a   : > { %v2160_v26 = vsel %vm1158_vm6, %v2105_v43, 0.0  ;;  %v2106_v6 = vmax.f32 %v2054_v25, 0.0 }
 0x26b   : > { %v2161_v14 = vadd.f32 %v2160_v26, %v2159_v42  ;;  %v2166_v50 = vsel %vm1158_vm6, %v2108_v29, 0.0 }
 0x26c   : > { %v2162_v52 = vsel %vm1158_vm6, %v2106_v6, 0.0 }
 0x26d   : > { %v2163_v7 = vadd.f32 %v2162_v52, %v2161_v14 }
 0x26f   : > { %v2165_v28 = vadd.f32 %v2164_v0, %v2163_v7  ;;  %v2789_v56 = vpop.f32.mrb[12].mxu1 }
 0x270   : > { %v2066_v36 = vpop.f32.mrb[13].mxu1  ;;  %v2075_v24 = vadd.f32 %v2789_v56, %v4873_v46 }
 0x271   : > { %v2067_v2 = vadd.f32 %v4873_v46, %v2066_v36  ;;  %v2167_v40 = vadd.f32 %v2166_v50, %v2165_v28  ;;  %v2790_v57 = vpop.f32.mrb[14].mxu1 }
 0x272   : > { %v2069_v47 = vpop.f32.mrb[15].mxu1  ;;  %v2078_v42 = vadd.f32 %v2790_v57, %v4873_v46  ;;  %v2111_v26 = vmax.f32 %v2075_v24, 0.0 }
 0x273   : > { %v2109_v25 = vmax.f32 %v2067_v2, 0.0  ;;  %v2070_v18 = vadd.f32 %v4873_v46, %v2069_v47 }
 0x274   : > { %v2112_v0 = vmax.f32 %v2078_v42, 0.0  ;;  %v2172_v56 = vsel %vm1158_vm6, %v2111_v26, 0.0 }
 0x275   : > { %v2168_v14 = vsel %vm1158_vm6, %v2109_v25, 0.0  ;;  %v2110_v52 = vmax.f32 %v2070_v18, 0.0 }
 0x276   : > { %v2169_v7 = vadd.f32 %v2168_v14, %v2167_v40  ;;  %v2174_v28 = vsel %vm1158_vm6, %v2112_v0, 0.0 }
 0x277   : > { %v2170_v1 = vsel %vm1158_vm6, %v2110_v52, 0.0 }
 0x278   : > { %v2171_v30 = vadd.f32 %v2170_v1, %v2169_v7 }
 0x27a   : > { %v2173_v36 = vadd.f32 %v2172_v56, %v2171_v30 }
 0x27c   : > { %v2175_v50 = vadd.f32 %v2174_v28, %v2173_v36 }
 0x27e   : > { %v2176_v2 = vrot.slane %v2175_v50, 4 }
 0x280   : > { %v2177_v21 = vadd.f32 %v2176_v2, %v2175_v50 }
 0x282   : > { %v2178_v57 = vrot.slane %v2177_v21, 2 }
 0x284   : > { %v2179_v35 = vadd.f32 %v2178_v57, %v2177_v21 }
 0x286   : > { %v2180_v46 = vrot.slane %v2179_v35, 1 }
 0x288   : > { %v2181_v47 = vadd.f32 %v2180_v46, %v2179_v35 }
 0x28a   : > { %v5048_v24 = vmul.f32 0.00390625, %v2181_v47 }
 0x28c   : > { %v5051_v40 = vsub.f32 %v2101_v33, %v5048_v24  ;;  %v5054_v42 = vsub.f32 %v2102_v37, %v5048_v24  ;;  %v5057_v1 = vsub.f32 %v2103_v48, %v5048_v24  ;;  %v5060_v30 = vsub.f32 %v2104_v44, %v5048_v24 }
 0x28d   : > { %v5063_v18 = vsub.f32 %v2105_v43, %v5048_v24  ;;  %v5066_v21 = vsub.f32 %v2106_v6, %v5048_v24  ;;  %v5069_v35 = vsub.f32 %v2107_v41, %v5048_v24  ;;  %v5072_v33 = vsub.f32 %v2108_v29, %v5048_v24 }
 0x28e   : > { %v5075_v37 = vsub.f32 %v2109_v25, %v5048_v24  ;;  %v5078_v48 = vsub.f32 %v2110_v52, %v5048_v24  ;;  %v5081_v44 = vsub.f32 %v2111_v26, %v5048_v24  ;;  %v5084_v43 = vsub.f32 %v2112_v0, %v5048_v24 }
 0x28f   : > { %v5089_v41 = vsub.f32 %v2081_v51, %v5048_v24  ;;  %v5094_v6 = vsub.f32 %v2082_v11, %v5048_v24  ;;  %v5099_v29 = vsub.f32 %v2083_v5, %v5048_v24  ;;  %v5104_v25 = vsub.f32 %v2084_v19, %v5048_v24 }
 0x290   : > { %v5113_v61 = vsub.f32 %v2085_v58, %v5048_v24  ;;  %v5120_v27 = vsub.f32 %v2086_v22, %v5048_v24  ;;  %v5129_v15 = vsub.f32 %v2087_v16, %v5048_v24  ;;  %v5137_v14 = vsub.f32 %v2088_v34, %v5048_v24 }
 0x291   : > { %v2216_v45 = vmul.f32 %v5089_v41, %v5089_v41  ;;  %v2217_v51 = vmul.f32 %v5094_v6, %v5094_v6  ;;  %v2218_v11 = vmul.f32 %v5099_v29, %v5099_v29  ;;  %v2219_v5 = vmul.f32 %v5104_v25, %v5104_v25 }
 0x292   : > { %v2220_v58 = vmul.f32 %v5113_v61, %v5113_v61  ;;  %v2221_v52 = vmul.f32 %v5120_v27, %v5120_v27  ;;  %v5145_v54 = vsub.f32 %v2089_v53, %v5048_v24  ;;  %v2222_v16 = vmul.f32 %v5129_v15, %v5129_v15 }
 0x293   : > { %v2248_v32 = vsel %vm1158_vm6, %v2216_v45, 0.0  ;;  %v2249_v19 = vsel %vm1158_vm6, %v2217_v51, 0.0  ;;  %v2251_v59 = vsel %vm1158_vm6, %v2218_v11, 0.0  ;;  %v2253_v7 = vsel %vm1158_vm6, %v2219_v5, 0.0 }
 0x294   : > { %v2250_v26 = vadd.f32 %v2249_v19, %v2248_v32  ;;  %v2255_v56 = vsel %vm1158_vm6, %v2220_v58, 0.0  ;;  %v5153_v55 = vsub.f32 %v2090_v12, %v5048_v24  ;;  %v2223_v34 = vmul.f32 %v5137_v14, %v5137_v14 }
 0x295   : > { %v2257_v28 = vsel %vm1158_vm6, %v2221_v52, 0.0  ;;  %v5161_v17 = vsub.f32 %v2091_v39, %v5048_v24  ;;  %v2224_v53 = vmul.f32 %v5145_v54, %v5145_v54  ;;  %v2259_v2 = vsel %vm1158_vm6, %v2222_v16, 0.0 }
 0x296   : > { %v2252_v22 = vadd.f32 %v2251_v59, %v2250_v26  ;;  %v5169_v31 = vsub.f32 %v2092_v13, %v5048_v24  ;;  %v2225_v12 = vmul.f32 %v5153_v55, %v5153_v55  ;;  %v2261_v46 = vsel %vm1158_vm6, %v2223_v34, 0.0 }
 0x297   : > { %v5177_v62 = vsub.f32 %v2093_v3, %v5048_v24  ;;  %v2226_v39 = vmul.f32 %v5161_v17, %v5161_v17  ;;  %v2263_v45 = vsel %vm1158_vm6, %v2224_v53, 0.0  ;;  %v5185_v10 = vsub.f32 %v2094_v49, %v5048_v24 }
 0x298   : > { %v2254_v0 = vadd.f32 %v2253_v7, %v2252_v22  ;;  %v2227_v13 = vmul.f32 %v5169_v31, %v5169_v31  ;;  %v2265_v11 = vsel %vm1158_vm6, %v2225_v12, 0.0  ;;  %v5193_v3 = vsub.f32 %v5598_v20, %v5048_v24 }
 0x299   : > { %v2228_v32 = vmul.f32 %v5177_v62, %v5177_v62  ;;  %v2267_v19 = vsel %vm1158_vm6, %v2226_v39, 0.0  ;;  %v5201_v49 = vsub.f32 %v5599_v4, %v5048_v24  ;;  %v2229_v58 = vmul.f32 %v5185_v10, %v5185_v10 }
 0x29a   : > { %v2256_v36 = vadd.f32 %v2255_v56, %v2254_v0  ;;  %v2269_v59 = vsel %vm1158_vm6, %v2227_v13, 0.0  ;;  %v5209_v52 = vsub.f32 %v5600_v8, %v5048_v24  ;;  %v2230_v7 = vmul.f32 %v5193_v3, %v5193_v3 }
 0x29b   : > { %v2271_v0 = vsel %vm1158_vm6, %v2228_v32, 0.0  ;;  %v5217_v56 = vsub.f32 %v5601_v60, %v5048_v24  ;;  %v2273_v34 = vsel %vm1158_vm6, %v2229_v58, 0.0  ;;  %v5233_v12 = vsub.f32 %v5603_v9, %v5048_v24 }
 0x29c   : > { %v2258_v50 = vadd.f32 %v2257_v28, %v2256_v36  ;;  %v2231_v36 = vmul.f32 %v5201_v49, %v5201_v49  ;;  %v2232_v53 = vmul.f32 %v5209_v52, %v5209_v52  ;;  %v2237_v32 = vmul.f32 %v5054_v42, %v5054_v42 }
 0x29d   : > { %v2235_v13 = vmul.f32 %v5233_v12, %v5233_v12  ;;  %v2238_v4 = vmul.f32 %v5057_v1, %v5057_v1 }
 0x29e   : > { %v2260_v57 = vadd.f32 %v2259_v2, %v2258_v50  ;;  %v5225_v50 = vsub.f32 %v5602_v63, %v5048_v24  ;;  %v2275_v2 = vsel %vm1158_vm6, %v2230_v7, 0.0  ;;  %v2236_v24 = vmul.f32 %v5051_v40, %v5051_v40 }
 0x29f   : > { %v2289_v8 = vsel %vm1158_vm6, %v2237_v32, 0.0  ;;  %v2242_v63 = vmul.f32 %v5069_v35, %v5069_v35 }
 0x2a0   : > { %v2262_v47 = vadd.f32 %v2261_v46, %v2260_v57  ;;  %v2233_v46 = vmul.f32 %v5217_v56, %v5217_v56  ;;  %v2234_v23 = vmul.f32 %v5225_v50, %v5225_v50  ;;  %v2287_v58 = vsel %vm1158_vm6, %v2236_v24, 0.0 }
 0x2a2   : > { %v2264_v51 = vadd.f32 %v2263_v45, %v2262_v47  ;;  %v2277_v47 = vsel %vm1158_vm6, %v2231_v36, 0.0  ;;  %v2279_v45 = vsel %vm1158_vm6, %v2232_v53, 0.0  ;;  %v2241_v36 = vmul.f32 %v5066_v21, %v5066_v21 }
 0x2a4   : > { %v2266_v5 = vadd.f32 %v2265_v11, %v2264_v51  ;;  %v2281_v11 = vsel %vm1158_vm6, %v2233_v46, 0.0  ;;  %v2297_v9 = vsel %vm1158_vm6, %v2241_v36, 0.0 }
 0x2a6   : > { %v2268_v26 = vadd.f32 %v2267_v19, %v2266_v5  ;;  %v2283_v5 = vsel %vm1158_vm6, %v2234_v23, 0.0  ;;  %v2285_v19 = vsel %vm1158_vm6, %v2235_v13, 0.0 }
 0x2a8   : > { %v2270_v22 = vadd.f32 %v2269_v59, %v2268_v26 }
 0x2aa   : > { %v2272_v16 = vadd.f32 %v2271_v0, %v2270_v22  ;;  %v2239_v22 = vmul.f32 %v5060_v30, %v5060_v30  ;;  %v2240_v0 = vmul.f32 %v5063_v18, %v5063_v18 }
 0x2ac   : > { %v2274_v28 = vadd.f32 %v2273_v34, %v2272_v16  ;;  %v2291_v16 = vsel %vm1158_vm6, %v2238_v4, 0.0  ;;  %v2293_v34 = vsel %vm1158_vm6, %v2239_v22, 0.0  ;;  %v2295_v53 = vsel %vm1158_vm6, %v2240_v0, 0.0 }
 0x2ae   : > { %v2276_v57 = vadd.f32 %v2275_v2, %v2274_v28 }
 0x2b0   : > { %v2278_v39 = vadd.f32 %v2277_v47, %v2276_v57  ;;  %v2243_v57 = vmul.f32 %v5072_v33, %v5072_v33  ;;  %v2244_v47 = vmul.f32 %v5075_v37, %v5075_v37 }
 0x2b2   : > { %v2280_v51 = vadd.f32 %v2279_v45, %v2278_v39  ;;  %v2299_v39 = vsel %vm1158_vm6, %v2242_v63, 0.0  ;;  %v2245_v45 = vmul.f32 %v5078_v48, %v5078_v48 }
 0x2b4   : > { %v2282_v38 = vadd.f32 %v2281_v11, %v2280_v51  ;;  %v2301_v51 = vsel %vm1158_vm6, %v2243_v57, 0.0  ;;  %v2246_v11 = vmul.f32 %v5081_v44, %v5081_v44 }
 0x2b6   : > { %v2284_v20 = vadd.f32 %v2283_v5, %v2282_v38  ;;  %v2303_v38 = vsel %vm1158_vm6, %v2244_v47, 0.0  ;;  %v2247_v5 = vmul.f32 %v5084_v43, %v5084_v43 }
 0x2b8   : > { %v2286_v26 = vadd.f32 %v2285_v19, %v2284_v20  ;;  %v2305_v20 = vsel %vm1158_vm6, %v2245_v45, 0.0  ;;  %v2307_v19 = vsel %vm1158_vm6, %v2246_v11, 0.0  ;;  %v2309_v4 = vsel %vm1158_vm6, %v2247_v5, 0.0 }
 0x2ba   : > { %v2288_v59 = vadd.f32 %v2287_v58, %v2286_v26 }
 0x2bc   : > { %v2290_v7 = vadd.f32 %v2289_v8, %v2288_v59 }
 0x2be   : > { %v2292_v60 = vadd.f32 %v2291_v16, %v2290_v7 }
 0x2c0   : > { %v2294_v28 = vadd.f32 %v2293_v34, %v2292_v60 }
 0x2c2   : > { %v2296_v2 = vadd.f32 %v2295_v53, %v2294_v28 }
 0x2c4   : > { %v2298_v46 = vadd.f32 %v2297_v9, %v2296_v2 }
 0x2c6   : > { %v2300_v23 = vadd.f32 %v2299_v39, %v2298_v46 }
 0x2c8   : > { %v2302_v13 = vadd.f32 %v2301_v51, %v2300_v23 }
 0x2ca   : > { %v2304_v24 = vadd.f32 %v2303_v38, %v2302_v13 }
 0x2cc   : > { %v2306_v32 = vadd.f32 %v2305_v20, %v2304_v24 }
 0x2ce   : > { %v2308_v26 = vadd.f32 %v2307_v19, %v2306_v32 }
 0x2d0   : > { %v2310_v58 = vadd.f32 %v2309_v4, %v2308_v26 }
 0x2d2   : > { %v2311_v59 = vrot.slane %v2310_v58, 4 }
 0x2d4   : > { %v2312_v22 = vadd.f32 %v2311_v59, %v2310_v58 }
 0x2d6   : > { %v2313_v8 = vrot.slane %v2312_v22, 2 }
 0x2d8   : > { %v2314_v7 = vadd.f32 %v2313_v8, %v2312_v22 }
 0x2da   : > { %v2315_v0 = vrot.slane %v2314_v7, 1 }
 0x2dc   : > { %v2316_v16 = vadd.f32 %v2315_v0, %v2314_v7 }
 0x2de   : > { %v2317_v60 = vmul.f32 0.00390625, %v2316_v16 }
 0x2e0   : > { %v2318_v36 = vadd.f32 1e-05, %v2317_v60 }
 0x2e2   : > { %3455 = vrsqrt.f32 %v2318_v36 }
 0x2ec   : > { %v5282_v34 = vpop.eup %3455 }
 0x2ed   : > { %v2349_v28 = vmul.f32 %v5282_v34, %v5078_v48  ;;  %v2351_v63 = vmul.f32 %v5282_v34, %v5084_v43  ;;  %v2320_v53 = vmul.f32 %v5282_v34, %v5089_v41  ;;  %v5292_v2 = vmul.f32 %v5282_v34, %v5094_v6 }
 0x2ee   : > { %v2322_v57 = vmul.f32 %v5282_v34, %v5099_v29  ;;  %v5298_v9 = vmul.f32 %v5282_v34, %v5104_v25  ;;  %v2324_v48 = vmul.f32 %v5282_v34, %v5113_v61  ;;  %v5306_v41 = vmul.f32 %v5282_v34, %v5120_v27 }
 0x2ef   : > { %v2397_v46 = vsel %vm1158_vm6, %v2349_v28, -inf  ;;  %v2398_v43 = vsel %vm1158_vm6, %v2351_v63, -inf  ;;  %v2326_v6 = vmul.f32 %v5282_v34, %v5129_v15  ;;  %v5312_v29 = vmul.f32 %v5282_v34, %v5137_v14 }
 0x2f0   : > { %v2399_v47 = vmax.f32 %v2397_v46, %v2398_v43  ;;  %v2328_v25 = vmul.f32 %v5282_v34, %v5145_v54  ;;  %v5318_v61 = vmul.f32 %v5282_v34, %v5153_v55  ;;  %v2330_v39 = vmul.f32 %v5282_v34, %v5161_v17 }
 0x2f1   : > { %v5324_v27 = vmul.f32 %v5282_v34, %v5169_v31  ;;  %v2332_v15 = vmul.f32 %v5282_v34, %v5177_v62  ;;  %v5330_v14 = vmul.f32 %v5282_v34, %v5185_v10  ;;  %v2334_v54 = vmul.f32 %v5282_v34, %v5193_v3 }
 0x2f2   : > { %v2447_v23 = vrot.slane %v2399_v47, 1  ;;  %v5336_v55 = vmul.f32 %v5282_v34, %v5201_v49  ;;  %v2336_v17 = vmul.f32 %v5282_v34, %v5209_v52  ;;  %v5342_v31 = vmul.f32 %v5282_v34, %v5217_v56 }
 0x2f3   : > { %v2338_v62 = vmul.f32 %v5282_v34, %v5225_v50  ;;  %v5348_v10 = vmul.f32 %v5282_v34, %v5233_v12  ;;  %v2340_v3 = vmul.f32 %v5282_v34, %v5051_v40  ;;  %v5356_v49 = vmul.f32 %v5282_v34, %v5054_v42 }
 0x2f4   : > { %v5352_v45 = vmax.f32 %v2399_v47, %v2447_v23  ;;  %v2342_v52 = vmul.f32 %v5282_v34, %v5057_v1  ;;  %v2344_v56 = vmul.f32 %v5282_v34, %v5063_v18  ;;  %v5364_v50 = vmul.f32 %v5282_v34, %v5060_v30 }
 0x2f5   : > { %v2346_v12 = vmul.f32 %v5282_v34, %v5069_v35  ;;  %v5370_v40 = vmul.f32 %v5282_v34, %v5072_v33  ;;  %v2348_v42 = vmul.f32 %v5282_v34, %v5075_v37  ;;  %v2350_v1 = vmul.f32 %v5282_v34, %v5081_v44 }
 0x2f6   : > { %v2352_v51 = vsel %vm1158_vm6, %v2320_v53, -inf  ;;  %v2353_v18 = vsel %vm1158_vm6, %v2322_v57, -inf  ;;  %v2358_v30 = vsel %vm1158_vm6, %v2324_v48, -inf  ;;  %v2359_v11 = vsel %vm1158_vm6, %v2326_v6, -inf }
 0x2f7   : > { %v2354_v13 = vmax.f32 %v2352_v51, %v2353_v18  ;;  %v2364_v35 = vsel %vm1158_vm6, %v2328_v25, -inf  ;;  %v2365_v33 = vsel %vm1158_vm6, %v2330_v39, -inf  ;;  %v2360_v38 = vmax.f32 %v2358_v30, %v2359_v11 }
 0x2f8   : > { %v2366_v24 = vmax.f32 %v2364_v35, %v2365_v33  ;;  %v2370_v37 = vsel %vm1158_vm6, %v2332_v15, -inf  ;;  %v2371_v44 = vsel %vm1158_vm6, %v2334_v54, -inf  ;;  %v2376_v20 = vsel %vm1158_vm6, %v2336_v17, -inf }
 0x2f9   : > { %v2372_v5 = vmax.f32 %v2370_v37, %v2371_v44  ;;  %v2377_v32 = vsel %vm1158_vm6, %v2338_v62, -inf  ;;  %v2382_v19 = vsel %vm1158_vm6, %v2340_v3, -inf  ;;  %v2383_v4 = vsel %vm1158_vm6, %v2342_v52, -inf }
 0x2fa   : > { %v2378_v26 = vmax.f32 %v2376_v20, %v2377_v32  ;;  %v2388_v58 = vsel %vm1158_vm6, %v2344_v56, -inf  ;;  %v2389_v59 = vsel %vm1158_vm6, %v2346_v12, -inf  ;;  %v2384_v22 = vmax.f32 %v2382_v19, %v2383_v4 }
 0x2fb   : > { %v2390_v8 = vmax.f32 %v2388_v58, %v2389_v59  ;;  %v2394_v7 = vsel %vm1158_vm6, %v2348_v42, -inf  ;;  %v2395_v0 = vsel %vm1158_vm6, %v2350_v1, -inf  ;;  %v2408_v60 = vrot.slane %v2354_v13, 1 }
 0x2fc   : > { %v2396_v16 = vmax.f32 %v2394_v7, %v2395_v0  ;;  %v2409_v36 = vrot.slane %v2360_v38, 1  ;;  %v2410_v28 = vrot.slane %v2366_v24, 1  ;;  %v2411_v63 = vrot.slane %v2372_v5, 1 }
 0x2fd   : > { %v2412_v53 = vrot.slane %v2378_v26, 1  ;;  %v2413_v57 = vrot.slane %v2384_v22, 1  ;;  %v2414_v48 = vrot.slane %v2390_v8, 1  ;;  %v5392_v43 = vmax.f32 %v2354_v13, %v2408_v60 }
 0x2fe   : > { %v2415_v46 = vrot.slane %v2396_v16, 1  ;;  %v5394_v6 = vmax.f32 %v2360_v38, %v2409_v36  ;;  %v5396_v47 = vmax.f32 %v2366_v24, %v2410_v28  ;;  %v2345_v25 = vmul.f32 %v5282_v34, %v5066_v21 }
 0x2ff   : > { %v5400_v39 = vmax.f32 %v2372_v5, %v2411_v63  ;;  %v5402_v15 = vmax.f32 %v2384_v22, %v2413_v57  ;;  %v5404_v23 = vmax.f32 %v2390_v8, %v2414_v48  ;;  %v2511_v17 = vrot.slane %v5392_v43, 4 }
 0x300   : > { %v5406_v54 = vmax.f32 %v2396_v16, %v2415_v46  ;;  %v2512_v62 = vrot.slane %v5394_v6, 3  ;;  %v2514_v3 = vrot.slane %v5396_v47, 2  ;;  %v5411_v52 = vmax.f32 %v2378_v26, %v2412_v53 }
 0x301   : > { %v2516_v56 = vrot.slane %v5400_v39, 1  ;;  %v2519_v21 = vrot.slane %v5402_v15, 7  ;;  %v2521_v34 = vrot.slane %v5404_v23, 6  ;;  %v2355_v1 = vsel %vm1158_vm6, %v5292_v2, -inf }
 0x302   : > { %v2513_v12 = vsel %vm2473_vm14, %v2512_v62, %v2511_v17  ;;  %v2523_v42 = vrot.slane %v5406_v54, 5  ;;  %v2356_v51 = vsel %vm1158_vm6, %v5298_v9, -inf  ;;  %v2361_v30 = vsel %vm1158_vm6, %v5306_v41, -inf }
 0x303   : > { %v2515_v18 = vsel %vm2476_vm15, %v2514_v3, %v2513_v12  ;;  %v2362_v13 = vsel %vm1158_vm6, %v5312_v29, -inf  ;;  %v2367_v11 = vsel %vm1158_vm6, %v5318_v61, -inf  ;;  %v2368_v33 = vsel %vm1158_vm6, %v5324_v27, -inf }
 0x304   : > { %v2517_v35 = vsel %vm2479_vm0, %v2516_v56, %v2515_v18  ;;  %v2373_v2 = vsel %vm1158_vm6, %v5330_v14, -inf  ;;  %v2374_v9 = vsel %vm1158_vm6, %v5336_v55, -inf  ;;  %v2379_v29 = vsel %vm1158_vm6, %v5342_v31, -inf }
 0x305   : > { %v2518_v41 = vsel %vm2482_vm1, %v5411_v52, %v2517_v35  ;;  %v2380_v61 = vsel %vm1158_vm6, %v5348_v10, -inf  ;;  %v2385_v38 = vsel %vm1158_vm6, %v5356_v49, -inf  ;;  %v2386_v14 = vsel %vm1158_vm6, %v5364_v50, -inf }
 0x306   : > { %v2520_v27 = vsel %vm2485_vm2, %v2519_v21, %v2518_v41  ;;  %v2391_v24 = vsel %vm1158_vm6, %v2345_v25, -inf  ;;  %v2392_v55 = vsel %vm1158_vm6, %v5370_v40, -inf  ;;  %v2472_v31 = vrot.slane %v5394_v6, 7 }
 0x307   : > { %v2522_v37 = vsel %vm2488_vm3, %v2521_v34, %v2520_v27  ;;  %v2494_v44 = vrot.slane %v5392_v43, 2  ;;  %v2495_v10 = vrot.slane %v5394_v6, 1  ;;  %v2475_v5 = vrot.slane %v5396_v47, 6 }
 0x308   : > { %v2524_v49 = vsel %vm2491_vm4, %v2523_v42, %v2522_v37  ;;  %v2528_v20 = vrot.slane %v5392_v43, 6  ;;  %v2529_v50 = vrot.slane %v5394_v6, 5  ;;  %v2498_v32 = vrot.slane %v5400_v39, 7 }
 0x309   : > { %2525 = vrot.lane.b32.xlu0 %v2524_v49, %s3469_s21  ;;  %v2496_v40 = vsel %vm2473_vm14, %v2495_v10, %v2494_v44  ;;  %v2500_v19 = vrot.slane %v5411_v52, 6  ;;  %v2502_v26 = vrot.slane %v5402_v15, 5  ;;  %v2504_v58 = vrot.slane %v5404_v23, 4  ;;  %s2694_s21 = sshll.u32 %s5605_s13, 3 }
 0x30a   : > { %v2497_v4 = vsel %vm2476_vm15, %v5396_v47, %v2496_v40  ;;  %v2506_v59 = vrot.slane %v5406_v54, 3  ;;  %v2357_v22 = vmax.f32 %v2355_v1, %v2356_v51  ;;  %v2363_v7 = vmax.f32 %v2361_v30, %v2362_v13  ;;  %s168_s24 = scalar_lea.vmem %s5591_s3, %s2694_s21 }
 0x30b   : > { %v2499_v8 = vsel %vm2479_vm0, %v2498_v32, %v2497_v4  ;;  %v2369_v0 = vmax.f32 %v2367_v11, %v2368_v33  ;;  %v2375_v16 = vmax.f32 %v2373_v2, %v2374_v9  ;;  %v2381_v36 = vmax.f32 %v2379_v29, %v2380_v61 }
 0x30c   : > { %v2501_v60 = vsel %vm2482_vm1, %v2500_v19, %v2499_v8  ;;  %v2387_v28 = vmax.f32 %v2385_v38, %v2386_v14  ;;  %v2393_v63 = vmax.f32 %v2391_v24, %v2392_v55  ;;  %v2440_v57 = vrot.slane %v2357_v22, 1 }
 0x30d   : > { %v2503_v53 = vsel %vm2485_vm2, %v2502_v26, %v2501_v60  ;;  %v2441_v48 = vrot.slane %v2363_v7, 1  ;;  %v2442_v46 = vrot.slane %v2369_v0, 1  ;;  %v2443_v17 = vrot.slane %v2375_v16, 1 }
 0x30e   : > { %v2505_v25 = vsel %vm2488_vm3, %v2504_v58, %v2503_v53  ;;  %v2444_v62 = vrot.slane %v2381_v36, 1  ;;  %v2445_v3 = vrot.slane %v2387_v28, 1  ;;  %v2446_v21 = vrot.slane %v2393_v63, 1 }
 0x30f   : > { %v2507_v56 = vsel %vm2491_vm4, %v2506_v59, %v2505_v25  ;;  %v5472_v34 = vmax.f32 %v2357_v22, %v2440_v57  ;;  %v5474_v12 = vmax.f32 %v2363_v7, %v2441_v48  ;;  %v5477_v42 = vmax.f32 %v2369_v0, %v2442_v46 }
 0x310   : > { %2508 = vrot.lane.b32.xlu1 %v2507_v56, %s3466_s18  ;;  %v5479_v1 = vmax.f32 %v2375_v16, %v2443_v17  ;;  %v5481_v51 = vmax.f32 %v2381_v36, %v2444_v62  ;;  %v5483_v18 = vmax.f32 %v2387_v28, %v2445_v3  ;;  %v2531_v30 = vrot.slane %v5396_v47, 4  ;;  %s3475_s18 = smov 24  }
 0x311   : > { %v5486_v13 = vmax.f32 %v2393_v63, %v2446_v21  ;;  %v2553_v11 = vrot.slane %v5474_v12, 7  ;;  %v2565_v35 = vrot.slane %v5352_v45, 1  ;;  %v2555_v33 = vrot.slane %v5477_v42, 6 }
 0x312   : > { %v2557_v2 = vrot.slane %v5479_v1, 5  ;;  %v2559_v9 = vrot.slane %v5481_v51, 4  ;;  %v2570_v41 = vrot.slane %v5472_v34, 2  ;;  %v2561_v61 = vrot.slane %v5483_v18, 3 }
 0x313   : > { %v2554_v29 = vsel %vm2473_vm14, %v2553_v11, %v5472_v34  ;;  %v2563_v38 = vrot.slane %v5486_v13, 2  ;;  %v2587_v27 = vrot.slane %v5472_v34, 4  ;;  %v2571_v24 = vrot.slane %v5474_v12, 1 }
 0x314   : > { %v2556_v14 = vsel %vm2476_vm15, %v2555_v33, %v2554_v29  ;;  %v2588_v55 = vrot.slane %v5474_v12, 3  ;;  %v2590_v37 = vrot.slane %v5477_v42, 2  ;;  %v2604_v10 = vrot.slane %v5472_v34, 6 }
 0x315   : > { %v2558_v44 = vsel %vm2479_vm0, %v2557_v2, %v2556_v14  ;;  %v2605_v49 = vrot.slane %v5474_v12, 5  ;;  %v2530_v40 = vsel %vm2473_vm14, %v2529_v50, %v2528_v20  ;;  %v2607_v19 = vrot.slane %v5477_v42, 4 }
 0x316   : > { %v2560_v32 = vsel %vm2482_vm1, %v2559_v9, %v2558_v44  ;;  %v2532_v26 = vsel %vm2476_vm15, %v2531_v30, %v2530_v40  ;;  %v2533_v4 = vrot.slane %v5400_v39, 3  ;;  %v2535_v59 = vrot.slane %v5411_v52, 2 }
 0x317   : > { %v2562_v58 = vsel %vm2485_vm2, %v2561_v61, %v2560_v32  ;;  %v2537_v22 = vrot.slane %v5402_v15, 1  ;;  %v2589_v8 = vsel %vm2473_vm14, %v2588_v55, %v2587_v27  ;;  %v2592_v0 = vrot.slane %v5479_v1, 1 }
 0x318   : > { %v2564_v7 = vsel %vm2488_vm3, %v2563_v38, %v2562_v58  ;;  %v2534_v20 = vsel %vm2479_vm0, %v2533_v4, %v2532_v26  ;;  %v2591_v50 = vsel %vm2476_vm15, %v2590_v37, %v2589_v8  ;;  %v2540_v36 = vrot.slane %v5406_v54, 7 }
 0x319   : > { %v2566_v16 = vsel %vm2491_vm4, %v2565_v35, %v2564_v7  ;;  %v2536_v60 = vsel %vm2482_vm1, %v2535_v59, %v2534_v20  ;;  %v2595_v28 = vrot.slane %v5483_v18, 7  ;;  %v2593_v53 = vsel %vm2479_vm0, %v2592_v0, %v2591_v50 }
 0x31a   : > { %2567 = vrot.lane.b32.xlu0 %v2566_v16, %s3474_s17  ;;  %v2538_v63 = vsel %vm2485_vm2, %v2537_v22, %v2536_v60  ;;  %v2597_v57 = vrot.slane %v5486_v13, 6  ;;  %v2572_v48 = vsel %vm2473_vm14, %v2571_v24, %v2570_v41  ;;  %v2594_v25 = vsel %vm2482_vm1, %v5481_v51, %v2593_v53 }
 0x31b   : > { %v2539_v46 = vsel %vm2488_vm3, %v5404_v23, %v2538_v63  ;;  %v2573_v17 = vsel %vm2476_vm15, %v5477_v42, %v2572_v48  ;;  %v2574_v62 = vrot.slane %v5479_v1, 7  ;;  %v2596_v56 = vsel %vm2485_vm2, %v2595_v28, %v2594_v25 }
 0x31c   : > { %v2541_v3 = vsel %vm2491_vm4, %v2540_v36, %v2539_v46  ;;  %v2599_v21 = vrot.slane %v5352_v45, 5  ;;  %v2576_v34 = vrot.slane %v5481_v51, 6  ;;  %v2598_v12 = vsel %vm2488_vm3, %v2597_v57, %v2596_v56 }
 0x31d   : > { %2542 = vrot.lane.b32.xlu1 %v2541_v3, %s3475_s18  ;;  %v2575_v30 = vsel %vm2479_vm0, %v2574_v62, %v2573_v17  ;;  %v2578_v11 = vrot.slane %v5483_v18, 5  ;;  %v2580_v42 = vrot.slane %v5486_v13, 4  ;;  %v2606_v2 = vsel %vm2473_vm14, %v2605_v49, %v2604_v10 }
 0x31e   : > { %v2600_v35 = vsel %vm2491_vm4, %v2599_v21, %v2598_v12  ;;  %v2577_v33 = vsel %vm2482_vm1, %v2576_v34, %v2575_v30  ;;  %v2609_v9 = vrot.slane %v5479_v1, 3  ;;  %v2582_v29 = vrot.slane %v5352_v45, 3 }
 0x31f   : > { %2601 = vrot.lane.b32.xlu0 %v2600_v35, %s3476_s19  ;;  %v2579_v41 = vsel %vm2485_vm2, %v2578_v11, %v2577_v33  ;;  %v2608_v61 = vsel %vm2476_vm15, %v2607_v19, %v2606_v2  ;;  %v2611_v38 = vrot.slane %v5481_v51, 2  ;;  %v2613_v24 = vrot.slane %v5483_v18, 1 }
 0x320   : > { %v2581_v27 = vsel %vm2488_vm3, %v2580_v42, %v2579_v41  ;;  %v2610_v14 = vsel %vm2479_vm0, %v2609_v9, %v2608_v61  ;;  %v2616_v44 = vrot.slane %v5352_v45, 7  ;;  %v2478_v10 = vrot.slane %v5400_v39, 5 }
 0x321   : > { %v2583_v55 = vsel %vm2491_vm4, %v2582_v29, %v2581_v27  ;;  %v2612_v1 = vsel %vm2482_vm1, %v2611_v38, %v2610_v14  ;;  %v2474_v51 = vsel %vm2473_vm14, %v2472_v31, %v5392_v43  ;;  %v2481_v49 = vrot.slane %v5411_v52, 4 }
 0x322   : > { %2584 = vrot.lane.b32.xlu1 %v2583_v55, %s3471_s6  ;;  %v2614_v37 = vsel %vm2485_vm2, %v2613_v24, %v2612_v1  ;;  %v2477_v40 = vsel %vm2476_vm15, %v2475_v5, %v2474_v51  ;;  %v2484_v45 = vrot.slane %v5402_v15, 3  ;;  %v2487_v19 = vrot.slane %v5404_v23, 2 }
 0x323   : > { %v2615_v18 = vsel %vm2488_vm3, %v5486_v13, %v2614_v37  ;;  %v2480_v39 = vsel %vm2479_vm0, %v2478_v10, %v2477_v40  ;;  %v2490_v43 = vrot.slane %v5406_v54, 1 }
 0x324   : > { %v2617_v32 = vsel %vm2491_vm4, %v2616_v44, %v2615_v18  ;;  %v2483_v6 = vsel %vm2482_vm1, %v2481_v49, %v2480_v39 }
 0x325   : > { %v2486_v52 = vsel %vm2485_vm2, %v2484_v45, %v2483_v6 }
 0x326   : > { %2618 = vrot.lane.b32.xlu1 %v2617_v32, %s3477_s20  ;;  %v2489_v47 = vsel %vm2488_vm3, %v2487_v19, %v2486_v52 }
 0x327   : > { %v2492_v31 = vsel %vm2491_vm4, %v2490_v43, %v2489_v47 }
 0x37b   : > { %v2526_v5 = vpop.permute.xlu0 %2525 }
 0x382   : > { %v2509_v13 = vpop.permute.xlu1 %2508 }
 0x383   : > { %v2621_v15 = vsel %vm1158_vm6, %v2492_v31, %v2509_v13  ;;  %vm2632_vm6 = vcmask 523264  }
 0x384   : > { %v2622_v4 = vsel %vm1226_vm8, %v2621_v15, %v2526_v5 }
 0x38c   : > { %v2568_v26 = vpop.permute.xlu0 %2567 }
 0x38f   : > { %v2543_v23 = vpop.permute.xlu1 %2542 }
 0x390   : > { %v2624_v58 = vsel %vm2623_vm5, %v2622_v4, %v2543_v23 }
 0x391   : > { %v2626_v22 = vsel %vm2625_vm7, %v2624_v58, %v2568_v26  ;;  %v2602_v54 = vpop.permute.xlu0 %2601 }
 0x394   : > { %v2585_v59 = vpop.permute.xlu1 %2584 }
 0x395   : > { %v2627_v8 = vsel %vm1694_vm10, %v2626_v22, %v2585_v59 }
 0x396   : > { %v2629_v20 = vsel %vm2628_vm9, %v2627_v8, %v2602_v54 }
 0x398   : > { %v2619_v7 = vpop.permute.xlu1 %2618 }
 0x399   : > { %v2631_v50 = vsel %vm2630_vm11, %v2629_v20, %v2619_v7 }
 0x39a   : > { %2633 = vst.msk [vmem:[%s168_s24] sm:$0xff] %vm2632_vm6, %v2631_v50 }
 0x39b PF: > { %s13_s12 = sadd.s32 1, %s3463_s12  }
 0x39c   : > { %p10_p4 = scmp.ge.s32.totalorder %s13_s12, 4  }
 0x39e   :  { %12 = sbr.rel (!%p10_p4) target bundleno = 1 (0x1), region = 62 }

// kernel: convae_forward.7
= control target key start
LH: loop header
LB: loop body
LE: loop exit
PB: predicated region body
PF: predicated region fallthrough
CT: control target
= control target key end

     0   :  { %s4354_s18 = smov 0   ;;  %s6704_s0 = inlined_call_operand.vmem [shape: f32[2,8,8,8], index: 0, kind: input, shape index: {}]   ;;  %s6705_s1 = inlined_call_operand.vmem [shape: bf16[72,8], index: 1, kind: input, shape index: {}]   ;;  %s6706_s2 = inlined_call_operand.vmem [shape: f32[1,8], index: 2, kind: input, shape index: {}]   ;;  %s6707_s3 = inlined_call_operand.vmem [shape: bf16[72,4], index: 3, kind: input, shape index: {}]   ;;  %s6708_s4 = inlined_call_operand.vmem [shape: f32[1,4], index: 4, kind: input, shape index: {}]   ;;  %s6709_s5 = inlined_call_operand.vmem [shape: f32[2,16,64], index: 5, kind: output, shape index: {}]  }
   0x1 LB: > { %s3449_s19 = sadd.s32 4294967295, %s4306_s18   ;;  %p3453_p0 = scmp.ge.s32.totalorder %s4306_s18, 1  ;;  %s4306_s18 = sphi %s4354_s18, %s15_s18  }
   0x2   : > { %p187_p1 = scmp.lt.s32.totalorder %s4306_s18, 3 }
   0x4   : > { %p188_p2 = pnand %p3453_p0, %p187_p1 }
   0x5   : > { %p215_p3 = scmp.lt.s32.totalorder (!%p188_p2), %s3449_s19, 1  ;;  %vm354_vm0 = vcmask (!%p188_p2), 1040384   ;;  %vm363_vm1 = vcmask (!%p188_p2), 1041408   ;;  %vm372_vm2 = vcmask (!%p188_p2), 1042432   ;;  %vm381_vm3 = vcmask (!%p188_p2), 1043456   ;;  %s4309_s24 = smov (!%p188_p2), 8  }
   0x6   : > { %191 = sbr.rel (%p188_p2) target bundleno = 1445 (0x5a5), region = 40  ;;  %vm390_vm4 = vcmask (!%p188_p2), 1044480   ;;  %vm399_vm5 = vcmask (!%p188_p2), 1045504   ;;  %vm408_vm6 = vcmask (!%p188_p2), 1046528   ;;  %v4308_v1 = vmov (!%p188_p2), 0.0   ;;  %s4310_s25 = smov (!%p188_p2), 16  }
   0x7   : > { %v4371_v2 = vrot.slane (!%p188_p2), %v4308_v1, 1  ;;  %v4373_v3 = vrot.slane (!%p188_p2), %v4308_v1, 2  ;;  %vm660_vm7 = vcmask (!%p188_p2), 64512   ;;  %vm678_vm8 = vcmask (!%p188_p2), 130048   ;;  %s4311_s11 = smov (!%p188_p2), 24   ;;  %s4312_s12 = smov (!%p188_p2), 48  }
   0x8   : > { %vm809_vm9 = vcmask (!%p188_p2), 195584   ;;  %vm842_vm10 = vcmask (!%p188_p2), 392192   ;;  %vm934_vm11 = vcmask (!%p188_p2), 588800   ;;  %vm2340_vm12 = vcmask (!%p188_p2), 31744   ;;  %s4313_s6 = smov (!%p188_p2), 4   ;;  %s4314_s7 = smov (!%p188_p2), 12  }
   0x9   : > { %vm2789_vm13 = vcmask (!%p188_p2), 1041409   ;;  %vm2792_vm14 = vcmask (!%p188_p2), 1042434   ;;  %vm2795_vm15 = vcmask (!%p188_p2), 1043459   ;;  %s4317_s8 = smov (!%p188_p2), 32   ;;  %s4318_s9 = smov (!%p188_p2), 36  }
   0xa   : > { %s4319_s10 = smov (!%p188_p2), 40   ;;  %s4322_s13 = smov (!%p188_p2), 56  }
   0xb   : > { %s4323_s14 = smov (!%p188_p2), 60  }
   0xd   : > { %s6711_s19 = smov (!%p215_p3, %s3449_s19), 1 }
   0xe   : > { %s3536_s20 = sshll.u32 %s6711_s19, 6  ;;  %s3537_s15 = sshll.u32 %s6711_s19, 4 }
   0xf   : > { %s4368_s23 = scalar_lea.vmem %s6704_s0, %s3536_s20  ;;  %s224_s19 = scalar_lea.vmem %s6709_s5, %s3537_s15 }
  0x10   : > { %v226_v0 = vld [vmem:[%s4368_s23] sm:$0xff]  ;;  %v227_v4 = vld [vmem:[%s4368_s23 + $0x8] sm:$0xff]  ;;  %v4401_v41 = vld [vmem:[%s4368_s23 + $0x10] sm:$0xff] }
  0x11   : > { %v242_v5 = vrot.slane %v226_v0, 7  ;;  %v258_v6 = vrot.slane %v226_v0, 6  ;;  %v274_v7 = vrot.slane %v226_v0, 5  ;;  %v290_v8 = vrot.slane %v226_v0, 4 }
  0x12   : > { %v306_v9 = vrot.slane %v226_v0, 3  ;;  %v322_v10 = vrot.slane %v226_v0, 2  ;;  %v338_v11 = vrot.slane %v226_v0, 1  ;;  %v243_v12 = vrot.slane %v227_v4, 7 }
  0x13   : > { %v355_v13 = vsel %vm354_vm0, 0.0, %v242_v5  ;;  %v259_v14 = vrot.slane %v227_v4, 6  ;;  %v275_v15 = vrot.slane %v227_v4, 5  ;;  %v291_v16 = vrot.slane %v227_v4, 4 }
  0x14   : > { %v364_v17 = vsel %vm363_vm1, %v355_v13, 0.0  ;;  %v417_v18 = vsel %vm354_vm0, 0.0, %v306_v9  ;;  %v307_v19 = vrot.slane %v227_v4, 3  ;;  %v323_v20 = vrot.slane %v227_v4, 2 }
  0x15   : > { %v373_v21 = vsel %vm372_vm2, %v364_v17, %v258_v6  ;;  %v425_v22 = vsel %vm363_vm1, %v417_v18, 0.0  ;;  %v339_v23 = vrot.slane %v227_v4, 1  ;;  %v356_v24 = vsel %vm354_vm0, 0.0, %v243_v12 }
  0x16   : > { %v382_v25 = vsel %vm381_vm3, %v373_v21, 0.0  ;;  %v433_v26 = vsel %vm372_vm2, %v425_v22, %v322_v10  ;;  %v365_v27 = vsel %vm363_vm1, %v356_v24, 0.0  ;;  %v418_v28 = vsel %vm354_vm0, 0.0, %v307_v19 }
  0x17   : > { %v391_v29 = vsel %vm390_vm4, %v382_v25, %v274_v7  ;;  %v441_v30 = vsel %vm381_vm3, %v433_v26, 0.0  ;;  %v374_v31 = vsel %vm372_vm2, %v365_v27, %v259_v14  ;;  %v426_v32 = vsel %vm363_vm1, %v418_v28, 0.0 }
  0x18   : > { %v400_v33 = vsel %vm399_vm5, %v391_v29, 0.0  ;;  %v449_v34 = vsel %vm390_vm4, %v441_v30, %v338_v11  ;;  %v383_v35 = vsel %vm381_vm3, %v374_v31, 0.0  ;;  %v434_v36 = vsel %vm372_vm2, %v426_v32, %v323_v20 }
  0x19   : > { %v4395_v37 = vsel %vm408_vm6, %v400_v33, %v290_v8  ;;  %v457_v38 = vsel %vm399_vm5, %v449_v34, 0.0  ;;  %v392_v39 = vsel %vm390_vm4, %v383_v35, %v275_v15  ;;  %v442_v40 = vsel %vm381_vm3, %v434_v36, 0.0  ;;  %v4440_v8 = vld [vmem:[%s4368_s23 + $0x18] sm:$0xff] }
  0x1a   : > { %v4404_v42 = vsel %vm408_vm6, %v457_v38, %v226_v0  ;;  %v492_v43 = vrot.slane %v4395_v37, 1  ;;  %v577_v44 = vrot.slane %v4395_v37, 2  ;;  %v401_v45 = vsel %vm399_vm5, %v392_v39, 0.0  ;;  %v4477_v38 = vld [vmem:[%s4368_s23 + $0x20] sm:$0xff] }
  0x1b   : > { %v493_v46 = vrot.slane %v4404_v42, 1  ;;  %v578_v47 = vrot.slane %v4404_v42, 2  ;;  %v4412_v48 = vsel %vm408_vm6, %v401_v45, %v291_v16  ;;  %v450_v49 = vsel %vm390_vm4, %v442_v40, %v339_v23 }
  0x1c   : > { %v458_v50 = vsel %vm399_vm5, %v450_v49, 0.0  ;;  %v496_v51 = vrot.slane %v4412_v48, 1  ;;  %v581_v52 = vrot.slane %v4412_v48, 2  ;;  %v244_v53 = vrot.slane %v4401_v41, 7 }
  0x1d   : > { %v494_v54 = vsel %vm408_vm6, %v492_v43, %v493_v46  ;;  %v495_v55 = vsel %vm408_vm6, %v493_v46, %v4371_v2  ;;  %v579_v56 = vsel %vm399_vm5, %v577_v44, %v578_v47  ;;  %v580_v57 = vsel %vm399_vm5, %v578_v47, %v4373_v3 }
  0x1e   : > { %v3690_v58 = vpack.i.bf16 %v495_v55, %v494_v54  ;;  %v3700_v59 = vpack.i.bf16 %v580_v57, %v579_v56  ;;  %v4426_v60 = vsel %vm408_vm6, %v458_v50, %v227_v4  ;;  %v260_v61 = vrot.slane %v4401_v41, 6 }
  0x1f   : > { %v497_v62 = vrot.slane %v4426_v60, 1  ;;  %v582_v63 = vrot.slane %v4426_v60, 2  ;;  %v276_v0 = vrot.slane %v4401_v41, 5  ;;  %v292_v1 = vrot.slane %v4401_v41, 4 }
  0x20   : > { %3691 = vrot.lane.b32.xlu0 %v3690_v58, %s4309_s24  ;;  %3701 = vrot.lane.b32.xlu1 %v3700_v59, %s4310_s25  ;;  %v308_v5 = vrot.slane %v4401_v41, 3  ;;  %v324_v4 = vrot.slane %v4401_v41, 2  ;;  %v340_v6 = vrot.slane %v4401_v41, 1  ;;  %v357_v7 = vsel %vm354_vm0, 0.0, %v244_v53 }
  0x21   : > { %v498_v9 = vsel %vm408_vm6, %v496_v51, %v497_v62  ;;  %v499_v10 = vsel %vm408_vm6, %v497_v62, %v4371_v2  ;;  %v583_v11 = vsel %vm399_vm5, %v581_v52, %v582_v63  ;;  %v584_v12 = vsel %vm399_vm5, %v582_v63, %v4373_v3 }
  0x22   : > { %v3695_v13 = vpack.i.bf16 %v498_v9, %v4371_v2  ;;  %v3705_v14 = vpack.i.bf16 %v583_v11, %v4373_v3  ;;  %v366_v15 = vsel %vm363_vm1, %v357_v7, 0.0  ;;  %v419_v16 = vsel %vm354_vm0, 0.0, %v308_v5  ;;  %v4516_v7 = vld [vmem:[%s4368_s23 + $0x28] sm:$0xff] }
  0x23   : > { %v375_v17 = vsel %vm372_vm2, %v366_v15, %v260_v61  ;;  %v427_v18 = vsel %vm363_vm1, %v419_v16, 0.0  ;;  %v245_v19 = vrot.slane %v4440_v8, 7  ;;  %v261_v20 = vrot.slane %v4440_v8, 6 }
  0x24   : > { %3696 = vrot.lane.b32.xlu0 %v3695_v13, %s4309_s24  ;;  %532 = vrot.lane.b32.xlu1 %v499_v10, %s4309_s24  ;;  %v384_v21 = vsel %vm381_vm3, %v375_v17, 0.0  ;;  %v435_v22 = vsel %vm372_vm2, %v427_v18, %v324_v4  ;;  %v277_v23 = vrot.slane %v4440_v8, 5  ;;  %v293_v24 = vrot.slane %v4440_v8, 4 }
  0x25   : > { %v393_v25 = vsel %vm390_vm4, %v384_v21, %v276_v0  ;;  %v443_v26 = vsel %vm381_vm3, %v435_v22, 0.0  ;;  %v309_v27 = vrot.slane %v4440_v8, 3  ;;  %v325_v28 = vrot.slane %v4440_v8, 2 }
  0x26   : > { %v402_v29 = vsel %vm399_vm5, %v393_v25, 0.0  ;;  %v451_v30 = vsel %vm390_vm4, %v443_v26, %v340_v6  ;;  %v341_v31 = vrot.slane %v4440_v8, 1  ;;  %v358_v32 = vsel %vm354_vm0, 0.0, %v245_v19 }
  0x27   : > { %v4471_v33 = vsel %vm408_vm6, %v402_v29, %v292_v1  ;;  %v459_v34 = vsel %vm399_vm5, %v451_v30, 0.0  ;;  %v367_v35 = vsel %vm363_vm1, %v358_v32, 0.0  ;;  %v420_v36 = vsel %vm354_vm0, 0.0, %v309_v27 }
  0x28   : > { %3706 = vrot.lane.b32.xlu0 %v3705_v14, %s4310_s25  ;;  %617 = vrot.lane.b32.xlu1 %v584_v12, %s4310_s25  ;;  %v4483_v39 = vsel %vm408_vm6, %v459_v34, %v4401_v41  ;;  %v500_v40 = vrot.slane %v4471_v33, 1  ;;  %v585_v43 = vrot.slane %v4471_v33, 2  ;;  %v376_v44 = vsel %vm372_vm2, %v367_v35, %v261_v20 }
  0x29   : > { %v501_v45 = vrot.slane %v4483_v39, 1  ;;  %v586_v46 = vrot.slane %v4483_v39, 2  ;;  %v385_v47 = vsel %vm381_vm3, %v376_v44, 0.0  ;;  %v428_v49 = vsel %vm363_vm1, %v420_v36, 0.0 }
  0x2a   : > { %v394_v50 = vsel %vm390_vm4, %v385_v47, %v277_v23  ;;  %v436_v51 = vsel %vm372_vm2, %v428_v49, %v325_v28  ;;  %v246_v41 = vrot.slane %v4477_v38, 7  ;;  %v262_v63 = vrot.slane %v4477_v38, 6 }
  0x2b   : > { %v502_v52 = vsel %vm408_vm6, %v500_v40, %v501_v45  ;;  %v503_v53 = vsel %vm408_vm6, %v501_v45, %v4371_v2  ;;  %v587_v54 = vsel %vm399_vm5, %v585_v43, %v586_v46  ;;  %v588_v55 = vsel %vm399_vm5, %v586_v46, %v4373_v3  ;;  %v4558_v46 = vld [vmem:[%s4368_s23 + $0x30] sm:$0xff] }
  0x2c   : > { %v3710_v56 = vpack.i.bf16 %v503_v53, %v502_v52  ;;  %v3715_v57 = vpack.i.bf16 %v588_v55, %v587_v54  ;;  %v403_v58 = vsel %vm399_vm5, %v394_v50, 0.0  ;;  %v444_v59 = vsel %vm381_vm3, %v436_v51, 0.0 }
  0x2d   : > { %v4504_v61 = vsel %vm408_vm6, %v403_v58, %v293_v24  ;;  %v452_v62 = vsel %vm390_vm4, %v444_v59, %v341_v31  ;;  %v278_v0 = vrot.slane %v4477_v38, 5  ;;  %v310_v6 = vrot.slane %v4477_v38, 3 }
  0x2e   : > { %3711 = vrot.lane.b32.xlu0 %v3710_v56, %s4309_s24  ;;  %3716 = vrot.lane.b32.xlu1 %v3715_v57, %s4310_s25  ;;  %v460_v1 = vsel %vm399_vm5, %v452_v62, 0.0  ;;  %v504_v5 = vrot.slane %v4504_v61, 1  ;;  %v589_v4 = vrot.slane %v4504_v61, 2  ;;  %v294_v10 = vrot.slane %v4477_v38, 4 }
  0x2f   : > { %v4520_v9 = vsel %vm408_vm6, %v460_v1, %v4440_v8  ;;  %v326_v11 = vrot.slane %v4477_v38, 2  ;;  %v359_v12 = vsel %vm354_vm0, 0.0, %v246_v41  ;;  %v421_v16 = vsel %vm354_vm0, 0.0, %v310_v6 }
  0x30   : > { %v505_v13 = vrot.slane %v4520_v9, 1  ;;  %v590_v14 = vrot.slane %v4520_v9, 2  ;;  %v368_v15 = vsel %vm363_vm1, %v359_v12, 0.0  ;;  %v342_v17 = vrot.slane %v4477_v38, 1 }
  0x31   : > { %v377_v18 = vsel %vm372_vm2, %v368_v15, %v262_v63  ;;  %v429_v8 = vsel %vm363_vm1, %v421_v16, 0.0  ;;  %v247_v19 = vrot.slane %v4516_v7, 7  ;;  %v263_v30 = vrot.slane %v4516_v7, 6 }
  0x32   : > { %v506_v20 = vsel %vm408_vm6, %v504_v5, %v505_v13  ;;  %v507_v21 = vsel %vm408_vm6, %v505_v13, %v4371_v2  ;;  %v591_v22 = vsel %vm399_vm5, %v589_v4, %v590_v14  ;;  %v592_v23 = vsel %vm399_vm5, %v590_v14, %v4373_v3 }
  0x33   : > { %v3720_v24 = vpack.i.bf16 %v507_v21, %v506_v20  ;;  %v3725_v25 = vpack.i.bf16 %v592_v23, %v591_v22  ;;  %v386_v26 = vsel %vm381_vm3, %v377_v18, 0.0  ;;  %v437_v27 = vsel %vm372_vm2, %v429_v8, %v326_v11 }
  0x34   : > { %v395_v28 = vsel %vm390_vm4, %v386_v26, %v278_v0  ;;  %v445_v29 = vsel %vm381_vm3, %v437_v27, 0.0  ;;  %v279_v31 = vrot.slane %v4516_v7, 5  ;;  %v295_v35 = vrot.slane %v4516_v7, 4 }
  0x35   : > { %3721 = vrot.lane.b32.xlu0 %v3720_v24, %s4309_s24  ;;  %3726 = vrot.lane.b32.xlu1 %v3725_v25, %s4310_s25  ;;  %v404_v32 = vsel %vm399_vm5, %v395_v28, 0.0  ;;  %v453_v34 = vsel %vm390_vm4, %v445_v29, %v342_v17  ;;  %v311_v36 = vrot.slane %v4516_v7, 3  ;;  %v327_v44 = vrot.slane %v4516_v7, 2 }
  0x36   : > { %v4552_v40 = vsel %vm408_vm6, %v404_v32, %v294_v10  ;;  %v461_v43 = vsel %vm399_vm5, %v453_v34, 0.0  ;;  %v360_v45 = vsel %vm354_vm0, 0.0, %v247_v19  ;;  %v343_v55 = vrot.slane %v4516_v7, 1  ;;  %v4599_v19 = vld [vmem:[%s4368_s23 + $0x38] sm:$0xff] }
  0x37   : > { %v4562_v47 = vsel %vm408_vm6, %v461_v43, %v4477_v38  ;;  %v508_v49 = vrot.slane %v4552_v40, 1  ;;  %v593_v50 = vrot.slane %v4552_v40, 2  ;;  %v369_v51 = vsel %vm363_vm1, %v360_v45, 0.0 }
  0x38   : > { %v509_v41 = vrot.slane %v4562_v47, 1  ;;  %v594_v52 = vrot.slane %v4562_v47, 2  ;;  %v378_v53 = vsel %vm372_vm2, %v369_v51, %v263_v30  ;;  %v422_v54 = vsel %vm354_vm0, 0.0, %v311_v36 }
  0x39   : > { %v387_v56 = vsel %vm381_vm3, %v378_v53, 0.0  ;;  %v430_v38 = vsel %vm363_vm1, %v422_v54, 0.0  ;;  %v248_v57 = vrot.slane %v4558_v46, 7  ;;  %v264_v11 = vrot.slane %v4558_v46, 6 }
  0x3a   : > { %v510_v58 = vsel %vm408_vm6, %v508_v49, %v509_v41  ;;  %v511_v59 = vsel %vm408_vm6, %v509_v41, %v4371_v2  ;;  %v595_v62 = vsel %vm399_vm5, %v593_v50, %v594_v52  ;;  %v596_v63 = vsel %vm399_vm5, %v594_v52, %v4373_v3 }
  0x3b   : > { %v3730_v0 = vpack.i.bf16 %v511_v59, %v510_v58  ;;  %v3735_v1 = vpack.i.bf16 %v596_v63, %v595_v62  ;;  %v396_v5 = vsel %vm390_vm4, %v387_v56, %v279_v31  ;;  %v438_v4 = vsel %vm372_vm2, %v430_v38, %v327_v44 }
  0x3c   : > { %v405_v6 = vsel %vm399_vm5, %v396_v5, 0.0  ;;  %v446_v10 = vsel %vm381_vm3, %v438_v4, 0.0  ;;  %v312_v14 = vrot.slane %v4558_v46, 3  ;;  %v328_v15 = vrot.slane %v4558_v46, 2 }
  0x3d   : > { %3731 = vrot.lane.b32.xlu0 %v3730_v0, %s4309_s24  ;;  %3736 = vrot.lane.b32.xlu1 %v3735_v1, %s4310_s25  ;;  %v4589_v12 = vsel %vm408_vm6, %v405_v6, %v295_v35  ;;  %v454_v13 = vsel %vm390_vm4, %v446_v10, %v343_v55  ;;  %v280_v8 = vrot.slane %v4558_v46, 5  ;;  %v344_v21 = vrot.slane %v4558_v46, 1 }
  0x3e   : > { %v462_v16 = vsel %vm399_vm5, %v454_v13, 0.0  ;;  %v512_v17 = vrot.slane %v4589_v12, 1  ;;  %v597_v18 = vrot.slane %v4589_v12, 2  ;;  %v361_v22 = vsel %vm354_vm0, 0.0, %v248_v57 }
  0x3f   : > { %v4603_v20 = vsel %vm408_vm6, %v462_v16, %v4516_v7  ;;  %v423_v23 = vsel %vm354_vm0, 0.0, %v312_v14  ;;  %v370_v26 = vsel %vm363_vm1, %v361_v22, 0.0  ;;  %v296_v28 = vrot.slane %v4558_v46, 4 }
  0x40   : > { %v513_v24 = vrot.slane %v4603_v20, 1  ;;  %v598_v25 = vrot.slane %v4603_v20, 2  ;;  %v431_v27 = vsel %vm363_vm1, %v423_v23, 0.0  ;;  %v379_v29 = vsel %vm372_vm2, %v370_v26, %v264_v11  ;;  %v4161_v26 = vld [vmem:[%s6705_s1 + $0x8] sm:$0xff]  }
  0x41   : > { %v439_v7 = vsel %vm372_vm2, %v431_v27, %v328_v15  ;;  %v249_v30 = vrot.slane %v4599_v19, 7  ;;  %v388_v44 = vsel %vm381_vm3, %v379_v29, 0.0  ;;  %v265_v51 = vrot.slane %v4599_v19, 6 }
  0x42   : > { %v514_v31 = vsel %vm408_vm6, %v512_v17, %v513_v24  ;;  %v515_v32 = vsel %vm408_vm6, %v513_v24, %v4371_v2  ;;  %v599_v34 = vsel %vm399_vm5, %v597_v18, %v598_v25  ;;  %v600_v35 = vsel %vm399_vm5, %v598_v25, %v4373_v3  ;;  %v4160_v25 = vld [vmem:[%s6705_s1] sm:$0xff]  }
  0x43   : > { %v3740_v36 = vpack.i.bf16 %v515_v32, %v514_v31  ;;  %v3745_v43 = vpack.i.bf16 %v600_v35, %v599_v34  ;;  %v447_v45 = vsel %vm381_vm3, %v439_v7, 0.0  ;;  %v397_v49 = vsel %vm390_vm4, %v388_v44, %v280_v8  ;;  %3580 = vmatprep.subr.bf16.mxu0 %v4160_v25  ;;  %v4162_v44 = vld [vmem:[%s6705_s1 + $0x10] sm:$0xff]  }
  0x44   : > { %v455_v50 = vsel %vm390_vm4, %v447_v45, %v344_v21  ;;  %v313_v41 = vrot.slane %v4599_v19, 3  ;;  %v406_v52 = vsel %vm399_vm5, %v397_v49, 0.0  ;;  %v281_v54 = vrot.slane %v4599_v19, 5  ;;  %3581 = vmatpush3.bf16.msra.mxu0 %v4160_v25 }
  0x45   : > { %3741 = vrot.lane.b32.xlu0 %v3740_v36, %s4309_s24  ;;  %3746 = vrot.lane.b32.xlu1 %v3745_v43, %s4310_s25  ;;  %v463_v53 = vsel %vm399_vm5, %v455_v50, 0.0  ;;  %v329_v55 = vrot.slane %v4599_v19, 2  ;;  %v4635_v56 = vsel %vm408_vm6, %v406_v52, %v296_v28  ;;  %v362_v57 = vsel %vm354_vm0, 0.0, %v249_v30 }
  0x46   : > { %v4639_v38 = vsel %vm408_vm6, %v463_v53, %v4558_v46  ;;  %v424_v58 = vsel %vm354_vm0, 0.0, %v313_v41  ;;  %v516_v59 = vrot.slane %v4635_v56, 1  ;;  %v601_v63 = vrot.slane %v4635_v56, 2  ;;  %3582 = vmatprep.subr.bf16.mxu0 %v4161_v26 }
  0x47   : > { %v517_v62 = vrot.slane %v4639_v38, 1  ;;  %v602_v0 = vrot.slane %v4639_v38, 2  ;;  %v297_v1 = vrot.slane %v4599_v19, 4  ;;  %v345_v5 = vrot.slane %v4599_v19, 1 }
  0x48   : > { %v371_v4 = vsel %vm363_vm1, %v362_v57, 0.0  ;;  %v432_v46 = vsel %vm363_vm1, %v424_v58, 0.0  ;;  %3583 = vmatpush3.bf16.msra.mxu0 %v4161_v26  ;;  %vm2801_vm1 = vcmask 1045509  }
  0x49   : > { %v518_v6 = vsel %vm408_vm6, %v516_v59, %v517_v62  ;;  %v519_v10 = vsel %vm408_vm6, %v517_v62, %v4371_v2  ;;  %v603_v11 = vsel %vm399_vm5, %v601_v63, %v602_v0  ;;  %v604_v13 = vsel %vm399_vm5, %v602_v0, %v4373_v3  ;;  %3584 = vmatprep.subr.bf16.mxu0 %v4162_v44  ;;  %v4164_v59 = vld [vmem:[%s6705_s1 + $0x20] ss:$0 sps:$4 sm:$0xff]  }
  0x4a   : > { %v3750_v14 = vpack.i.bf16 %v519_v10, %v518_v6  ;;  %v3755_v15 = vpack.i.bf16 %v604_v13, %v603_v11  ;;  %v380_v16 = vsel %vm372_vm2, %v371_v4, %v265_v51  ;;  %v440_v17 = vsel %vm372_vm2, %v432_v46, %v329_v55 }
  0x4b   : > { %v389_v18 = vsel %vm381_vm3, %v380_v16, 0.0  ;;  %v448_v8 = vsel %vm381_vm3, %v440_v17, 0.0  ;;  %vm2804_vm2 = vcmask 1046534  }
  0x4c   : > { %3751 = vrot.lane.b32.xlu0 %v3750_v14, %s4309_s24  ;;  %3756 = vrot.lane.b32.xlu1 %v3755_v15, %s4310_s25  ;;  %v398_v21 = vsel %vm390_vm4, %v389_v18, %v281_v54  ;;  %v456_v22 = vsel %vm390_vm4, %v448_v8, %v345_v5  ;;  %vm3355_vm4 = vcmask 97280  }
  0x4d   : > { %v407_v23 = vsel %vm399_vm5, %v398_v21, 0.0  ;;  %v464_v24 = vsel %vm399_vm5, %v456_v22, 0.0  ;;  %3585 = vmatpush3.bf16.msra.mxu0 %v4162_v44 }
  0x4e   : > { %v4674_v27 = vsel %vm408_vm6, %v407_v23, %v297_v1  ;;  %v4678_v28 = vsel %vm408_vm6, %v464_v24, %v4599_v19 }
  0x4f   : > { %v520_v29 = vrot.slane %v4674_v27, 1  ;;  %v521_v7 = vrot.slane %v4678_v28, 1  ;;  %v605_v30 = vrot.slane %v4674_v27, 2  ;;  %v606_v31 = vrot.slane %v4678_v28, 2 }
  0x51   : > { %v522_v32 = vsel %vm408_vm6, %v520_v29, %v521_v7  ;;  %v523_v34 = vsel %vm408_vm6, %v521_v7, %v4371_v2  ;;  %v607_v35 = vsel %vm399_vm5, %v605_v30, %v606_v31  ;;  %v608_v19 = vsel %vm399_vm5, %v606_v31, %v4373_v3  ;;  %v4163_v2 = vld [vmem:[%s6705_s1 + $0x18] sm:$0xff]  }
  0x52   : > { %v3760_v36 = vpack.i.bf16 %v523_v34, %v522_v32  ;;  %v3765_v43 = vpack.i.bf16 %v608_v19, %v607_v35  ;;  %3586 = vmatprep.subr.bf16.mxu0 %v4163_v2 }
  0x53   : > { %3587 = vmatpush3.bf16.msra.mxu0 %v4163_v2 }
  0x54   : > { %3761 = vrot.lane.b32.xlu0 %v3760_v36, %s4309_s24  ;;  %3766 = vrot.lane.b32.xlu1 %v3765_v43, %s4310_s25 }
  0x55   : > { %3664 = vmatprep.subr.msk.bf16.mxu0 %vm381_vm3, %v4164_v59 }
  0x92   : > { %v3692_v45 = vpop.permute.xlu0 %3691  ;;  %v3702_v3 = vpop.permute.xlu1 %3701 }
  0x93   : > { %v3694_v49 = vunpack.i.h.bf16 %v3692_v45  ;;  %v3693_v50 = vunpack.i.l.bf16 %v3692_v45  ;;  %v3704_v51 = vunpack.i.h.bf16 %v3702_v3  ;;  %v3703_v41 = vunpack.i.l.bf16 %v3702_v3 }
  0x95   : > { %v662_v52 = vsel %vm660_vm7, %v4395_v37, %v3693_v50  ;;  %v663_v53 = vsel %vm660_vm7, %v4404_v42, %v3694_v49  ;;  %v984_v42 = vsel %vm381_vm3, %v4164_v59, 0 }
  0x96   : > { %v3697_v54 = vpop.permute.xlu0 %3696  ;;  %v533_v55 = vpop.permute.xlu1 %532  ;;  %v4703_v57 = vsel %vm678_vm8, %v662_v52, %v3703_v41  ;;  %v4706_v58 = vsel %vm678_vm8, %v663_v53, %v3704_v51  ;;  %3589 = vmatpush3.bf16.msra.mxu0 %v984_v42 }
  0x97   : > { %v3770_v62 = vpack.i.bf16 %v4706_v58, %v4703_v57  ;;  %v3699_v63 = vunpack.i.h.bf16 %v3697_v54  ;;  %v3698_v37 = vunpack.i.l.bf16 %v3697_v54  ;;  %v665_v10 = vsel %vm660_vm7, %v4426_v60, %v533_v55 }
  0x99   : > { %3771 = vrot.lane.b32.xlu0 %v3770_v62, %s4311_s11  ;;  %v664_v46 = vsel %vm660_vm7, %v4412_v48, %v3699_v63  ;;  %v661_v6 = vsel %vm660_vm7, 0.0, %v3698_v37 }
  0x9a   : > { %v3707_v0 = vpop.permute.xlu0 %3706  ;;  %v618_v1 = vpop.permute.xlu1 %617 }
  0x9b   : > { %v3709_v5 = vunpack.i.h.bf16 %v3707_v0  ;;  %v3708_v4 = vunpack.i.l.bf16 %v3707_v0  ;;  %v4732_v15 = vsel %vm678_vm8, %v665_v10, %v618_v1 }
  0x9d   : > { %v4722_v11 = vsel %vm678_vm8, %v661_v6, %v3708_v4  ;;  %v4725_v13 = vsel %vm678_vm8, %v664_v46, %v3709_v5 }
  0x9e   : > { %717 = vrot.lane.b32.xlu1 %v4722_v11, %s4311_s11  ;;  %v3775_v14 = vpack.i.bf16 %v4725_v13, %v4722_v11  ;;  %v3780_v21 = vpack.i.bf16 %v4732_v15, %v4725_v13 }
  0xa0   : > { %v3712_v48 = vpop.permute.xlu0 %3711  ;;  %v3717_v16 = vpop.permute.xlu1 %3716  ;;  %3776 = vrot.lane.b32.xlu0 %v3775_v14, %s4312_s12 }
  0xa1   : > { %v3714_v60 = vunpack.i.h.bf16 %v3712_v48  ;;  %v3713_v17 = vunpack.i.l.bf16 %v3712_v48  ;;  %v3719_v18 = vunpack.i.h.bf16 %v3717_v16  ;;  %v3718_v8 = vunpack.i.l.bf16 %v3717_v16 }
  0xa2   : > { %768 = vrot.lane.b32.xlu1 %v4732_v15, %s4312_s12 }
  0xa3   : > { %v667_v22 = vsel %vm660_vm7, %v4483_v39, %v3714_v60  ;;  %v666_v23 = vsel %vm660_vm7, %v4471_v33, %v3713_v17 }
  0xa4   : > { %3781 = vrot.lane.b32.xlu0 %v3780_v21, %s4311_s11  ;;  %v4745_v24 = vsel %vm678_vm8, %v666_v23, %v3718_v8  ;;  %v4748_v25 = vsel %vm678_vm8, %v667_v22, %v3719_v18 }
  0xa5   : > { %v3785_v26 = vpack.i.bf16 %v4748_v25, %v4745_v24 }
  0xa7   : > { %v3722_v29 = vpop.permute.xlu0 %3721  ;;  %v3727_v7 = vpop.permute.xlu1 %3726  ;;  %3786 = vrot.lane.b32.xlu1 %v3785_v26, %s4312_s12 }
  0xa8   : > { %v3724_v30 = vunpack.i.h.bf16 %v3722_v29  ;;  %v3723_v39 = vunpack.i.l.bf16 %v3722_v29  ;;  %v3729_v31 = vunpack.i.h.bf16 %v3727_v7  ;;  %v3728_v32 = vunpack.i.l.bf16 %v3727_v7  ;;  %3791 = vrot.lane.b32.xlu0 %v3785_v26, %s4311_s11 }
  0xaa   : > { %v669_v33 = vsel %vm660_vm7, %v4520_v9, %v3724_v30  ;;  %v668_v34 = vsel %vm660_vm7, %v4504_v61, %v3723_v39 }
  0xab   : > { %v4759_v35 = vsel %vm678_vm8, %v668_v34, %v3728_v32  ;;  %v4762_v19 = vsel %vm678_vm8, %v669_v33, %v3729_v31 }
  0xac   : > { %v3795_v36 = vpack.i.bf16 %v4762_v19, %v4759_v35 }
  0xae   : > { %3796 = vrot.lane.b32.xlu1 %v3795_v36, %s4312_s12  ;;  %3801 = vrot.lane.b32.xlu0 %v3795_v36, %s4311_s11 }
  0xaf   : > { %v3732_v43 = vpop.permute.xlu0 %3731  ;;  %v3737_v44 = vpop.permute.xlu1 %3736 }
  0xb0   : > { %v3734_v2 = vunpack.i.h.bf16 %v3732_v43  ;;  %v3733_v9 = vunpack.i.l.bf16 %v3732_v43  ;;  %v3739_v45 = vunpack.i.h.bf16 %v3737_v44  ;;  %v3738_v3 = vunpack.i.l.bf16 %v3737_v44 }
  0xb2   : > { %v671_v61 = vsel %vm660_vm7, %v4562_v47, %v3734_v2  ;;  %v670_v49 = vsel %vm660_vm7, %v4552_v40, %v3733_v9 }
  0xb3   : > { %v4773_v50 = vsel %vm678_vm8, %v670_v49, %v3738_v3  ;;  %v4776_v51 = vsel %vm678_vm8, %v671_v61, %v3739_v45 }
  0xb4   : > { %v3805_v41 = vpack.i.bf16 %v4776_v51, %v4773_v50 }
  0xb6   : > { %3806 = vrot.lane.b32.xlu1 %v3805_v41, %s4312_s12  ;;  %3811 = vrot.lane.b32.xlu0 %v3805_v41, %s4311_s11 }
  0xb7   : > { %v3742_v52 = vpop.permute.xlu0 %3741  ;;  %v3747_v53 = vpop.permute.xlu1 %3746 }
  0xb8   : > { %v3744_v54 = vunpack.i.h.bf16 %v3742_v52  ;;  %v3743_v47 = vunpack.i.l.bf16 %v3742_v52  ;;  %v3749_v55 = vunpack.i.h.bf16 %v3747_v53  ;;  %v3748_v59 = vunpack.i.l.bf16 %v3747_v53 }
  0xba   : > { %v673_v40 = vsel %vm660_vm7, %v4603_v20, %v3744_v54  ;;  %v672_v62 = vsel %vm660_vm7, %v4589_v12, %v3743_v47 }
  0xbb   : > { %v4787_v63 = vsel %vm678_vm8, %v672_v62, %v3748_v59  ;;  %v4790_v37 = vsel %vm678_vm8, %v673_v40, %v3749_v55 }
  0xbc   : > { %v3815_v42 = vpack.i.bf16 %v4790_v37, %v4787_v63 }
  0xbe   : > { %v3752_v0 = vpop.permute.xlu0 %3751  ;;  %v3757_v1 = vpop.permute.xlu1 %3756  ;;  %3816 = vrot.lane.b32.xlu1 %v3815_v42, %s4312_s12  ;;  %3821 = vrot.lane.b32.xlu0 %v3815_v42, %s4311_s11 }
  0xbf   : > { %v3754_v5 = vunpack.i.h.bf16 %v3752_v0  ;;  %v3753_v20 = vunpack.i.l.bf16 %v3752_v0  ;;  %v3759_v4 = vunpack.i.h.bf16 %v3757_v1  ;;  %v3758_v46 = vunpack.i.l.bf16 %v3757_v1 }
  0xc1   : > { %v675_v12 = vsel %vm660_vm7, %v4639_v38, %v3754_v5  ;;  %v674_v6 = vsel %vm660_vm7, %v4635_v56, %v3753_v20 }
  0xc2   : > { %v4801_v10 = vsel %vm678_vm8, %v674_v6, %v3758_v46  ;;  %v4804_v14 = vsel %vm678_vm8, %v675_v12, %v3759_v4 }
  0xc3   : > { %v3825_v48 = vpack.i.bf16 %v4804_v14, %v4801_v10 }
  0xc5   : > { %3826 = vrot.lane.b32.xlu1 %v3825_v48, %s4312_s12  ;;  %3831 = vrot.lane.b32.xlu0 %v3825_v48, %s4311_s11 }
  0xc6   : > { %v3762_v16 = vpop.permute.xlu0 %3761  ;;  %v3767_v60 = vpop.permute.xlu1 %3766 }
  0xc7   : > { %v3764_v17 = vunpack.i.h.bf16 %v3762_v16  ;;  %v3763_v38 = vunpack.i.l.bf16 %v3762_v16  ;;  %v3769_v18 = vunpack.i.h.bf16 %v3767_v60  ;;  %v3768_v8 = vunpack.i.l.bf16 %v3767_v60 }
  0xc9   : > { %v677_v56 = vsel %vm660_vm7, %v4678_v28, %v3764_v17  ;;  %v676_v21 = vsel %vm660_vm7, %v4674_v27, %v3763_v38 }
  0xca   : > { %v4815_v22 = vsel %vm678_vm8, %v676_v21, %v3768_v8  ;;  %v4818_v23 = vsel %vm678_vm8, %v677_v56, %v3769_v18 }
  0xcb   : > { %v3835_v26 = vpack.i.bf16 %v4818_v23, %v4815_v22 }
  0xcd   : > { %3836 = vrot.lane.b32.xlu1 %v3835_v26, %s4312_s12  ;;  %3841 = vrot.lane.b32.xlu0 %v3835_v26, %s4311_s11 }
 0x10b   : > { %v3772_v29 = vpop.permute.xlu0 %3771 }
 0x10c   : > { %v3774_v7 = vunpack.i.h.bf16 %v3772_v29  ;;  %v3773_v30 = vunpack.i.l.bf16 %v3772_v29 }
 0x10e   : > { %v810_v36 = vsel %vm809_vm9, %v4722_v11, %v3773_v30  ;;  %v811_v43 = vsel %vm809_vm9, %v4722_v11, %v3774_v7 }
 0x110   : > { %v4824_v28 = vpop.permute.xlu1 %717 }
 0x111   : > { %v812_v33 = vsel %vm809_vm9, %v4703_v57, %v4824_v28  ;;  %v813_v34 = vsel %vm809_vm9, %v4706_v58, %v4824_v28  ;;  %v816_v53 = vsel %vm809_vm9, %v4725_v13, %v4824_v28  ;;  %v817_v42 = vsel %vm809_vm9, %v4732_v15, %v4824_v28 }
 0x112   : > { %v3777_v27 = vpop.permute.xlu0 %3776  ;;  %v820_v56 = vsel %vm809_vm9, %v4745_v24, %v4824_v28  ;;  %v821_v21 = vsel %vm809_vm9, %v4748_v25, %v4824_v28 }
 0x113   : > { %v3779_v39 = vunpack.i.h.bf16 %v3777_v27  ;;  %v4826_v31 = vunpack.i.l.bf16 %v3777_v27 }
 0x114   : > { %v769_v32 = vpop.permute.xlu1 %768 }
 0x115   : > { %v845_v44 = vsel %vm842_vm10, %v812_v33, %v3779_v39  ;;  %v846_v2 = vsel %vm842_vm10, %v813_v34, %v769_v32  ;;  %v843_v9 = vsel %vm842_vm10, %v810_v36, %v4826_v31  ;;  %v844_v57 = vsel %vm842_vm10, %v811_v43, %v4826_v31 }
 0x116   : > { %v876_v45 = vpack.c.bf16 %v846_v2, %v845_v44  ;;  %v3782_v3 = vpop.permute.xlu0 %3781  ;;  %v875_v61 = vpack.c.bf16 %v844_v57, %v843_v9  ;;  %v824_v2 = vsel %vm809_vm9, %v4759_v35, %v4824_v28  ;;  %v825_v9 = vsel %vm809_vm9, %v4762_v19, %v4824_v28 }
 0x117   : > { %v3784_v58 = vunpack.i.h.bf16 %v3782_v3  ;;  %v3783_v49 = vunpack.i.l.bf16 %v3782_v3 }
 0x118   : > { %3590 = vmatprep.mubr.msk.bf16.mxu0 %vm934_vm11, %v875_v61 }
 0x119   : > { %v815_v41 = vsel %vm809_vm9, %v4722_v11, %v3784_v58  ;;  %v814_v52 = vsel %vm809_vm9, %v4722_v11, %v3783_v49  ;;  %v3787_v54 = vpop.permute.xlu1 %3786  ;;  %3591 = vmatmul.mubr.msk.bf16.vlgmr.msra.gmra.mrb[0].mxu0 %vm934_vm11, %v876_v45 }
 0x11a   : > { %v3789_v47 = vunpack.i.h.bf16 %v3787_v54  ;;  %v3788_v55 = vunpack.i.l.bf16 %v3787_v54  ;;  %v3792_v59 = vpop.permute.xlu0 %3791  ;;  %v847_v40 = vsel %vm842_vm10, %v814_v52, %v4826_v31  ;;  %v848_v62 = vsel %vm842_vm10, %v815_v41, %v4826_v31 }
 0x11b   : > { %v3794_v0 = vunpack.i.h.bf16 %v3792_v59  ;;  %v3793_v1 = vunpack.i.l.bf16 %v3792_v59  ;;  %v877_v5 = vpack.c.bf16 %v848_v62, %v847_v40  ;;  %v828_v59 = vsel %vm809_vm9, %v4773_v50, %v4824_v28 }
 0x11c   : > { %v850_v13 = vsel %vm842_vm10, %v817_v42, %v3789_v47  ;;  %v849_v20 = vsel %vm842_vm10, %v816_v53, %v3788_v55  ;;  %v829_v40 = vsel %vm809_vm9, %v4776_v51, %v4824_v28 }
 0x11d   : > { %v819_v4 = vsel %vm809_vm9, %v4722_v11, %v3794_v0  ;;  %v818_v46 = vsel %vm809_vm9, %v4722_v11, %v3793_v1  ;;  %3594 = vmatprep.mubr.msk.bf16.mxu0 %vm934_vm11, %v877_v5  ;;  %v878_v6 = vpack.c.bf16 %v850_v13, %v849_v20 }
 0x11e   : > { %v851_v12 = vsel %vm842_vm10, %v818_v46, %v4826_v31  ;;  %v852_v15 = vsel %vm842_vm10, %v819_v4, %v4826_v31 }
 0x11f   : > { %v879_v48 = vpack.c.bf16 %v852_v15, %v851_v12 }
 0x120   : > { %v3797_v16 = vpop.permute.xlu1 %3796  ;;  %v3802_v60 = vpop.permute.xlu0 %3801 }
 0x121   : > { %v3799_v17 = vunpack.i.h.bf16 %v3797_v16  ;;  %v3798_v38 = vunpack.i.l.bf16 %v3797_v16  ;;  %v3804_v18 = vunpack.i.h.bf16 %v3802_v60  ;;  %v3803_v8 = vunpack.i.l.bf16 %v3802_v60  ;;  %3595 = vmatmul.mubr.msk.bf16.gmra.mrb[4].mxu0 %vm934_vm11, %v878_v6 }
 0x122   : > { %3598 = vmatprep.mubr.msk.bf16.mxu0 %vm934_vm11, %v879_v48  ;;  %v832_v60 = vsel %vm809_vm9, %v4787_v63, %v4824_v28 }
 0x123   : > { %v823_v26 = vsel %vm809_vm9, %v4722_v11, %v3804_v18  ;;  %v822_v29 = vsel %vm809_vm9, %v4722_v11, %v3803_v8  ;;  %v854_v7 = vsel %vm842_vm10, %v821_v21, %v3799_v17  ;;  %v853_v30 = vsel %vm842_vm10, %v820_v56, %v3798_v38 }
 0x124   : > { %v855_v27 = vsel %vm842_vm10, %v822_v29, %v4826_v31  ;;  %v856_v24 = vsel %vm842_vm10, %v823_v26, %v4826_v31  ;;  %v880_v39 = vpack.c.bf16 %v854_v7, %v853_v30  ;;  %v833_v17 = vsel %vm809_vm9, %v4790_v37, %v4824_v28 }
 0x125   : > { %v881_v25 = vpack.c.bf16 %v856_v24, %v855_v27 }
 0x128   : > { %v3807_v32 = vpop.permute.xlu1 %3806  ;;  %v3812_v33 = vpop.permute.xlu0 %3811 }
 0x129   : > { %v3809_v34 = vunpack.i.h.bf16 %v3807_v32  ;;  %v3808_v36 = vunpack.i.l.bf16 %v3807_v32  ;;  %v3814_v43 = vunpack.i.h.bf16 %v3812_v33  ;;  %v3813_v44 = vunpack.i.l.bf16 %v3812_v33  ;;  %3599 = vmatmul.mubr.msk.bf16.gmra.mrb[8].mxu0 %vm934_vm11, %v880_v39 }
 0x12a   : > { %3602 = vmatprep.mubr.msk.bf16.mxu0 %vm934_vm11, %v881_v25  ;;  %v836_v32 = vsel %vm809_vm9, %v4801_v10, %v4824_v28  ;;  %v837_v33 = vsel %vm809_vm9, %v4804_v14, %v4824_v28  ;;  %v840_v10 = vsel %vm809_vm9, %v4815_v22, %v4824_v28  ;;  %v841_v14 = vsel %vm809_vm9, %v4818_v23, %v4824_v28 }
 0x12b   : > { %v827_v57 = vsel %vm809_vm9, %v4722_v11, %v3814_v43  ;;  %v826_v45 = vsel %vm809_vm9, %v4722_v11, %v3813_v44  ;;  %v858_v3 = vsel %vm842_vm10, %v825_v9, %v3809_v34  ;;  %v857_v61 = vsel %vm842_vm10, %v824_v2, %v3808_v36 }
 0x12c   : > { %v859_v58 = vsel %vm842_vm10, %v826_v45, %v4826_v31  ;;  %v860_v35 = vsel %vm842_vm10, %v827_v57, %v4826_v31  ;;  %v882_v49 = vpack.c.bf16 %v858_v3, %v857_v61  ;;  %v873_v9 = vsel %vm842_vm10, %v840_v10, %v4826_v31  ;;  %v4977_v3 = vld [vmem:[%s6706_s2] ss:$0 sm:$0xff] }
 0x12d   : > { %v883_v19 = vpack.c.bf16 %v860_v35, %v859_v58  ;;  %v874_v57 = vsel %vm842_vm10, %v841_v14, %v4826_v31 }
 0x12e   : > { %v890_v45 = vpack.c.bf16 %v874_v57, %v873_v9 }
 0x130   : > { %v3817_v41 = vpop.permute.xlu1 %3816  ;;  %v3822_v52 = vpop.permute.xlu0 %3821 }
 0x131   : > { %v3819_v53 = vunpack.i.h.bf16 %v3817_v41  ;;  %v3818_v54 = vunpack.i.l.bf16 %v3817_v41  ;;  %v3824_v47 = vunpack.i.h.bf16 %v3822_v52  ;;  %v3823_v55 = vunpack.i.l.bf16 %v3822_v52  ;;  %3603 = vmatmul.mubr.msk.bf16.gmra.mrb[12].mxu0 %vm934_vm11, %v882_v49 }
 0x132   : > { %3606 = vmatprep.mubr.msk.bf16.mxu0 %vm934_vm11, %v883_v19 }
 0x133   : > { %v831_v62 = vsel %vm809_vm9, %v4722_v11, %v3824_v47  ;;  %v830_v42 = vsel %vm809_vm9, %v4722_v11, %v3823_v55  ;;  %v862_v0 = vsel %vm842_vm10, %v829_v40, %v3819_v53  ;;  %v861_v1 = vsel %vm842_vm10, %v828_v59, %v3818_v54 }
 0x134   : > { %v863_v5 = vsel %vm842_vm10, %v830_v42, %v4826_v31  ;;  %v864_v50 = vsel %vm842_vm10, %v831_v62, %v4826_v31  ;;  %v884_v4 = vpack.c.bf16 %v862_v0, %v861_v1 }
 0x135   : > { %v885_v51 = vpack.c.bf16 %v864_v50, %v863_v5 }
 0x137   : > { %v3827_v13 = vpop.permute.xlu1 %3826  ;;  %v3832_v20 = vpop.permute.xlu0 %3831 }
 0x138   : > { %v3829_v46 = vunpack.i.h.bf16 %v3827_v13  ;;  %v3828_v12 = vunpack.i.l.bf16 %v3827_v13  ;;  %v3834_v15 = vunpack.i.h.bf16 %v3832_v20  ;;  %v3833_v6 = vunpack.i.l.bf16 %v3832_v20 }
 0x139   : > { %3607 = vmatmul.mubr.msk.bf16.gmra.mrb[16].mxu0 %vm934_vm11, %v884_v4 }
 0x13a   : > { %v835_v48 = vsel %vm809_vm9, %v4722_v11, %v3834_v15  ;;  %v834_v16 = vsel %vm809_vm9, %v4722_v11, %v3833_v6  ;;  %3610 = vmatprep.mubr.msk.bf16.mxu0 %vm934_vm11, %v885_v51  ;;  %v866_v38 = vsel %vm842_vm10, %v833_v17, %v3829_v46  ;;  %v865_v18 = vsel %vm842_vm10, %v832_v60, %v3828_v12 }
 0x13b   : > { %v867_v8 = vsel %vm842_vm10, %v834_v16, %v4826_v31  ;;  %v868_v56 = vsel %vm842_vm10, %v835_v48, %v4826_v31  ;;  %v886_v21 = vpack.c.bf16 %v866_v38, %v865_v18 }
 0x13c   : > { %v887_v7 = vpack.c.bf16 %v868_v56, %v867_v8 }
 0x13f   : > { %v3837_v26 = vpop.permute.xlu1 %3836  ;;  %v3842_v29 = vpop.permute.xlu0 %3841 }
 0x140   : > { %v3839_v30 = vunpack.i.h.bf16 %v3837_v26  ;;  %v3838_v63 = vunpack.i.l.bf16 %v3837_v26  ;;  %v3844_v27 = vunpack.i.h.bf16 %v3842_v29  ;;  %v3843_v24 = vunpack.i.l.bf16 %v3842_v29 }
 0x141   : > { %3611 = vmatmul.mubr.msk.bf16.gmra.mrb[20].mxu0 %vm934_vm11, %v886_v21 }
 0x142   : > { %v839_v37 = vsel %vm809_vm9, %v4722_v11, %v3844_v27  ;;  %v838_v39 = vsel %vm809_vm9, %v4722_v11, %v3843_v24  ;;  %3614 = vmatprep.mubr.msk.bf16.mxu0 %vm934_vm11, %v887_v7  ;;  %v870_v25 = vsel %vm842_vm10, %v837_v33, %v3839_v30  ;;  %v869_v34 = vsel %vm842_vm10, %v836_v32, %v3838_v63 }
 0x143   : > { %v871_v36 = vsel %vm842_vm10, %v838_v39, %v4826_v31  ;;  %v872_v43 = vsel %vm842_vm10, %v839_v37, %v4826_v31  ;;  %v888_v44 = vpack.c.bf16 %v870_v25, %v869_v34 }
 0x144   : > { %v889_v2 = vpack.c.bf16 %v872_v43, %v871_v36 }
 0x149   : > { %3615 = vmatmul.mubr.msk.bf16.gmra.mrb[24].mxu0 %vm934_vm11, %v888_v44 }
 0x14a   : > { %3618 = vmatprep.mubr.msk.bf16.mxu0 %vm934_vm11, %v889_v2 }
 0x151   : > { %3619 = vmatmul.mubr.msk.bf16.gmra.mrb[28].mxu0 %vm934_vm11, %v890_v45 }
 0x1ec   : > { %v3592_v61 = vpop.f32.mrb[0].mxu0 }
 0x1ed   : > { %v1029_v22 = vadd.f32 %v3592_v61, %v4977_v3  ;;  %v1020_v58 = vpop.f32.mrb[1].mxu0 }
 0x1ee   : > { %v1021_v23 = vadd.f32 %v4977_v3, %v1020_v58  ;;  %v3593_v28 = vpop.f32.mrb[2].mxu0 }
 0x1ef   : > { %v1149_v35 = vmax.f32 %v1029_v22, 0.0  ;;  %v1032_v49 = vadd.f32 %v3593_v28, %v4977_v3  ;;  %v1023_v41 = vpop.f32.mrb[3].mxu0 }
 0x1f0   : > { %v1147_v52 = vmax.f32 %v1021_v23, 0.0  ;;  %v1024_v19 = vadd.f32 %v4977_v3, %v1023_v41 }
 0x1f1   : > { %v1214_v53 = vrot.slane %v1149_v35, 7  ;;  %v1150_v54 = vmax.f32 %v1032_v49, 0.0 }
 0x1f2   : > { %v1148_v47 = vmax.f32 %v1024_v19, 0.0  ;;  %v1211_v59 = vrot.slane %v1147_v52, 7 }
 0x1f3   : > { %v1215_v55 = vrot.slane %v1150_v54, 7  ;;  %v4984_v42 = vsel %vm354_vm0, 0.0, %v1214_v53 }
 0x1f4   : > { %v1212_v40 = vrot.slane %v1148_v47, 7  ;;  %v3596_v62 = vpop.f32.mrb[4].mxu0  ;;  %v1376_v48 = vrot.slane %v4984_v42, 1  ;;  %v1552_v16 = vrot.slane %v4984_v42, 2  ;;  %v5000_v60 = vsel %vm354_vm0, 0.0, %v1211_v59 }
 0x1f5   : > { %v4987_v0 = vsel %vm354_vm0, %v1214_v53, %v1215_v55  ;;  %v1324_v1 = vsel %vm354_vm0, %v1215_v55, 0.0  ;;  %v1036_v5 = vpop.f32.mrb[5].mxu0  ;;  %v1045_v12 = vadd.f32 %v3596_v62, %v4977_v3  ;;  %v1371_v44 = vrot.slane %v5000_v60, 1 }
 0x1f6   : > { %v1377_v50 = vrot.slane %v4987_v0, 1  ;;  %v1379_v13 = vrot.slane %v1324_v1, 1  ;;  %v1553_v20 = vrot.slane %v4987_v0, 2  ;;  %v1555_v4 = vrot.slane %v1324_v1, 2  ;;  %v3597_v51 = vpop.f32.mrb[6].mxu0 }
 0x1f7   : > { %v4993_v46 = vsel %vm354_vm0, %v1211_v59, %v1212_v40  ;;  %v1037_v15 = vadd.f32 %v4977_v3, %v1036_v5  ;;  %v1039_v6 = vpop.f32.mrb[7].mxu0  ;;  %v1323_v17 = vsel %vm354_vm0, %v1212_v40, 0.0  ;;  %v1153_v38 = vmax.f32 %v1045_v12, 0.0 }
 0x1f8   : > { %v1048_v8 = vadd.f32 %v3597_v51, %v4977_v3  ;;  %v1040_v56 = vadd.f32 %v4977_v3, %v1039_v6  ;;  %v1554_v21 = vsel %vm399_vm5, %v1552_v16, %v1553_v20  ;;  %v1556_v26 = vsel %vm399_vm5, %v1553_v20, %v1555_v4 }
 0x1f9   : > { %v1151_v18 = vmax.f32 %v1037_v15, 0.0  ;;  %v1378_v29 = vsel %vm408_vm6, %v1376_v48, %v1377_v50  ;;  %v1380_v7 = vsel %vm408_vm6, %v1377_v50, %v1379_v13  ;;  %v1220_v30 = vrot.slane %v1153_v38, 7 }
 0x1fa   : > { %v1154_v27 = vmax.f32 %v1048_v8, 0.0  ;;  %v1152_v24 = vmax.f32 %v1040_v56, 0.0  ;;  %v1372_v37 = vrot.slane %v4993_v46, 1  ;;  %v1374_v39 = vrot.slane %v1323_v17, 1 }
 0x1fb   : > { %v1217_v63 = vrot.slane %v1151_v18, 7  ;;  %v3850_v32 = vpack.i.bf16 %v1556_v26, %v1554_v21  ;;  %v3845_v33 = vpack.i.bf16 %v1380_v7, %v1378_v29  ;;  %v1548_v2 = vrot.slane %v4993_v46, 2 }
 0x1fc   : > { %v3600_v25 = vpop.f32.mrb[8].mxu0  ;;  %v1221_v34 = vrot.slane %v1154_v27, 7  ;;  %v1218_v36 = vrot.slane %v1152_v24, 7  ;;  %v5013_v10 = vsel %vm354_vm0, 0.0, %v1220_v30  ;;  %v1550_v57 = vrot.slane %v1323_v17, 2 }
 0x1fd   : > { %v1052_v43 = vpop.f32.mrb[9].mxu0  ;;  %v5016_v14 = vsel %vm354_vm0, 0.0, %v1217_v63  ;;  %3851 = vrot.lane.b32.xlu1 %v3850_v32, %s4310_s25  ;;  %3846 = vrot.lane.b32.xlu0 %v3845_v33, %s4309_s24  ;;  %v1547_v23 = vrot.slane %v5000_v60, 2  ;;  %v1373_v28 = vsel %vm408_vm6, %v1371_v44, %v1372_v37  ;;  %v1375_v35 = vsel %vm408_vm6, %v1372_v37, %v1374_v39 }
 0x1fe   : > { %v3601_v9 = vpop.f32.mrb[10].mxu0  ;;  %v5021_v45 = vsel %vm354_vm0, %v1220_v30, %v1221_v34  ;;  %v5024_v61 = vsel %vm354_vm0, %v1217_v63, %v1218_v36  ;;  %v5027_v22 = vsel %vm354_vm0, %v1218_v36, 0.0  ;;  %v1386_v49 = vrot.slane %v5013_v10, 1 }
 0x1ff   : > { %v1055_v58 = vpop.f32.mrb[11].mxu0  ;;  %v1381_v41 = vrot.slane %v5016_v14, 1  ;;  %v1382_v52 = vrot.slane %v5024_v61, 1  ;;  %v1384_v19 = vrot.slane %v5027_v22, 1  ;;  %v1061_v53 = vadd.f32 %v3600_v25, %v4977_v3 }
 0x200   : > { %v1053_v54 = vadd.f32 %v4977_v3, %v1052_v43  ;;  %v1064_v47 = vadd.f32 %v3601_v9, %v4977_v3  ;;  %v1056_v55 = vadd.f32 %v4977_v3, %v1055_v58  ;;  %v3855_v59 = vpack.i.bf16 %v1375_v35, %v1373_v28 }
 0x201   : > { %v1549_v40 = vsel %vm399_vm5, %v1547_v23, %v1548_v2  ;;  %v1551_v62 = vsel %vm399_vm5, %v1548_v2, %v1550_v57  ;;  %v1383_v1 = vsel %vm408_vm6, %v1381_v41, %v1382_v52  ;;  %v1157_v5 = vmax.f32 %v1061_v53, 0.0 }
 0x202   : > { %v1155_v50 = vmax.f32 %v1053_v54, 0.0  ;;  %v1158_v13 = vmax.f32 %v1064_v47, 0.0  ;;  %v1156_v20 = vmax.f32 %v1056_v55, 0.0  ;;  %v1562_v51 = vrot.slane %v5013_v10, 2  ;;  %3856 = vrot.lane.b32.xlu1 %v3855_v59, %s4309_s24 }
 0x203   : > { %v5045_v12 = vsel %vm354_vm0, %v1221_v34, 0.0  ;;  %v1385_v6 = vsel %vm408_vm6, %v1382_v52, %v1384_v19  ;;  %v1387_v16 = vrot.slane %v5021_v45, 1  ;;  %v1226_v17 = vrot.slane %v1157_v5, 7 }
 0x204   : > { %v3604_v4 = vpop.f32.mrb[12].mxu0  ;;  %v1223_v38 = vrot.slane %v1155_v50, 7  ;;  %v1227_v18 = vrot.slane %v1158_v13, 7  ;;  %v1224_v56 = vrot.slane %v1156_v20, 7  ;;  %v3860_v21 = vpack.i.bf16 %v1551_v62, %v1549_v40 }
 0x205   : > { %v1077_v15 = vadd.f32 %v3604_v4, %v4977_v3  ;;  %v1068_v48 = vpop.f32.mrb[13].mxu0  ;;  %v3875_v26 = vpack.i.bf16 %v1385_v6, %v1383_v1  ;;  %v1557_v30 = vrot.slane %v5016_v14, 2  ;;  %v5054_v63 = vsel %vm354_vm0, 0.0, %v1226_v17 }
 0x206   : > { %v3605_v8 = vpop.f32.mrb[14].mxu0  ;;  %v1069_v29 = vadd.f32 %v4977_v3, %v1068_v48  ;;  %v5057_v27 = vsel %vm354_vm0, %v1226_v17, %v1227_v18  ;;  %v1389_v37 = vrot.slane %v5045_v12, 1  ;;  %v1563_v39 = vrot.slane %v5021_v45, 2  ;;  %3861 = vrot.lane.b32.xlu1 %v3860_v21, %s4310_s25 }
 0x207   : > { %v1071_v7 = vpop.f32.mrb[15].mxu0  ;;  %v1161_v24 = vmax.f32 %v1077_v15, 0.0  ;;  %v5062_v32 = vsel %vm354_vm0, 0.0, %v1223_v38  ;;  %3876 = vrot.lane.b32.xlu0 %v3875_v26, %s4309_s24  ;;  %v1080_v33 = vadd.f32 %v3605_v8, %v4977_v3  ;;  %v1565_v25 = vrot.slane %v5045_v12, 2 }
 0x208   : > { %v1558_v34 = vrot.slane %v5024_v61, 2  ;;  %v1560_v36 = vrot.slane %v5027_v22, 2  ;;  %v1388_v43 = vsel %vm408_vm6, %v1386_v49, %v1387_v16  ;;  %v1396_v44 = vrot.slane %v5054_v63, 1 }
 0x209   : > { %v5073_v2 = vsel %vm354_vm0, %v1227_v18, 0.0  ;;  %v5076_v9 = vsel %vm354_vm0, %v1223_v38, %v1224_v56  ;;  %v1159_v57 = vmax.f32 %v1069_v29, 0.0  ;;  %v1572_v58 = vrot.slane %v5054_v63, 2 }
 0x20a   : > { %v1391_v23 = vrot.slane %v5062_v32, 1  ;;  %v1567_v28 = vrot.slane %v5062_v32, 2  ;;  %v1232_v35 = vrot.slane %v1161_v24, 7  ;;  %v5082_v22 = vsel %vm354_vm0, %v1224_v56, 0.0 }
 0x20b   : > { %v1229_v49 = vrot.slane %v1159_v57, 7  ;;  %v1162_v52 = vmax.f32 %v1080_v33, 0.0  ;;  %v1072_v19 = vadd.f32 %v4977_v3, %v1071_v7  ;;  %v1397_v54 = vrot.slane %v5057_v27, 1 }
 0x20c   : > { %v3608_v41 = vpop.f32.mrb[16].mxu0  ;;  %v1399_v47 = vrot.slane %v5073_v2, 1  ;;  %v1390_v55 = vsel %vm408_vm6, %v1387_v16, %v1389_v37  ;;  %v1559_v59 = vsel %vm399_vm5, %v1557_v30, %v1558_v34  ;;  %v1573_v62 = vrot.slane %v5057_v27, 2 }
 0x20d   : > { %v1084_v53 = vpop.f32.mrb[17].mxu0  ;;  %v1233_v1 = vrot.slane %v1162_v52, 7  ;;  %v1160_v5 = vmax.f32 %v1072_v19, 0.0  ;;  %v3865_v50 = vpack.i.bf16 %v1390_v55, %v1388_v43  ;;  %v1392_v20 = vrot.slane %v5076_v9, 1 }
 0x20e   : > { %v3609_v40 = vpop.f32.mrb[18].mxu0  ;;  %v1394_v4 = vrot.slane %v5082_v22, 1  ;;  %v5093_v12 = vsel %vm354_vm0, 0.0, %v1232_v35  ;;  %v1561_v15 = vsel %vm399_vm5, %v1558_v34, %v1560_v36  ;;  %v5097_v6 = vsel %vm354_vm0, 0.0, %v1229_v49 }
 0x20f   : > { %v1087_v13 = vpop.f32.mrb[19].mxu0  ;;  %v5100_v48 = vsel %vm354_vm0, %v1232_v35, %v1233_v1  ;;  %v1230_v16 = vrot.slane %v1160_v5, 7  ;;  %3866 = vrot.lane.b32.xlu1 %v3865_v50, %s4309_s24  ;;  %v3880_v17 = vpack.i.bf16 %v1561_v15, %v1559_v59  ;;  %v1575_v38 = vrot.slane %v5073_v2, 2 }
 0x210   : > { %v1568_v18 = vrot.slane %v5076_v9, 2  ;;  %v1570_v8 = vrot.slane %v5082_v22, 2  ;;  %v1564_v56 = vsel %vm399_vm5, %v1562_v51, %v1563_v39  ;;  %v1406_v21 = vrot.slane %v5093_v12, 1 }
 0x211   : > { %v5111_v26 = vsel %vm354_vm0, %v1229_v49, %v1230_v16  ;;  %3881 = vrot.lane.b32.xlu0 %v3880_v17, %s4310_s25  ;;  %v1566_v29 = vsel %vm399_vm5, %v1563_v39, %v1565_v25  ;;  %v1093_v7 = vadd.f32 %v3608_v41, %v4977_v3  ;;  %v1582_v30 = vrot.slane %v5093_v12, 2 }
 0x212   : > { %v1401_v24 = vrot.slane %v5097_v6, 1  ;;  %v1577_v37 = vrot.slane %v5097_v6, 2  ;;  %v5120_v33 = vsel %vm354_vm0, %v1233_v1, 0.0  ;;  %v3870_v34 = vpack.i.bf16 %v1566_v29, %v1564_v56 }
 0x213   : > { %v1165_v36 = vmax.f32 %v1093_v7, 0.0  ;;  %v1393_v43 = vsel %vm408_vm6, %v1391_v23, %v1392_v20  ;;  %v1395_v2 = vsel %vm408_vm6, %v1392_v20, %v1394_v4  ;;  %v1085_v25 = vadd.f32 %v4977_v3, %v1084_v53 }
 0x214   : > { %v3612_v51 = vpop.f32.mrb[20].mxu0  ;;  %v3895_v39 = vpack.i.bf16 %v1395_v2, %v1393_v43  ;;  %v1096_v35 = vadd.f32 %v3609_v40, %v4977_v3  ;;  %v1088_v41 = vadd.f32 %v4977_v3, %v1087_v13  ;;  %v1407_v49 = vrot.slane %v5100_v48, 1  ;;  %3871 = vrot.lane.b32.xlu1 %v3870_v34, %s4310_s25 }
 0x215   : > { %v1100_v57 = vpop.f32.mrb[21].mxu0  ;;  %v1238_v52 = vrot.slane %v1165_v36, 7  ;;  %v1398_v19 = vsel %vm408_vm6, %v1396_v44, %v1397_v54  ;;  %v1400_v23 = vsel %vm408_vm6, %v1397_v54, %v1399_v47  ;;  %v1163_v59 = vmax.f32 %v1085_v25, 0.0 }
 0x216   : > { %v3613_v22 = vpop.f32.mrb[22].mxu0  ;;  %3896 = vrot.lane.b32.xlu0 %v3895_v39, %s4309_s24  ;;  %v1166_v1 = vmax.f32 %v1096_v35, 0.0  ;;  %v1164_v53 = vmax.f32 %v1088_v41, 0.0  ;;  %v1569_v40 = vsel %vm399_vm5, %v1567_v28, %v1568_v18  ;;  %v1329_v5 = vsel %vm354_vm0, %v1230_v16, 0.0 }
 0x217   : > { %v1103_v55 = vpop.f32.mrb[23].mxu0  ;;  %v1402_v50 = vrot.slane %v5111_v26, 1  ;;  %v3885_v13 = vpack.i.bf16 %v1400_v23, %v1398_v19  ;;  %v1571_v20 = vsel %vm399_vm5, %v1568_v18, %v1570_v8  ;;  %v1235_v4 = vrot.slane %v1163_v59, 7 }
 0x218   : > { %v1239_v15 = vrot.slane %v1166_v1, 7  ;;  %v1574_v44 = vsel %vm399_vm5, %v1572_v58, %v1573_v62  ;;  %v1576_v54 = vsel %vm399_vm5, %v1573_v62, %v1575_v38  ;;  %v1409_v47 = vrot.slane %v5120_v33, 1 }
 0x219   : > { %v5142_v17 = vsel %vm354_vm0, 0.0, %v1238_v52  ;;  %v1236_v28 = vrot.slane %v1164_v53, 7  ;;  %3886 = vrot.lane.b32.xlu1 %v3885_v13, %s4309_s24  ;;  %v3900_v16 = vpack.i.bf16 %v1571_v20, %v1569_v40  ;;  %v1404_v56 = vrot.slane %v1329_v5, 1 }
 0x21a   : > { %v5146_v18 = vsel %vm354_vm0, 0.0, %v1235_v4  ;;  %v5149_v8 = vsel %vm354_vm0, %v1238_v52, %v1239_v15  ;;  %v1109_v58 = vadd.f32 %v3612_v51, %v4977_v3  ;;  %v1583_v62 = vrot.slane %v5100_v48, 2 }
 0x21b   : > { %v1585_v38 = vrot.slane %v5120_v33, 2  ;;  %v1578_v7 = vrot.slane %v5111_v26, 2  ;;  %3901 = vrot.lane.b32.xlu0 %v3900_v16, %s4310_s25  ;;  %v3890_v34 = vpack.i.bf16 %v1576_v54, %v1574_v44  ;;  %v1580_v43 = vrot.slane %v1329_v5, 2 }
 0x21c   : > { %v5152_v29 = vpop.f32.mrb[24].mxu0  ;;  %v1416_v2 = vrot.slane %v5142_v17, 1  ;;  %v5162_v39 = vsel %vm354_vm0, %v1235_v4, %v1236_v28  ;;  %v1403_v51 = vsel %vm408_vm6, %v1401_v24, %v1402_v50  ;;  %v1592_v35 = vrot.slane %v5142_v17, 2 }
 0x21d   : > { %v5158_v36 = vpop.f32.mrb[25].mxu0  ;;  %v1411_v33 = vrot.slane %v5146_v18, 1  ;;  %v5168_v41 = vsel %vm354_vm0, %v1239_v15, 0.0  ;;  %v5171_v52 = vsel %vm354_vm0, %v1236_v28, 0.0  ;;  %3891 = vrot.lane.b32.xlu1 %v3890_v34, %s4310_s25  ;;  %v1169_v23 = vmax.f32 %v1109_v58, 0.0 }
 0x21e   : > { %v3617_v25 = vpop.f32.mrb[26].mxu0  ;;  %v1405_v59 = vsel %vm408_vm6, %v1402_v50, %v1404_v56  ;;  %v1101_v1 = vadd.f32 %v4977_v3, %v1100_v57  ;;  %v1112_v24 = vadd.f32 %v3613_v22, %v4977_v3  ;;  %v1104_v40 = vadd.f32 %v4977_v3, %v1103_v55 }
 0x21f   : > { %v1119_v19 = vpop.f32.mrb[27].mxu0  ;;  %v3915_v53 = vpack.i.bf16 %v1405_v59, %v1403_v51  ;;  %v1408_v5 = vsel %vm408_vm6, %v1406_v21, %v1407_v49  ;;  %v1410_v13 = vsel %vm408_vm6, %v1407_v49, %v1409_v47  ;;  %v1244_v20 = vrot.slane %v1169_v23, 7 }
 0x220   : > { %v1167_v4 = vmax.f32 %v1101_v1, 0.0  ;;  %v1170_v15 = vmax.f32 %v1112_v24, 0.0  ;;  %v3905_v44 = vpack.i.bf16 %v1410_v13, %v1408_v5  ;;  %v1168_v50 = vmax.f32 %v1104_v40, 0.0 }
 0x221   : > { %3916 = vrot.lane.b32.xlu0 %v3915_v53, %s4309_s24  ;;  %v1579_v57 = vsel %vm399_vm5, %v1577_v37, %v1578_v7  ;;  %v1581_v22 = vsel %vm399_vm5, %v1578_v7, %v1580_v43  ;;  %v1584_v55 = vsel %vm399_vm5, %v1582_v30, %v1583_v62  ;;  %v1587_v21 = vrot.slane %v5146_v18, 2 }
 0x222   : > { %v1412_v49 = vrot.slane %v5162_v39, 1  ;;  %v1241_v54 = vrot.slane %v1167_v4, 7  ;;  %v1245_v47 = vrot.slane %v1170_v15, 7  ;;  %3906 = vrot.lane.b32.xlu1 %v3905_v44, %s4309_s24  ;;  %v5194_v16 = vsel %vm354_vm0, 0.0, %v1244_v20 }
 0x223   : > { %v1242_v56 = vrot.slane %v1168_v50, 7  ;;  %v3920_v37 = vpack.i.bf16 %v1581_v22, %v1579_v57  ;;  %v1586_v58 = vsel %vm399_vm5, %v1583_v62, %v1585_v38  ;;  %v1414_v30 = vrot.slane %v5171_v52, 1 }
 0x224   : > { %v3620_v28 = vpop.f32.mrb[28].mxu0  ;;  %v5201_v34 = vsel %vm354_vm0, 0.0, %v1241_v54  ;;  %v5204_v43 = vsel %vm354_vm0, %v1244_v20, %v1245_v47  ;;  %v3910_v51 = vpack.i.bf16 %v1586_v58, %v1584_v55  ;;  %v1417_v59 = vrot.slane %v5149_v8, 1 }
 0x225   : > { %v5197_v7 = vpop.f32.mrb[29].mxu0  ;;  %v1419_v1 = vrot.slane %v5168_v41, 1  ;;  %v1593_v24 = vrot.slane %v5149_v8, 2  ;;  %v1595_v62 = vrot.slane %v5168_v41, 2  ;;  %3921 = vrot.lane.b32.xlu0 %v3920_v37, %s4310_s25  ;;  %v1588_v53 = vrot.slane %v5162_v39, 2 }
 0x226   : > { %v5206_v23 = vpop.f32.mrb[30].mxu0  ;;  %v1590_v40 = vrot.slane %v5171_v52, 2  ;;  %v1426_v5 = vrot.slane %v5194_v16, 1  ;;  %v5219_v13 = vsel %vm354_vm0, %v1241_v54, %v1242_v56  ;;  %3911 = vrot.lane.b32.xlu1 %v3910_v51, %s4310_s25  ;;  %v1602_v20 = vrot.slane %v5194_v16, 2 }
 0x227   : > { %v5213_v38 = vpop.f32.mrb[31].mxu0  ;;  %v1421_v4 = vrot.slane %v5201_v34, 1  ;;  %v5225_v41 = vsel %vm354_vm0, %v1245_v47, 0.0  ;;  %v5228_v15 = vsel %vm354_vm0, %v1242_v56, 0.0  ;;  %v1125_v52 = vadd.f32 %v5152_v29, %v4977_v3 }
 0x228   : > { %v1413_v44 = vsel %vm408_vm6, %v1411_v33, %v1412_v49  ;;  %v1415_v50 = vsel %vm408_vm6, %v1412_v49, %v1414_v30  ;;  %v1117_v57 = vadd.f32 %v4977_v3, %v5158_v36  ;;  %v1128_v55 = vadd.f32 %v3617_v25, %v4977_v3 }
 0x229   : > { %v3935_v22 = vpack.i.bf16 %v1415_v50, %v1413_v44  ;;  %v1120_v54 = vadd.f32 %v4977_v3, %v1119_v19  ;;  %v1418_v47 = vsel %vm408_vm6, %v1416_v2, %v1417_v59  ;;  %v1173_v56 = vmax.f32 %v1125_v52, 0.0 }
 0x22a   : > { %v1171_v37 = vmax.f32 %v1117_v57, 0.0  ;;  %v1420_v29 = vsel %vm408_vm6, %v1417_v59, %v1419_v1  ;;  %v1589_v33 = vsel %vm399_vm5, %v1587_v21, %v1588_v53  ;;  %v1174_v49 = vmax.f32 %v1128_v55, 0.0 }
 0x22b   : > { %3936 = vrot.lane.b32.xlu0 %v3935_v22, %s4309_s24  ;;  %v1172_v58 = vmax.f32 %v1120_v54, 0.0  ;;  %v3925_v36 = vpack.i.bf16 %v1420_v29, %v1418_v47  ;;  %v1591_v30 = vsel %vm399_vm5, %v1588_v53, %v1590_v40  ;;  %v1422_v25 = vrot.slane %v5219_v13, 1 }
 0x22c   : > { %v1250_v19 = vrot.slane %v1173_v56, 7  ;;  %v1247_v51 = vrot.slane %v1171_v37, 7  ;;  %v1594_v2 = vsel %vm399_vm5, %v1592_v35, %v1593_v24  ;;  %v1251_v52 = vrot.slane %v1174_v49, 7 }
 0x22d   : > { %v1248_v44 = vrot.slane %v1172_v58, 7  ;;  %3926 = vrot.lane.b32.xlu1 %v3925_v36, %s4309_s24  ;;  %v3940_v21 = vpack.i.bf16 %v1591_v30, %v1589_v33  ;;  %v1596_v59 = vsel %vm399_vm5, %v1593_v24, %v1595_v62  ;;  %v1597_v1 = vrot.slane %v5201_v34, 2 }
 0x22e   : > { %v1427_v50 = vrot.slane %v5204_v43, 1  ;;  %v1429_v53 = vrot.slane %v5225_v41, 1  ;;  %v5255_v40 = vsel %vm354_vm0, 0.0, %v1250_v19  ;;  %v1424_v57 = vrot.slane %v5228_v15, 1 }
 0x22f   : > { %v5259_v35 = vsel %vm354_vm0, 0.0, %v1247_v51  ;;  %3941 = vrot.lane.b32.xlu0 %v3940_v21, %s4310_s25  ;;  %v3930_v22 = vpack.i.bf16 %v1596_v59, %v1594_v2  ;;  %v1141_v55 = vadd.f32 %v3620_v28, %v4977_v3  ;;  %v1603_v24 = vrot.slane %v5204_v43, 2 }
 0x230   : > { %v1605_v62 = vrot.slane %v5225_v41, 2  ;;  %v5266_v54 = vsel %vm354_vm0, %v1250_v19, %v1251_v52  ;;  %v5269_v47 = vsel %vm354_vm0, %v1247_v51, %v1248_v44  ;;  %v1598_v56 = vrot.slane %v5219_v13, 2 }
 0x231   : > { %v1600_v37 = vrot.slane %v5228_v15, 2  ;;  %v1436_v29 = vrot.slane %v5255_v40, 1  ;;  %3931 = vrot.lane.b32.xlu1 %v3930_v22, %s4310_s25  ;;  %v1423_v28 = vsel %vm408_vm6, %v1421_v4, %v1422_v25  ;;  %v1612_v33 = vrot.slane %v5255_v40, 2 }
 0x232   : > { %v1431_v41 = vrot.slane %v5259_v35, 1  ;;  %v1336_v49 = vsel %vm354_vm0, %v1251_v52, 0.0  ;;  %v1335_v58 = vsel %vm354_vm0, %v1248_v44, 0.0  ;;  %v1177_v36 = vmax.f32 %v1141_v55, 0.0 }
 0x233   : > { %v1425_v30 = vsel %vm408_vm6, %v1422_v25, %v1424_v57  ;;  %v1133_v15 = vadd.f32 %v4977_v3, %v5197_v7  ;;  %v1144_v19 = vadd.f32 %v5206_v23, %v4977_v3  ;;  %v1136_v4 = vadd.f32 %v4977_v3, %v5213_v38 }
 0x234   : > { %v3955_v51 = vpack.i.bf16 %v1425_v30, %v1423_v28  ;;  %v1428_v2 = vsel %vm408_vm6, %v1426_v5, %v1427_v50  ;;  %v1430_v21 = vsel %vm408_vm6, %v1427_v50, %v1429_v53  ;;  %v1437_v52 = vrot.slane %v5266_v54, 1 }
 0x235   : > { %v1175_v44 = vmax.f32 %v1133_v15, 0.0  ;;  %v1178_v59 = vmax.f32 %v1144_v19, 0.0  ;;  %v3945_v22 = vpack.i.bf16 %v1430_v21, %v1428_v2  ;;  %v1176_v25 = vmax.f32 %v1136_v4, 0.0 }
 0x236   : > { %3956 = vrot.lane.b32.xlu0 %v3955_v51, %s4309_s24  ;;  %v1599_v7 = vsel %vm399_vm5, %v1597_v1, %v1598_v56  ;;  %v1601_v23 = vsel %vm399_vm5, %v1598_v56, %v1600_v37  ;;  %v1604_v3 = vsel %vm399_vm5, %v1602_v20, %v1603_v24  ;;  %v1439_v38 = vrot.slane %v1336_v49, 1 }
 0x237   : > { %v1256_v5 = vrot.slane %v1177_v36, 7  ;;  %v1253_v57 = vrot.slane %v1175_v44, 7  ;;  %v1257_v50 = vrot.slane %v1178_v59, 7  ;;  %3946 = vrot.lane.b32.xlu1 %v3945_v22, %s4309_s24  ;;  %v1432_v53 = vrot.slane %v5269_v47, 1 }
 0x238   : > { %v1254_v55 = vrot.slane %v1176_v25, 7  ;;  %v3960_v28 = vpack.i.bf16 %v1601_v23, %v1599_v7  ;;  %v1606_v30 = vsel %vm399_vm5, %v1603_v24, %v1605_v62  ;;  %v1434_v15 = vrot.slane %v1335_v58, 1 }
 0x239   : > { %v5300_v1 = vsel %vm354_vm0, 0.0, %v1253_v57  ;;  %v5303_v56 = vsel %vm354_vm0, %v1256_v5, %v1257_v50  ;;  %v3950_v20 = vpack.i.bf16 %v1606_v30, %v1604_v3  ;;  %v1607_v37 = vrot.slane %v5259_v35, 2 }
 0x23a   : > { %v1613_v36 = vrot.slane %v5266_v54, 2  ;;  %v1615_v19 = vrot.slane %v1336_v49, 2  ;;  %v1608_v51 = vrot.slane %v5269_v47, 2  ;;  %3961 = vrot.lane.b32.xlu0 %v3960_v28, %s4310_s25  ;;  %v1610_v4 = vrot.slane %v1335_v58, 2 }
 0x23b   : > { %v1338_v24 = vsel %vm354_vm0, %v1257_v50, 0.0  ;;  %v5311_v62 = vsel %vm354_vm0, %v1253_v57, %v1254_v55  ;;  %v1337_v2 = vsel %vm354_vm0, %v1254_v55, 0.0  ;;  %3951 = vrot.lane.b32.xlu1 %v3950_v20, %s4310_s25  ;;  %v5316_v21 = vsel %vm354_vm0, 0.0, %v1256_v5 }
 0x23c   : > { %v1441_v44 = vrot.slane %v5300_v1, 1  ;;  %v1442_v49 = vrot.slane %v5311_v62, 1  ;;  %v1444_v59 = vrot.slane %v1337_v2, 1  ;;  %v1433_v22 = vsel %vm408_vm6, %v1431_v41, %v1432_v53 }
 0x23d   : > { %v1435_v58 = vsel %vm408_vm6, %v1432_v53, %v1434_v15  ;;  %v1438_v25 = vsel %vm408_vm6, %v1436_v29, %v1437_v52  ;;  %v1440_v7 = vsel %vm408_vm6, %v1437_v52, %v1439_v38  ;;  %v1447_v23 = vrot.slane %v5303_v56, 1 }
 0x23e   : > { %v1449_v3 = vrot.slane %v1338_v24, 1  ;;  %v3975_v57 = vpack.i.bf16 %v1435_v58, %v1433_v22  ;;  %v3965_v50 = vpack.i.bf16 %v1440_v7, %v1438_v25  ;;  %v1609_v5 = vsel %vm399_vm5, %v1607_v37, %v1608_v51 }
 0x23f   : > { %v1611_v55 = vsel %vm399_vm5, %v1608_v51, %v1610_v4  ;;  %v1614_v28 = vsel %vm399_vm5, %v1612_v33, %v1613_v36  ;;  %v1616_v30 = vsel %vm399_vm5, %v1613_v36, %v1615_v19  ;;  %v1446_v29 = vrot.slane %v5316_v21, 1 }
 0x240   : > { %3976 = vrot.lane.b32.xlu0 %v3975_v57, %s4309_s24  ;;  %3966 = vrot.lane.b32.xlu1 %v3965_v50, %s4309_s24  ;;  %v1443_v41 = vsel %vm408_vm6, %v1441_v44, %v1442_v49  ;;  %v1445_v52 = vsel %vm408_vm6, %v1442_v49, %v1444_v59  ;;  %v3980_v38 = vpack.i.bf16 %v1611_v55, %v1609_v5  ;;  %v1618_v15 = vrot.slane %v5311_v62, 2 }
 0x241   : > { %v3970_v53 = vpack.i.bf16 %v1616_v30, %v1614_v28  ;;  %v1620_v20 = vrot.slane %v1337_v2, 2  ;;  %v1448_v37 = vsel %vm408_vm6, %v1446_v29, %v1447_v23  ;;  %v1450_v33 = vsel %vm408_vm6, %v1447_v23, %v1449_v3  ;;  %v4165_v2 = vld [vmem:[%s6707_s3] sm:$0xff]   ;;  %v4166_v23 = vld [vmem:[%s6707_s3 + $0x8] sm:$0xff]   ;;  %v4167_v3 = vld [vmem:[%s6707_s3 + $0x10] sm:$0xff]  }
 0x242   : > { %v3990_v36 = vpack.i.bf16 %v1445_v52, %v1443_v41  ;;  %v1617_v19 = vrot.slane %v5300_v1, 2  ;;  %v3985_v51 = vpack.i.bf16 %v1450_v33, %v1448_v37  ;;  %v1623_v4 = vrot.slane %v5303_v56, 2  ;;  %3622 = vmatprep.subr.bf16.mxu1 %v4165_v2 }
 0x243   : > { %v1625_v44 = vrot.slane %v1338_v24, 2  ;;  %v1621_v59 = vsel %vm399_vm5, %v1618_v15, %v1620_v20  ;;  %v1622_v22 = vrot.slane %v5316_v21, 2  ;;  %3623 = vmatpush3.bf16.msra.mxu1 %v4165_v2  ;;  %v4169_v2 = vld [vmem:[%s6707_s3 + $0x20] ss:$0 sps:$4 sm:$0xff]   ;;  %vm2798_vm0 = vcmask 1044484  }
 0x244   : > { %3981 = vrot.lane.b32.xlu0 %v3980_v38, %s4310_s25  ;;  %3971 = vrot.lane.b32.xlu1 %v3970_v53, %s4310_s25  ;;  %v1619_v49 = vsel %vm399_vm5, %v1617_v19, %v1618_v15  ;;  %v4168_v53 = vld [vmem:[%s6707_s3 + $0x18] sm:$0xff]   ;;  %vm3365_vm6 = vcmask 228352  }
 0x245   : > { %v3995_v58 = vpack.i.bf16 %v1621_v59, %v1619_v49  ;;  %v1624_v25 = vsel %vm399_vm5, %v1622_v22, %v1623_v4  ;;  %v1626_v24 = vsel %vm399_vm5, %v1623_v4, %v1625_v44  ;;  %3624 = vmatprep.subr.bf16.mxu1 %v4166_v23  ;;  %vm3360_vm5 = vcmask 162816  }
 0x246   : > { %v4000_v7 = vpack.i.bf16 %v1626_v24, %v1624_v25 }
 0x247   : > { %3625 = vmatpush3.bf16.msra.mxu1 %v4166_v23 }
 0x248   : > { %3991 = vrot.lane.b32.xlu0 %v3990_v36, %s4309_s24  ;;  %3986 = vrot.lane.b32.xlu1 %v3985_v51, %s4309_s24 }
 0x249   : > { %3626 = vmatprep.subr.bf16.mxu1 %v4167_v3 }
 0x24b   : > { %3627 = vmatpush3.bf16.msra.mxu1 %v4167_v3 }
 0x24c   : > { %3996 = vrot.lane.b32.xlu0 %v3995_v58, %s4310_s25  ;;  %3628 = vmatprep.subr.bf16.mxu1 %v4168_v53 }
 0x24f   : > { %3629 = vmatpush3.bf16.msra.mxu1 %v4168_v53 }
 0x250   : > { %4001 = vrot.lane.b32.xlu0 %v4000_v7, %s4310_s25  ;;  %3665 = vmatprep.subr.msk.bf16.mxu1 %vm381_vm3, %v4169_v2 }
 0x26f   : > { %v3852_v57 = vpop.permute.xlu1 %3851  ;;  %v3847_v50 = vpop.permute.xlu0 %3846 }
 0x270   : > { %v3854_v5 = vunpack.i.h.bf16 %v3852_v57  ;;  %v3853_v55 = vunpack.i.l.bf16 %v3852_v57  ;;  %v3849_v28 = vunpack.i.h.bf16 %v3847_v50  ;;  %v3848_v30 = vunpack.i.l.bf16 %v3847_v50 }
 0x272   : > { %v1726_v29 = vsel %vm660_vm7, %v4987_v0, %v3849_v28  ;;  %v1725_v41 = vsel %vm660_vm7, %v4984_v42, %v3848_v30 }
 0x273   : > { %v5364_v52 = vsel %vm678_vm8, %v1725_v41, %v3853_v55  ;;  %v5367_v38 = vsel %vm678_vm8, %v1726_v29, %v3854_v5 }
 0x274   : > { %v4005_v15 = vpack.i.bf16 %v5367_v38, %v5364_v52  ;;  %v3857_v20 = vpop.permute.xlu1 %3856 }
 0x275   : > { %v3859_v42 = vunpack.i.h.bf16 %v3857_v20  ;;  %v3858_v0 = vunpack.i.l.bf16 %v3857_v20 }
 0x276   : > { %4006 = vrot.lane.b32.xlu0 %v4005_v15, %s4311_s11 }
 0x277   : > { %v1724_v19 = vsel %vm660_vm7, %v4993_v46, %v3859_v42  ;;  %v1723_v51 = vsel %vm660_vm7, %v5000_v60, %v3858_v0  ;;  %v2177_v60 = vsel %vm381_vm3, %v4169_v2, 0  ;;  %vm2807_vm3 = vcmask 1047559  }
 0x278   : > { %v3862_v37 = vpop.permute.xlu1 %3861  ;;  %3631 = vmatpush3.bf16.msra.mxu1 %v2177_v60 }
 0x279   : > { %v3864_v33 = vunpack.i.h.bf16 %v3862_v37  ;;  %v3863_v36 = vunpack.i.l.bf16 %v3862_v37  ;;  %v3877_v49 = vpop.permute.xlu0 %3876 }
 0x27a   : > { %v3879_v46 = vunpack.i.h.bf16 %v3877_v49  ;;  %v3878_v22 = vunpack.i.l.bf16 %v3877_v49 }
 0x27b   : > { %v5380_v4 = vsel %vm678_vm8, %v1723_v51, %v3863_v36  ;;  %v5383_v44 = vsel %vm678_vm8, %v1724_v19, %v3864_v33 }
 0x27c   : > { %v4010_v59 = vpack.i.bf16 %v5383_v44, %v5380_v4  ;;  %v1728_v23 = vsel %vm660_vm7, %v5024_v61, %v3879_v46  ;;  %v1727_v3 = vsel %vm660_vm7, %v5016_v14, %v3878_v22 }
 0x27e   : > { %4011 = vrot.lane.b32.xlu1 %v4010_v59, %s4311_s11 }
 0x281   : > { %v3867_v58 = vpop.permute.xlu1 %3866 }
 0x282   : > { %4016 = vrot.lane.b32.xlu1 %v4005_v15, %s4312_s12  ;;  %v3869_v57 = vunpack.i.h.bf16 %v3867_v58  ;;  %v3868_v50 = vunpack.i.l.bf16 %v3867_v58 }
 0x283   : > { %v3882_v25 = vpop.permute.xlu0 %3881 }
 0x284   : > { %v3884_v24 = vunpack.i.h.bf16 %v3882_v25  ;;  %v3883_v7 = vunpack.i.l.bf16 %v3882_v25  ;;  %v1730_v61 = vsel %vm660_vm7, %v5021_v45, %v3869_v57  ;;  %v1729_v14 = vsel %vm660_vm7, %v5013_v10, %v3868_v50 }
 0x286   : > { %v5399_v5 = vsel %vm678_vm8, %v1727_v3, %v3883_v7  ;;  %v5402_v55 = vsel %vm678_vm8, %v1728_v23, %v3884_v24  ;;  %v3872_v28 = vpop.permute.xlu1 %3871 }
 0x287   : > { %v4020_v30 = vpack.i.bf16 %v5402_v55, %v5399_v5  ;;  %v3874_v29 = vunpack.i.h.bf16 %v3872_v28  ;;  %v3873_v41 = vunpack.i.l.bf16 %v3872_v28 }
 0x288   : > { %v3897_v53 = vpop.permute.xlu0 %3896 }
 0x289   : > { %4021 = vrot.lane.b32.xlu0 %v4020_v30, %s4312_s12  ;;  %4031 = vrot.lane.b32.xlu1 %v4020_v30, %s4311_s11  ;;  %v5413_v15 = vsel %vm678_vm8, %v1729_v14, %v3873_v41  ;;  %v5416_v20 = vsel %vm678_vm8, %v1730_v61, %v3874_v29  ;;  %v3899_v42 = vunpack.i.h.bf16 %v3897_v53  ;;  %v3898_v0 = vunpack.i.l.bf16 %v3897_v53 }
 0x28a   : > { %v4025_v33 = vpack.i.bf16 %v5416_v20, %v5413_v15 }
 0x28b   : > { %v3887_v37 = vpop.permute.xlu1 %3886  ;;  %v1732_v49 = vsel %vm660_vm7, %v5076_v9, %v3899_v42  ;;  %v1731_v59 = vsel %vm660_vm7, %v5062_v32, %v3898_v0 }
 0x28c   : > { %v3889_v45 = vunpack.i.h.bf16 %v3887_v37  ;;  %v3888_v36 = vunpack.i.l.bf16 %v3887_v37 }
 0x28d   : > { %v3902_v19 = vpop.permute.xlu0 %3901  ;;  %4026 = vrot.lane.b32.xlu0 %v4025_v33, %s4311_s11  ;;  %4036 = vrot.lane.b32.xlu1 %v4025_v33, %s4312_s12 }
 0x28e   : > { %v3904_v10 = vunpack.i.h.bf16 %v3902_v19  ;;  %v3903_v51 = vunpack.i.l.bf16 %v3902_v19  ;;  %v1734_v25 = vsel %vm660_vm7, %v5057_v27, %v3889_v45  ;;  %v1733_v24 = vsel %vm660_vm7, %v5054_v63, %v3888_v36 }
 0x28f   : > { %v3892_v2 = vpop.permute.xlu1 %3891 }
 0x290   : > { %v3894_v46 = vunpack.i.h.bf16 %v3892_v2  ;;  %v3893_v22 = vunpack.i.l.bf16 %v3892_v2  ;;  %v5427_v58 = vsel %vm678_vm8, %v1731_v59, %v3903_v51  ;;  %v5430_v60 = vsel %vm678_vm8, %v1732_v49, %v3904_v10 }
 0x291   : > { %v4040_v9 = vpack.i.bf16 %v5430_v60, %v5427_v58 }
 0x292   : > { %v5439_v32 = vsel %vm678_vm8, %v1733_v24, %v3893_v22  ;;  %v5442_v7 = vsel %vm678_vm8, %v1734_v25, %v3894_v46 }
 0x293   : > { %v3917_v23 = vpop.permute.xlu0 %3916  ;;  %4041 = vrot.lane.b32.xlu0 %v4040_v9, %s4312_s12  ;;  %4051 = vrot.lane.b32.xlu1 %v4040_v9, %s4311_s11  ;;  %v4045_v27 = vpack.i.bf16 %v5442_v7, %v5439_v32 }
 0x294   : > { %v3907_v3 = vpop.permute.xlu1 %3906  ;;  %v3919_v57 = vunpack.i.h.bf16 %v3917_v23  ;;  %v3918_v63 = vunpack.i.l.bf16 %v3917_v23 }
 0x295   : > { %v3909_v50 = vunpack.i.h.bf16 %v3907_v3  ;;  %v3908_v28 = vunpack.i.l.bf16 %v3907_v3 }
 0x296   : > { %v1736_v61 = vsel %vm660_vm7, %v5111_v26, %v3919_v57  ;;  %v1735_v14 = vsel %vm660_vm7, %v5097_v6, %v3918_v63 }
 0x297   : > { %v3922_v30 = vpop.permute.xlu0 %3921  ;;  %4046 = vrot.lane.b32.xlu0 %v4045_v27, %s4311_s11  ;;  %4056 = vrot.lane.b32.xlu1 %v4045_v27, %s4312_s12  ;;  %v1738_v37 = vsel %vm660_vm7, %v5100_v48, %v3909_v50  ;;  %v1737_v33 = vsel %vm660_vm7, %v5093_v12, %v3908_v28 }
 0x298   : > { %v3924_v29 = vunpack.i.h.bf16 %v3922_v30  ;;  %v3923_v41 = vunpack.i.l.bf16 %v3922_v30  ;;  %v3912_v53 = vpop.permute.xlu1 %3911 }
 0x299   : > { %v3914_v42 = vunpack.i.h.bf16 %v3912_v53  ;;  %v3913_v0 = vunpack.i.l.bf16 %v3912_v53 }
 0x29a   : > { %v5459_v45 = vsel %vm678_vm8, %v1735_v14, %v3923_v41  ;;  %v5462_v36 = vsel %vm678_vm8, %v1736_v61, %v3924_v29 }
 0x29b   : > { %v4060_v26 = vpack.i.bf16 %v5462_v36, %v5459_v45  ;;  %v5467_v19 = vsel %vm678_vm8, %v1737_v33, %v3913_v0  ;;  %v5470_v6 = vsel %vm678_vm8, %v1738_v37, %v3914_v42 }
 0x29c   : > { %v4065_v12 = vpack.i.bf16 %v5470_v6, %v5467_v19 }
 0x29d   : > { %v3937_v10 = vpop.permute.xlu0 %3936  ;;  %4061 = vrot.lane.b32.xlu0 %v4060_v26, %s4312_s12  ;;  %4071 = vrot.lane.b32.xlu1 %v4060_v26, %s4311_s11 }
 0x29e   : > { %v3939_v48 = vunpack.i.h.bf16 %v3937_v10  ;;  %v3938_v51 = vunpack.i.l.bf16 %v3937_v10 }
 0x29f   : > { %v3927_v49 = vpop.permute.xlu1 %3926 }
 0x2a0   : > { %v3929_v59 = vunpack.i.h.bf16 %v3927_v49  ;;  %v3928_v2 = vunpack.i.l.bf16 %v3927_v49  ;;  %v1740_v24 = vsel %vm660_vm7, %v5162_v39, %v3939_v48  ;;  %v1739_v9 = vsel %vm660_vm7, %v5146_v18, %v3938_v51 }
 0x2a1   : > { %v3942_v46 = vpop.permute.xlu0 %3941  ;;  %4066 = vrot.lane.b32.xlu0 %v4065_v12, %s4311_s11  ;;  %4076 = vrot.lane.b32.xlu1 %v4065_v12, %s4312_s12 }
 0x2a2   : > { %v3944_v22 = vunpack.i.h.bf16 %v3942_v46  ;;  %v3943_v25 = vunpack.i.l.bf16 %v3942_v46  ;;  %v1742_v50 = vsel %vm660_vm7, %v5149_v8, %v3929_v59  ;;  %v1741_v28 = vsel %vm660_vm7, %v5142_v17, %v3928_v2 }
 0x2a3   : > { %v3932_v23 = vpop.permute.xlu1 %3931 }
 0x2a4   : > { %v3934_v27 = vunpack.i.h.bf16 %v3932_v23  ;;  %v3933_v3 = vunpack.i.l.bf16 %v3932_v23  ;;  %v5483_v57 = vsel %vm678_vm8, %v1739_v9, %v3943_v25  ;;  %v5486_v63 = vsel %vm678_vm8, %v1740_v24, %v3944_v22 }
 0x2a5   : > { %v4080_v39 = vpack.i.bf16 %v5486_v63, %v5483_v57 }
 0x2a6   : > { %v5495_v18 = vsel %vm678_vm8, %v1741_v28, %v3933_v3  ;;  %v5498_v30 = vsel %vm678_vm8, %v1742_v50, %v3934_v27 }
 0x2a7   : > { %4081 = vrot.lane.b32.xlu0 %v4080_v39, %s4312_s12  ;;  %4091 = vrot.lane.b32.xlu1 %v4080_v39, %s4311_s11  ;;  %v4085_v29 = vpack.i.bf16 %v5498_v30, %v5495_v18 }
 0x2a8   : > { %v3957_v8 = vpop.permute.xlu0 %3956 }
 0x2a9   : > { %v3947_v41 = vpop.permute.xlu1 %3946  ;;  %v3959_v53 = vunpack.i.h.bf16 %v3957_v8  ;;  %v3958_v17 = vunpack.i.l.bf16 %v3957_v8 }
 0x2aa   : > { %v3949_v61 = vunpack.i.h.bf16 %v3947_v41  ;;  %v3948_v14 = vunpack.i.l.bf16 %v3947_v41 }
 0x2ab   : > { %4086 = vrot.lane.b32.xlu0 %v4085_v29, %s4311_s11  ;;  %4096 = vrot.lane.b32.xlu1 %v4085_v29, %s4312_s12  ;;  %v1744_v26 = vsel %vm660_vm7, %v5219_v13, %v3959_v53  ;;  %v1743_v10 = vsel %vm660_vm7, %v5201_v34, %v3958_v17 }
 0x2ac   : > { %v3962_v42 = vpop.permute.xlu0 %3961  ;;  %v1746_v51 = vsel %vm660_vm7, %v5204_v43, %v3949_v61  ;;  %v1745_v49 = vsel %vm660_vm7, %v5194_v16, %v3948_v14 }
 0x2ad   : > { %v3964_v0 = vunpack.i.h.bf16 %v3962_v42  ;;  %v3963_v37 = vunpack.i.l.bf16 %v3962_v42  ;;  %v3952_v33 = vpop.permute.xlu1 %3951 }
 0x2ae   : > { %v3954_v12 = vunpack.i.h.bf16 %v3952_v33  ;;  %v3953_v48 = vunpack.i.l.bf16 %v3952_v33 }
 0x2af   : > { %v5515_v59 = vsel %vm678_vm8, %v1743_v10, %v3963_v37  ;;  %v5518_v2 = vsel %vm678_vm8, %v1744_v26, %v3964_v0 }
 0x2b0   : > { %v4100_v13 = vpack.i.bf16 %v5518_v2, %v5515_v59  ;;  %v5523_v46 = vsel %vm678_vm8, %v1745_v49, %v3953_v48  ;;  %v5526_v34 = vsel %vm678_vm8, %v1746_v51, %v3954_v12 }
 0x2b1   : > { %v4105_v16 = vpack.i.bf16 %v5526_v34, %v5523_v46 }
 0x2b2   : > { %v3977_v22 = vpop.permute.xlu0 %3976  ;;  %4101 = vrot.lane.b32.xlu0 %v4100_v13, %s4312_s12  ;;  %v3967_v43 = vpop.permute.xlu1 %3966  ;;  %4111 = vrot.lane.b32.xlu1 %v4100_v13, %s4311_s11 }
 0x2b3   : > { %v3979_v25 = vunpack.i.h.bf16 %v3977_v22  ;;  %v3978_v24 = vunpack.i.l.bf16 %v3977_v22  ;;  %v3969_v9 = vunpack.i.h.bf16 %v3967_v43  ;;  %v3968_v23 = vunpack.i.l.bf16 %v3967_v43 }
 0x2b5   : > { %v1748_v8 = vsel %vm660_vm7, %v5269_v47, %v3979_v25  ;;  %v1747_v41 = vsel %vm660_vm7, %v5259_v35, %v3978_v24  ;;  %v1750_v53 = vsel %vm660_vm7, %v5266_v54, %v3969_v9  ;;  %v1749_v17 = vsel %vm660_vm7, %v5255_v40, %v3968_v23 }
 0x2b6   : > { %v3982_v27 = vpop.permute.xlu0 %3981  ;;  %4106 = vrot.lane.b32.xlu0 %v4105_v16, %s4311_s11  ;;  %v3972_v3 = vpop.permute.xlu1 %3971  ;;  %4116 = vrot.lane.b32.xlu1 %v4105_v16, %s4312_s12 }
 0x2b7   : > { %v3984_v50 = vunpack.i.h.bf16 %v3982_v27  ;;  %v3983_v28 = vunpack.i.l.bf16 %v3982_v27  ;;  %v3974_v39 = vunpack.i.h.bf16 %v3972_v3  ;;  %v3973_v29 = vunpack.i.l.bf16 %v3972_v3 }
 0x2b9   : > { %v5543_v61 = vsel %vm678_vm8, %v1747_v41, %v3983_v28  ;;  %v5546_v14 = vsel %vm678_vm8, %v1748_v8, %v3984_v50  ;;  %v5549_v42 = vsel %vm678_vm8, %v1749_v17, %v3973_v29  ;;  %v5552_v47 = vsel %vm678_vm8, %v1750_v53, %v3974_v39 }
 0x2ba   : > { %v3992_v0 = vpop.permute.xlu0 %3991  ;;  %v4120_v35 = vpack.i.bf16 %v5546_v14, %v5543_v61  ;;  %v4125_v40 = vpack.i.bf16 %v5552_v47, %v5549_v42  ;;  %v3987_v33 = vpop.permute.xlu1 %3986 }
 0x2bb   : > { %v3994_v54 = vunpack.i.h.bf16 %v3992_v0  ;;  %v3993_v37 = vunpack.i.l.bf16 %v3992_v0  ;;  %v3989_v49 = vunpack.i.h.bf16 %v3987_v33  ;;  %v3988_v13 = vunpack.i.l.bf16 %v3987_v33 }
 0x2bc   : > { %4121 = vrot.lane.b32.xlu0 %v4120_v35, %s4312_s12  ;;  %4131 = vrot.lane.b32.xlu1 %v4120_v35, %s4311_s11 }
 0x2bd   : > { %v1752_v48 = vsel %vm660_vm7, %v5311_v62, %v3994_v54  ;;  %v1751_v51 = vsel %vm660_vm7, %v5300_v1, %v3993_v37  ;;  %v1754_v1 = vsel %vm660_vm7, %v5303_v56, %v3989_v49  ;;  %v1753_v9 = vsel %vm660_vm7, %v5316_v21, %v3988_v13 }
 0x2be   : > { %v3997_v26 = vpop.permute.xlu0 %3996 }
 0x2bf   : > { %v3999_v10 = vunpack.i.h.bf16 %v3997_v26  ;;  %v3998_v12 = vunpack.i.l.bf16 %v3997_v26 }
 0x2c0   : > { %4126 = vrot.lane.b32.xlu0 %v4125_v40, %s4311_s11  ;;  %4136 = vrot.lane.b32.xlu1 %v4125_v40, %s4312_s12 }
 0x2c1   : > { %v5567_v22 = vsel %vm678_vm8, %v1751_v51, %v3998_v12  ;;  %v5570_v43 = vsel %vm678_vm8, %v1752_v48, %v3999_v10 }
 0x2c2   : > { %v4002_v16 = vpop.permute.xlu0 %4001  ;;  %v4140_v25 = vpack.i.bf16 %v5570_v43, %v5567_v22 }
 0x2c3   : > { %v4004_v62 = vunpack.i.h.bf16 %v4002_v16  ;;  %v4003_v24 = vunpack.i.l.bf16 %v4002_v16 }
 0x2c4   : > { %4141 = vrot.lane.b32.xlu0 %v4140_v25, %s4312_s12  ;;  %4151 = vrot.lane.b32.xlu1 %v4140_v25, %s4311_s11 }
 0x2c5   : > { %v1785_v23 = vsel %vm678_vm8, %v1753_v9, %v4003_v24  ;;  %v1786_v27 = vsel %vm678_vm8, %v1754_v1, %v4004_v62 }
 0x2c6   : > { %v4145_v3 = vpack.i.bf16 %v1786_v27, %v1785_v23 }
 0x2c8   : > { %4146 = vrot.lane.b32.xlu0 %v4145_v3, %s4311_s11  ;;  %4156 = vrot.lane.b32.xlu1 %v4145_v3, %s4312_s12 }
 0x2e8   : > { %v4007_v29 = vpop.permute.xlu0 %4006 }
 0x2e9   : > { %v4009_v35 = vunpack.i.h.bf16 %v4007_v29  ;;  %v4008_v54 = vunpack.i.l.bf16 %v4007_v29 }
 0x2eb   : > { %v2007_v12 = vsel %vm809_vm9, %v5380_v4, %v4008_v54  ;;  %v2008_v48 = vsel %vm809_vm9, %v5383_v44, %v4009_v35 }
 0x2f0   : > { %v4012_v50 = vpop.permute.xlu1 %4011 }
 0x2f1   : > { %v4014_v28 = vunpack.i.h.bf16 %v4012_v50  ;;  %v4013_v39 = vunpack.i.l.bf16 %v4012_v50 }
 0x2f3   : > { %v2005_v41 = vsel %vm809_vm9, %v4722_v11, %v4013_v39  ;;  %v2006_v53 = vsel %vm809_vm9, %v4722_v11, %v4014_v28 }
 0x2f4   : > { %v4017_v56 = vpop.permute.xlu1 %4016 }
 0x2f5   : > { %v4019_v8 = vunpack.i.h.bf16 %v4017_v56  ;;  %v4018_v21 = vunpack.i.l.bf16 %v4017_v56 }
 0x2f7   : > { %v2037_v17 = vsel %vm842_vm10, %v2005_v41, %v4018_v21  ;;  %v2038_v0 = vsel %vm842_vm10, %v2006_v53, %v4019_v8 }
 0x2f8   : > { %v2069_v37 = vpack.c.bf16 %v2038_v0, %v2037_v17 }
 0x2fa   : > { %3632 = vmatprep.mubr.msk.bf16.mxu1 %vm934_vm11, %v2069_v37 }
 0x2fb   : > { %v4022_v40 = vpop.permute.xlu0 %4021  ;;  %v4032_v33 = vpop.permute.xlu1 %4031 }
 0x2fc   : > { %v4024_v26 = vunpack.i.h.bf16 %v4022_v40  ;;  %v4023_v10 = vunpack.i.l.bf16 %v4022_v40  ;;  %v4034_v11 = vunpack.i.h.bf16 %v4032_v33  ;;  %v4033_v51 = vunpack.i.l.bf16 %v4032_v33 }
 0x2fe   : > { %v2039_v49 = vsel %vm842_vm10, %v2007_v12, %v4023_v10  ;;  %v2040_v13 = vsel %vm842_vm10, %v2008_v48, %v4024_v26  ;;  %v2010_v9 = vsel %vm809_vm9, %v5367_v38, %v4034_v11  ;;  %v2009_v4 = vsel %vm809_vm9, %v5364_v52, %v4033_v51 }
 0x2ff   : > { %v2070_v16 = vpack.c.bf16 %v2040_v13, %v2039_v49  ;;  %v4027_v25 = vpop.permute.xlu0 %4026  ;;  %v4037_v62 = vpop.permute.xlu1 %4036 }
 0x300   : > { %v4039_v24 = vunpack.i.h.bf16 %v4037_v62  ;;  %v4038_v1 = vunpack.i.l.bf16 %v4037_v62  ;;  %v4029_v27 = vunpack.i.h.bf16 %v4027_v25  ;;  %v4028_v3 = vunpack.i.l.bf16 %v4027_v25 }
 0x301   : > { %3633 = vmatmul.mubr.msk.bf16.vlgmr.msra.gmra.mrb[0].mxu1 %vm934_vm11, %v2070_v16 }
 0x302   : > { %v2041_v44 = vsel %vm842_vm10, %v2009_v4, %v4038_v1  ;;  %v2042_v23 = vsel %vm842_vm10, %v2010_v9, %v4039_v24  ;;  %v2012_v38 = vsel %vm809_vm9, %v5402_v55, %v4029_v27  ;;  %v2011_v52 = vsel %vm809_vm9, %v5399_v5, %v4028_v3 }
 0x303   : > { %v2071_v50 = vpack.c.bf16 %v2042_v23, %v2041_v44 }
 0x305   : > { %v4042_v28 = vpop.permute.xlu0 %4041  ;;  %v4052_v39 = vpop.permute.xlu1 %4051  ;;  %3636 = vmatprep.mubr.msk.bf16.mxu1 %vm934_vm11, %v2071_v50 }
 0x306   : > { %v4044_v56 = vunpack.i.h.bf16 %v4042_v28  ;;  %v4043_v29 = vunpack.i.l.bf16 %v4042_v28  ;;  %v4054_v8 = vunpack.i.h.bf16 %v4052_v39  ;;  %v4053_v21 = vunpack.i.l.bf16 %v4052_v39 }
 0x308   : > { %v2043_v41 = vsel %vm842_vm10, %v2011_v52, %v4043_v29  ;;  %v2044_v53 = vsel %vm842_vm10, %v2012_v38, %v4044_v56  ;;  %v2014_v40 = vsel %vm809_vm9, %v5416_v20, %v4054_v8  ;;  %v2013_v55 = vsel %vm809_vm9, %v5413_v15, %v4053_v21 }
 0x309   : > { %v2072_v17 = vpack.c.bf16 %v2044_v53, %v2043_v41  ;;  %v4047_v0 = vpop.permute.xlu0 %4046  ;;  %v4057_v35 = vpop.permute.xlu1 %4056 }
 0x30a   : > { %v4059_v54 = vunpack.i.h.bf16 %v4057_v35  ;;  %v4058_v37 = vunpack.i.l.bf16 %v4057_v35  ;;  %v4049_v26 = vunpack.i.h.bf16 %v4047_v0  ;;  %v4048_v10 = vunpack.i.l.bf16 %v4047_v0 }
 0x30b   : > { %3637 = vmatmul.mubr.msk.bf16.gmra.mrb[4].mxu1 %vm934_vm11, %v2072_v17 }
 0x30c   : > { %v2045_v5 = vsel %vm842_vm10, %v2013_v55, %v4058_v37  ;;  %v2046_v33 = vsel %vm842_vm10, %v2014_v40, %v4059_v54  ;;  %v2016_v20 = vsel %vm809_vm9, %v5430_v60, %v4049_v26  ;;  %v2015_v15 = vsel %vm809_vm9, %v5427_v58, %v4048_v10 }
 0x30d   : > { %v2073_v12 = vpack.c.bf16 %v2046_v33, %v2045_v5 }
 0x30f   : > { %v4062_v48 = vpop.permute.xlu0 %4061  ;;  %v4072_v11 = vpop.permute.xlu1 %4071  ;;  %3640 = vmatprep.mubr.msk.bf16.mxu1 %vm934_vm11, %v2073_v12 }
 0x310   : > { %v4064_v51 = vunpack.i.h.bf16 %v4062_v48  ;;  %v4063_v49 = vunpack.i.l.bf16 %v4062_v48  ;;  %v4074_v13 = vunpack.i.h.bf16 %v4072_v11  ;;  %v4073_v16 = vunpack.i.l.bf16 %v4072_v11 }
 0x312   : > { %v2047_v25 = vsel %vm842_vm10, %v2015_v15, %v4063_v49  ;;  %v2048_v62 = vsel %vm842_vm10, %v2016_v20, %v4064_v51  ;;  %v2018_v23 = vsel %vm809_vm9, %v5442_v7, %v4074_v13  ;;  %v2017_v60 = vsel %vm809_vm9, %v5439_v32, %v4073_v16 }
 0x313   : > { %v2074_v24 = vpack.c.bf16 %v2048_v62, %v2047_v25  ;;  %v4067_v1 = vpop.permute.xlu0 %4066  ;;  %v4077_v9 = vpop.permute.xlu1 %4076 }
 0x314   : > { %v4079_v4 = vunpack.i.h.bf16 %v4077_v9  ;;  %v4078_v44 = vunpack.i.l.bf16 %v4077_v9  ;;  %v4069_v3 = vunpack.i.h.bf16 %v4067_v1  ;;  %v4068_v50 = vunpack.i.l.bf16 %v4067_v1 }
 0x315   : > { %3641 = vmatmul.mubr.msk.bf16.gmra.mrb[8].mxu1 %vm934_vm11, %v2074_v24 }
 0x316   : > { %v2049_v58 = vsel %vm842_vm10, %v2017_v60, %v4078_v44  ;;  %v2050_v27 = vsel %vm842_vm10, %v2018_v23, %v4079_v4  ;;  %v2020_v7 = vsel %vm809_vm9, %v5462_v36, %v4069_v3  ;;  %v2019_v32 = vsel %vm809_vm9, %v5459_v45, %v4068_v50 }
 0x317   : > { %v2075_v28 = vpack.c.bf16 %v2050_v27, %v2049_v58 }
 0x319   : > { %v4082_v39 = vpop.permute.xlu0 %4081  ;;  %v4092_v56 = vpop.permute.xlu1 %4091  ;;  %3644 = vmatprep.mubr.msk.bf16.mxu1 %vm934_vm11, %v2075_v28 }
 0x31a   : > { %v4084_v29 = vunpack.i.h.bf16 %v4082_v39  ;;  %v4083_v38 = vunpack.i.l.bf16 %v4082_v39  ;;  %v4094_v52 = vunpack.i.h.bf16 %v4092_v56  ;;  %v4093_v8 = vunpack.i.l.bf16 %v4092_v56 }
 0x31c   : > { %v2051_v21 = vsel %vm842_vm10, %v2019_v32, %v4083_v38  ;;  %v2052_v41 = vsel %vm842_vm10, %v2020_v7, %v4084_v29  ;;  %v2022_v37 = vsel %vm809_vm9, %v5470_v6, %v4094_v52  ;;  %v2021_v36 = vsel %vm809_vm9, %v5467_v19, %v4093_v8 }
 0x31d   : > { %v2076_v53 = vpack.c.bf16 %v2052_v41, %v2051_v21  ;;  %v4097_v17 = vpop.permute.xlu1 %4096  ;;  %v4087_v0 = vpop.permute.xlu0 %4086 }
 0x31e   : > { %v4099_v35 = vunpack.i.h.bf16 %v4097_v17  ;;  %v4098_v54 = vunpack.i.l.bf16 %v4097_v17  ;;  %v4089_v5 = vunpack.i.h.bf16 %v4087_v0  ;;  %v4088_v33 = vunpack.i.l.bf16 %v4087_v0 }
 0x31f   : > { %3645 = vmatmul.mubr.msk.bf16.gmra.mrb[12].mxu1 %vm934_vm11, %v2076_v53 }
 0x320   : > { %v2053_v45 = vsel %vm842_vm10, %v2021_v36, %v4098_v54  ;;  %v2054_v40 = vsel %vm842_vm10, %v2022_v37, %v4099_v35  ;;  %v2024_v6 = vsel %vm809_vm9, %v5486_v63, %v4089_v5  ;;  %v2023_v19 = vsel %vm809_vm9, %v5483_v57, %v4088_v33 }
 0x321   : > { %v2077_v55 = vpack.c.bf16 %v2054_v40, %v2053_v45 }
 0x323   : > { %3648 = vmatprep.mubr.msk.bf16.mxu1 %vm934_vm11, %v2077_v55 }
 0x324   : > { %v4102_v26 = vpop.permute.xlu0 %4101  ;;  %v4112_v10 = vpop.permute.xlu1 %4111 }
 0x325   : > { %v4104_v12 = vunpack.i.h.bf16 %v4102_v26  ;;  %v4103_v48 = vunpack.i.l.bf16 %v4102_v26  ;;  %v4114_v11 = vunpack.i.h.bf16 %v4112_v10  ;;  %v4113_v51 = vunpack.i.l.bf16 %v4112_v10 }
 0x327   : > { %v2055_v49 = vsel %vm842_vm10, %v2023_v19, %v4103_v48  ;;  %v2056_v20 = vsel %vm842_vm10, %v2024_v6, %v4104_v12  ;;  %v2026_v24 = vsel %vm809_vm9, %v5498_v30, %v4114_v11  ;;  %v2025_v63 = vsel %vm809_vm9, %v5495_v18, %v4113_v51 }
 0x328   : > { %v2078_v15 = vpack.c.bf16 %v2056_v20, %v2055_v49  ;;  %v4107_v13 = vpop.permute.xlu0 %4106  ;;  %v4117_v16 = vpop.permute.xlu1 %4116 }
 0x329   : > { %v4119_v25 = vunpack.i.h.bf16 %v4117_v16  ;;  %v4118_v62 = vunpack.i.l.bf16 %v4117_v16  ;;  %v4109_v9 = vunpack.i.h.bf16 %v4107_v13  ;;  %v4108_v4 = vunpack.i.l.bf16 %v4107_v13 }
 0x32a   : > { %3649 = vmatmul.mubr.msk.bf16.gmra.mrb[16].mxu1 %vm934_vm11, %v2078_v15 }
 0x32b   : > { %v2057_v57 = vsel %vm842_vm10, %v2025_v63, %v4118_v62  ;;  %v2058_v1 = vsel %vm842_vm10, %v2026_v24, %v4119_v25  ;;  %v2028_v30 = vsel %vm809_vm9, %v5518_v2, %v4109_v9  ;;  %v2027_v18 = vsel %vm809_vm9, %v5515_v59, %v4108_v4 }
 0x32c   : > { %v2079_v44 = vpack.c.bf16 %v2058_v1, %v2057_v57 }
 0x32e   : > { %v4122_v23 = vpop.permute.xlu0 %4121  ;;  %v4132_v60 = vpop.permute.xlu1 %4131  ;;  %3652 = vmatprep.mubr.msk.bf16.mxu1 %vm934_vm11, %v2079_v44 }
 0x32f   : > { %v4124_v58 = vunpack.i.h.bf16 %v4122_v23  ;;  %v4123_v27 = vunpack.i.l.bf16 %v4122_v23  ;;  %v4134_v3 = vunpack.i.h.bf16 %v4132_v60  ;;  %v4133_v50 = vunpack.i.l.bf16 %v4132_v60 }
 0x331   : > { %v2059_v28 = vsel %vm842_vm10, %v2027_v18, %v4123_v27  ;;  %v2060_v39 = vsel %vm842_vm10, %v2028_v30, %v4124_v58  ;;  %v2030_v52 = vsel %vm809_vm9, %v5526_v34, %v4134_v3  ;;  %v2029_v2 = vsel %vm809_vm9, %v5523_v46, %v4133_v50 }
 0x332   : > { %v2080_v56 = vpack.c.bf16 %v2060_v39, %v2059_v28  ;;  %v4127_v29 = vpop.permute.xlu0 %4126  ;;  %v4137_v38 = vpop.permute.xlu1 %4136 }
 0x333   : > { %v4139_v7 = vunpack.i.h.bf16 %v4137_v38  ;;  %v4138_v32 = vunpack.i.l.bf16 %v4137_v38  ;;  %v4129_v8 = vunpack.i.h.bf16 %v4127_v29  ;;  %v4128_v21 = vunpack.i.l.bf16 %v4127_v29 }
 0x334   : > { %3653 = vmatmul.mubr.msk.bf16.gmra.mrb[20].mxu1 %vm934_vm11, %v2080_v56 }
 0x335   : > { %v2061_v59 = vsel %vm842_vm10, %v2029_v2, %v4138_v32  ;;  %v2062_v41 = vsel %vm842_vm10, %v2030_v52, %v4139_v7  ;;  %v2032_v37 = vsel %vm809_vm9, %v5546_v14, %v4129_v8  ;;  %v2031_v34 = vsel %vm809_vm9, %v5543_v61, %v4128_v21 }
 0x336   : > { %v2081_v53 = vpack.c.bf16 %v2062_v41, %v2061_v59  ;;  %v4142_v17 = vpop.permute.xlu0 %4141  ;;  %v4152_v0 = vpop.permute.xlu1 %4151 }
 0x337   : > { %v4144_v35 = vunpack.i.h.bf16 %v4142_v17  ;;  %v4143_v54 = vunpack.i.l.bf16 %v4142_v17  ;;  %v4154_v46 = vunpack.i.h.bf16 %v4152_v0  ;;  %v4153_v36 = vunpack.i.l.bf16 %v4152_v0 }
 0x338   : > { %3656 = vmatprep.mubr.msk.bf16.mxu1 %vm934_vm11, %v2081_v53 }
 0x339   : > { %v2063_v45 = vsel %vm842_vm10, %v2031_v34, %v4143_v54  ;;  %v2064_v40 = vsel %vm842_vm10, %v2032_v37, %v4144_v35  ;;  %v2034_v14 = vsel %vm809_vm9, %v5552_v47, %v4154_v46  ;;  %v2033_v61 = vsel %vm809_vm9, %v5549_v42, %v4153_v36 }
 0x33a   : > { %v2082_v55 = vpack.c.bf16 %v2064_v40, %v2063_v45  ;;  %v4147_v5 = vpop.permute.xlu0 %4146  ;;  %v4157_v33 = vpop.permute.xlu1 %4156 }
 0x33b   : > { %v4149_v26 = vunpack.i.h.bf16 %v4147_v5  ;;  %v4148_v10 = vunpack.i.l.bf16 %v4147_v5  ;;  %v4159_v12 = vunpack.i.h.bf16 %v4157_v33  ;;  %v4158_v48 = vunpack.i.l.bf16 %v4157_v33 }
 0x33c   : > { %3657 = vmatmul.mubr.msk.bf16.gmra.mrb[24].mxu1 %vm934_vm11, %v2082_v55 }
 0x33d   : > { %v2036_v6 = vsel %vm809_vm9, %v5570_v43, %v4149_v26  ;;  %v2035_v19 = vsel %vm809_vm9, %v5567_v22, %v4148_v10  ;;  %v2065_v11 = vsel %vm842_vm10, %v2033_v61, %v4158_v48  ;;  %v2066_v51 = vsel %vm842_vm10, %v2034_v14, %v4159_v12  ;;  %v5701_v22 = vld [vmem:[%s6708_s4] ss:$0 sm:$0xff] }
 0x33e   : > { %v2083_v49 = vpack.c.bf16 %v2066_v51, %v2065_v11  ;;  %v2067_v20 = vsel %vm842_vm10, %v2035_v19, %v4826_v31  ;;  %v2068_v47 = vsel %vm842_vm10, %v2036_v6, %v4826_v31 }
 0x33f   : > { %v2084_v42 = vpack.c.bf16 %v2068_v47, %v2067_v20 }
 0x340   : > { %3660 = vmatprep.mubr.msk.bf16.mxu1 %vm934_vm11, %v2083_v49 }
 0x344   : > { %3661 = vmatmul.mubr.msk.bf16.gmra.mrb[28].mxu1 %vm934_vm11, %v2084_v42  ;;  %vm3368_vm11 = vcmask 261120  }
 0x3d4   : > { %v3634_v43 = vpop.f32.mrb[0].mxu1 }
 0x3d5   : > { %v2213_v15 = vpop.f32.mrb[1].mxu1  ;;  %v5707_v31 = vadd.f32 %v3634_v43, %v5701_v22 }
 0x3d6   : > { %v5704_v13 = vadd.f32 %v5701_v22, %v2213_v15  ;;  %v3635_v16 = vpop.f32.mrb[2].mxu1 }
 0x3d7   : > { %v2216_v25 = vpop.f32.mrb[3].mxu1  ;;  %v5715_v63 = vadd.f32 %v3635_v16, %v5701_v22  ;;  %v2344_v9 = vsel %vm2340_vm12, %v5707_v31, 0.0 }
 0x3d8   : > { %v5710_v62 = vadd.f32 %v5701_v22, %v2216_v25  ;;  %v2341_v24 = vsel %vm2340_vm12, %v5704_v13, 0.0 }
 0x3d9   : > { %v2346_v44 = vsel %vm2340_vm12, %v5715_v63, 0.0 }
 0x3da   : > { %v2342_v57 = vsel %vm2340_vm12, %v5710_v62, 0.0 }
 0x3db   : > { %v2343_v1 = vadd.f32 %v2342_v57, %v2341_v24 }
 0x3dd   : > { %v2345_v4 = vadd.f32 %v2344_v9, %v2343_v1 }
 0x3de   : > { %v3638_v23 = vpop.f32.mrb[4].mxu1 }
 0x3df   : > { %v2229_v60 = vpop.f32.mrb[5].mxu1  ;;  %v2347_v58 = vadd.f32 %v2346_v44, %v2345_v4  ;;  %v5727_v3 = vadd.f32 %v3638_v23, %v5701_v22 }
 0x3e0   : > { %v5724_v27 = vadd.f32 %v5701_v22, %v2229_v60  ;;  %v3639_v30 = vpop.f32.mrb[6].mxu1 }
 0x3e1   : > { %v2232_v18 = vpop.f32.mrb[7].mxu1  ;;  %v5735_v56 = vadd.f32 %v3639_v30, %v5701_v22  ;;  %v2352_v7 = vsel %vm2340_vm12, %v5727_v3, 0.0 }
 0x3e2   : > { %v2348_v50 = vsel %vm2340_vm12, %v5724_v27, 0.0  ;;  %v5732_v28 = vadd.f32 %v5701_v22, %v2232_v18 }
 0x3e3   : > { %v2349_v39 = vadd.f32 %v2348_v50, %v2347_v58  ;;  %v2354_v52 = vsel %vm2340_vm12, %v5735_v56, 0.0 }
 0x3e4   : > { %v2350_v29 = vsel %vm2340_vm12, %v5732_v28, 0.0 }
 0x3e5   : > { %v2351_v38 = vadd.f32 %v2350_v29, %v2349_v39 }
 0x3e7   : > { %v2353_v32 = vadd.f32 %v2352_v7, %v2351_v38 }
 0x3e8   : > { %v3642_v2 = vpop.f32.mrb[8].mxu1 }
 0x3e9   : > { %v2245_v8 = vpop.f32.mrb[9].mxu1  ;;  %v2355_v21 = vadd.f32 %v2354_v52, %v2353_v32  ;;  %v5747_v17 = vadd.f32 %v3642_v2, %v5701_v22 }
 0x3ea   : > { %v5744_v59 = vadd.f32 %v5701_v22, %v2245_v8  ;;  %v3643_v41 = vpop.f32.mrb[10].mxu1 }
 0x3eb   : > { %v2248_v53 = vpop.f32.mrb[11].mxu1  ;;  %v5755_v37 = vadd.f32 %v3643_v41, %v5701_v22  ;;  %v2360_v36 = vsel %vm2340_vm12, %v5747_v17, 0.0 }
 0x3ec   : > { %v2356_v0 = vsel %vm2340_vm12, %v5744_v59, 0.0  ;;  %v5752_v35 = vadd.f32 %v5701_v22, %v2248_v53 }
 0x3ed   : > { %v2357_v54 = vadd.f32 %v2356_v0, %v2355_v21  ;;  %v2362_v40 = vsel %vm2340_vm12, %v5755_v37, 0.0 }
 0x3ee   : > { %v2358_v34 = vsel %vm2340_vm12, %v5752_v35, 0.0 }
 0x3ef   : > { %v2359_v46 = vadd.f32 %v2358_v34, %v2357_v54 }
 0x3f1   : > { %v2361_v45 = vadd.f32 %v2360_v36, %v2359_v46 }
 0x3f2   : > { %v3646_v55 = vpop.f32.mrb[12].mxu1 }
 0x3f3   : > { %v2261_v5 = vpop.f32.mrb[13].mxu1  ;;  %v2363_v33 = vadd.f32 %v2362_v40, %v2361_v45  ;;  %v5767_v48 = vadd.f32 %v3646_v55, %v5701_v22 }
 0x3f4   : > { %v5764_v26 = vadd.f32 %v5701_v22, %v2261_v5  ;;  %v3647_v10 = vpop.f32.mrb[14].mxu1 }
 0x3f5   : > { %v2264_v12 = vpop.f32.mrb[15].mxu1  ;;  %v5775_v19 = vadd.f32 %v3647_v10, %v5701_v22  ;;  %v2368_v49 = vsel %vm2340_vm12, %v5767_v48, 0.0 }
 0x3f6   : > { %v2364_v14 = vsel %vm2340_vm12, %v5764_v26, 0.0  ;;  %v5772_v61 = vadd.f32 %v5701_v22, %v2264_v12 }
 0x3f7   : > { %v2365_v6 = vadd.f32 %v2364_v14, %v2363_v33  ;;  %v2370_v47 = vsel %vm2340_vm12, %v5775_v19, 0.0 }
 0x3f8   : > { %v2366_v11 = vsel %vm2340_vm12, %v5772_v61, 0.0 }
 0x3f9   : > { %v2367_v51 = vadd.f32 %v2366_v11, %v2365_v6 }
 0x3fb   : > { %v2369_v20 = vadd.f32 %v2368_v49, %v2367_v51 }
 0x3fd   : > { %v3650_v42 = vpop.f32.mrb[16].mxu1  ;;  %v2371_v43 = vadd.f32 %v2370_v47, %v2369_v20 }
 0x3fe   : > { %v2277_v15 = vpop.f32.mrb[17].mxu1  ;;  %v5787_v57 = vadd.f32 %v3650_v42, %v5701_v22 }
 0x3ff   : > { %v5784_v16 = vadd.f32 %v5701_v22, %v2277_v15  ;;  %v3651_v25 = vpop.f32.mrb[18].mxu1 }
 0x400   : > { %v2280_v24 = vpop.f32.mrb[19].mxu1  ;;  %v5795_v44 = vadd.f32 %v3651_v25, %v5701_v22  ;;  %v2376_v58 = vsel %vm2340_vm12, %v5787_v57, 0.0 }
 0x401   : > { %v2372_v1 = vsel %vm2340_vm12, %v5784_v16, 0.0  ;;  %v5792_v9 = vadd.f32 %v5701_v22, %v2280_v24 }
 0x402   : > { %v2373_v4 = vadd.f32 %v2372_v1, %v2371_v43  ;;  %v2378_v18 = vsel %vm2340_vm12, %v5795_v44, 0.0 }
 0x403   : > { %v2374_v23 = vsel %vm2340_vm12, %v5792_v9, 0.0 }
 0x404   : > { %v2375_v60 = vadd.f32 %v2374_v23, %v2373_v4 }
 0x406   : > { %v2377_v30 = vadd.f32 %v2376_v58, %v2375_v60 }
 0x407   : > { %v3654_v50 = vpop.f32.mrb[20].mxu1 }
 0x408   : > { %v2293_v39 = vpop.f32.mrb[21].mxu1  ;;  %v2379_v29 = vadd.f32 %v2378_v18, %v2377_v30  ;;  %v2302_v52 = vadd.f32 %v3654_v50, %v5701_v22 }
 0x409   : > { %v2294_v38 = vadd.f32 %v5701_v22, %v2293_v39  ;;  %v3655_v7 = vpop.f32.mrb[22].mxu1 }
 0x40a   : > { %v2296_v32 = vpop.f32.mrb[23].mxu1  ;;  %v2305_v41 = vadd.f32 %v3655_v7, %v5701_v22  ;;  %v2384_v54 = vsel %vm2340_vm12, %v2302_v52, 0.0 }
 0x40b   : > { %v2380_v2 = vsel %vm2340_vm12, %v2294_v38, 0.0  ;;  %v2297_v8 = vadd.f32 %v5701_v22, %v2296_v32 }
 0x40c   : > { %v2381_v21 = vadd.f32 %v2380_v2, %v2379_v29  ;;  %v2386_v45 = vsel %vm2340_vm12, %v2305_v41, 0.0 }
 0x40d   : > { %v2382_v53 = vsel %vm2340_vm12, %v2297_v8, 0.0 }
 0x40e   : > { %v2383_v0 = vadd.f32 %v2382_v53, %v2381_v21 }
 0x40f   : > { %v3658_v34 = vpop.f32.mrb[24].mxu1 }
 0x410   : > { %v2385_v46 = vadd.f32 %v2384_v54, %v2383_v0  ;;  %v2309_v36 = vpop.f32.mrb[25].mxu1  ;;  %v2318_v10 = vadd.f32 %v3658_v34, %v5701_v22 }
 0x411   : > { %v2310_v40 = vadd.f32 %v5701_v22, %v2309_v36  ;;  %v3659_v55 = vpop.f32.mrb[26].mxu1 }
 0x412   : > { %v2387_v5 = vadd.f32 %v2386_v45, %v2385_v46  ;;  %v2312_v33 = vpop.f32.mrb[27].mxu1  ;;  %v2321_v11 = vadd.f32 %v3659_v55, %v5701_v22  ;;  %v2392_v20 = vsel %vm2340_vm12, %v2318_v10, 0.0 }
 0x413   : > { %v2388_v12 = vsel %vm2340_vm12, %v2310_v40, 0.0  ;;  %v2313_v14 = vadd.f32 %v5701_v22, %v2312_v33 }
 0x414   : > { %v2389_v6 = vadd.f32 %v2388_v12, %v2387_v5  ;;  %v2394_v15 = vsel %vm2340_vm12, %v2321_v11, 0.0 }
 0x415   : > { %v2390_v51 = vsel %vm2340_vm12, %v2313_v14, 0.0 }
 0x416   : > { %v2391_v49 = vadd.f32 %v2390_v51, %v2389_v6 }
 0x417   : > { %v3662_v47 = vpop.f32.mrb[28].mxu1 }
 0x418   : > { %v2393_v42 = vadd.f32 %v2392_v20, %v2391_v49  ;;  %v2325_v43 = vpop.f32.mrb[29].mxu1  ;;  %v2334_v23 = vadd.f32 %v3662_v47, %v5701_v22 }
 0x419   : > { %v2326_v25 = vadd.f32 %v5701_v22, %v2325_v43  ;;  %v3663_v24 = vpop.f32.mrb[30].mxu1 }
 0x41a   : > { %v2395_v1 = vadd.f32 %v2394_v15, %v2393_v42  ;;  %v2328_v4 = vpop.f32.mrb[31].mxu1  ;;  %v2337_v18 = vadd.f32 %v3663_v24, %v5701_v22  ;;  %v2400_v29 = vsel %vm2340_vm12, %v2334_v23, 0.0 }
 0x41b   : > { %v2396_v60 = vsel %vm2340_vm12, %v2326_v25, 0.0  ;;  %v2329_v58 = vadd.f32 %v5701_v22, %v2328_v4 }
 0x41c   : > { %v2397_v30 = vadd.f32 %v2396_v60, %v2395_v1  ;;  %v2402_v32 = vsel %vm2340_vm12, %v2337_v18, 0.0 }
 0x41d   : > { %v2398_v50 = vsel %vm2340_vm12, %v2329_v58, 0.0 }
 0x41e   : > { %v2399_v39 = vadd.f32 %v2398_v50, %v2397_v30 }
 0x420   : > { %v2401_v7 = vadd.f32 %v2400_v29, %v2399_v39 }
 0x422   : > { %v2403_v2 = vadd.f32 %v2402_v32, %v2401_v7 }
 0x424   : > { %v2404_v21 = vrot.slane %v2403_v2, 4 }
 0x426   : > { %v2405_v53 = vadd.f32 %v2404_v21, %v2403_v2 }
 0x428   : > { %v2406_v0 = vrot.slane %v2405_v53, 2 }
 0x42a   : > { %v2407_v54 = vadd.f32 %v2406_v0, %v2405_v53 }
 0x42c   : > { %v2408_v34 = vrot.slane %v2407_v54, 1 }
 0x42e   : > { %v2409_v46 = vadd.f32 %v2408_v34, %v2407_v54 }
 0x430   : > { %v2411_v36 = vmul.f32 0.00390625, %v2409_v46 }
 0x432   : > { %v5828_v45 = vsub.f32 %v5764_v26, %v2411_v36  ;;  %v5831_v22 = vsub.f32 %v5772_v61, %v2411_v36  ;;  %v5834_v55 = vsub.f32 %v5767_v48, %v2411_v36  ;;  %v5837_v5 = vsub.f32 %v5775_v19, %v2411_v36 }
 0x433   : > { %v5840_v33 = vsub.f32 %v5784_v16, %v2411_v36  ;;  %v5843_v12 = vsub.f32 %v5792_v9, %v2411_v36  ;;  %v5846_v6 = vsub.f32 %v5787_v57, %v2411_v36  ;;  %v5849_v26 = vsub.f32 %v5795_v44, %v2411_v36 }
 0x434   : > { %v5851_v61 = vsub.f32 %v2294_v38, %v2411_v36  ;;  %v5853_v51 = vsub.f32 %v2297_v8, %v2411_v36  ;;  %v5855_v48 = vsub.f32 %v2302_v52, %v2411_v36  ;;  %v5857_v19 = vsub.f32 %v2305_v41, %v2411_v36 }
 0x435   : > { %v5859_v49 = vsub.f32 %v2310_v40, %v2411_v36  ;;  %v5861_v16 = vsub.f32 %v2313_v14, %v2411_v36  ;;  %v5863_v9 = vsub.f32 %v2318_v10, %v2411_v36  ;;  %v5865_v20 = vsub.f32 %v2321_v11, %v2411_v36 }
 0x436   : > { %v5867_v57 = vsub.f32 %v2326_v25, %v2411_v36  ;;  %v5869_v44 = vsub.f32 %v2329_v58, %v2411_v36  ;;  %v5871_v38 = vsub.f32 %v2334_v23, %v2411_v36  ;;  %v5873_v8 = vsub.f32 %v2337_v18, %v2411_v36 }
 0x437   : > { %v5876_v52 = vsub.f32 %v5704_v13, %v2411_v36  ;;  %v5879_v41 = vsub.f32 %v5710_v62, %v2411_v36  ;;  %v5882_v40 = vsub.f32 %v5707_v31, %v2411_v36  ;;  %v5885_v10 = vsub.f32 %v5715_v63, %v2411_v36 }
 0x438   : > { %v5892_v47 = vsub.f32 %v5724_v27, %v2411_v36  ;;  %v5897_v62 = vsub.f32 %v5732_v28, %v2411_v36  ;;  %v5904_v15 = vsub.f32 %v5727_v3, %v2411_v36  ;;  %v5910_v28 = vsub.f32 %v5735_v56, %v2411_v36 }
 0x439   : > { %v2444_v14 = vmul.f32 %v5876_v52, %v5876_v52  ;;  %v2445_v11 = vmul.f32 %v5879_v41, %v5879_v41  ;;  %v2446_v13 = vmul.f32 %v5882_v40, %v5882_v40  ;;  %v2447_v31 = vmul.f32 %v5885_v10, %v5885_v10 }
 0x43a   : > { %v2448_v27 = vmul.f32 %v5892_v47, %v5892_v47  ;;  %v2449_v1 = vmul.f32 %v5897_v62, %v5897_v62  ;;  %v5916_v60 = vsub.f32 %v5744_v59, %v2411_v36  ;;  %v2450_v3 = vmul.f32 %v5904_v15, %v5904_v15 }
 0x43b   : > { %v2476_v63 = vsel %vm2340_vm12, %v2444_v14, 0.0  ;;  %v2477_v42 = vsel %vm2340_vm12, %v2445_v11, 0.0  ;;  %v2479_v25 = vsel %vm2340_vm12, %v2446_v13, 0.0  ;;  %v2481_v4 = vsel %vm2340_vm12, %v2447_v31, 0.0 }
 0x43c   : > { %v2478_v43 = vadd.f32 %v2477_v42, %v2476_v63  ;;  %v2483_v58 = vsel %vm2340_vm12, %v2448_v27, 0.0  ;;  %v5922_v18 = vsub.f32 %v5752_v35, %v2411_v36  ;;  %v2451_v56 = vmul.f32 %v5910_v28, %v5910_v28 }
 0x43d   : > { %v2485_v50 = vsel %vm2340_vm12, %v2449_v1, 0.0  ;;  %v5928_v29 = vsub.f32 %v5747_v17, %v2411_v36  ;;  %v2452_v59 = vmul.f32 %v5916_v60, %v5916_v60  ;;  %v2487_v7 = vsel %vm2340_vm12, %v2450_v3, 0.0 }
 0x43e   : > { %v2480_v24 = vadd.f32 %v2479_v25, %v2478_v43  ;;  %v5934_v2 = vsub.f32 %v5755_v37, %v2411_v36  ;;  %v2453_v35 = vmul.f32 %v5922_v18, %v5922_v18  ;;  %v2489_v21 = vsel %vm2340_vm12, %v2451_v56, 0.0 }
 0x43f   : > { %v2454_v0 = vmul.f32 %v5928_v29, %v5928_v29  ;;  %v2491_v17 = vsel %vm2340_vm12, %v2452_v59, 0.0  ;;  %v2456_v37 = vmul.f32 %v5828_v45, %v5828_v45  ;;  %v2457_v13 = vmul.f32 %v5831_v22, %v5831_v22 }
 0x440   : > { %v2482_v23 = vadd.f32 %v2481_v4, %v2480_v24  ;;  %v2455_v34 = vmul.f32 %v5934_v2, %v5934_v2  ;;  %v2493_v46 = vsel %vm2340_vm12, %v2453_v35, 0.0  ;;  %v2458_v42 = vmul.f32 %v5834_v55, %v5834_v55 }
 0x441   : > { %v2495_v36 = vsel %vm2340_vm12, %v2454_v0, 0.0  ;;  %v2499_v43 = vsel %vm2340_vm12, %v2456_v37, 0.0  ;;  %v2459_v25 = vmul.f32 %v5837_v5, %v5837_v5  ;;  %v2501_v24 = vsel %vm2340_vm12, %v2457_v13, 0.0 }
 0x442   : > { %v2484_v30 = vadd.f32 %v2483_v58, %v2482_v23  ;;  %v2497_v31 = vsel %vm2340_vm12, %v2455_v34, 0.0  ;;  %v2460_v4 = vmul.f32 %v5840_v33, %v5840_v33  ;;  %v2503_v23 = vsel %vm2340_vm12, %v2458_v42, 0.0 }
 0x443   : > { %v2461_v58 = vmul.f32 %v5843_v12, %v5843_v12 }
 0x444   : > { %v2486_v39 = vadd.f32 %v2485_v50, %v2484_v30  ;;  %v2505_v30 = vsel %vm2340_vm12, %v2459_v25, 0.0  ;;  %v2462_v50 = vmul.f32 %v5846_v6, %v5846_v6 }
 0x446   : > { %v2488_v32 = vadd.f32 %v2487_v7, %v2486_v39  ;;  %v2507_v39 = vsel %vm2340_vm12, %v2460_v4, 0.0  ;;  %v2463_v7 = vmul.f32 %v5849_v26, %v5849_v26 }
 0x448   : > { %v2490_v53 = vadd.f32 %v2489_v21, %v2488_v32  ;;  %v2509_v32 = vsel %vm2340_vm12, %v2461_v58, 0.0  ;;  %v2464_v21 = vmul.f32 %v5851_v61, %v5851_v61 }
 0x44a   : > { %v2492_v54 = vadd.f32 %v2491_v17, %v2490_v53  ;;  %v2511_v53 = vsel %vm2340_vm12, %v2462_v50, 0.0  ;;  %v2465_v17 = vmul.f32 %v5853_v51, %v5853_v51 }
 0x44c   : > { %v2494_v14 = vadd.f32 %v2493_v46, %v2492_v54  ;;  %v2513_v54 = vsel %vm2340_vm12, %v2463_v7, 0.0  ;;  %v2466_v46 = vmul.f32 %v5855_v48, %v5855_v48 }
 0x44e   : > { %v2496_v11 = vadd.f32 %v2495_v36, %v2494_v14  ;;  %v2515_v14 = vsel %vm2340_vm12, %v2464_v21, 0.0  ;;  %v2467_v36 = vmul.f32 %v5857_v19, %v5857_v19 }
 0x450   : > { %v2498_v63 = vadd.f32 %v2497_v31, %v2496_v11  ;;  %v2517_v11 = vsel %vm2340_vm12, %v2465_v17, 0.0  ;;  %v2468_v31 = vmul.f32 %v5859_v49, %v5859_v49 }
 0x452   : > { %v2500_v27 = vadd.f32 %v2499_v43, %v2498_v63  ;;  %v2519_v63 = vsel %vm2340_vm12, %v2466_v46, 0.0  ;;  %v2469_v43 = vmul.f32 %v5861_v16, %v5861_v16 }
 0x454   : > { %v2502_v1 = vadd.f32 %v2501_v24, %v2500_v27  ;;  %v2521_v27 = vsel %vm2340_vm12, %v2467_v36, 0.0  ;;  %v2470_v24 = vmul.f32 %v5863_v9, %v5863_v9 }
 0x456   : > { %v2504_v3 = vadd.f32 %v2503_v23, %v2502_v1  ;;  %v2523_v1 = vsel %vm2340_vm12, %v2468_v31, 0.0  ;;  %v2471_v23 = vmul.f32 %v5865_v20, %v5865_v20 }
 0x458   : > { %v2506_v56 = vadd.f32 %v2505_v30, %v2504_v3  ;;  %v2525_v3 = vsel %vm2340_vm12, %v2469_v43, 0.0  ;;  %v2472_v30 = vmul.f32 %v5867_v57, %v5867_v57 }
 0x45a   : > { %v2508_v59 = vadd.f32 %v2507_v39, %v2506_v56  ;;  %v2527_v56 = vsel %vm2340_vm12, %v2470_v24, 0.0  ;;  %v2473_v39 = vmul.f32 %v5869_v44, %v5869_v44 }
 0x45c   : > { %v2510_v35 = vadd.f32 %v2509_v32, %v2508_v59  ;;  %v2529_v59 = vsel %vm2340_vm12, %v2471_v23, 0.0  ;;  %v2474_v32 = vmul.f32 %v5871_v38, %v5871_v38 }
 0x45e   : > { %v2512_v0 = vadd.f32 %v2511_v53, %v2510_v35  ;;  %v2531_v35 = vsel %vm2340_vm12, %v2472_v30, 0.0  ;;  %v2475_v53 = vmul.f32 %v5873_v8, %v5873_v8 }
 0x460   : > { %v2514_v34 = vadd.f32 %v2513_v54, %v2512_v0  ;;  %v2533_v0 = vsel %vm2340_vm12, %v2473_v39, 0.0  ;;  %v2535_v54 = vsel %vm2340_vm12, %v2474_v32, 0.0  ;;  %v2537_v46 = vsel %vm2340_vm12, %v2475_v53, 0.0 }
 0x462   : > { %v2516_v37 = vadd.f32 %v2515_v14, %v2514_v34 }
 0x464   : > { %v2518_v13 = vadd.f32 %v2517_v11, %v2516_v37 }
 0x466   : > { %v2520_v42 = vadd.f32 %v2519_v63, %v2518_v13 }
 0x468   : > { %v2522_v25 = vadd.f32 %v2521_v27, %v2520_v42 }
 0x46a   : > { %v2524_v4 = vadd.f32 %v2523_v1, %v2522_v25 }
 0x46c   : > { %v2526_v58 = vadd.f32 %v2525_v3, %v2524_v4 }
 0x46e   : > { %v2528_v50 = vadd.f32 %v2527_v56, %v2526_v58 }
 0x470   : > { %v2530_v7 = vadd.f32 %v2529_v59, %v2528_v50 }
 0x472   : > { %v2532_v21 = vadd.f32 %v2531_v35, %v2530_v7 }
 0x474   : > { %v2534_v17 = vadd.f32 %v2533_v0, %v2532_v21 }
 0x476   : > { %v2536_v34 = vadd.f32 %v2535_v54, %v2534_v17 }
 0x478   : > { %v2538_v14 = vadd.f32 %v2537_v46, %v2536_v34 }
 0x47a   : > { %v2539_v37 = vrot.slane %v2538_v14, 4 }
 0x47c   : > { %v2540_v36 = vadd.f32 %v2539_v37, %v2538_v14 }
 0x47e   : > { %v2541_v11 = vrot.slane %v2540_v36, 2 }
 0x480   : > { %v2542_v13 = vadd.f32 %v2541_v11, %v2540_v36 }
 0x482   : > { %v2543_v31 = vrot.slane %v2542_v13, 1 }
 0x484   : > { %v2544_v63 = vadd.f32 %v2543_v31, %v2542_v13 }
 0x486   : > { %v2545_v42 = vmul.f32 0.00390625, %v2544_v63 }
 0x488   : > { %v2546_v43 = vadd.f32 1e-05, %v2545_v42 }
 0x48a   : > { %4170 = vrsqrt.f32 %v2546_v43 }
 0x494   : > { %v4171_v27 = vpop.eup %4170 }
 0x495   : > { %v2577_v25 = vmul.f32 %v4171_v27, %v5869_v44  ;;  %v2564_v1 = vmul.f32 %v4171_v27, %v5840_v33  ;;  %v2566_v4 = vmul.f32 %v4171_v27, %v5846_v6  ;;  %v2568_v23 = vmul.f32 %v4171_v27, %v5851_v61 }
 0x496   : > { %v2570_v3 = vmul.f32 %v4171_v27, %v5855_v48  ;;  %v2572_v58 = vmul.f32 %v4171_v27, %v5859_v49  ;;  %v2574_v30 = vmul.f32 %v4171_v27, %v5863_v9  ;;  %v2576_v56 = vmul.f32 %v4171_v27, %v5867_v57 }
 0x497   : > { %v3531_v24 = vmul.f32 -1.442695, %v2577_v25  ;;  %v2578_v50 = vmul.f32 %v4171_v27, %v5871_v38  ;;  %v3518_v39 = vmul.f32 -1.442695, %v2564_v1  ;;  %v3520_v44 = vmul.f32 -1.442695, %v2566_v4 }
 0x498   : > { %v3522_v59 = vmul.f32 -1.442695, %v2568_v23  ;;  %v3524_v7 = vmul.f32 -1.442695, %v2570_v3  ;;  %v3526_v33 = vmul.f32 -1.442695, %v2572_v58  ;;  %v2548_v6 = vmul.f32 %v4171_v27, %v5876_v52 }
 0x499   : > { %4172 = vpow2.f32 %v3531_v24  ;;  %v3528_v61 = vmul.f32 -1.442695, %v2574_v30  ;;  %v2549_v48 = vmul.f32 %v4171_v27, %v5879_v41  ;;  %v2550_v49 = vmul.f32 %v4171_v27, %v5882_v40 }
 0x49a   : > { %4174 = vpow2.f32 %v3518_v39  ;;  %v3530_v9 = vmul.f32 -1.442695, %v2576_v56  ;;  %v2551_v57 = vmul.f32 %v4171_v27, %v5885_v10  ;;  %v2552_v38 = vmul.f32 %v4171_v27, %v5892_v47 }
 0x49b   : > { %4176 = vpow2.f32 %v3520_v44  ;;  %v2553_v32 = vmul.f32 %v4171_v27, %v5897_v62  ;;  %v2554_v21 = vmul.f32 %v4171_v27, %v5904_v15  ;;  %v2555_v52 = vmul.f32 %v4171_v27, %v5910_v28 }
 0x49c   : > { %4178 = vpow2.f32 %v3522_v59  ;;  %v3532_v53 = vmul.f32 -1.442695, %v2578_v50  ;;  %v2556_v41 = vmul.f32 %v4171_v27, %v5916_v60  ;;  %v3502_v40 = vmul.f32 -1.442695, %v2548_v6 }
 0x49d   : > { %4180 = vpow2.f32 %v3524_v7  ;;  %v2557_v17 = vmul.f32 %v4171_v27, %v5922_v18  ;;  %v2558_v10 = vmul.f32 %v4171_v27, %v5928_v29  ;;  %v3504_v47 = vmul.f32 -1.442695, %v2550_v49 }
 0x49e   : > { %4182 = vpow2.f32 %v3526_v33  ;;  %v2559_v62 = vmul.f32 %v4171_v27, %v5934_v2  ;;  %v2560_v15 = vmul.f32 %v4171_v27, %v5828_v45  ;;  %v3506_v54 = vmul.f32 -1.442695, %v2552_v38 }
 0x49f   : > { %4184 = vpow2.f32 %v3528_v61  ;;  %v2561_v28 = vmul.f32 %v4171_v27, %v5831_v22  ;;  %v2562_v34 = vmul.f32 %v4171_v27, %v5834_v55  ;;  %v3508_v60 = vmul.f32 -1.442695, %v2554_v21 }
 0x4a0   : > { %4186 = vpow2.f32 %v3530_v9  ;;  %v2563_v46 = vmul.f32 %v4171_v27, %v5837_v5  ;;  %v2565_v18 = vmul.f32 %v4171_v27, %v5843_v12  ;;  %v2567_v29 = vmul.f32 %v4171_v27, %v5849_v26 }
 0x4a1   : > { %v2569_v37 = vmul.f32 %v4171_v27, %v5853_v51  ;;  %v2571_v2 = vmul.f32 %v4171_v27, %v5857_v19  ;;  %v2573_v45 = vmul.f32 %v4171_v27, %v5861_v16  ;;  %v2575_v55 = vmul.f32 %v4171_v27, %v5865_v20 }
 0x4a2   : > { %v2579_v36 = vmul.f32 %v4171_v27, %v5873_v8  ;;  %v6039_v13 = vmul.f32 -1.442695, %v2549_v48  ;;  %v6041_v26 = vmul.f32 -1.442695, %v2551_v57  ;;  %v6043_v19 = vmul.f32 -1.442695, %v2553_v32 }
 0x4a3   : > { %v4173_v35 = vpop.eup %4172  ;;  %v6045_v16 = vmul.f32 -1.442695, %v2555_v52  ;;  %v3510_v8 = vmul.f32 -1.442695, %v2556_v41  ;;  %v6047_v42 = vmul.f32 -1.442695, %v2557_v17 }
 0x4a4   : > { %v2705_v0 = vadd.f32 1.0, %v4173_v35  ;;  %v4175_v14 = vpop.eup %4174  ;;  %v3512_v25 = vmul.f32 -1.442695, %v2558_v10  ;;  %v6049_v24 = vmul.f32 -1.442695, %v2559_v62 }
 0x4a5   : > { %v4177_v22 = vpop.eup %4176  ;;  %v2692_v11 = vadd.f32 1.0, %v4175_v14  ;;  %v3514_v23 = vmul.f32 -1.442695, %v2560_v15  ;;  %v6051_v3 = vmul.f32 -1.442695, %v2561_v28 }
 0x4a6   : > { %4188 = vrcp.f32 %v2705_v0  ;;  %v4179_v5 = vpop.eup %4178  ;;  %v2694_v12 = vadd.f32 1.0, %v4177_v22  ;;  %v3516_v56 = vmul.f32 -1.442695, %v2562_v34  ;;  %v6055_v50 = vmul.f32 -1.442695, %v2563_v46 }
 0x4a7   : > { %4190 = vpow2.f32 %v3532_v53  ;;  %v4181_v51 = vpop.eup %4180  ;;  %v2696_v31 = vadd.f32 1.0, %v4179_v5  ;;  %v6057_v44 = vmul.f32 -1.442695, %v2565_v18  ;;  %v6059_v59 = vmul.f32 -1.442695, %v2567_v29 }
 0x4a8   : > { %4192 = vpow2.f32 %v3502_v40  ;;  %v4183_v63 = vpop.eup %4182  ;;  %v2698_v20 = vadd.f32 1.0, %v4181_v51  ;;  %v6061_v7 = vmul.f32 -1.442695, %v2569_v37  ;;  %v6063_v61 = vmul.f32 -1.442695, %v2571_v2 }
 0x4a9   : > { %4194 = vpow2.f32 %v3504_v47  ;;  %v4185_v43 = vpop.eup %4184  ;;  %v2700_v27 = vadd.f32 1.0, %v4183_v63  ;;  %v6065_v48 = vmul.f32 -1.442695, %v2573_v45  ;;  %v6067_v9 = vmul.f32 -1.442695, %v2575_v55 }
 0x4aa   : > { %4196 = vpow2.f32 %v3506_v54  ;;  %v4187_v1 = vpop.eup %4186  ;;  %v2702_v4 = vadd.f32 1.0, %v4185_v43  ;;  %v6069_v57 = vmul.f32 -1.442695, %v2579_v36 }
 0x4ab   : > { %4198 = vpow2.f32 %v3508_v60  ;;  %v2704_v30 = vadd.f32 1.0, %v4187_v1 }
 0x4ac   : > { %4200 = vrcp.f32 %v2692_v11 }
 0x4ad   : > { %4202 = vrcp.f32 %v2694_v12 }
 0x4ae   : > { %4204 = vrcp.f32 %v2696_v31 }
 0x4af   : > { %4206 = vrcp.f32 %v2698_v20 }
 0x4b0   : > { %v6053_v58 = vpop.eup %4188  ;;  %4208 = vrcp.f32 %v2700_v27 }
 0x4b1   : > { %v4191_v39 = vpop.eup %4190  ;;  %4210 = vrcp.f32 %v2702_v4  ;;  %v3103_v38 = vrot.slane %v6053_v58, 2  ;;  %v3137_v21 = vrot.slane %v6053_v58, 3  ;;  %v3171_v52 = vrot.slane %v6053_v58, 4 }
 0x4b2   : > { %v4193_v33 = vpop.eup %4192  ;;  %v2706_v6 = vadd.f32 1.0, %v4191_v39  ;;  %4212 = vrcp.f32 %v2704_v30  ;;  %v3205_v41 = vrot.slane %v6053_v58, 5  ;;  %v3239_v40 = vrot.slane %v6053_v58, 6 }
 0x4b3   : > { %v4195_v49 = vpop.eup %4194  ;;  %4214 = vpow2.f32 %v3510_v8  ;;  %v2676_v35 = vadd.f32 1.0, %v4193_v33  ;;  %v3273_v62 = vrot.slane %v6053_v58, 7 }
 0x4b4   : > { %v4197_v32 = vpop.eup %4196  ;;  %4216 = vrcp.f32 %v2706_v6  ;;  %v2678_v0 = vadd.f32 1.0, %v4195_v49 }
 0x4b5   : > { %v4199_v53 = vpop.eup %4198  ;;  %4218 = vpow2.f32 %v3512_v25  ;;  %v2680_v10 = vadd.f32 1.0, %v4197_v32 }
 0x4b6   : > { %v6076_v17 = vpop.eup %4200  ;;  %4220 = vpow2.f32 %v3514_v23  ;;  %v2682_v47 = vadd.f32 1.0, %v4199_v53 }
 0x4b7   : > { %v6079_v15 = vpop.eup %4202  ;;  %v2839_v54 = vrot.slane %v6076_v17, 1  ;;  %4222 = vpow2.f32 %v3516_v56  ;;  %v2873_v28 = vrot.slane %v6076_v17, 2  ;;  %v2907_v34 = vrot.slane %v6076_v17, 3 }
 0x4b8   : > { %v6084_v60 = vpop.eup %4204  ;;  %4224 = vrcp.f32 %v2676_v35  ;;  %v2874_v46 = vrot.slane %v6079_v15, 1  ;;  %v2908_v18 = vrot.slane %v6079_v15, 2  ;;  %v2941_v29 = vrot.slane %v6076_v17, 4 }
 0x4b9   : > { %v6089_v14 = vpop.eup %4206  ;;  %v2840_v37 = vsel %vm2789_vm13, %v6079_v15, %v2839_v54  ;;  %v2841_v2 = vrot.slane %v6084_v60, 7  ;;  %4226 = vrcp.f32 %v2678_v0  ;;  %v2910_v45 = vrot.slane %v6084_v60, 1 }
 0x4ba   : > { %v6095_v22 = vpop.eup %4208  ;;  %v2843_v55 = vrot.slane %v6089_v14, 6  ;;  %4228 = vrcp.f32 %v2680_v10  ;;  %v2875_v36 = vsel %vm2789_vm13, %v2874_v46, %v2873_v28  ;;  %v2877_v11 = vrot.slane %v6089_v14, 7 }
 0x4bb   : > { %v6100_v5 = vpop.eup %4210  ;;  %v2842_v12 = vsel %vm2792_vm14, %v2841_v2, %v2840_v37  ;;  %v2845_v51 = vrot.slane %v6095_v22, 5  ;;  %4230 = vrcp.f32 %v2682_v47  ;;  %v2876_v31 = vsel %vm2792_vm14, %v6084_v60, %v2875_v36 }
 0x4bc   : > { %v6106_v63 = vpop.eup %4212  ;;  %v2844_v20 = vsel %vm2795_vm15, %v2843_v55, %v2842_v12  ;;  %v2847_v8 = vrot.slane %v6100_v5, 4  ;;  %4232 = vpow2.f32 %v6039_v13  ;;  %v2878_v43 = vsel %vm2795_vm15, %v2877_v11, %v2876_v31 }
 0x4bd   : > { %v4215_v27 = vpop.eup %4214  ;;  %v2846_v25 = vsel %vm2798_vm0, %v2845_v51, %v2844_v20  ;;  %v2849_v1 = vrot.slane %v6106_v63, 3  ;;  %4234 = vpow2.f32 %v6041_v26  ;;  %v2879_v4 = vrot.slane %v6095_v22, 6 }
 0x4be   : > { %v6116_v23 = vpop.eup %4216  ;;  %v2848_v30 = vsel %vm2801_vm1, %v2847_v8, %v2846_v25  ;;  %v2684_v56 = vadd.f32 1.0, %v4215_v27  ;;  %4236 = vpow2.f32 %v6043_v19  ;;  %v2881_v13 = vrot.slane %v6100_v5, 5 }
 0x4bf   : > { %v4219_v39 = vpop.eup %4218  ;;  %v2850_v33 = vsel %vm2804_vm2, %v2849_v1, %v2848_v30  ;;  %v2851_v6 = vrot.slane %v6116_v23, 2  ;;  %4238 = vpow2.f32 %v6045_v16  ;;  %v2880_v26 = vsel %vm2798_vm0, %v2879_v4, %v2878_v43 }
 0x4c0   : > { %v4221_v49 = vpop.eup %4220  ;;  %v2686_v32 = vadd.f32 1.0, %v4219_v39  ;;  %4240 = vrcp.f32 %v2684_v56  ;;  %v2882_v35 = vsel %vm2801_vm1, %v2881_v13, %v2880_v26  ;;  %v2883_v53 = vrot.slane %v6106_v63, 4 }
 0x4c1   : > { %v4223_v0 = vpop.eup %4222  ;;  %v2852_v19 = vsel %vm2807_vm3, %v2851_v6, %v2850_v33  ;;  %v2688_v10 = vadd.f32 1.0, %v4221_v49  ;;  %4242 = vpow2.f32 %v6047_v42  ;;  %v2885_v47 = vrot.slane %v6116_v23, 3 }
 0x4c2   : > { %v6130_v54 = vpop.eup %4224  ;;  %2855 = vrot.lane.b32.xlu1 %v2852_v19, %s4313_s6  ;;  %v2690_v16 = vadd.f32 1.0, %v4223_v0  ;;  %4244 = vrcp.f32 %v2686_v32  ;;  %v2884_v28 = vsel %vm2804_vm2, %v2883_v53, %v2882_v35  ;;  %v2909_v46 = vsel %vm2789_vm13, %v2908_v18, %v2907_v34 }
 0x4c3   : > { %v6135_v37 = vpop.eup %4226  ;;  %4246 = vrcp.f32 %v2688_v10  ;;  %v2825_v2 = vrot.slane %v6130_v54, 1  ;;  %v2886_v42 = vsel %vm2807_vm3, %v2885_v47, %v2884_v28  ;;  %v2859_v55 = vrot.slane %v6130_v54, 2 }
 0x4c4   : > { %v6140_v36 = vpop.eup %4228  ;;  %4248 = vrcp.f32 %v2690_v16  ;;  %v2860_v11 = vrot.slane %v6135_v37, 1  ;;  %v2911_v12 = vsel %vm2792_vm14, %v2910_v45, %v2909_v46  ;;  %v2913_v51 = vrot.slane %v6095_v22, 7 }
 0x4c5   : > { %v6145_v31 = vpop.eup %4230  ;;  %v2826_v34 = vsel %vm2789_vm13, %v6135_v37, %v2825_v2  ;;  %v2827_v18 = vrot.slane %v6140_v36, 7  ;;  %4250 = vpow2.f32 %v6049_v24  ;;  %v2912_v20 = vsel %vm2795_vm15, %v6089_v14, %v2911_v12 }
 0x4c6   : > { %v4233_v8 = vpop.eup %4232  ;;  %v2829_v43 = vrot.slane %v6145_v31, 6  ;;  %4252 = vpow2.f32 %v6051_v3  ;;  %2889 = vrot.lane.b32.xlu1 %v2886_v42, %s4309_s24  ;;  %v2861_v45 = vsel %vm2789_vm13, %v2860_v11, %v2859_v55  ;;  %v2863_v27 = vrot.slane %v6145_v31, 7 }
 0x4c7   : > { %v4235_v25 = vpop.eup %4234  ;;  %v2828_v1 = vsel %vm2792_vm14, %v2827_v18, %v2826_v34  ;;  %4254 = vpow2.f32 %v6055_v50  ;;  %v2677_v24 = vadd.f32 1.0, %v4233_v8  ;;  %v2862_v4 = vsel %vm2792_vm14, %v6140_v36, %v2861_v45 }
 0x4c8   : > { %v4237_v30 = vpop.eup %4236  ;;  %v2830_v56 = vsel %vm2795_vm15, %v2829_v43, %v2828_v1  ;;  %4256 = vpow2.f32 %v6057_v44  ;;  %v2679_v3 = vadd.f32 1.0, %v4235_v25  ;;  %v2864_v13 = vsel %vm2795_vm15, %v2863_v27, %v2862_v4 }
 0x4c9   : > { %v4239_v39 = vpop.eup %4238  ;;  %4258 = vpow2.f32 %v6059_v59  ;;  %v2681_v33 = vadd.f32 1.0, %v4237_v30  ;;  %v2914_v6 = vsel %vm2798_vm0, %v2913_v51, %v2912_v20  ;;  %v2915_v50 = vrot.slane %v6100_v5, 6 }
 0x4ca   : > { %v6168_v26 = vpop.eup %4240  ;;  %4260 = vpow2.f32 %v6061_v7  ;;  %v2683_v49 = vadd.f32 1.0, %v4239_v39  ;;  %v2917_v32 = vrot.slane %v6106_v63, 5  ;;  %v2919_v44 = vrot.slane %v6116_v23, 4 }
 0x4cb   : > { %v4243_v35 = vpop.eup %4242  ;;  %v2831_v53 = vrot.slane %v6168_v26, 5  ;;  %4262 = vpow2.f32 %v6063_v61  ;;  %v2865_v59 = vrot.slane %v6168_v26, 6  ;;  %v2916_v0 = vsel %vm2801_vm1, %v2915_v50, %v2914_v6 }
 0x4cc   : > { %v6177_v19 = vpop.eup %4244  ;;  %4264 = vpow2.f32 %v6065_v48  ;;  %v2685_v10 = vadd.f32 1.0, %v4243_v35  ;;  %v2918_v7 = vsel %vm2804_vm2, %v2917_v32, %v2916_v0  ;;  %v2893_v47 = vrot.slane %v6130_v54, 3 }
 0x4cd   : > { %v6182_v16 = vpop.eup %4246  ;;  %v2832_v28 = vsel %vm2798_vm0, %v2831_v53, %v2830_v56  ;;  %v2833_v46 = vrot.slane %v6177_v19, 4  ;;  %4266 = vpow2.f32 %v6067_v9  ;;  %v2866_v61 = vsel %vm2798_vm0, %v2865_v59, %v2864_v13 }
 0x4ce   : > { %v6188_v2 = vpop.eup %4248  ;;  %v2835_v42 = vrot.slane %v6182_v16, 3  ;;  %4268 = vpow2.f32 %v6069_v57  ;;  %v2867_v48 = vrot.slane %v6177_v19, 5  ;;  %v2869_v55 = vrot.slane %v6182_v16, 4 }
 0x4cf   : > { %v4251_v11 = vpop.eup %4250  ;;  %v2834_v12 = vsel %vm2801_vm1, %v2833_v46, %v2832_v28  ;;  %v2837_v51 = vrot.slane %v6188_v2, 2  ;;  %v2871_v34 = vrot.slane %v6188_v2, 3  ;;  %4270 = vrcp.f32 %v2677_v24 }
 0x4d0   : > { %v4253_v9 = vpop.eup %4252  ;;  %v2836_v18 = vsel %vm2804_vm2, %v2835_v42, %v2834_v12  ;;  %v2687_v20 = vadd.f32 1.0, %v4251_v11  ;;  %v2868_v8 = vsel %vm2801_vm1, %v2867_v48, %v2866_v61  ;;  %4272 = vrcp.f32 %v2679_v3 }
 0x4d1   : > { %v4255_v57 = vpop.eup %4254  ;;  %v2838_v43 = vsel %vm2807_vm3, %v2837_v51, %v2836_v18  ;;  %v2689_v45 = vadd.f32 1.0, %v4253_v9  ;;  %v2870_v27 = vsel %vm2804_vm2, %v2869_v55, %v2868_v8  ;;  %4274 = vrcp.f32 %v2681_v33 }
 0x4d2   : > { %v4257_v25 = vpop.eup %4256  ;;  %2853 = vrot.lane.b32.xlu0 %v2838_v43, %s4313_s6  ;;  %v2691_v1 = vadd.f32 1.0, %v4255_v57  ;;  %v2872_v24 = vsel %vm2807_vm3, %v2871_v34, %v2870_v27  ;;  %4276 = vrcp.f32 %v2683_v49  ;;  %v2920_v4 = vsel %vm2807_vm3, %v2919_v44, %v2918_v7 }
 0x4d3   : > { %v4259_v30 = vpop.eup %4258  ;;  %v2693_v56 = vadd.f32 1.0, %v4257_v25  ;;  %4278 = vrcp.f32 %v2685_v10  ;;  %2923 = vrot.lane.b32.xlu1 %v2920_v4, %s4314_s7  ;;  %v2894_v3 = vrot.slane %v6135_v37, 2  ;;  %v2896_v13 = vrot.slane %v6140_v36, 1 }
 0x4d4   : > { %v4261_v39 = vpop.eup %4260  ;;  %v2695_v33 = vadd.f32 1.0, %v4259_v30  ;;  %4280 = vrcp.f32 %v2687_v20  ;;  %v2899_v6 = vrot.slane %v6168_v26, 7  ;;  %v2901_v50 = vrot.slane %v6177_v19, 6 }
 0x4d5   : > { %v4263_v49 = vpop.eup %4262  ;;  %v2697_v32 = vadd.f32 1.0, %v4261_v39  ;;  %4282 = vrcp.f32 %v2689_v45  ;;  %v2895_v44 = vsel %vm2789_vm13, %v2894_v3, %v2893_v47  ;;  %v2903_v35 = vrot.slane %v6182_v16, 5 }
 0x4d6   : > { %v4265_v53 = vpop.eup %4264  ;;  %v2699_v59 = vadd.f32 1.0, %v4263_v49  ;;  %2887 = vrot.lane.b32.xlu0 %v2872_v24, %s4309_s24  ;;  %4284 = vrcp.f32 %v2691_v1  ;;  %v2897_v0 = vsel %vm2792_vm14, %v2896_v13, %v2895_v44  ;;  %v2905_v10 = vrot.slane %v6188_v2, 4  ;;  %s4315_s24 = smov 20  }
 0x4d7   : > { %v4267_v7 = vpop.eup %4266  ;;  %v2701_v28 = vadd.f32 1.0, %v4265_v53  ;;  %4286 = vrcp.f32 %v2693_v56  ;;  %v2898_v46 = vsel %vm2795_vm15, %v6145_v31, %v2897_v0  ;;  %v2942_v61 = vrot.slane %v6079_v15, 3 }
 0x4d8   : > { %v4269_v47 = vpop.eup %4268  ;;  %v2703_v42 = vadd.f32 1.0, %v4267_v7  ;;  %4288 = vrcp.f32 %v2695_v33  ;;  %v2900_v48 = vsel %vm2798_vm0, %v2899_v6, %v2898_v46  ;;  %v2944_v55 = vrot.slane %v6084_v60, 2 }
 0x4d9   : > { %v6219_v11 = vpop.eup %4270  ;;  %v2707_v12 = vadd.f32 1.0, %v4269_v47  ;;  %4290 = vrcp.f32 %v2697_v32  ;;  %v2902_v51 = vsel %vm2801_vm1, %v2901_v50, %v2900_v48  ;;  %v2943_v34 = vsel %vm2789_vm13, %v2942_v61, %v2941_v29 }
 0x4da   : > { %v6225_v9 = vpop.eup %4272  ;;  %4292 = vrcp.f32 %v2699_v59  ;;  %v2904_v18 = vsel %vm2804_vm2, %v2903_v35, %v2902_v51  ;;  %v2945_v20 = vsel %vm2792_vm14, %v2944_v55, %v2943_v34  ;;  %v2946_v8 = vrot.slane %v6089_v14, 1 }
 0x4db   : > { %v6230_v57 = vpop.eup %4274  ;;  %4294 = vrcp.f32 %v2701_v28  ;;  %v2906_v43 = vsel %vm2807_vm3, %v2905_v10, %v2904_v18  ;;  %v2949_v45 = vrot.slane %v6100_v5, 7  ;;  %v3342_v27 = vrot.slane %v6053_v58, 1 }
 0x4dc   : > { %v6235_v25 = vpop.eup %4276  ;;  %4296 = vrcp.f32 %v2703_v42  ;;  %2921 = vrot.lane.b32.xlu0 %v2906_v43, %s4314_s7  ;;  %v2947_v29 = vsel %vm2795_vm15, %v2946_v8, %v2945_v20  ;;  %v2951_v1 = vrot.slane %v6106_v63, 6  ;;  %v2927_v24 = vrot.slane %v6130_v54, 4 }
 0x4dd   : > { %v6241_v4 = vpop.eup %4278  ;;  %v2948_v30 = vsel %vm2798_vm0, %v6095_v22, %v2947_v29  ;;  %v2953_v56 = vrot.slane %v6116_v23, 5  ;;  %v2928_v3 = vrot.slane %v6135_v37, 3  ;;  %v2930_v13 = vrot.slane %v6140_v36, 2 }
 0x4de   : > { %v6248_v39 = vpop.eup %4280  ;;  %4298 = vrcp.f32 %v2707_v12  ;;  %v2950_v33 = vsel %vm2801_vm1, %v2949_v45, %v2948_v30  ;;  %v2932_v6 = vrot.slane %v6145_v31, 1  ;;  %v2935_v50 = vrot.slane %v6177_v19, 7 }
 0x4df   : > { %v6253_v49 = vpop.eup %4282  ;;  %v2952_v32 = vsel %vm2804_vm2, %v2951_v1, %v2950_v33  ;;  %v2929_v44 = vsel %vm2789_vm13, %v2928_v3, %v2927_v24  ;;  %v2937_v35 = vrot.slane %v6182_v16, 6  ;;  %v2975_v53 = vrot.slane %v6076_v17, 5 }
 0x4e0   : > { %v6259_v59 = vpop.eup %4284  ;;  %v2954_v0 = vsel %vm2807_vm3, %v2953_v56, %v2952_v32  ;;  %v2931_v10 = vsel %vm2792_vm14, %v2930_v13, %v2929_v44  ;;  %v2976_v7 = vrot.slane %v6079_v15, 4  ;;  %v2978_v28 = vrot.slane %v6084_v60, 3 }
 0x4e1   : > { %v6265_v46 = vpop.eup %4286  ;;  %2957 = vrot.lane.b32.xlu1 %v2954_v0, %s4310_s25  ;;  %v2933_v61 = vsel %vm2795_vm15, %v2932_v6, %v2931_v10  ;;  %v2939_v47 = vrot.slane %v6188_v2, 5  ;;  %v2980_v42 = vrot.slane %v6089_v14, 2  ;;  %v2982_v48 = vrot.slane %v6095_v22, 1 }
 0x4e2   : > { %v6272_v55 = vpop.eup %4288  ;;  %v2934_v12 = vsel %vm2798_vm0, %v6168_v26, %v2933_v61  ;;  %v2977_v51 = vsel %vm2789_vm13, %v2976_v7, %v2975_v53  ;;  %v2985_v34 = vrot.slane %v6106_v63, 7  ;;  %v2961_v18 = vrot.slane %v6130_v54, 5 }
 0x4e3   : > { %v6279_v20 = vpop.eup %4290  ;;  %v2936_v8 = vsel %vm2801_vm1, %v2935_v50, %v2934_v12  ;;  %v2979_v43 = vsel %vm2792_vm14, %v2978_v28, %v2977_v51  ;;  %v2962_v45 = vrot.slane %v6135_v37, 4  ;;  %v2964_v29 = vrot.slane %v6140_v36, 3 }
 0x4e4   : > { %v6285_v1 = vpop.eup %4292  ;;  %v2938_v24 = vsel %vm2804_vm2, %v2937_v35, %v2936_v8  ;;  %v2981_v30 = vsel %vm2795_vm15, %v2980_v42, %v2979_v43  ;;  %v2987_v56 = vrot.slane %v6116_v23, 6  ;;  %v2966_v3 = vrot.slane %v6145_v31, 2 }
 0x4e5   : > { %v6291_v13 = vpop.eup %4294  ;;  %v2940_v33 = vsel %vm2807_vm3, %v2939_v47, %v2938_v24  ;;  %v2983_v6 = vsel %vm2798_vm0, %v2982_v48, %v2981_v30  ;;  %v2963_v50 = vsel %vm2789_vm13, %v2962_v45, %v2961_v18  ;;  %v2968_v32 = vrot.slane %v6168_v26, 1 }
 0x4e6   : > { %v6297_v44 = vpop.eup %4296  ;;  %2955 = vrot.lane.b32.xlu0 %v2940_v33, %s4310_s25  ;;  %v2984_v35 = vsel %vm2801_vm1, %v6100_v5, %v2983_v6  ;;  %v2965_v53 = vsel %vm2792_vm14, %v2964_v29, %v2963_v50  ;;  %v2971_v0 = vrot.slane %v6182_v16, 7  ;;  %v3009_v10 = vrot.slane %v6076_v17, 6  ;;  %s4316_s25 = smov 28  }
 0x4e7   : > { %v2986_v7 = vsel %vm2804_vm2, %v2985_v34, %v2984_v35  ;;  %v2967_v28 = vsel %vm2795_vm15, %v2966_v3, %v2965_v53  ;;  %v3010_v61 = vrot.slane %v6079_v15, 5  ;;  %v3012_v47 = vrot.slane %v6084_v60, 4 }
 0x4e8   : > { %v6309_v42 = vpop.eup %4298  ;;  %v2988_v48 = vsel %vm2807_vm3, %v2987_v56, %v2986_v7  ;;  %v2969_v12 = vsel %vm2798_vm0, %v2968_v32, %v2967_v28  ;;  %v2973_v51 = vrot.slane %v6188_v2, 6  ;;  %v3014_v18 = vrot.slane %v6089_v14, 3 }
 0x4e9   : > { %2991 = vrot.lane.b32.xlu1 %v2988_v48, %s4315_s24  ;;  %v2970_v34 = vsel %vm2801_vm1, %v6177_v19, %v2969_v12  ;;  %v3011_v8 = vsel %vm2789_vm13, %v3010_v61, %v3009_v10  ;;  %v3016_v43 = vrot.slane %v6095_v22, 2  ;;  %v3018_v45 = vrot.slane %v6100_v5, 1 }
 0x4ea   : > { %v2972_v29 = vsel %vm2804_vm2, %v2971_v0, %v2970_v34  ;;  %v3013_v24 = vsel %vm2792_vm14, %v3012_v47, %v3011_v8  ;;  %v2995_v30 = vrot.slane %v6130_v54, 6  ;;  %v2996_v56 = vrot.slane %v6135_v37, 5 }
 0x4eb   : > { %v2974_v3 = vsel %vm2807_vm3, %v2973_v51, %v2972_v29  ;;  %v3015_v33 = vsel %vm2795_vm15, %v3014_v18, %v3013_v24  ;;  %v3021_v6 = vrot.slane %v6116_v23, 7  ;;  %v2998_v50 = vrot.slane %v6140_v36, 4 }
 0x4ec   : > { %2989 = vrot.lane.b32.xlu0 %v2974_v3, %s4315_s24  ;;  %v3017_v32 = vsel %vm2798_vm0, %v3016_v43, %v3015_v33  ;;  %v2997_v35 = vsel %vm2789_vm13, %v2996_v56, %v2995_v30  ;;  %v3000_v53 = vrot.slane %v6145_v31, 3  ;;  %v3002_v0 = vrot.slane %v6168_v26, 2 }
 0x4ed   : > { %v3019_v10 = vsel %vm2801_vm1, %v3018_v45, %v3017_v32  ;;  %v2999_v7 = vsel %vm2792_vm14, %v2998_v50, %v2997_v35  ;;  %v3004_v28 = vrot.slane %v6177_v19, 1  ;;  %v3043_v61 = vrot.slane %v6076_v17, 7 }
 0x4ee   : > { %v3020_v47 = vsel %vm2804_vm2, %v6106_v63, %v3019_v10  ;;  %v3001_v48 = vsel %vm2795_vm15, %v3000_v53, %v2999_v7  ;;  %v3044_v12 = vrot.slane %v6079_v15, 6  ;;  %v3046_v51 = vrot.slane %v6084_v60, 5 }
 0x4ef   : > { %v3022_v18 = vsel %vm2807_vm3, %v3021_v6, %v3020_v47  ;;  %v3003_v34 = vsel %vm2798_vm0, %v3002_v0, %v3001_v48  ;;  %v3007_v8 = vrot.slane %v6188_v2, 7  ;;  %v3048_v43 = vrot.slane %v6089_v14, 4 }
 0x4f0   : > { %3025 = vrot.lane.b32.xlu1 %v3022_v18, %s4311_s11  ;;  %v3005_v45 = vsel %vm2801_vm1, %v3004_v28, %v3003_v34  ;;  %v3045_v29 = vsel %vm2789_vm13, %v3044_v12, %v3043_v61  ;;  %v3050_v24 = vrot.slane %v6095_v22, 3  ;;  %v3052_v30 = vrot.slane %v6100_v5, 2 }
 0x4f1   : > { %v3006_v56 = vsel %vm2804_vm2, %v6182_v16, %v3005_v45  ;;  %v3047_v3 = vsel %vm2792_vm14, %v3046_v51, %v3045_v29  ;;  %v3029_v33 = vrot.slane %v6130_v54, 7  ;;  %v3030_v6 = vrot.slane %v6135_v37, 6 }
 0x4f2   : > { %v3008_v50 = vsel %vm2807_vm3, %v3007_v8, %v3006_v56  ;;  %v3049_v32 = vsel %vm2795_vm15, %v3048_v43, %v3047_v3  ;;  %v3054_v35 = vrot.slane %v6106_v63, 1  ;;  %v3032_v53 = vrot.slane %v6140_v36, 5 }
 0x4f3   : > { %3023 = vrot.lane.b32.xlu0 %v3008_v50, %s4311_s11  ;;  %v3051_v0 = vsel %vm2798_vm0, %v3050_v24, %v3049_v32  ;;  %v3031_v10 = vsel %vm2789_vm13, %v3030_v6, %v3029_v33  ;;  %v3034_v7 = vrot.slane %v6145_v31, 4  ;;  %v3036_v28 = vrot.slane %v6168_v26, 3  ;;  %s4320_s11 = smov 44  }
 0x4f4   : > { %v3053_v61 = vsel %vm2801_vm1, %v3052_v30, %v3051_v0  ;;  %v3033_v47 = vsel %vm2792_vm14, %v3032_v53, %v3031_v10  ;;  %v3038_v48 = vrot.slane %v6177_v19, 2  ;;  %v3093_v12 = vrot.slane %v6272_v55, 7 }
 0x4f5   : > { %v3055_v51 = vsel %vm2804_vm2, %v3054_v35, %v3053_v61  ;;  %v3035_v18 = vsel %vm2795_vm15, %v3034_v7, %v3033_v47  ;;  %v3040_v34 = vrot.slane %v6182_v16, 1  ;;  %v3095_v8 = vrot.slane %v6279_v20, 6 }
 0x4f6   : > { %v3056_v43 = vsel %vm2807_vm3, %v6116_v23, %v3055_v51  ;;  %v3037_v45 = vsel %vm2798_vm0, %v3036_v28, %v3035_v18  ;;  %v3094_v29 = vsel %vm2789_vm13, %v3093_v12, %v6265_v46  ;;  %v3097_v24 = vrot.slane %v6285_v1, 5 }
 0x4f7   : > { %3059 = vrot.lane.b32.xlu1 %v3056_v43, %s4316_s25  ;;  %v3039_v30 = vsel %vm2801_vm1, %v3038_v48, %v3037_v45  ;;  %v3096_v56 = vsel %vm2792_vm14, %v3095_v8, %v3094_v29  ;;  %v3099_v3 = vrot.slane %v6291_v13, 4  ;;  %v3101_v33 = vrot.slane %v6297_v44, 3 }
 0x4f8   : > { %v3041_v6 = vsel %vm2804_vm2, %v3040_v34, %v3039_v30  ;;  %v3098_v50 = vsel %vm2795_vm15, %v3097_v24, %v3096_v56  ;;  %v3079_v32 = vrot.slane %v6225_v9, 7  ;;  %v3081_v35 = vrot.slane %v6230_v57, 6 }
 0x4f9   : > { %v3042_v53 = vsel %vm2807_vm3, %v6188_v2, %v3041_v6  ;;  %v3100_v0 = vsel %vm2798_vm0, %v3099_v3, %v3098_v50  ;;  %v3105_v10 = vrot.slane %v6309_v42, 1  ;;  %v3083_v7 = vrot.slane %v6235_v25, 5 }
 0x4fa   : > { %3057 = vrot.lane.b32.xlu0 %v3042_v53, %s4316_s25  ;;  %v3102_v28 = vsel %vm2801_vm1, %v3101_v33, %v3100_v0  ;;  %v3080_v61 = vsel %vm2789_vm13, %v3079_v32, %v6219_v11  ;;  %v3085_v47 = vrot.slane %v6241_v4, 4  ;;  %v3087_v48 = vrot.slane %v6248_v39, 3 }
 0x4fb   : > { %v3104_v12 = vsel %vm2804_vm2, %v3103_v38, %v3102_v28  ;;  %v3082_v51 = vsel %vm2792_vm14, %v3081_v35, %v3080_v61  ;;  %v3089_v18 = vrot.slane %v6253_v49, 2  ;;  %v3127_v34 = vrot.slane %v6265_v46, 1 }
 0x4fc   : > { %v3106_v8 = vsel %vm2807_vm3, %v3105_v10, %v3104_v12  ;;  %v3084_v43 = vsel %vm2795_vm15, %v3083_v7, %v3082_v51  ;;  %v3091_v45 = vrot.slane %v6259_v59, 1  ;;  %v3129_v29 = vrot.slane %v6279_v20, 7 }
 0x4fd   : > { %3109 = vrot.lane.b32.xlu1 %v3106_v8, %s4317_s8  ;;  %v3086_v24 = vsel %vm2798_vm0, %v3085_v47, %v3084_v43  ;;  %v3128_v38 = vsel %vm2789_vm13, %v6272_v55, %v3127_v34  ;;  %v3131_v30 = vrot.slane %v6285_v1, 6  ;;  %v3133_v56 = vrot.slane %v6291_v13, 5 }
 0x4fe   : > { %v3088_v3 = vsel %vm2801_vm1, %v3087_v48, %v3086_v24  ;;  %v3130_v33 = vsel %vm2792_vm14, %v3129_v29, %v3128_v38  ;;  %v3135_v6 = vrot.slane %v6297_v44, 4  ;;  %v3113_v50 = vrot.slane %v6219_v11, 1 }
 0x4ff   : > { %v3090_v32 = vsel %vm2804_vm2, %v3089_v18, %v3088_v3  ;;  %v3132_v35 = vsel %vm2795_vm15, %v3131_v30, %v3130_v33  ;;  %v3139_v53 = vrot.slane %v6309_v42, 2  ;;  %v3115_v0 = vrot.slane %v6230_v57, 7 }
 0x500   : > { %v3092_v10 = vsel %vm2807_vm3, %v3091_v45, %v3090_v32  ;;  %v3134_v7 = vsel %vm2798_vm0, %v3133_v56, %v3132_v35  ;;  %v3114_v28 = vsel %vm2789_vm13, %v6225_v9, %v3113_v50  ;;  %v3117_v61 = vrot.slane %v6235_v25, 6 }
 0x501   : > { %3107 = vrot.lane.b32.xlu0 %v3092_v10, %s4317_s8  ;;  %v3136_v47 = vsel %vm2801_vm1, %v3135_v6, %v3134_v7  ;;  %v3116_v48 = vsel %vm2792_vm14, %v3115_v0, %v3114_v28  ;;  %v3119_v12 = vrot.slane %v6241_v4, 5  ;;  %v3121_v51 = vrot.slane %v6248_v39, 4 }
 0x502   : > { %v3138_v18 = vsel %vm2804_vm2, %v3137_v21, %v3136_v47  ;;  %v3118_v34 = vsel %vm2795_vm15, %v3117_v61, %v3116_v48  ;;  %v3123_v8 = vrot.slane %v6253_v49, 3  ;;  %v3161_v43 = vrot.slane %v6265_v46, 2 }
 0x503   : > { %v3140_v45 = vsel %vm2807_vm3, %v3139_v53, %v3138_v18  ;;  %v3120_v29 = vsel %vm2798_vm0, %v3119_v12, %v3118_v34  ;;  %v3125_v24 = vrot.slane %v6259_v59, 2  ;;  %v3162_v38 = vrot.slane %v6272_v55, 1 }
 0x504   : > { %3143 = vrot.lane.b32.xlu1 %v3140_v45, %s4318_s9  ;;  %v3122_v30 = vsel %vm2801_vm1, %v3121_v51, %v3120_v29  ;;  %v3165_v21 = vrot.slane %v6285_v1, 7  ;;  %v3167_v56 = vrot.slane %v6291_v13, 6  ;;  %v3169_v3 = vrot.slane %v6297_v44, 5 }
 0x505   : > { %v3124_v33 = vsel %vm2804_vm2, %v3123_v8, %v3122_v30  ;;  %v3163_v6 = vsel %vm2789_vm13, %v3162_v38, %v3161_v43  ;;  %v3147_v50 = vrot.slane %v6219_v11, 2  ;;  %v3148_v32 = vrot.slane %v6225_v9, 1 }
 0x506   : > { %v3126_v35 = vsel %vm2807_vm3, %v3125_v24, %v3124_v33  ;;  %v3164_v53 = vsel %vm2792_vm14, %v6279_v20, %v3163_v6  ;;  %v3173_v0 = vrot.slane %v6309_v42, 3  ;;  %v3151_v10 = vrot.slane %v6235_v25, 7 }
 0x507   : > { %3141 = vrot.lane.b32.xlu0 %v3126_v35, %s4318_s9  ;;  %v3166_v7 = vsel %vm2795_vm15, %v3165_v21, %v3164_v53  ;;  %v3149_v28 = vsel %vm2789_vm13, %v3148_v32, %v3147_v50  ;;  %v3153_v61 = vrot.slane %v6241_v4, 6  ;;  %v3155_v47 = vrot.slane %v6248_v39, 5 }
 0x508   : > { %v3168_v48 = vsel %vm2798_vm0, %v3167_v56, %v3166_v7  ;;  %v3150_v12 = vsel %vm2792_vm14, %v6230_v57, %v3149_v28  ;;  %v3157_v51 = vrot.slane %v6253_v49, 4  ;;  %v3195_v18 = vrot.slane %v6265_v46, 3 }
 0x509   : > { %v3170_v34 = vsel %vm2801_vm1, %v3169_v3, %v3168_v48  ;;  %v3152_v8 = vsel %vm2795_vm15, %v3151_v10, %v3150_v12  ;;  %v3196_v43 = vrot.slane %v6272_v55, 2  ;;  %v3198_v45 = vrot.slane %v6279_v20, 1 }
 0x50a   : > { %v3172_v29 = vsel %vm2804_vm2, %v3171_v52, %v3170_v34  ;;  %v3154_v24 = vsel %vm2798_vm0, %v3153_v61, %v3152_v8  ;;  %v3159_v38 = vrot.slane %v6259_v59, 3  ;;  %v3201_v30 = vrot.slane %v6291_v13, 7 }
 0x50b   : > { %v3174_v21 = vsel %vm2807_vm3, %v3173_v0, %v3172_v29  ;;  %v3156_v56 = vsel %vm2801_vm1, %v3155_v47, %v3154_v24  ;;  %v3197_v3 = vsel %vm2789_vm13, %v3196_v43, %v3195_v18  ;;  %v3203_v33 = vrot.slane %v6297_v44, 6 }
 0x50c   : > { %3177 = vrot.lane.b32.xlu1 %v3174_v21, %s4319_s10  ;;  %v3158_v6 = vsel %vm2804_vm2, %v3157_v51, %v3156_v56  ;;  %v3199_v52 = vsel %vm2792_vm14, %v3198_v45, %v3197_v3  ;;  %v3181_v50 = vrot.slane %v6219_v11, 3  ;;  %v3182_v32 = vrot.slane %v6225_v9, 2 }
 0x50d   : > { %v3160_v35 = vsel %vm2807_vm3, %v3159_v38, %v3158_v6  ;;  %v3200_v53 = vsel %vm2795_vm15, %v6285_v1, %v3199_v52  ;;  %v3207_v0 = vrot.slane %v6309_v42, 4  ;;  %v3184_v10 = vrot.slane %v6230_v57, 1 }
 0x50e   : > { %3175 = vrot.lane.b32.xlu0 %v3160_v35, %s4319_s10  ;;  %v3202_v7 = vsel %vm2798_vm0, %v3201_v30, %v3200_v53  ;;  %v3183_v28 = vsel %vm2789_vm13, %v3182_v32, %v3181_v50  ;;  %v3187_v61 = vrot.slane %v6241_v4, 7  ;;  %v3189_v47 = vrot.slane %v6248_v39, 6 }
 0x50f   : > { %v3204_v48 = vsel %vm2801_vm1, %v3203_v33, %v3202_v7  ;;  %v3185_v12 = vsel %vm2792_vm14, %v3184_v10, %v3183_v28  ;;  %v3191_v51 = vrot.slane %v6253_v49, 5  ;;  %v3229_v18 = vrot.slane %v6265_v46, 4 }
 0x510   : > { %v3206_v34 = vsel %vm2804_vm2, %v3205_v41, %v3204_v48  ;;  %v3186_v8 = vsel %vm2795_vm15, %v6235_v25, %v3185_v12  ;;  %v3230_v43 = vrot.slane %v6272_v55, 3  ;;  %v3232_v45 = vrot.slane %v6279_v20, 2 }
 0x511   : > { %v3208_v29 = vsel %vm2807_vm3, %v3207_v0, %v3206_v34  ;;  %v3188_v24 = vsel %vm2798_vm0, %v3187_v61, %v3186_v8  ;;  %v3193_v38 = vrot.slane %v6259_v59, 4  ;;  %v3234_v30 = vrot.slane %v6285_v1, 1 }
 0x512   : > { %3211 = vrot.lane.b32.xlu1 %v3208_v29, %s4320_s11  ;;  %v3190_v21 = vsel %vm2801_vm1, %v3189_v47, %v3188_v24  ;;  %v3231_v41 = vsel %vm2789_vm13, %v3230_v43, %v3229_v18  ;;  %v3237_v56 = vrot.slane %v6297_v44, 7  ;;  %v3215_v3 = vrot.slane %v6219_v11, 4 }
 0x513   : > { %v3192_v33 = vsel %vm2804_vm2, %v3191_v51, %v3190_v21  ;;  %v3233_v6 = vsel %vm2792_vm14, %v3232_v45, %v3231_v41  ;;  %v3216_v52 = vrot.slane %v6225_v9, 3  ;;  %v3218_v50 = vrot.slane %v6230_v57, 2 }
 0x514   : > { %v3194_v32 = vsel %vm2807_vm3, %v3193_v38, %v3192_v33  ;;  %v3235_v35 = vsel %vm2795_vm15, %v3234_v30, %v3233_v6  ;;  %v3241_v53 = vrot.slane %v6309_v42, 5  ;;  %v3220_v0 = vrot.slane %v6235_v25, 1 }
 0x515   : > { %3209 = vrot.lane.b32.xlu0 %v3194_v32, %s4320_s11  ;;  %v3236_v10 = vsel %vm2798_vm0, %v6291_v13, %v3235_v35  ;;  %v3217_v7 = vsel %vm2789_vm13, %v3216_v52, %v3215_v3  ;;  %v3223_v28 = vrot.slane %v6248_v39, 7  ;;  %v3225_v61 = vrot.slane %v6253_v49, 6 }
 0x516   : > { %v3238_v47 = vsel %vm2801_vm1, %v3237_v56, %v3236_v10  ;;  %v3219_v48 = vsel %vm2792_vm14, %v3218_v50, %v3217_v7  ;;  %v3263_v12 = vrot.slane %v6265_v46, 5  ;;  %v3264_v51 = vrot.slane %v6272_v55, 4 }
 0x517   : > { %v3240_v18 = vsel %vm2804_vm2, %v3239_v40, %v3238_v47  ;;  %v3221_v34 = vsel %vm2795_vm15, %v3220_v0, %v3219_v48  ;;  %v3227_v8 = vrot.slane %v6259_v59, 5  ;;  %v3266_v43 = vrot.slane %v6279_v20, 3 }
 0x518   : > { %v3242_v45 = vsel %vm2807_vm3, %v3241_v53, %v3240_v18  ;;  %v3222_v29 = vsel %vm2798_vm0, %v6241_v4, %v3221_v34  ;;  %v3265_v24 = vsel %vm2789_vm13, %v3264_v51, %v3263_v12  ;;  %v3268_v38 = vrot.slane %v6285_v1, 2 }
 0x519   : > { %3245 = vrot.lane.b32.xlu1 %v3242_v45, %s4312_s12  ;;  %v3224_v30 = vsel %vm2801_vm1, %v3223_v28, %v3222_v29  ;;  %v3267_v40 = vsel %vm2792_vm14, %v3266_v43, %v3265_v24  ;;  %v3270_v21 = vrot.slane %v6291_v13, 1  ;;  %v3249_v41 = vrot.slane %v6219_v11, 5 }
 0x51a   : > { %v3226_v56 = vsel %vm2804_vm2, %v3225_v61, %v3224_v30  ;;  %v3269_v3 = vsel %vm2795_vm15, %v3268_v38, %v3267_v40  ;;  %v3250_v33 = vrot.slane %v6225_v9, 4  ;;  %v3252_v6 = vrot.slane %v6230_v57, 3 }
 0x51b   : > { %v3228_v52 = vsel %vm2807_vm3, %v3227_v8, %v3226_v56  ;;  %v3271_v50 = vsel %vm2798_vm0, %v3270_v21, %v3269_v3  ;;  %v3275_v32 = vrot.slane %v6309_v42, 6  ;;  %v3254_v35 = vrot.slane %v6235_v25, 2 }
 0x51c   : > { %3243 = vrot.lane.b32.xlu0 %v3228_v52, %s4312_s12  ;;  %v3272_v53 = vsel %vm2801_vm1, %v6297_v44, %v3271_v50  ;;  %v3251_v0 = vsel %vm2789_vm13, %v3250_v33, %v3249_v41  ;;  %v3256_v10 = vrot.slane %v6241_v4, 1  ;;  %v3259_v7 = vrot.slane %v6253_v49, 7  ;;  %s4321_s12 = smov 52  }
 0x51d   : > { %v3274_v28 = vsel %vm2804_vm2, %v3273_v62, %v3272_v53  ;;  %v3253_v61 = vsel %vm2792_vm14, %v3252_v6, %v3251_v0  ;;  %v3297_v47 = vrot.slane %v6265_v46, 6  ;;  %v3298_v48 = vrot.slane %v6272_v55, 5 }
 0x51e   : > { %v3276_v12 = vsel %vm2807_vm3, %v3275_v32, %v3274_v28  ;;  %v3255_v51 = vsel %vm2795_vm15, %v3254_v35, %v3253_v61  ;;  %v3261_v18 = vrot.slane %v6259_v59, 6  ;;  %v3300_v34 = vrot.slane %v6279_v20, 4 }
 0x51f   : > { %3279 = vrot.lane.b32.xlu1 %v3276_v12, %s4321_s12  ;;  %v3257_v8 = vsel %vm2798_vm0, %v3256_v10, %v3255_v51  ;;  %v3299_v62 = vsel %vm2789_vm13, %v3298_v48, %v3297_v47  ;;  %v3302_v43 = vrot.slane %v6285_v1, 3  ;;  %v3304_v45 = vrot.slane %v6291_v13, 2 }
 0x520   : > { %v3258_v29 = vsel %vm2801_vm1, %v6248_v39, %v3257_v8  ;;  %v3301_v24 = vsel %vm2792_vm14, %v3300_v34, %v3299_v62  ;;  %v3306_v38 = vrot.slane %v6297_v44, 1  ;;  %v3283_v30 = vrot.slane %v6219_v11, 6 }
 0x521   : > { %v3260_v40 = vsel %vm2804_vm2, %v3259_v7, %v3258_v29  ;;  %v3303_v21 = vsel %vm2795_vm15, %v3302_v43, %v3301_v24  ;;  %v3284_v41 = vrot.slane %v6225_v9, 5  ;;  %v3286_v56 = vrot.slane %v6230_v57, 4 }
 0x522   : > { %v3262_v3 = vsel %vm2807_vm3, %v3261_v18, %v3260_v40  ;;  %v3305_v33 = vsel %vm2798_vm0, %v3304_v45, %v3303_v21  ;;  %v3309_v6 = vrot.slane %v6309_v42, 7  ;;  %v3288_v52 = vrot.slane %v6235_v25, 3 }
 0x523   : > { %3277 = vrot.lane.b32.xlu0 %v3262_v3, %s4321_s12  ;;  %v3307_v50 = vsel %vm2801_vm1, %v3306_v38, %v3305_v33  ;;  %v3285_v32 = vsel %vm2789_vm13, %v3284_v41, %v3283_v30  ;;  %v3290_v35 = vrot.slane %v6241_v4, 2  ;;  %v3292_v53 = vrot.slane %v6248_v39, 1 }
 0x524   : > { %v3308_v0 = vsel %vm2804_vm2, %v6053_v58, %v3307_v50  ;;  %v3287_v10 = vsel %vm2792_vm14, %v3286_v56, %v3285_v32  ;;  %v3331_v7 = vrot.slane %v6265_v46, 7  ;;  %v3332_v28 = vrot.slane %v6272_v55, 6 }
 0x525   : > { %v3310_v61 = vsel %vm2807_vm3, %v3309_v6, %v3308_v0  ;;  %v3289_v47 = vsel %vm2795_vm15, %v3288_v52, %v3287_v10  ;;  %v3295_v48 = vrot.slane %v6259_v59, 7  ;;  %v3334_v12 = vrot.slane %v6279_v20, 5 }
 0x526   : > { %3313 = vrot.lane.b32.xlu1 %v3310_v61, %s4322_s13  ;;  %v3291_v51 = vsel %vm2798_vm0, %v3290_v35, %v3289_v47  ;;  %v3333_v18 = vsel %vm2789_vm13, %v3332_v28, %v3331_v7  ;;  %v3336_v34 = vrot.slane %v6285_v1, 4  ;;  %v3338_v46 = vrot.slane %v6291_v13, 3 }
 0x527   : > { %v3293_v55 = vsel %vm2801_vm1, %v3292_v53, %v3291_v51  ;;  %v3335_v8 = vsel %vm2792_vm14, %v3334_v12, %v3333_v18  ;;  %v3317_v62 = vrot.slane %v6219_v11, 7  ;;  %v3318_v43 = vrot.slane %v6225_v9, 6 }
 0x528   : > { %v3294_v20 = vsel %vm2804_vm2, %v6253_v49, %v3293_v55  ;;  %v3337_v45 = vsel %vm2795_vm15, %v3336_v34, %v3335_v8  ;;  %v3340_v29 = vrot.slane %v6297_v44, 2  ;;  %v3320_v24 = vrot.slane %v6230_v57, 5 }
 0x529   : > { %v3296_v1 = vsel %vm2807_vm3, %v3295_v48, %v3294_v20  ;;  %v3339_v13 = vsel %vm2798_vm0, %v3338_v46, %v3337_v45  ;;  %v3319_v38 = vsel %vm2789_vm13, %v3318_v43, %v3317_v62  ;;  %v3322_v30 = vrot.slane %v6235_v25, 4 }
 0x52a   : > { %3311 = vrot.lane.b32.xlu0 %v3296_v1, %s4322_s13  ;;  %v3341_v11 = vsel %vm2801_vm1, %v3340_v29, %v3339_v13  ;;  %v3321_v9 = vsel %vm2792_vm14, %v3320_v24, %v3319_v38  ;;  %v3324_v40 = vrot.slane %v6241_v4, 3  ;;  %v3326_v21 = vrot.slane %v6248_v39, 2 }
 0x52b   : > { %v3343_v44 = vsel %vm2804_vm2, %v3342_v27, %v3341_v11  ;;  %v3323_v57 = vsel %vm2795_vm15, %v3322_v30, %v3321_v9  ;;  %v3328_v56 = vrot.slane %v6253_v49, 1  ;;  %v2809_v61 = vrot.slane %v6079_v15, 7 }
 0x52c   : > { %v3344_v41 = vsel %vm2807_vm3, %v6309_v42, %v3343_v44  ;;  %v3325_v25 = vsel %vm2798_vm0, %v3324_v40, %v3323_v57  ;;  %v2811_v48 = vrot.slane %v6084_v60, 6  ;;  %v2788_v12 = vrot.slane %v6135_v37, 7 }
 0x52d   : > { %3347 = vrot.lane.b32.xlu1 %v3344_v41, %s4323_s14  ;;  %v3327_v3 = vsel %vm2801_vm1, %v3326_v21, %v3325_v25  ;;  %v2810_v18 = vsel %vm2789_vm13, %v2809_v61, %v6076_v17  ;;  %v2791_v34 = vrot.slane %v6140_v36, 6  ;;  %v2813_v15 = vrot.slane %v6089_v14, 5 }
 0x52e   : > { %v3329_v4 = vsel %vm2804_vm2, %v3328_v56, %v3327_v3  ;;  %v2812_v55 = vsel %vm2792_vm14, %v2811_v48, %v2810_v18  ;;  %v2790_v8 = vsel %vm2789_vm13, %v2788_v12, %v6130_v54  ;;  %v2815_v43 = vrot.slane %v6095_v22, 4 }
 0x52f   : > { %v3330_v58 = vsel %vm2807_vm3, %v6259_v59, %v3329_v4  ;;  %v2814_v60 = vsel %vm2795_vm15, %v2813_v15, %v2812_v55  ;;  %v2793_v37 = vsel %vm2792_vm14, %v2791_v34, %v2790_v8  ;;  %v2794_v20 = vrot.slane %v6145_v31, 5 }
 0x530   : > { %3345 = vrot.lane.b32.xlu0 %v3330_v58, %s4323_s14  ;;  %v2816_v36 = vsel %vm2798_vm0, %v2815_v43, %v2814_v60  ;;  %v2817_v29 = vrot.slane %v6100_v5, 3  ;;  %v2797_v54 = vrot.slane %v6168_v26, 4  ;;  %v2819_v13 = vrot.slane %v6106_v63, 2 }
 0x531   : > { %v2796_v45 = vsel %vm2795_vm15, %v2794_v20, %v2793_v37  ;;  %v2800_v22 = vrot.slane %v6177_v19, 3  ;;  %v2821_v11 = vrot.slane %v6116_v23, 1  ;;  %v2803_v5 = vrot.slane %v6182_v16, 2 }
 0x532   : > { %v2818_v14 = vsel %vm2801_vm1, %v2817_v29, %v2816_v36  ;;  %v2799_v1 = vsel %vm2798_vm0, %v2797_v54, %v2796_v45  ;;  %v2806_v63 = vrot.slane %v6188_v2, 1  ;;  %vm3371_vm13 = vcmask 293888  }
 0x533   : > { %v2820_v31 = vsel %vm2804_vm2, %v2819_v13, %v2818_v14  ;;  %v2802_v30 = vsel %vm2801_vm1, %v2800_v22, %v2799_v1  ;;  %vm3374_vm14 = vcmask 326656   ;;  %vm3391_vm15 = vcmask 523264  }
 0x534   : > { %v2856_v27 = vpop.permute.xlu1 %2855  ;;  %v2822_v26 = vsel %vm2807_vm3, %v2821_v11, %v2820_v31  ;;  %v2805_v40 = vsel %vm2804_vm2, %v2803_v5, %v2802_v30 }
 0x535   : > { %v3352_v44 = vsel %vm2340_vm12, %v2822_v26, %v2856_v27  ;;  %v2808_v21 = vsel %vm2807_vm3, %v2806_v63, %v2805_v40 }
 0x538   : > { %v2890_v39 = vpop.permute.xlu1 %2889 }
 0x539   : > { %v3354_v19 = vsel %vm660_vm7, %v3352_v44, %v2890_v39 }
 0x544   : > { %v2854_v33 = vpop.permute.xlu0 %2853 }
 0x545   : > { %v2924_v52 = vpop.permute.xlu1 %2923  ;;  %v3351_v23 = vsel %vm2340_vm12, %v2808_v21, %v2854_v33  ;;  %vm3385_vm12 = vcmask 457728  }
 0x546   : > { %v3357_v41 = vsel %vm3355_vm4, %v3354_v19, %v2924_v52 }
 0x548   : > { %v2888_v6 = vpop.permute.xlu0 %2887 }
 0x549   : > { %v3353_v25 = vsel %vm660_vm7, %v3351_v23, %v2888_v6  ;;  %vm3377_vm7 = vcmask 359424  }
 0x54e   : > { %v2922_v42 = vpop.permute.xlu0 %2921 }
 0x54f   : > { %v3356_v2 = vsel %vm3355_vm4, %v3353_v25, %v2922_v42 }
 0x553   : > { %v2958_v50 = vpop.permute.xlu1 %2957 }
 0x554   : > { %v3359_v16 = vsel %vm678_vm8, %v3357_v41, %v2958_v50 }
 0x558   : > { %v2956_v32 = vpop.permute.xlu0 %2955 }
 0x559   : > { %v3358_v58 = vsel %vm678_vm8, %v3356_v2, %v2956_v32  ;;  %vm3382_vm8 = vcmask 424960  }
 0x55b   : > { %v2992_v35 = vpop.permute.xlu1 %2991 }
 0x55c   : > { %v3362_v56 = vsel %vm3360_vm5, %v3359_v16, %v2992_v35 }
 0x55e   : > { %v6626_v49 = vpop.permute.xlu0 %2989 }
 0x55f   : > { %v3361_v33 = vsel %vm3360_vm5, %v3358_v58, %v6626_v49 }
 0x562   : > { %v3026_v53 = vpop.permute.xlu1 %3025 }
 0x563   : > { %v3364_v4 = vsel %vm809_vm9, %v3362_v56, %v3026_v53 }
 0x565   : > { %v6628_v0 = vpop.permute.xlu0 %3023 }
 0x566   : > { %v3363_v52 = vsel %vm809_vm9, %v3361_v33, %v6628_v0  ;;  %vm3388_vm9 = vcmask 490496  }
 0x569   : > { %v3060_v10 = vpop.permute.xlu1 %3059 }
 0x56a   : > { %v3367_v27 = vsel %vm3365_vm6, %v3364_v4, %v3060_v10 }
 0x56c   : > { %v6630_v7 = vpop.permute.xlu0 %3057 }
 0x56d   : > { %v3366_v50 = vsel %vm3365_vm6, %v3363_v52, %v6630_v7 }
 0x56f   : > { %v3110_v28 = vpop.permute.xlu1 %3109 }
 0x570   : > { %v3370_v39 = vsel %vm3368_vm11, %v3367_v27, %v3110_v28 }
 0x573   : > { %v6632_v59 = vpop.permute.xlu0 %3107 }
 0x574   : > { %v3369_v35 = vsel %vm3368_vm11, %v3366_v50, %v6632_v59 }
 0x576   : > { %v3144_v47 = vpop.permute.xlu1 %3143 }
 0x577   : > { %v3373_v42 = vsel %vm3371_vm13, %v3370_v39, %v3144_v47 }
 0x579   : > { %v6637_v51 = vpop.permute.xlu0 %3141 }
 0x57a   : > { %v3372_v10 = vsel %vm3371_vm13, %v3369_v35, %v6637_v51 }
 0x57e   : > { %v3178_v46 = vpop.permute.xlu1 %3177 }
 0x57f   : > { %v3376_v32 = vsel %vm3374_vm14, %v3373_v42, %v3178_v46 }
 0x580   : > { %v3176_v62 = vpop.permute.xlu0 %3175 }
 0x581   : > { %v3375_v28 = vsel %vm3374_vm14, %v3372_v10, %v3176_v62 }
 0x584   : > { %v3212_v17 = vpop.permute.xlu1 %3211 }
 0x585   : > { %v3379_v49 = vsel %vm3377_vm7, %v3376_v32, %v3212_v17 }
 0x587   : > { %v3210_v24 = vpop.permute.xlu0 %3209 }
 0x588   : > { %v3378_v59 = vsel %vm3377_vm7, %v3375_v28, %v3210_v24 }
 0x58b   : > { %v3246_v38 = vpop.permute.xlu1 %3245 }
 0x58c   : > { %v3381_v0 = vsel %vm842_vm10, %v3379_v49, %v3246_v38 }
 0x58e   : > { %v3244_v9 = vpop.permute.xlu0 %3243 }
 0x58f   : > { %v3380_v48 = vsel %vm842_vm10, %v3378_v59, %v3244_v9 }
 0x591   : > { %v3280_v57 = vpop.permute.xlu1 %3279 }
 0x592   : > { %v3384_v7 = vsel %vm3382_vm8, %v3381_v0, %v3280_v57 }
 0x595   : > { %v3278_v3 = vpop.permute.xlu0 %3277 }
 0x596   : > { %v3383_v51 = vsel %vm3382_vm8, %v3380_v48, %v3278_v3 }
 0x598   : > { %v3314_v6 = vpop.permute.xlu1 %3313 }
 0x599   : > { %v3387_v61 = vsel %vm3385_vm12, %v3384_v7, %v3314_v6 }
 0x59c   : > { %v3312_v53 = vpop.permute.xlu0 %3311 }
 0x59d   : > { %v3386_v18 = vsel %vm3385_vm12, %v3383_v51, %v3312_v53 }
 0x59f   : > { %v3348_v47 = vpop.permute.xlu1 %3347 }
 0x5a0   : > { %v3390_v12 = vsel %vm3388_vm9, %v3387_v61, %v3348_v47 }
 0x5a1   : > { %3393 = vst.msk [vmem:[%s224_s19 + $0x8] sm:$0xff] %vm3391_vm15, %v3390_v12 }
 0x5a2   : > { %v3346_v34 = vpop.permute.xlu0 %3345 }
 0x5a3   : > { %v3389_v46 = vsel %vm3388_vm9, %v3386_v18, %v3346_v34 }
 0x5a4   : > { %3392 = vst.msk [vmem:[%s224_s19] sm:$0xff] %vm3391_vm15, %v3389_v46 }
 0x5a5 PF: > { %s15_s18 = sadd.s32 1, %s4306_s18  }
 0x5a6   : > { %p12_p4 = scmp.ge.s32.totalorder %s15_s18, 4  }
 0x5a8   :  { %14 = sbr.rel (!%p12_p4) target bundleno = 1 (0x1), region = 70 }

</bundles_post_ra>
